<compile_context>
chip_gen: v5e
topology: v5e:2x2
jax: 0.10.0
libtpu: 0.0.40
codegen_flags: <defaults>
</compile_context>

<pallas_src>
import functools
import math

import jax
import jax.numpy as jnp
from jax import lax
from jax.experimental import pallas as pl
from jax.experimental.pallas import tpu as pltpu


# ---------------------------------------------------------------------------
# In-kernel helpers (traced inside the Pallas kernels, operate on VMEM values)
# ---------------------------------------------------------------------------
_NT_DIMS = (((1,), (1,)), ((), ()))   # contract last dims: q @ k^T


def _ln(x, g, b, eps=1e-6):
    mu = jnp.mean(x, axis=-1, keepdims=True)
    var = jnp.mean((x - mu) * (x - mu), axis=-1, keepdims=True)
    return (x - mu) * lax.rsqrt(var + eps) * g + b


def _dot_bias(x, w, b):
    # bf16 MXU operands, f32 accumulation.
    return jnp.dot(x.astype(jnp.bfloat16), w,
                   preferred_element_type=jnp.float32) + b


def _key_bias(mask_row):
    # (1, Tk) float {0,1}  ->  additive bias (0 / -1e9), built in-kernel.
    return jnp.where(mask_row > 0.0, 0.0, -1e9).astype(jnp.float32)


def _mha_proj(q, k, v, bias, wo_heads, bo, num_heads):
    """Multi-head attention + output projection, all on VMEM values.

    q, k, v  : (Tq, H) / (Tk, H) / (Tk, H) f32 (heads folded into feature axis)
    bias     : additive mask, (1, Tk) or (Tq, Tk) f32
    wo_heads : (num_heads, Dh, H) bf16   (output projection, per-head rows)
    bo       : (1, H) f32
    Returns the projected context (Tq, H) f32.  The static per-head loop
    keeps lane slices on the folded feature axis and folds the output
    projection into the loop (no lane concatenation, no 3-D transposes).
    """
    Tq, H = q.shape
    dh = H // num_heads
    scale = 1.0 / math.sqrt(dh)
    qb = q.astype(jnp.bfloat16)
    kb = k.astype(jnp.bfloat16)
    vb = v.astype(jnp.bfloat16)
    acc = None
    for h in range(num_heads):
        sl = slice(h * dh, (h + 1) * dh)
        s = lax.dot_general(qb[:, sl], kb[:, sl], _NT_DIMS,
                            preferred_element_type=jnp.float32)
        s = s * scale + bias
        m = jnp.max(s, axis=-1, keepdims=True)
        p = jnp.exp(s - m)
        p = p * pl.reciprocal(jnp.sum(p, axis=-1, keepdims=True), approx=True)
        ctx_h = jnp.dot(p.astype(jnp.bfloat16), vb[:, sl],
                        preferred_element_type=jnp.float32)          # (Tq, Dh)
        proj_h = jnp.dot(ctx_h.astype(jnp.bfloat16), wo_heads[h],
                         preferred_element_type=jnp.float32)         # (Tq, H)
        acc = proj_h if acc is None else acc + proj_h
    return acc + bo


# ---------------------------------------------------------------------------
# Fused Pallas kernels (one grid step == one batch element)
# ---------------------------------------------------------------------------
def _encoder_kernel(sgn_ref, smask_ref,
                    we, be, ln1g, ln1b, wqkv, bqkv, wo, bo,
                    ln2g, ln2b, w1, b1, w2, b2, lng, lnb, wg, bg,
                    enc_ref, gls_ref, *, num_heads):
    sgn = sgn_ref[0]                                   # (T, F) f32
    bias = _key_bias(smask_ref[0])                     # (1, T)
    H = wqkv.shape[0]

    x = _dot_bias(sgn, we[...], be[...])               # sgn_embed -> (T, H)

    # pre-LN self-attention (fused QKV + per-head attn + output proj)
    xn = _ln(x, ln1g[...], ln1b[...])
    qkv = _dot_bias(xn, wqkv[...], bqkv[...])          # (T, 3H)
    x = x + _mha_proj(qkv[:, :H], qkv[:, H:2 * H], qkv[:, 2 * H:],
                      bias, wo[...], bo[...], num_heads)

    # pre-LN FFN
    xn = _ln(x, ln2g[...], ln2b[...])
    h1 = jnp.maximum(_dot_bias(xn, w1[...], b1[...]), 0.0)
    x = x + _dot_bias(h1, w2[...], b2[...])

    enc = _ln(x, lng[...], lnb[...])                   # final encoder LN
    enc_ref[0] = enc

    # fused gloss head: linear + exact log_softmax
    gs = _dot_bias(enc, wg[...], bg[...])              # (T, Vg)
    mx = jnp.max(gs, axis=-1, keepdims=True)
    z = gs - mx
    gls_ref[0] = z - jnp.log(jnp.sum(jnp.exp(z), axis=-1, keepdims=True))


def _query_encoder_kernel(qv_ref, enc_ref, smask_ref,
                          ln1g, ln1b, wq, bq, wkv, bkv, wo, bo,
                          ln2g, ln2b, w1, b1, w2, b2, lnfg, lnfb,
                          out_ref, *, num_heads):
    qv = qv_ref[0]                                     # (Q, H)
    enc = enc_ref[0]                                   # (T, H)
    bias = _key_bias(smask_ref[0])                     # (1, T)
    H = qv.shape[-1]

    # pre-LN cross-attention: queries from LN(query_vec), keys/values from enc
    xn = _ln(qv, ln1g[...], ln1b[...])
    q = _dot_bias(xn, wq[...], bq[...])
    kv = _dot_bias(enc, wkv[...], bkv[...])            # (T, 2H)
    x = qv + _mha_proj(q, kv[:, :H], kv[:, H:],
                       bias, wo[...], bo[...], num_heads)

    # pre-LN FFN
    xn = _ln(x, ln2g[...], ln2b[...])
    h1 = jnp.maximum(_dot_bias(xn, w1[...], b1[...]), 0.0)
    x = x + _dot_bias(h1, w2[...], b2[...])

    out_ref[0] = _ln(x, lnfg[...], lnfb[...])


def _decoder_kernel(trg_ref, tmask_ref, enc_ref, smask_ref, qo_ref, qmask_ref,
                    ln1g, ln1b, wqkv_s, bqkv_s, wo_s, bo_s,
                    ln2g, ln2b, wq_c, bq_c, wkv_c, bkv_c, wo_c, bo_c,
                    ln3g, ln3b, wq_c2, bq_c2, wkv_c2, bkv_c2, wo_c2, bo_c2,
                    ln4g, ln4b, w1, b1, w2, b2, lng, lnb, wout, bout,
                    out_ref, *, num_heads):
    x = trg_ref[0]                                     # (Tt, H)
    Tt, H = x.shape
    enc = enc_ref[0]
    qo = qo_ref[0]

    # masks built in-kernel (no (B*heads, Tq, Tk) bias tensors from HBM)
    row = lax.broadcasted_iota(jnp.int32, (Tt, Tt), 0)
    col = lax.broadcasted_iota(jnp.int32, (Tt, Tt), 1)
    allowed = jnp.logical_and(col <= row, tmask_ref[0] > 0.0)
    self_bias = jnp.where(allowed, 0.0, -1e9).astype(jnp.float32)
    src_bias = _key_bias(smask_ref[0])                 # (1, T_sgn)
    qry_bias = _key_bias(qmask_ref[0])                 # (1, Q)

    # masked self-attention (LN computed once, reused for q & kv)
    xn = _ln(x, ln1g[...], ln1b[...])
    qkv = _dot_bias(xn, wqkv_s[...], bqkv_s[...])      # (Tt, 3H)
    x = x + _mha_proj(qkv[:, :H], qkv[:, H:2 * H], qkv[:, 2 * H:],
                      self_bias, wo_s[...], bo_s[...], num_heads)

    # cross-attention over encoder output
    xn = _ln(x, ln2g[...], ln2b[...])
    q = _dot_bias(xn, wq_c[...], bq_c[...])
    kv = _dot_bias(enc, wkv_c[...], bkv_c[...])
    x = x + _mha_proj(q, kv[:, :H], kv[:, H:],
                      src_bias, wo_c[...], bo_c[...], num_heads)

    # cross-attention over query-encoder output
    xn = _ln(x, ln3g[...], ln3b[...])
    q = _dot_bias(xn, wq_c2[...], bq_c2[...])
    kv = _dot_bias(qo, wkv_c2[...], bkv_c2[...])
    x = x + _mha_proj(q, kv[:, :H], kv[:, H:],
                      qry_bias, wo_c2[...], bo_c2[...], num_heads)

    # FFN + final LN + output projection (all fused)
    xn = _ln(x, ln4g[...], ln4b[...])
    h1 = jnp.maximum(_dot_bias(xn, w1[...], b1[...]), 0.0)
    x = x + _dot_bias(h1, w2[...], b2[...])
    x = _ln(x, lng[...], lnb[...])
    out_ref[0] = _dot_bias(x, wout[...], bout[...])    # (Tt, txt_vocab)


# ---------------------------------------------------------------------------
# pallas_call wrapper: grid over batch, weights block-invariant, megacore
# ---------------------------------------------------------------------------
def _fused_call(kernel, num_heads, batched, params, out_shapes):
    B = batched[0].shape[0]

    def bspec(shape):
        nd = len(shape) - 1
        return pl.BlockSpec((1,) + tuple(shape[1:]),
                            lambda b, nd=nd: (b,) + (0,) * nd)

    def pspec(shape):
        nd = len(shape)
        return pl.BlockSpec(tuple(shape), lambda b, nd=nd: (0,) * nd)

    in_specs = ([bspec(a.shape) for a in batched]
                + [pspec(a.shape) for a in params])
    multi = len(out_shapes) > 1
    out_specs = tuple(bspec(s.shape) for s in out_shapes)
    return pl.pallas_call(
        functools.partial(kernel, num_heads=num_heads),
        grid=(B,),
        in_specs=in_specs,
        out_specs=out_specs if multi else out_specs[0],
        out_shape=tuple(out_shapes) if multi else out_shapes[0],
        compiler_params=pltpu.CompilerParams(
            dimension_semantics=("parallel",)),
    )(*batched, *params)


# ---------------------------------------------------------------------------
# SignModel (forward only)
# ---------------------------------------------------------------------------
class SignModelPallas:
    def __init__(self, params, num_heads, gloss_rate,
                 do_recognition=True, do_translation=True):
        self.p = params
        self.num_heads = num_heads
        self.gloss_rate = gloss_rate
        self.do_recognition = do_recognition
        self.do_translation = do_translation

    # encoder: sgn_embed -> pre-LN transformer layer -> final LN (+gloss head)
    def encode(self, sgn, sgn_mask_f):
        p = self.p
        lp = p['enc_layer']
        B, T, _ = sgn.shape
        H = lp['wqkv'].shape[0]
        Vg = p['gloss_w'].shape[1]
        enc_out, gloss_log = _fused_call(
            _encoder_kernel, self.num_heads,
            batched=(sgn, sgn_mask_f),
            params=(p['sgn_embed_w'], p['sgn_embed_b'],
                    lp['ln1g'], lp['ln1b'], lp['wqkv'], lp['bqkv'],
                    lp['wo'], lp['bo'], lp['ln2g'], lp['ln2b'],
                    lp['w1'], lp['b1'], lp['w2'], lp['b2'],
                    p['enc_ln_g'], p['enc_ln_b'],
                    p['gloss_w'], p['gloss_b']),
            out_shapes=(jax.ShapeDtypeStruct((B, T, H), jnp.float32),
                        jax.ShapeDtypeStruct((B, T, Vg), jnp.float32)))
        return enc_out, gloss_log

    # query branch: learned query embeddings cross-attend encoder output
    def query_encode(self, query_vec, enc_out, sgn_mask_f):
        p = self.p['query_encoder']
        B, Q, H = query_vec.shape
        return _fused_call(
            _query_encoder_kernel, self.num_heads,
            batched=(query_vec, enc_out, sgn_mask_f),
            params=(p['ln1g'], p['ln1b'], p['wq'], p['bq'], p['wkv'], p['bkv'],
                    p['wo'], p['bo'], p['ln2g'], p['ln2b'],
                    p['w1'], p['b1'], p['w2'], p['b2'],
                    p['lnfg'], p['lnfb']),
            out_shapes=(jax.ShapeDtypeStruct((B, Q, H), jnp.float32),))

    # decoder: self-attn (causal+pad) -> cross(enc) -> cross(query) -> FFN -> out
    def decode(self, enc_out, query_out, sgn_mask_f, query_mask_f,
               txt_input, txt_mask_f):
        p = self.p
        lp = p['dec_layer']
        B, Tt = txt_input.shape
        V = p['output_w'].shape[1]
        trg_embed = p['txt_embedding'][txt_input]          # (B, Tt, H) gather
        word_outputs = _fused_call(
            _decoder_kernel, self.num_heads,
            batched=(trg_embed, txt_mask_f, enc_out, sgn_mask_f,
                     query_out, query_mask_f),
            params=(lp['ln1g'], lp['ln1b'],
                    lp['self_wqkv'], lp['self_bqkv'],
                    lp['self_wo'], lp['self_bo'],
                    lp['ln2g'], lp['ln2b'],
                    lp['ca_wq'], lp['ca_bq'], lp['ca_wkv'], lp['ca_bkv'],
                    lp['ca_wo'], lp['ca_bo'],
                    lp['ln3g'], lp['ln3b'],
                    lp['ca2_wq'], lp['ca2_bq'], lp['ca2_wkv'], lp['ca2_bkv'],
                    lp['ca2_wo'], lp['ca2_bo'],
                    lp['ln4g'], lp['ln4b'],
                    lp['w1'], lp['b1'], lp['w2'], lp['b2'],
                    p['dec_ln_g'], p['dec_ln_b'],
                    p['output_w'], p['output_b']),
            out_shapes=(jax.ShapeDtypeStruct((B, Tt, V), jnp.float32),))
        return (word_outputs, None, None, None)

    def forward(self, sgn, sgn_mask, sgn_lengths, txt_input, txt_mask=None):
        p = self.p
        B = sgn.shape[0]
        sgn_mask_f = sgn_mask.astype(jnp.float32)

        encoder_output, gloss_log = self.encode(sgn, sgn_mask_f)

        # ---- query branch: statically padded to max_query_len (jittable,
        #      no host sync); padded query rows are masked out downstream.
        Q, H = p['query_embedding'].shape
        if self.gloss_rate < 0:
            query_lens = sgn_lengths
        else:
            query_lens = sgn_lengths // self.gloss_rate
        query_lens = jnp.maximum(query_lens, 1)
        query_mask = (jnp.arange(Q)[None, :] < query_lens[:, None])   # (B, Q)
        query_vec = jnp.broadcast_to(p['query_embedding'][None], (B, Q, H))
        query_output = self.query_encode(query_vec, encoder_output, sgn_mask_f)

        # ---- recognition head (computed fused inside the encoder kernel)
        # TODO(synk): gloss head is computed even when do_recognition=False
        #             (discarded here); cost is negligible at these sizes.
        gloss_probabilities = (jnp.transpose(gloss_log, (1, 0, 2))
                               if self.do_recognition else None)      # (T,B,V)

        # ---- translation decoder
        decoder_outputs = None
        if self.do_translation:
            decoder_outputs = self.decode(
                encoder_output, query_output, sgn_mask_f,
                query_mask[:, None, :].astype(jnp.float32),
                txt_input, txt_mask.astype(jnp.float32))

        return decoder_outputs, gloss_probabilities, encoder_output


# ---------------------------------------------------------------------------
# Deterministic parameter initialization (bf16 matmul weights, f32 the rest)
# ---------------------------------------------------------------------------
def init_params(key, feat_dim, hidden, d_ff, txt_vocab, gls_vocab,
                max_query_len, num_heads):
    keys = iter(jax.random.split(key, 64))
    H = hidden
    dh = H // num_heads

    def dense(k_in, k_out):
        w = (0.02 * jax.random.normal(next(keys), (k_in, k_out), jnp.float32)
             ).astype(jnp.bfloat16)
        return w, jnp.zeros((1, k_out), jnp.float32)

    def ln_pair():
        return jnp.ones((1, H), jnp.float32), jnp.zeros((1, H), jnp.float32)

    def out_proj():
        w, b = dense(H, H)
        return w.reshape(num_heads, dh, H), b       # per-head rows of Wo

    def self_att_p():
        wqkv, bqkv = dense(H, 3 * H)
        wo, bo = out_proj()
        return dict(wqkv=wqkv, bqkv=bqkv, wo=wo, bo=bo)

    def cross_att_p():
        wq, bq = dense(H, H)
        wkv, bkv = dense(H, 2 * H)
        wo, bo = out_proj()
        return dict(wq=wq, bq=bq, wkv=wkv, bkv=bkv, wo=wo, bo=bo)

    def ffn_p():
        w1, b1 = dense(H, d_ff)
        w2, b2 = dense(d_ff, H)
        return dict(w1=w1, b1=b1, w2=w2, b2=b2)

    sgn_w, sgn_b = dense(feat_dim, H)
    gloss_w, gloss_b = dense(H, gls_vocab)
    out_w, out_b = dense(H, txt_vocab)

    e_ln1, e_ln2, e_lnf = ln_pair(), ln_pair(), ln_pair()
    e_att, e_ffn = self_att_p(), ffn_p()

    q_ln1, q_ln2, q_lnf = ln_pair(), ln_pair(), ln_pair()
    q_att, q_ffn = cross_att_p(), ffn_p()

    d_ln1, d_ln2, d_ln3, d_ln4, d_lnf = (ln_pair(), ln_pair(), ln_pair(),
                                         ln_pair(), ln_pair())
    d_sa, d_ca, d_ca2, d_ffn = self_att_p(), cross_att_p(), cross_att_p(), ffn_p()

    params = dict(
        sgn_embed_w=sgn_w, sgn_embed_b=sgn_b,
        enc_layer=dict(ln1g=e_ln1[0], ln1b=e_ln1[1],
                       ln2g=e_ln2[0], ln2b=e_ln2[1],
                       **e_att, **e_ffn),
        enc_ln_g=e_lnf[0], enc_ln_b=e_lnf[1],
        gloss_w=gloss_w, gloss_b=gloss_b,
        query_embedding=0.02 * jax.random.normal(
            next(keys), (max_query_len, H), jnp.float32),
        query_encoder=dict(ln1g=q_ln1[0], ln1b=q_ln1[1],
                           ln2g=q_ln2[0], ln2b=q_ln2[1],
                           lnfg=q_lnf[0], lnfb=q_lnf[1],
                           **q_att, **q_ffn),
        txt_embedding=0.02 * jax.random.normal(
            next(keys), (txt_vocab, H), jnp.float32),
        dec_layer=dict(
            ln1g=d_ln1[0], ln1b=d_ln1[1],
            self_wqkv=d_sa['wqkv'], self_bqkv=d_sa['bqkv'],
            self_wo=d_sa['wo'], self_bo=d_sa['bo'],
            ln2g=d_ln2[0], ln2b=d_ln2[1],
            ca_wq=d_ca['wq'], ca_bq=d_ca['bq'],
            ca_wkv=d_ca['wkv'], ca_bkv=d_ca['bkv'],
            ca_wo=d_ca['wo'], ca_bo=d_ca['bo'],
            ln3g=d_ln3[0], ln3b=d_ln3[1],
            ca2_wq=d_ca2['wq'], ca2_bq=d_ca2['bq'],
            ca2_wkv=d_ca2['wkv'], ca2_bkv=d_ca2['bkv'],
            ca2_wo=d_ca2['wo'], ca2_bo=d_ca2['bo'],
            ln4g=d_ln4[0], ln4b=d_ln4[1],
            **d_ffn),
        dec_ln_g=d_lnf[0], dec_ln_b=d_lnf[1],
        output_w=out_w, output_b=out_b,
    )
    return params


# ---------------------------------------------------------------------------
if __name__ == "__main__":
    B, T_SGN, F_FEAT = 2, 16, 48
    H, NUM_HEADS, D_FF = 32, 4, 64
    T_TXT, TXT_VOCAB, GLS_VOCAB = 8, 24, 12
    GLOSS_RATE = 4
    MAX_QUERY_LEN = 8

    key = jax.random.PRNGKey(0)
    k_p, k_sgn, k_txt = jax.random.split(key, 3)

    params = init_params(k_p, F_FEAT, H, D_FF, TXT_VOCAB, GLS_VOCAB,
                         MAX_QUERY_LEN, NUM_HEADS)
    model = SignModelPallas(params, NUM_HEADS, GLOSS_RATE)

    sgn = jax.random.normal(k_sgn, (B, T_SGN, F_FEAT), jnp.float32)
    sgn_lengths = jnp.array([16, 12], jnp.int32)
    sgn_mask = (jnp.arange(T_SGN)[None, :] < sgn_lengths[:, None])[:, None, :]

    txt_input = jax.random.randint(k_txt, (B, T_TXT), 0, TXT_VOCAB, jnp.int32)
    txt_lengths = jnp.array([8, 6], jnp.int32)
    txt_mask = (jnp.arange(T_TXT)[None, :] < txt_lengths[:, None])[:, None, :]

    fwd = jax.jit(model.forward)       # now fully jittable (no host syncs)
    decoder_outputs, gloss_probabilities, encoder_output = fwd(
        sgn, sgn_mask, sgn_lengths, txt_input, txt_mask)

    word_outputs = decoder_outputs[0]
    jax.block_until_ready((word_outputs, gloss_probabilities, encoder_output))

    assert word_outputs.shape == (B, T_TXT, TXT_VOCAB)
    assert gloss_probabilities.shape == (T_SGN, B, GLS_VOCAB)
    assert encoder_output.shape == (B, T_SGN, H)
    # log_softmax rows must sum to ~1 in prob space
    assert jnp.allclose(jnp.exp(gloss_probabilities).sum(-1), 1.0, atol=1e-4)

    print("KERNEL_OK")
</pallas_src>

<mosaic_0001>
module attributes {stable_mosaic.version = 11 : i64} {
  func.func @_encoder_kernel(%arg0: i32, %arg1: memref<1x16x48xf32, #tpu.memory_space<vmem>>, %arg2: memref<1x1x16xf32, #tpu.memory_space<vmem>>, %arg3: memref<48x32xbf16, #tpu.memory_space<vmem>>, %arg4: memref<1x32xf32, #tpu.memory_space<vmem>>, %arg5: memref<1x32xf32, #tpu.memory_space<vmem>>, %arg6: memref<1x32xf32, #tpu.memory_space<vmem>>, %arg7: memref<32x96xbf16, #tpu.memory_space<vmem>>, %arg8: memref<1x96xf32, #tpu.memory_space<vmem>>, %arg9: memref<4x8x32xbf16, #tpu.memory_space<vmem>>, %arg10: memref<1x32xf32, #tpu.memory_space<vmem>>, %arg11: memref<1x32xf32, #tpu.memory_space<vmem>>, %arg12: memref<1x32xf32, #tpu.memory_space<vmem>>, %arg13: memref<32x64xbf16, #tpu.memory_space<vmem>>, %arg14: memref<1x64xf32, #tpu.memory_space<vmem>>, %arg15: memref<64x32xbf16, #tpu.memory_space<vmem>>, %arg16: memref<1x32xf32, #tpu.memory_space<vmem>>, %arg17: memref<1x32xf32, #tpu.memory_space<vmem>>, %arg18: memref<1x32xf32, #tpu.memory_space<vmem>>, %arg19: memref<32x12xbf16, #tpu.memory_space<vmem>>, %arg20: memref<1x12xf32, #tpu.memory_space<vmem>>, %arg21: memref<1x16x32xf32, #tpu.memory_space<vmem>>, %arg22: memref<1x16x12xf32, #tpu.memory_space<vmem>>) attributes {dimension_semantics = [#tpu.dimension_semantics<parallel>], iteration_bounds = array<i64: 2>, scalar_prefetch = 0 : i64, scratch_operands = 0 : i64, tpu.core_type = #tpu.core_type<tc>, window_params = [{transform_indices = @transform_0, window_bounds = array<i64: 1, 16, 48>}, {transform_indices = @transform_1, window_bounds = array<i64: 1, 1, 16>}, {pipeline_mode = #tpu.pipeline_mode<synchronous>, transform_indices = @transform_2, window_bounds = array<i64: 48, 32>}, {pipeline_mode = #tpu.pipeline_mode<synchronous>, transform_indices = @transform_3, window_bounds = array<i64: 1, 32>}, {pipeline_mode = #tpu.pipeline_mode<synchronous>, transform_indices = @transform_4, window_bounds = array<i64: 1, 32>}, {pipeline_mode = #tpu.pipeline_mode<synchronous>, transform_indices = @transform_5, window_bounds = array<i64: 1, 32>}, {pipeline_mode = #tpu.pipeline_mode<synchronous>, transform_indices = @transform_6, window_bounds = array<i64: 32, 96>}, {pipeline_mode = #tpu.pipeline_mode<synchronous>, transform_indices = @transform_7, window_bounds = array<i64: 1, 96>}, {pipeline_mode = #tpu.pipeline_mode<synchronous>, transform_indices = @transform_8, window_bounds = array<i64: 4, 8, 32>}, {pipeline_mode = #tpu.pipeline_mode<synchronous>, transform_indices = @transform_9, window_bounds = array<i64: 1, 32>}, {pipeline_mode = #tpu.pipeline_mode<synchronous>, transform_indices = @transform_10, window_bounds = array<i64: 1, 32>}, {pipeline_mode = #tpu.pipeline_mode<synchronous>, transform_indices = @transform_11, window_bounds = array<i64: 1, 32>}, {pipeline_mode = #tpu.pipeline_mode<synchronous>, transform_indices = @transform_12, window_bounds = array<i64: 32, 64>}, {pipeline_mode = #tpu.pipeline_mode<synchronous>, transform_indices = @transform_13, window_bounds = array<i64: 1, 64>}, {pipeline_mode = #tpu.pipeline_mode<synchronous>, transform_indices = @transform_14, window_bounds = array<i64: 64, 32>}, {pipeline_mode = #tpu.pipeline_mode<synchronous>, transform_indices = @transform_15, window_bounds = array<i64: 1, 32>}, {pipeline_mode = #tpu.pipeline_mode<synchronous>, transform_indices = @transform_16, window_bounds = array<i64: 1, 32>}, {pipeline_mode = #tpu.pipeline_mode<synchronous>, transform_indices = @transform_17, window_bounds = array<i64: 1, 32>}, {pipeline_mode = #tpu.pipeline_mode<synchronous>, transform_indices = @transform_18, window_bounds = array<i64: 32, 12>}, {pipeline_mode = #tpu.pipeline_mode<synchronous>, transform_indices = @transform_19, window_bounds = array<i64: 1, 12>}, {transform_indices = @transform_20, window_bounds = array<i64: 1, 16, 32>}, {transform_indices = @transform_21, window_bounds = array<i64: 1, 16, 12>}]} {
    %c0 = arith.constant 0 : index
    %c0_0 = arith.constant 0 : index
    %c0_1 = arith.constant 0 : index
    %0 = vector.load %arg1[%c0, %c0_0, %c0_1] : memref<1x16x48xf32, #tpu.memory_space<vmem>>, vector<1x16x48xf32>
    %1 = vector.shape_cast %0 : vector<1x16x48xf32> to vector<16x48xf32>
    %c0_2 = arith.constant 0 : index
    %c0_3 = arith.constant 0 : index
    %c0_4 = arith.constant 0 : index
    %2 = vector.load %arg2[%c0_2, %c0_3, %c0_4] : memref<1x1x16xf32, #tpu.memory_space<vmem>>, vector<1x1x16xf32>
    %3 = vector.shape_cast %2 : vector<1x1x16xf32> to vector<1x16xf32>
    %cst = arith.constant 0.000000e+00 : f32
    %4 = vector.broadcast %cst : f32 to vector<1x16xf32>
    %5 = arith.cmpf ogt, %3, %4 : vector<1x16xf32>
    %cst_5 = arith.constant 0.000000e+00 : f32
    %cst_6 = arith.constant -1.000000e+09 : f32
    %6 = vector.broadcast %cst_5 : f32 to vector<1x16xf32>
    %7 = vector.broadcast %cst_6 : f32 to vector<1x16xf32>
    %8 = arith.select %5, %6, %7 : vector<1x16xi1>, vector<1x16xf32>
    %c0_7 = arith.constant 0 : index
    %c0_8 = arith.constant 0 : index
    %9 = vector.load %arg3[%c0_7, %c0_8] : memref<48x32xbf16, #tpu.memory_space<vmem>>, vector<48x32xbf16>
    %c0_9 = arith.constant 0 : index
    %c0_10 = arith.constant 0 : index
    %10 = vector.load %arg4[%c0_9, %c0_10] : memref<1x32xf32, #tpu.memory_space<vmem>>, vector<1x32xf32>
    %11 = arith.truncf %1 : vector<16x48xf32> to vector<16x48xbf16>
    %cst_11 = arith.constant dense<0.000000e+00> : vector<16x32xf32>
    %12 = tpu.matmul %11, %9, %cst_11 {dimension_numbers = #tpu.dot_dimension_numbers<[1], [0], [0], [1], [0, 0, 1, 1], [], []>} : vector<16x48xbf16>, vector<48x32xbf16>, vector<16x32xf32> -> vector<16x32xf32>
    %13 = vector.broadcast %10 : vector<1x32xf32> to vector<16x32xf32>
    %14 = arith.addf %12, %13 : vector<16x32xf32>
    %c0_12 = arith.constant 0 : index
    %c0_13 = arith.constant 0 : index
    %15 = vector.load %arg5[%c0_12, %c0_13] : memref<1x32xf32, #tpu.memory_space<vmem>>, vector<1x32xf32>
    %c0_14 = arith.constant 0 : index
    %c0_15 = arith.constant 0 : index
    %16 = vector.load %arg6[%c0_14, %c0_15] : memref<1x32xf32, #tpu.memory_space<vmem>>, vector<1x32xf32>
    %cst_16 = arith.constant dense<0.000000e+00> : vector<16xf32>
    %17 = vector.multi_reduction <add>, %14, %cst_16 [1] : vector<16x32xf32> to vector<16xf32>
    %18 = vector.shape_cast %17 : vector<16xf32> to vector<16x1xf32>
    %cst_17 = arith.constant 3.200000e+01 : f32
    %19 = vector.broadcast %cst_17 : f32 to vector<16x1xf32>
    %20 = arith.divf %18, %19 : vector<16x1xf32>
    %21 = vector.broadcast %20 : vector<16x1xf32> to vector<16x32xf32>
    %22 = arith.subf %14, %21 : vector<16x32xf32>
    %23 = vector.broadcast %20 : vector<16x1xf32> to vector<16x32xf32>
    %24 = arith.subf %14, %23 : vector<16x32xf32>
    %25 = arith.mulf %22, %24 : vector<16x32xf32>
    %cst_18 = arith.constant dense<0.000000e+00> : vector<16xf32>
    %26 = vector.multi_reduction <add>, %25, %cst_18 [1] : vector<16x32xf32> to vector<16xf32>
    %27 = vector.shape_cast %26 : vector<16xf32> to vector<16x1xf32>
    %cst_19 = arith.constant 3.200000e+01 : f32
    %28 = vector.broadcast %cst_19 : f32 to vector<16x1xf32>
    %29 = arith.divf %27, %28 : vector<16x1xf32>
    %30 = vector.broadcast %20 : vector<16x1xf32> to vector<16x32xf32>
    %31 = arith.subf %14, %30 : vector<16x32xf32>
    %cst_20 = arith.constant 9.99999997E-7 : f32
    %32 = vector.broadcast %cst_20 : f32 to vector<16x1xf32>
    %33 = arith.addf %29, %32 : vector<16x1xf32>
    %34 = math.rsqrt %33 : vector<16x1xf32>
    %35 = vector.broadcast %34 : vector<16x1xf32> to vector<16x32xf32>
    %36 = arith.mulf %31, %35 : vector<16x32xf32>
    %37 = vector.broadcast %15 : vector<1x32xf32> to vector<16x32xf32>
    %38 = arith.mulf %36, %37 : vector<16x32xf32>
    %39 = vector.broadcast %16 : vector<1x32xf32> to vector<16x32xf32>
    %40 = arith.addf %38, %39 : vector<16x32xf32>
    %c0_21 = arith.constant 0 : index
    %c0_22 = arith.constant 0 : index
    %41 = vector.load %arg7[%c0_21, %c0_22] : memref<32x96xbf16, #tpu.memory_space<vmem>>, vector<32x96xbf16>
    %c0_23 = arith.constant 0 : index
    %c0_24 = arith.constant 0 : index
    %42 = vector.load %arg8[%c0_23, %c0_24] : memref<1x96xf32, #tpu.memory_space<vmem>>, vector<1x96xf32>
    %43 = arith.truncf %40 : vector<16x32xf32> to vector<16x32xbf16>
    %cst_25 = arith.constant dense<0.000000e+00> : vector<16x96xf32>
    %44 = tpu.matmul %43, %41, %cst_25 {dimension_numbers = #tpu.dot_dimension_numbers<[1], [0], [0], [1], [0, 0, 1, 1], [], []>} : vector<16x32xbf16>, vector<32x96xbf16>, vector<16x96xf32> -> vector<16x96xf32>
    %45 = vector.broadcast %42 : vector<1x96xf32> to vector<16x96xf32>
    %46 = arith.addf %44, %45 : vector<16x96xf32>
    %47 = vector.extract_strided_slice %46 {offsets = [0, 0], sizes = [16, 32], strides = [1, 1]} : vector<16x96xf32> to vector<16x32xf32>
    %48 = vector.extract_strided_slice %46 {offsets = [0, 32], sizes = [16, 32], strides = [1, 1]} : vector<16x96xf32> to vector<16x32xf32>
    %49 = vector.extract_strided_slice %46 {offsets = [0, 64], sizes = [16, 32], strides = [1, 1]} : vector<16x96xf32> to vector<16x32xf32>
    %c0_26 = arith.constant 0 : index
    %c0_27 = arith.constant 0 : index
    %c0_28 = arith.constant 0 : index
    %50 = vector.load %arg9[%c0_26, %c0_27, %c0_28] : memref<4x8x32xbf16, #tpu.memory_space<vmem>>, vector<4x8x32xbf16>
    %c0_29 = arith.constant 0 : index
    %c0_30 = arith.constant 0 : index
    %51 = vector.load %arg10[%c0_29, %c0_30] : memref<1x32xf32, #tpu.memory_space<vmem>>, vector<1x32xf32>
    %52 = arith.truncf %47 : vector<16x32xf32> to vector<16x32xbf16>
    %53 = arith.truncf %48 : vector<16x32xf32> to vector<16x32xbf16>
    %54 = arith.truncf %49 : vector<16x32xf32> to vector<16x32xbf16>
    %55 = vector.extract_strided_slice %52 {offsets = [0, 0], sizes = [16, 8], strides = [1, 1]} : vector<16x32xbf16> to vector<16x8xbf16>
    %56 = vector.extract_strided_slice %53 {offsets = [0, 0], sizes = [16, 8], strides = [1, 1]} : vector<16x32xbf16> to vector<16x8xbf16>
    %cst_31 = arith.constant dense<0.000000e+00> : vector<16x16xf32>
    %57 = tpu.matmul %55, %56, %cst_31 {dimension_numbers = #tpu.dot_dimension_numbers<[1], [1], [0], [0], [0, 0, 1, 0], [], []>} : vector<16x8xbf16>, vector<16x8xbf16>, vector<16x16xf32> -> vector<16x16xf32>
    %cst_32 = arith.constant 0.353553385 : f32
    %58 = vector.broadcast %cst_32 : f32 to vector<16x16xf32>
    %59 = arith.mulf %57, %58 : vector<16x16xf32>
    %60 = vector.broadcast %8 : vector<1x16xf32> to vector<16x16xf32>
    %61 = arith.addf %59, %60 : vector<16x16xf32>
    %cst_33 = arith.constant dense<0xFF800000> : vector<16xf32>
    %62 = vector.multi_reduction <maximumf>, %61, %cst_33 [1] : vector<16x16xf32> to vector<16xf32>
    %63 = vector.shape_cast %62 : vector<16xf32> to vector<16x1xf32>
    %64 = vector.broadcast %63 : vector<16x1xf32> to vector<16x16xf32>
    %65 = arith.subf %61, %64 : vector<16x16xf32>
    %66 = math.exp %65 : vector<16x16xf32>
    %cst_34 = arith.constant dense<0.000000e+00> : vector<16xf32>
    %67 = vector.multi_reduction <add>, %66, %cst_34 [1] : vector<16x16xf32> to vector<16xf32>
    %68 = vector.shape_cast %67 : vector<16xf32> to vector<16x1xf32>
    %69 = tpu.reciprocal %68 {approx = true} : vector<16x1xf32> -> vector<16x1xf32>
    %70 = vector.broadcast %69 : vector<16x1xf32> to vector<16x16xf32>
    %71 = arith.mulf %66, %70 : vector<16x16xf32>
    %72 = arith.truncf %71 : vector<16x16xf32> to vector<16x16xbf16>
    %73 = vector.extract_strided_slice %54 {offsets = [0, 0], sizes = [16, 8], strides = [1, 1]} : vector<16x32xbf16> to vector<16x8xbf16>
    %cst_35 = arith.constant dense<0.000000e+00> : vector<16x8xf32>
    %74 = tpu.matmul %72, %73, %cst_35 {dimension_numbers = #tpu.dot_dimension_numbers<[1], [0], [0], [1], [0, 0, 1, 1], [], []>} : vector<16x16xbf16>, vector<16x8xbf16>, vector<16x8xf32> -> vector<16x8xf32>
    %75 = arith.truncf %74 : vector<16x8xf32> to vector<16x8xbf16>
    %76 = vector.extract_strided_slice %50 {offsets = [0, 0, 0], sizes = [1, 8, 32], strides = [1, 1, 1]} : vector<4x8x32xbf16> to vector<1x8x32xbf16>
    %77 = vector.shape_cast %76 : vector<1x8x32xbf16> to vector<8x32xbf16>
    %cst_36 = arith.constant dense<0.000000e+00> : vector<16x32xf32>
    %78 = tpu.matmul %75, %77, %cst_36 {dimension_numbers = #tpu.dot_dimension_numbers<[1], [0], [0], [1], [0, 0, 1, 1], [], []>} : vector<16x8xbf16>, vector<8x32xbf16>, vector<16x32xf32> -> vector<16x32xf32>
    %79 = vector.extract_strided_slice %52 {offsets = [0, 8], sizes = [16, 8], strides = [1, 1]} : vector<16x32xbf16> to vector<16x8xbf16>
    %80 = vector.extract_strided_slice %53 {offsets = [0, 8], sizes = [16, 8], strides = [1, 1]} : vector<16x32xbf16> to vector<16x8xbf16>
    %cst_37 = arith.constant dense<0.000000e+00> : vector<16x16xf32>
    %81 = tpu.matmul %79, %80, %cst_37 {dimension_numbers = #tpu.dot_dimension_numbers<[1], [1], [0], [0], [0, 0, 1, 0], [], []>} : vector<16x8xbf16>, vector<16x8xbf16>, vector<16x16xf32> -> vector<16x16xf32>
    %cst_38 = arith.constant 0.353553385 : f32
    %82 = vector.broadcast %cst_38 : f32 to vector<16x16xf32>
    %83 = arith.mulf %81, %82 : vector<16x16xf32>
    %84 = vector.broadcast %8 : vector<1x16xf32> to vector<16x16xf32>
    %85 = arith.addf %83, %84 : vector<16x16xf32>
    %cst_39 = arith.constant dense<0xFF800000> : vector<16xf32>
    %86 = vector.multi_reduction <maximumf>, %85, %cst_39 [1] : vector<16x16xf32> to vector<16xf32>
    %87 = vector.shape_cast %86 : vector<16xf32> to vector<16x1xf32>
    %88 = vector.broadcast %87 : vector<16x1xf32> to vector<16x16xf32>
    %89 = arith.subf %85, %88 : vector<16x16xf32>
    %90 = math.exp %89 : vector<16x16xf32>
    %cst_40 = arith.constant dense<0.000000e+00> : vector<16xf32>
    %91 = vector.multi_reduction <add>, %90, %cst_40 [1] : vector<16x16xf32> to vector<16xf32>
    %92 = vector.shape_cast %91 : vector<16xf32> to vector<16x1xf32>
    %93 = tpu.reciprocal %92 {approx = true} : vector<16x1xf32> -> vector<16x1xf32>
    %94 = vector.broadcast %93 : vector<16x1xf32> to vector<16x16xf32>
    %95 = arith.mulf %90, %94 : vector<16x16xf32>
    %96 = arith.truncf %95 : vector<16x16xf32> to vector<16x16xbf16>
    %97 = vector.extract_strided_slice %54 {offsets = [0, 8], sizes = [16, 8], strides = [1, 1]} : vector<16x32xbf16> to vector<16x8xbf16>
    %cst_41 = arith.constant dense<0.000000e+00> : vector<16x8xf32>
    %98 = tpu.matmul %96, %97, %cst_41 {dimension_numbers = #tpu.dot_dimension_numbers<[1], [0], [0], [1], [0, 0, 1, 1], [], []>} : vector<16x16xbf16>, vector<16x8xbf16>, vector<16x8xf32> -> vector<16x8xf32>
    %99 = arith.truncf %98 : vector<16x8xf32> to vector<16x8xbf16>
    %100 = vector.extract_strided_slice %50 {offsets = [1, 0, 0], sizes = [1, 8, 32], strides = [1, 1, 1]} : vector<4x8x32xbf16> to vector<1x8x32xbf16>
    %101 = vector.shape_cast %100 : vector<1x8x32xbf16> to vector<8x32xbf16>
    %cst_42 = arith.constant dense<0.000000e+00> : vector<16x32xf32>
    %102 = tpu.matmul %99, %101, %cst_42 {dimension_numbers = #tpu.dot_dimension_numbers<[1], [0], [0], [1], [0, 0, 1, 1], [], []>} : vector<16x8xbf16>, vector<8x32xbf16>, vector<16x32xf32> -> vector<16x32xf32>
    %103 = arith.addf %78, %102 : vector<16x32xf32>
    %104 = vector.extract_strided_slice %52 {offsets = [0, 16], sizes = [16, 8], strides = [1, 1]} : vector<16x32xbf16> to vector<16x8xbf16>
    %105 = vector.extract_strided_slice %53 {offsets = [0, 16], sizes = [16, 8], strides = [1, 1]} : vector<16x32xbf16> to vector<16x8xbf16>
    %cst_43 = arith.constant dense<0.000000e+00> : vector<16x16xf32>
    %106 = tpu.matmul %104, %105, %cst_43 {dimension_numbers = #tpu.dot_dimension_numbers<[1], [1], [0], [0], [0, 0, 1, 0], [], []>} : vector<16x8xbf16>, vector<16x8xbf16>, vector<16x16xf32> -> vector<16x16xf32>
    %cst_44 = arith.constant 0.353553385 : f32
    %107 = vector.broadcast %cst_44 : f32 to vector<16x16xf32>
    %108 = arith.mulf %106, %107 : vector<16x16xf32>
    %109 = vector.broadcast %8 : vector<1x16xf32> to vector<16x16xf32>
    %110 = arith.addf %108, %109 : vector<16x16xf32>
    %cst_45 = arith.constant dense<0xFF800000> : vector<16xf32>
    %111 = vector.multi_reduction <maximumf>, %110, %cst_45 [1] : vector<16x16xf32> to vector<16xf32>
    %112 = vector.shape_cast %111 : vector<16xf32> to vector<16x1xf32>
    %113 = vector.broadcast %112 : vector<16x1xf32> to vector<16x16xf32>
    %114 = arith.subf %110, %113 : vector<16x16xf32>
    %115 = math.exp %114 : vector<16x16xf32>
    %cst_46 = arith.constant dense<0.000000e+00> : vector<16xf32>
    %116 = vector.multi_reduction <add>, %115, %cst_46 [1] : vector<16x16xf32> to vector<16xf32>
    %117 = vector.shape_cast %116 : vector<16xf32> to vector<16x1xf32>
    %118 = tpu.reciprocal %117 {approx = true} : vector<16x1xf32> -> vector<16x1xf32>
    %119 = vector.broadcast %118 : vector<16x1xf32> to vector<16x16xf32>
    %120 = arith.mulf %115, %119 : vector<16x16xf32>
    %121 = arith.truncf %120 : vector<16x16xf32> to vector<16x16xbf16>
    %122 = vector.extract_strided_slice %54 {offsets = [0, 16], sizes = [16, 8], strides = [1, 1]} : vector<16x32xbf16> to vector<16x8xbf16>
    %cst_47 = arith.constant dense<0.000000e+00> : vector<16x8xf32>
    %123 = tpu.matmul %121, %122, %cst_47 {dimension_numbers = #tpu.dot_dimension_numbers<[1], [0], [0], [1], [0, 0, 1, 1], [], []>} : vector<16x16xbf16>, vector<16x8xbf16>, vector<16x8xf32> -> vector<16x8xf32>
    %124 = arith.truncf %123 : vector<16x8xf32> to vector<16x8xbf16>
    %125 = vector.extract_strided_slice %50 {offsets = [2, 0, 0], sizes = [1, 8, 32], strides = [1, 1, 1]} : vector<4x8x32xbf16> to vector<1x8x32xbf16>
    %126 = vector.shape_cast %125 : vector<1x8x32xbf16> to vector<8x32xbf16>
    %cst_48 = arith.constant dense<0.000000e+00> : vector<16x32xf32>
    %127 = tpu.matmul %124, %126, %cst_48 {dimension_numbers = #tpu.dot_dimension_numbers<[1], [0], [0], [1], [0, 0, 1, 1], [], []>} : vector<16x8xbf16>, vector<8x32xbf16>, vector<16x32xf32> -> vector<16x32xf32>
    %128 = arith.addf %103, %127 : vector<16x32xf32>
    %129 = vector.extract_strided_slice %52 {offsets = [0, 24], sizes = [16, 8], strides = [1, 1]} : vector<16x32xbf16> to vector<16x8xbf16>
    %130 = vector.extract_strided_slice %53 {offsets = [0, 24], sizes = [16, 8], strides = [1, 1]} : vector<16x32xbf16> to vector<16x8xbf16>
    %cst_49 = arith.constant dense<0.000000e+00> : vector<16x16xf32>
    %131 = tpu.matmul %129, %130, %cst_49 {dimension_numbers = #tpu.dot_dimension_numbers<[1], [1], [0], [0], [0, 0, 1, 0], [], []>} : vector<16x8xbf16>, vector<16x8xbf16>, vector<16x16xf32> -> vector<16x16xf32>
    %cst_50 = arith.constant 0.353553385 : f32
    %132 = vector.broadcast %cst_50 : f32 to vector<16x16xf32>
    %133 = arith.mulf %131, %132 : vector<16x16xf32>
    %134 = vector.broadcast %8 : vector<1x16xf32> to vector<16x16xf32>
    %135 = arith.addf %133, %134 : vector<16x16xf32>
    %cst_51 = arith.constant dense<0xFF800000> : vector<16xf32>
    %136 = vector.multi_reduction <maximumf>, %135, %cst_51 [1] : vector<16x16xf32> to vector<16xf32>
    %137 = vector.shape_cast %136 : vector<16xf32> to vector<16x1xf32>
    %138 = vector.broadcast %137 : vector<16x1xf32> to vector<16x16xf32>
    %139 = arith.subf %135, %138 : vector<16x16xf32>
    %140 = math.exp %139 : vector<16x16xf32>
    %cst_52 = arith.constant dense<0.000000e+00> : vector<16xf32>
    %141 = vector.multi_reduction <add>, %140, %cst_52 [1] : vector<16x16xf32> to vector<16xf32>
    %142 = vector.shape_cast %141 : vector<16xf32> to vector<16x1xf32>
    %143 = tpu.reciprocal %142 {approx = true} : vector<16x1xf32> -> vector<16x1xf32>
    %144 = vector.broadcast %143 : vector<16x1xf32> to vector<16x16xf32>
    %145 = arith.mulf %140, %144 : vector<16x16xf32>
    %146 = arith.truncf %145 : vector<16x16xf32> to vector<16x16xbf16>
    %147 = vector.extract_strided_slice %54 {offsets = [0, 24], sizes = [16, 8], strides = [1, 1]} : vector<16x32xbf16> to vector<16x8xbf16>
    %cst_53 = arith.constant dense<0.000000e+00> : vector<16x8xf32>
    %148 = tpu.matmul %146, %147, %cst_53 {dimension_numbers = #tpu.dot_dimension_numbers<[1], [0], [0], [1], [0, 0, 1, 1], [], []>} : vector<16x16xbf16>, vector<16x8xbf16>, vector<16x8xf32> -> vector<16x8xf32>
    %149 = arith.truncf %148 : vector<16x8xf32> to vector<16x8xbf16>
    %150 = vector.extract_strided_slice %50 {offsets = [3, 0, 0], sizes = [1, 8, 32], strides = [1, 1, 1]} : vector<4x8x32xbf16> to vector<1x8x32xbf16>
    %151 = vector.shape_cast %150 : vector<1x8x32xbf16> to vector<8x32xbf16>
    %cst_54 = arith.constant dense<0.000000e+00> : vector<16x32xf32>
    %152 = tpu.matmul %149, %151, %cst_54 {dimension_numbers = #tpu.dot_dimension_numbers<[1], [0], [0], [1], [0, 0, 1, 1], [], []>} : vector<16x8xbf16>, vector<8x32xbf16>, vector<16x32xf32> -> vector<16x32xf32>
    %153 = arith.addf %128, %152 : vector<16x32xf32>
    %154 = vector.broadcast %51 : vector<1x32xf32> to vector<16x32xf32>
    %155 = arith.addf %153, %154 : vector<16x32xf32>
    %156 = arith.addf %14, %155 : vector<16x32xf32>
    %c0_55 = arith.constant 0 : index
    %c0_56 = arith.constant 0 : index
    %157 = vector.load %arg11[%c0_55, %c0_56] : memref<1x32xf32, #tpu.memory_space<vmem>>, vector<1x32xf32>
    %c0_57 = arith.constant 0 : index
    %c0_58 = arith.constant 0 : index
    %158 = vector.load %arg12[%c0_57, %c0_58] : memref<1x32xf32, #tpu.memory_space<vmem>>, vector<1x32xf32>
    %cst_59 = arith.constant dense<0.000000e+00> : vector<16xf32>
    %159 = vector.multi_reduction <add>, %156, %cst_59 [1] : vector<16x32xf32> to vector<16xf32>
    %160 = vector.shape_cast %159 : vector<16xf32> to vector<16x1xf32>
    %cst_60 = arith.constant 3.200000e+01 : f32
    %161 = vector.broadcast %cst_60 : f32 to vector<16x1xf32>
    %162 = arith.divf %160, %161 : vector<16x1xf32>
    %163 = vector.broadcast %162 : vector<16x1xf32> to vector<16x32xf32>
    %164 = arith.subf %156, %163 : vector<16x32xf32>
    %165 = vector.broadcast %162 : vector<16x1xf32> to vector<16x32xf32>
    %166 = arith.subf %156, %165 : vector<16x32xf32>
    %167 = arith.mulf %164, %166 : vector<16x32xf32>
    %cst_61 = arith.constant dense<0.000000e+00> : vector<16xf32>
    %168 = vector.multi_reduction <add>, %167, %cst_61 [1] : vector<16x32xf32> to vector<16xf32>
    %169 = vector.shape_cast %168 : vector<16xf32> to vector<16x1xf32>
    %cst_62 = arith.constant 3.200000e+01 : f32
    %170 = vector.broadcast %cst_62 : f32 to vector<16x1xf32>
    %171 = arith.divf %169, %170 : vector<16x1xf32>
    %172 = vector.broadcast %162 : vector<16x1xf32> to vector<16x32xf32>
    %173 = arith.subf %156, %172 : vector<16x32xf32>
    %cst_63 = arith.constant 9.99999997E-7 : f32
    %174 = vector.broadcast %cst_63 : f32 to vector<16x1xf32>
    %175 = arith.addf %171, %174 : vector<16x1xf32>
    %176 = math.rsqrt %175 : vector<16x1xf32>
    %177 = vector.broadcast %176 : vector<16x1xf32> to vector<16x32xf32>
    %178 = arith.mulf %173, %177 : vector<16x32xf32>
    %179 = vector.broadcast %157 : vector<1x32xf32> to vector<16x32xf32>
    %180 = arith.mulf %178, %179 : vector<16x32xf32>
    %181 = vector.broadcast %158 : vector<1x32xf32> to vector<16x32xf32>
    %182 = arith.addf %180, %181 : vector<16x32xf32>
    %c0_64 = arith.constant 0 : index
    %c0_65 = arith.constant 0 : index
    %183 = vector.load %arg13[%c0_64, %c0_65] : memref<32x64xbf16, #tpu.memory_space<vmem>>, vector<32x64xbf16>
    %c0_66 = arith.constant 0 : index
    %c0_67 = arith.constant 0 : index
    %184 = vector.load %arg14[%c0_66, %c0_67] : memref<1x64xf32, #tpu.memory_space<vmem>>, vector<1x64xf32>
    %185 = arith.truncf %182 : vector<16x32xf32> to vector<16x32xbf16>
    %cst_68 = arith.constant dense<0.000000e+00> : vector<16x64xf32>
    %186 = tpu.matmul %185, %183, %cst_68 {dimension_numbers = #tpu.dot_dimension_numbers<[1], [0], [0], [1], [0, 0, 1, 1], [], []>} : vector<16x32xbf16>, vector<32x64xbf16>, vector<16x64xf32> -> vector<16x64xf32>
    %187 = vector.broadcast %184 : vector<1x64xf32> to vector<16x64xf32>
    %188 = arith.addf %186, %187 : vector<16x64xf32>
    %cst_69 = arith.constant 0.000000e+00 : f32
    %189 = vector.broadcast %cst_69 : f32 to vector<16x64xf32>
    %190 = arith.maximumf %188, %189 : vector<16x64xf32>
    %c0_70 = arith.constant 0 : index
    %c0_71 = arith.constant 0 : index
    %191 = vector.load %arg15[%c0_70, %c0_71] : memref<64x32xbf16, #tpu.memory_space<vmem>>, vector<64x32xbf16>
    %c0_72 = arith.constant 0 : index
    %c0_73 = arith.constant 0 : index
    %192 = vector.load %arg16[%c0_72, %c0_73] : memref<1x32xf32, #tpu.memory_space<vmem>>, vector<1x32xf32>
    %193 = arith.truncf %190 : vector<16x64xf32> to vector<16x64xbf16>
    %cst_74 = arith.constant dense<0.000000e+00> : vector<16x32xf32>
    %194 = tpu.matmul %193, %191, %cst_74 {dimension_numbers = #tpu.dot_dimension_numbers<[1], [0], [0], [1], [0, 0, 1, 1], [], []>} : vector<16x64xbf16>, vector<64x32xbf16>, vector<16x32xf32> -> vector<16x32xf32>
    %195 = vector.broadcast %192 : vector<1x32xf32> to vector<16x32xf32>
    %196 = arith.addf %194, %195 : vector<16x32xf32>
    %197 = arith.addf %156, %196 : vector<16x32xf32>
    %c0_75 = arith.constant 0 : index
    %c0_76 = arith.constant 0 : index
    %198 = vector.load %arg17[%c0_75, %c0_76] : memref<1x32xf32, #tpu.memory_space<vmem>>, vector<1x32xf32>
    %c0_77 = arith.constant 0 : index
    %c0_78 = arith.constant 0 : index
    %199 = vector.load %arg18[%c0_77, %c0_78] : memref<1x32xf32, #tpu.memory_space<vmem>>, vector<1x32xf32>
    %cst_79 = arith.constant dense<0.000000e+00> : vector<16xf32>
    %200 = vector.multi_reduction <add>, %197, %cst_79 [1] : vector<16x32xf32> to vector<16xf32>
    %201 = vector.shape_cast %200 : vector<16xf32> to vector<16x1xf32>
    %cst_80 = arith.constant 3.200000e+01 : f32
    %202 = vector.broadcast %cst_80 : f32 to vector<16x1xf32>
    %203 = arith.divf %201, %202 : vector<16x1xf32>
    %204 = vector.broadcast %203 : vector<16x1xf32> to vector<16x32xf32>
    %205 = arith.subf %197, %204 : vector<16x32xf32>
    %206 = vector.broadcast %203 : vector<16x1xf32> to vector<16x32xf32>
    %207 = arith.subf %197, %206 : vector<16x32xf32>
    %208 = arith.mulf %205, %207 : vector<16x32xf32>
    %cst_81 = arith.constant dense<0.000000e+00> : vector<16xf32>
    %209 = vector.multi_reduction <add>, %208, %cst_81 [1] : vector<16x32xf32> to vector<16xf32>
    %210 = vector.shape_cast %209 : vector<16xf32> to vector<16x1xf32>
    %cst_82 = arith.constant 3.200000e+01 : f32
    %211 = vector.broadcast %cst_82 : f32 to vector<16x1xf32>
    %212 = arith.divf %210, %211 : vector<16x1xf32>
    %213 = vector.broadcast %203 : vector<16x1xf32> to vector<16x32xf32>
    %214 = arith.subf %197, %213 : vector<16x32xf32>
    %cst_83 = arith.constant 9.99999997E-7 : f32
    %215 = vector.broadcast %cst_83 : f32 to vector<16x1xf32>
    %216 = arith.addf %212, %215 : vector<16x1xf32>
    %217 = math.rsqrt %216 : vector<16x1xf32>
    %218 = vector.broadcast %217 : vector<16x1xf32> to vector<16x32xf32>
    %219 = arith.mulf %214, %218 : vector<16x32xf32>
    %220 = vector.broadcast %198 : vector<1x32xf32> to vector<16x32xf32>
    %221 = arith.mulf %219, %220 : vector<16x32xf32>
    %222 = vector.broadcast %199 : vector<1x32xf32> to vector<16x32xf32>
    %223 = arith.addf %221, %222 : vector<16x32xf32>
    %c0_84 = arith.constant 0 : index
    %c0_85 = arith.constant 0 : index
    %c0_86 = arith.constant 0 : index
    %224 = vector.load %arg21[%c0_84, %c0_85, %c0_86] : memref<1x16x32xf32, #tpu.memory_space<vmem>>, vector<1x16x32xf32>
    %225 = vector.shape_cast %224 : vector<1x16x32xf32> to vector<16x32xf32>
    %226 = vector.shape_cast %223 : vector<16x32xf32> to vector<1x16x32xf32>
    tpu.vector_store %arg21[%c0_84, %c0_85, %c0_86], %226 {strides = array<i32>} : memref<1x16x32xf32, #tpu.memory_space<vmem>>, vector<1x16x32xf32>,
    %c0_87 = arith.constant 0 : index
    %c0_88 = arith.constant 0 : index
    %227 = vector.load %arg19[%c0_87, %c0_88] : memref<32x12xbf16, #tpu.memory_space<vmem>>, vector<32x12xbf16>
    %c0_89 = arith.constant 0 : index
    %c0_90 = arith.constant 0 : index
    %228 = vector.load %arg20[%c0_89, %c0_90] : memref<1x12xf32, #tpu.memory_space<vmem>>, vector<1x12xf32>
    %229 = arith.truncf %223 : vector<16x32xf32> to vector<16x32xbf16>
    %cst_91 = arith.constant dense<0.000000e+00> : vector<16x12xf32>
    %230 = tpu.matmul %229, %227, %cst_91 {dimension_numbers = #tpu.dot_dimension_numbers<[1], [0], [0], [1], [0, 0, 1, 1], [], []>} : vector<16x32xbf16>, vector<32x12xbf16>, vector<16x12xf32> -> vector<16x12xf32>
    %231 = vector.broadcast %228 : vector<1x12xf32> to vector<16x12xf32>
    %232 = arith.addf %230, %231 : vector<16x12xf32>
    %cst_92 = arith.constant dense<0xFF800000> : vector<16xf32>
    %233 = vector.multi_reduction <maximumf>, %232, %cst_92 [1] : vector<16x12xf32> to vector<16xf32>
    %234 = vector.shape_cast %233 : vector<16xf32> to vector<16x1xf32>
    %235 = vector.broadcast %234 : vector<16x1xf32> to vector<16x12xf32>
    %236 = arith.subf %232, %235 : vector<16x12xf32>
    %237 = math.exp %236 : vector<16x12xf32>
    %cst_93 = arith.constant dense<0.000000e+00> : vector<16xf32>
    %238 = vector.multi_reduction <add>, %237, %cst_93 [1] : vector<16x12xf32> to vector<16xf32>
    %239 = vector.shape_cast %238 : vector<16xf32> to vector<16x1xf32>
    %240 = math.log %239 : vector<16x1xf32>
    %241 = vector.broadcast %240 : vector<16x1xf32> to vector<16x12xf32>
    %242 = arith.subf %236, %241 : vector<16x12xf32>
    %c0_94 = arith.constant 0 : index
    %c0_95 = arith.constant 0 : index
    %c0_96 = arith.constant 0 : index
    %243 = vector.load %arg22[%c0_94, %c0_95, %c0_96] : memref<1x16x12xf32, #tpu.memory_space<vmem>>, vector<1x16x12xf32>
    %244 = vector.shape_cast %243 : vector<1x16x12xf32> to vector<16x12xf32>
    %245 = vector.shape_cast %242 : vector<16x12xf32> to vector<1x16x12xf32>
    tpu.vector_store %arg22[%c0_94, %c0_95, %c0_96], %245 {strides = array<i32>} : memref<1x16x12xf32, #tpu.memory_space<vmem>>, vector<1x16x12xf32>,
    return
  }
  func.func @transform_0(%arg0: i32) -> (i32, i32, i32) {
    %c0_i32 = arith.constant 0 : i32
    %c0_i32_0 = arith.constant 0 : i32
    %c0_i32_1 = arith.constant 0 : i32
    return %arg0, %c0_i32, %c0_i32_0 : i32, i32, i32
  }
  func.func @transform_1(%arg0: i32) -> (i32, i32, i32) {
    %c0_i32 = arith.constant 0 : i32
    %c0_i32_0 = arith.constant 0 : i32
    %c0_i32_1 = arith.constant 0 : i32
    return %arg0, %c0_i32, %c0_i32_0 : i32, i32, i32
  }
  func.func @transform_2(%arg0: i32) -> (i32, i32) {
    %c0_i32 = arith.constant 0 : i32
    %c0_i32_0 = arith.constant 0 : i32
    %c0_i32_1 = arith.constant 0 : i32
    return %c0_i32, %c0_i32_0 : i32, i32
  }
  func.func @transform_3(%arg0: i32) -> (i32, i32) {
    %c0_i32 = arith.constant 0 : i32
    %c0_i32_0 = arith.constant 0 : i32
    %c0_i32_1 = arith.constant 0 : i32
    return %c0_i32, %c0_i32_0 : i32, i32
  }
  func.func @transform_4(%arg0: i32) -> (i32, i32) {
    %c0_i32 = arith.constant 0 : i32
    %c0_i32_0 = arith.constant 0 : i32
    %c0_i32_1 = arith.constant 0 : i32
    return %c0_i32, %c0_i32_0 : i32, i32
  }
  func.func @transform_5(%arg0: i32) -> (i32, i32) {
    %c0_i32 = arith.constant 0 : i32
    %c0_i32_0 = arith.constant 0 : i32
    %c0_i32_1 = arith.constant 0 : i32
    return %c0_i32, %c0_i32_0 : i32, i32
  }
  func.func @transform_6(%arg0: i32) -> (i32, i32) {
    %c0_i32 = arith.constant 0 : i32
    %c0_i32_0 = arith.constant 0 : i32
    %c0_i32_1 = arith.constant 0 : i32
    return %c0_i32, %c0_i32_0 : i32, i32
  }
  func.func @transform_7(%arg0: i32) -> (i32, i32) {
    %c0_i32 = arith.constant 0 : i32
    %c0_i32_0 = arith.constant 0 : i32
    %c0_i32_1 = arith.constant 0 : i32
    return %c0_i32, %c0_i32_0 : i32, i32
  }
  func.func @transform_8(%arg0: i32) -> (i32, i32, i32) {
    %c0_i32 = arith.constant 0 : i32
    %c0_i32_0 = arith.constant 0 : i32
    %c0_i32_1 = arith.constant 0 : i32
    %c0_i32_2 = arith.constant 0 : i32
    return %c0_i32, %c0_i32_0, %c0_i32_1 : i32, i32, i32
  }
  func.func @transform_9(%arg0: i32) -> (i32, i32) {
    %c0_i32 = arith.constant 0 : i32
    %c0_i32_0 = arith.constant 0 : i32
    %c0_i32_1 = arith.constant 0 : i32
    return %c0_i32, %c0_i32_0 : i32, i32
  }
  func.func @transform_10(%arg0: i32) -> (i32, i32) {
    %c0_i32 = arith.constant 0 : i32
    %c0_i32_0 = arith.constant 0 : i32
    %c0_i32_1 = arith.constant 0 : i32
    return %c0_i32, %c0_i32_0 : i32, i32
  }
  func.func @transform_11(%arg0: i32) -> (i32, i32) {
    %c0_i32 = arith.constant 0 : i32
    %c0_i32_0 = arith.constant 0 : i32
    %c0_i32_1 = arith.constant 0 : i32
    return %c0_i32, %c0_i32_0 : i32, i32
  }
  func.func @transform_12(%arg0: i32) -> (i32, i32) {
    %c0_i32 = arith.constant 0 : i32
    %c0_i32_0 = arith.constant 0 : i32
    %c0_i32_1 = arith.constant 0 : i32
    return %c0_i32, %c0_i32_0 : i32, i32
  }
  func.func @transform_13(%arg0: i32) -> (i32, i32) {
    %c0_i32 = arith.constant 0 : i32
    %c0_i32_0 = arith.constant 0 : i32
    %c0_i32_1 = arith.constant 0 : i32
    return %c0_i32, %c0_i32_0 : i32, i32
  }
  func.func @transform_14(%arg0: i32) -> (i32, i32) {
    %c0_i32 = arith.constant 0 : i32
    %c0_i32_0 = arith.constant 0 : i32
    %c0_i32_1 = arith.constant 0 : i32
    return %c0_i32, %c0_i32_0 : i32, i32
  }
  func.func @transform_15(%arg0: i32) -> (i32, i32) {
    %c0_i32 = arith.constant 0 : i32
    %c0_i32_0 = arith.constant 0 : i32
    %c0_i32_1 = arith.constant 0 : i32
    return %c0_i32, %c0_i32_0 : i32, i32
  }
  func.func @transform_16(%arg0: i32) -> (i32, i32) {
    %c0_i32 = arith.constant 0 : i32
    %c0_i32_0 = arith.constant 0 : i32
    %c0_i32_1 = arith.constant 0 : i32
    return %c0_i32, %c0_i32_0 : i32, i32
  }
  func.func @transform_17(%arg0: i32) -> (i32, i32) {
    %c0_i32 = arith.constant 0 : i32
    %c0_i32_0 = arith.constant 0 : i32
    %c0_i32_1 = arith.constant 0 : i32
    return %c0_i32, %c0_i32_0 : i32, i32
  }
  func.func @transform_18(%arg0: i32) -> (i32, i32) {
    %c0_i32 = arith.constant 0 : i32
    %c0_i32_0 = arith.constant 0 : i32
    %c0_i32_1 = arith.constant 0 : i32
    return %c0_i32, %c0_i32_0 : i32, i32
  }
  func.func @transform_19(%arg0: i32) -> (i32, i32) {
    %c0_i32 = arith.constant 0 : i32
    %c0_i32_0 = arith.constant 0 : i32
    %c0_i32_1 = arith.constant 0 : i32
    return %c0_i32, %c0_i32_0 : i32, i32
  }
  func.func @transform_20(%arg0: i32) -> (i32, i32, i32) {
    %c0_i32 = arith.constant 0 : i32
    %c0_i32_0 = arith.constant 0 : i32
    %c0_i32_1 = arith.constant 0 : i32
    return %arg0, %c0_i32, %c0_i32_0 : i32, i32, i32
  }
  func.func @transform_21(%arg0: i32) -> (i32, i32, i32) {
    %c0_i32 = arith.constant 0 : i32
    %c0_i32_0 = arith.constant 0 : i32
    %c0_i32_1 = arith.constant 0 : i32
    return %arg0, %c0_i32, %c0_i32_0 : i32, i32, i32
  }
}

module attributes {stable_mosaic.version = 11 : i64} {
  func.func @_query_encoder_kernel(%arg0: i32, %arg1: memref<1x8x32xf32, #tpu.memory_space<vmem>>, %arg2: memref<1x16x32xf32, #tpu.memory_space<vmem>>, %arg3: memref<1x1x16xf32, #tpu.memory_space<vmem>>, %arg4: memref<1x32xf32, #tpu.memory_space<vmem>>, %arg5: memref<1x32xf32, #tpu.memory_space<vmem>>, %arg6: memref<32x32xbf16, #tpu.memory_space<vmem>>, %arg7: memref<1x32xf32, #tpu.memory_space<vmem>>, %arg8: memref<32x64xbf16, #tpu.memory_space<vmem>>, %arg9: memref<1x64xf32, #tpu.memory_space<vmem>>, %arg10: memref<4x8x32xbf16, #tpu.memory_space<vmem>>, %arg11: memref<1x32xf32, #tpu.memory_space<vmem>>, %arg12: memref<1x32xf32, #tpu.memory_space<vmem>>, %arg13: memref<1x32xf32, #tpu.memory_space<vmem>>, %arg14: memref<32x64xbf16, #tpu.memory_space<vmem>>, %arg15: memref<1x64xf32, #tpu.memory_space<vmem>>, %arg16: memref<64x32xbf16, #tpu.memory_space<vmem>>, %arg17: memref<1x32xf32, #tpu.memory_space<vmem>>, %arg18: memref<1x32xf32, #tpu.memory_space<vmem>>, %arg19: memref<1x32xf32, #tpu.memory_space<vmem>>, %arg20: memref<1x8x32xf32, #tpu.memory_space<vmem>>) attributes {dimension_semantics = [#tpu.dimension_semantics<parallel>], iteration_bounds = array<i64: 2>, scalar_prefetch = 0 : i64, scratch_operands = 0 : i64, tpu.core_type = #tpu.core_type<tc>, window_params = [{transform_indices = @transform_0, window_bounds = array<i64: 1, 8, 32>}, {transform_indices = @transform_1, window_bounds = array<i64: 1, 16, 32>}, {transform_indices = @transform_2, window_bounds = array<i64: 1, 1, 16>}, {pipeline_mode = #tpu.pipeline_mode<synchronous>, transform_indices = @transform_3, window_bounds = array<i64: 1, 32>}, {pipeline_mode = #tpu.pipeline_mode<synchronous>, transform_indices = @transform_4, window_bounds = array<i64: 1, 32>}, {pipeline_mode = #tpu.pipeline_mode<synchronous>, transform_indices = @transform_5, window_bounds = array<i64: 32, 32>}, {pipeline_mode = #tpu.pipeline_mode<synchronous>, transform_indices = @transform_6, window_bounds = array<i64: 1, 32>}, {pipeline_mode = #tpu.pipeline_mode<synchronous>, transform_indices = @transform_7, window_bounds = array<i64: 32, 64>}, {pipeline_mode = #tpu.pipeline_mode<synchronous>, transform_indices = @transform_8, window_bounds = array<i64: 1, 64>}, {pipeline_mode = #tpu.pipeline_mode<synchronous>, transform_indices = @transform_9, window_bounds = array<i64: 4, 8, 32>}, {pipeline_mode = #tpu.pipeline_mode<synchronous>, transform_indices = @transform_10, window_bounds = array<i64: 1, 32>}, {pipeline_mode = #tpu.pipeline_mode<synchronous>, transform_indices = @transform_11, window_bounds = array<i64: 1, 32>}, {pipeline_mode = #tpu.pipeline_mode<synchronous>, transform_indices = @transform_12, window_bounds = array<i64: 1, 32>}, {pipeline_mode = #tpu.pipeline_mode<synchronous>, transform_indices = @transform_13, window_bounds = array<i64: 32, 64>}, {pipeline_mode = #tpu.pipeline_mode<synchronous>, transform_indices = @transform_14, window_bounds = array<i64: 1, 64>}, {pipeline_mode = #tpu.pipeline_mode<synchronous>, transform_indices = @transform_15, window_bounds = array<i64: 64, 32>}, {pipeline_mode = #tpu.pipeline_mode<synchronous>, transform_indices = @transform_16, window_bounds = array<i64: 1, 32>}, {pipeline_mode = #tpu.pipeline_mode<synchronous>, transform_indices = @transform_17, window_bounds = array<i64: 1, 32>}, {pipeline_mode = #tpu.pipeline_mode<synchronous>, transform_indices = @transform_18, window_bounds = array<i64: 1, 32>}, {transform_indices = @transform_19, window_bounds = array<i64: 1, 8, 32>}]} {
    %c0 = arith.constant 0 : index
    %c0_0 = arith.constant 0 : index
    %c0_1 = arith.constant 0 : index
    %0 = vector.load %arg1[%c0, %c0_0, %c0_1] : memref<1x8x32xf32, #tpu.memory_space<vmem>>, vector<1x8x32xf32>
    %1 = vector.shape_cast %0 : vector<1x8x32xf32> to vector<8x32xf32>
    %c0_2 = arith.constant 0 : index
    %c0_3 = arith.constant 0 : index
    %c0_4 = arith.constant 0 : index
    %2 = vector.load %arg2[%c0_2, %c0_3, %c0_4] : memref<1x16x32xf32, #tpu.memory_space<vmem>>, vector<1x16x32xf32>
    %3 = vector.shape_cast %2 : vector<1x16x32xf32> to vector<16x32xf32>
    %c0_5 = arith.constant 0 : index
    %c0_6 = arith.constant 0 : index
    %c0_7 = arith.constant 0 : index
    %4 = vector.load %arg3[%c0_5, %c0_6, %c0_7] : memref<1x1x16xf32, #tpu.memory_space<vmem>>, vector<1x1x16xf32>
    %5 = vector.shape_cast %4 : vector<1x1x16xf32> to vector<1x16xf32>
    %cst = arith.constant 0.000000e+00 : f32
    %6 = vector.broadcast %cst : f32 to vector<1x16xf32>
    %7 = arith.cmpf ogt, %5, %6 : vector<1x16xf32>
    %cst_8 = arith.constant 0.000000e+00 : f32
    %cst_9 = arith.constant -1.000000e+09 : f32
    %8 = vector.broadcast %cst_8 : f32 to vector<1x16xf32>
    %9 = vector.broadcast %cst_9 : f32 to vector<1x16xf32>
    %10 = arith.select %7, %8, %9 : vector<1x16xi1>, vector<1x16xf32>
    %c0_10 = arith.constant 0 : index
    %c0_11 = arith.constant 0 : index
    %11 = vector.load %arg4[%c0_10, %c0_11] : memref<1x32xf32, #tpu.memory_space<vmem>>, vector<1x32xf32>
    %c0_12 = arith.constant 0 : index
    %c0_13 = arith.constant 0 : index
    %12 = vector.load %arg5[%c0_12, %c0_13] : memref<1x32xf32, #tpu.memory_space<vmem>>, vector<1x32xf32>
    %cst_14 = arith.constant dense<0.000000e+00> : vector<8xf32>
    %13 = vector.multi_reduction <add>, %1, %cst_14 [1] : vector<8x32xf32> to vector<8xf32>
    %14 = vector.shape_cast %13 : vector<8xf32> to vector<8x1xf32>
    %cst_15 = arith.constant 3.200000e+01 : f32
    %15 = vector.broadcast %cst_15 : f32 to vector<8x1xf32>
    %16 = arith.divf %14, %15 : vector<8x1xf32>
    %17 = vector.broadcast %16 : vector<8x1xf32> to vector<8x32xf32>
    %18 = arith.subf %1, %17 : vector<8x32xf32>
    %19 = vector.broadcast %16 : vector<8x1xf32> to vector<8x32xf32>
    %20 = arith.subf %1, %19 : vector<8x32xf32>
    %21 = arith.mulf %18, %20 : vector<8x32xf32>
    %cst_16 = arith.constant dense<0.000000e+00> : vector<8xf32>
    %22 = vector.multi_reduction <add>, %21, %cst_16 [1] : vector<8x32xf32> to vector<8xf32>
    %23 = vector.shape_cast %22 : vector<8xf32> to vector<8x1xf32>
    %cst_17 = arith.constant 3.200000e+01 : f32
    %24 = vector.broadcast %cst_17 : f32 to vector<8x1xf32>
    %25 = arith.divf %23, %24 : vector<8x1xf32>
    %26 = vector.broadcast %16 : vector<8x1xf32> to vector<8x32xf32>
    %27 = arith.subf %1, %26 : vector<8x32xf32>
    %cst_18 = arith.constant 9.99999997E-7 : f32
    %28 = vector.broadcast %cst_18 : f32 to vector<8x1xf32>
    %29 = arith.addf %25, %28 : vector<8x1xf32>
    %30 = math.rsqrt %29 : vector<8x1xf32>
    %31 = vector.broadcast %30 : vector<8x1xf32> to vector<8x32xf32>
    %32 = arith.mulf %27, %31 : vector<8x32xf32>
    %33 = vector.broadcast %11 : vector<1x32xf32> to vector<8x32xf32>
    %34 = arith.mulf %32, %33 : vector<8x32xf32>
    %35 = vector.broadcast %12 : vector<1x32xf32> to vector<8x32xf32>
    %36 = arith.addf %34, %35 : vector<8x32xf32>
    %c0_19 = arith.constant 0 : index
    %c0_20 = arith.constant 0 : index
    %37 = vector.load %arg6[%c0_19, %c0_20] : memref<32x32xbf16, #tpu.memory_space<vmem>>, vector<32x32xbf16>
    %c0_21 = arith.constant 0 : index
    %c0_22 = arith.constant 0 : index
    %38 = vector.load %arg7[%c0_21, %c0_22] : memref<1x32xf32, #tpu.memory_space<vmem>>, vector<1x32xf32>
    %39 = arith.truncf %36 : vector<8x32xf32> to vector<8x32xbf16>
    %cst_23 = arith.constant dense<0.000000e+00> : vector<8x32xf32>
    %40 = tpu.matmul %39, %37, %cst_23 {dimension_numbers = #tpu.dot_dimension_numbers<[1], [0], [0], [1], [0, 0, 1, 1], [], []>} : vector<8x32xbf16>, vector<32x32xbf16>, vector<8x32xf32> -> vector<8x32xf32>
    %41 = vector.broadcast %38 : vector<1x32xf32> to vector<8x32xf32>
    %42 = arith.addf %40, %41 : vector<8x32xf32>
    %c0_24 = arith.constant 0 : index
    %c0_25 = arith.constant 0 : index
    %43 = vector.load %arg8[%c0_24, %c0_25] : memref<32x64xbf16, #tpu.memory_space<vmem>>, vector<32x64xbf16>
    %c0_26 = arith.constant 0 : index
    %c0_27 = arith.constant 0 : index
    %44 = vector.load %arg9[%c0_26, %c0_27] : memref<1x64xf32, #tpu.memory_space<vmem>>, vector<1x64xf32>
    %45 = arith.truncf %3 : vector<16x32xf32> to vector<16x32xbf16>
    %cst_28 = arith.constant dense<0.000000e+00> : vector<16x64xf32>
    %46 = tpu.matmul %45, %43, %cst_28 {dimension_numbers = #tpu.dot_dimension_numbers<[1], [0], [0], [1], [0, 0, 1, 1], [], []>} : vector<16x32xbf16>, vector<32x64xbf16>, vector<16x64xf32> -> vector<16x64xf32>
    %47 = vector.broadcast %44 : vector<1x64xf32> to vector<16x64xf32>
    %48 = arith.addf %46, %47 : vector<16x64xf32>
    %49 = vector.extract_strided_slice %48 {offsets = [0, 0], sizes = [16, 32], strides = [1, 1]} : vector<16x64xf32> to vector<16x32xf32>
    %50 = vector.extract_strided_slice %48 {offsets = [0, 32], sizes = [16, 32], strides = [1, 1]} : vector<16x64xf32> to vector<16x32xf32>
    %c0_29 = arith.constant 0 : index
    %c0_30 = arith.constant 0 : index
    %c0_31 = arith.constant 0 : index
    %51 = vector.load %arg10[%c0_29, %c0_30, %c0_31] : memref<4x8x32xbf16, #tpu.memory_space<vmem>>, vector<4x8x32xbf16>
    %c0_32 = arith.constant 0 : index
    %c0_33 = arith.constant 0 : index
    %52 = vector.load %arg11[%c0_32, %c0_33] : memref<1x32xf32, #tpu.memory_space<vmem>>, vector<1x32xf32>
    %53 = arith.truncf %42 : vector<8x32xf32> to vector<8x32xbf16>
    %54 = arith.truncf %49 : vector<16x32xf32> to vector<16x32xbf16>
    %55 = arith.truncf %50 : vector<16x32xf32> to vector<16x32xbf16>
    %56 = vector.extract_strided_slice %53 {offsets = [0, 0], sizes = [8, 8], strides = [1, 1]} : vector<8x32xbf16> to vector<8x8xbf16>
    %57 = vector.extract_strided_slice %54 {offsets = [0, 0], sizes = [16, 8], strides = [1, 1]} : vector<16x32xbf16> to vector<16x8xbf16>
    %cst_34 = arith.constant dense<0.000000e+00> : vector<8x16xf32>
    %58 = tpu.matmul %56, %57, %cst_34 {dimension_numbers = #tpu.dot_dimension_numbers<[1], [1], [0], [0], [0, 0, 1, 0], [], []>} : vector<8x8xbf16>, vector<16x8xbf16>, vector<8x16xf32> -> vector<8x16xf32>
    %cst_35 = arith.constant 0.353553385 : f32
    %59 = vector.broadcast %cst_35 : f32 to vector<8x16xf32>
    %60 = arith.mulf %58, %59 : vector<8x16xf32>
    %61 = vector.broadcast %10 : vector<1x16xf32> to vector<8x16xf32>
    %62 = arith.addf %60, %61 : vector<8x16xf32>
    %cst_36 = arith.constant dense<0xFF800000> : vector<8xf32>
    %63 = vector.multi_reduction <maximumf>, %62, %cst_36 [1] : vector<8x16xf32> to vector<8xf32>
    %64 = vector.shape_cast %63 : vector<8xf32> to vector<8x1xf32>
    %65 = vector.broadcast %64 : vector<8x1xf32> to vector<8x16xf32>
    %66 = arith.subf %62, %65 : vector<8x16xf32>
    %67 = math.exp %66 : vector<8x16xf32>
    %cst_37 = arith.constant dense<0.000000e+00> : vector<8xf32>
    %68 = vector.multi_reduction <add>, %67, %cst_37 [1] : vector<8x16xf32> to vector<8xf32>
    %69 = vector.shape_cast %68 : vector<8xf32> to vector<8x1xf32>
    %70 = tpu.reciprocal %69 {approx = true} : vector<8x1xf32> -> vector<8x1xf32>
    %71 = vector.broadcast %70 : vector<8x1xf32> to vector<8x16xf32>
    %72 = arith.mulf %67, %71 : vector<8x16xf32>
    %73 = arith.truncf %72 : vector<8x16xf32> to vector<8x16xbf16>
    %74 = vector.extract_strided_slice %55 {offsets = [0, 0], sizes = [16, 8], strides = [1, 1]} : vector<16x32xbf16> to vector<16x8xbf16>
    %cst_38 = arith.constant dense<0.000000e+00> : vector<8x8xf32>
    %75 = tpu.matmul %73, %74, %cst_38 {dimension_numbers = #tpu.dot_dimension_numbers<[1], [0], [0], [1], [0, 0, 1, 1], [], []>} : vector<8x16xbf16>, vector<16x8xbf16>, vector<8x8xf32> -> vector<8x8xf32>
    %76 = arith.truncf %75 : vector<8x8xf32> to vector<8x8xbf16>
    %77 = vector.extract_strided_slice %51 {offsets = [0, 0, 0], sizes = [1, 8, 32], strides = [1, 1, 1]} : vector<4x8x32xbf16> to vector<1x8x32xbf16>
    %78 = vector.shape_cast %77 : vector<1x8x32xbf16> to vector<8x32xbf16>
    %cst_39 = arith.constant dense<0.000000e+00> : vector<8x32xf32>
    %79 = tpu.matmul %76, %78, %cst_39 {dimension_numbers = #tpu.dot_dimension_numbers<[1], [0], [0], [1], [0, 0, 1, 1], [], []>} : vector<8x8xbf16>, vector<8x32xbf16>, vector<8x32xf32> -> vector<8x32xf32>
    %80 = vector.extract_strided_slice %53 {offsets = [0, 8], sizes = [8, 8], strides = [1, 1]} : vector<8x32xbf16> to vector<8x8xbf16>
    %81 = vector.extract_strided_slice %54 {offsets = [0, 8], sizes = [16, 8], strides = [1, 1]} : vector<16x32xbf16> to vector<16x8xbf16>
    %cst_40 = arith.constant dense<0.000000e+00> : vector<8x16xf32>
    %82 = tpu.matmul %80, %81, %cst_40 {dimension_numbers = #tpu.dot_dimension_numbers<[1], [1], [0], [0], [0, 0, 1, 0], [], []>} : vector<8x8xbf16>, vector<16x8xbf16>, vector<8x16xf32> -> vector<8x16xf32>
    %cst_41 = arith.constant 0.353553385 : f32
    %83 = vector.broadcast %cst_41 : f32 to vector<8x16xf32>
    %84 = arith.mulf %82, %83 : vector<8x16xf32>
    %85 = vector.broadcast %10 : vector<1x16xf32> to vector<8x16xf32>
    %86 = arith.addf %84, %85 : vector<8x16xf32>
    %cst_42 = arith.constant dense<0xFF800000> : vector<8xf32>
    %87 = vector.multi_reduction <maximumf>, %86, %cst_42 [1] : vector<8x16xf32> to vector<8xf32>
    %88 = vector.shape_cast %87 : vector<8xf32> to vector<8x1xf32>
    %89 = vector.broadcast %88 : vector<8x1xf32> to vector<8x16xf32>
    %90 = arith.subf %86, %89 : vector<8x16xf32>
    %91 = math.exp %90 : vector<8x16xf32>
    %cst_43 = arith.constant dense<0.000000e+00> : vector<8xf32>
    %92 = vector.multi_reduction <add>, %91, %cst_43 [1] : vector<8x16xf32> to vector<8xf32>
    %93 = vector.shape_cast %92 : vector<8xf32> to vector<8x1xf32>
    %94 = tpu.reciprocal %93 {approx = true} : vector<8x1xf32> -> vector<8x1xf32>
    %95 = vector.broadcast %94 : vector<8x1xf32> to vector<8x16xf32>
    %96 = arith.mulf %91, %95 : vector<8x16xf32>
    %97 = arith.truncf %96 : vector<8x16xf32> to vector<8x16xbf16>
    %98 = vector.extract_strided_slice %55 {offsets = [0, 8], sizes = [16, 8], strides = [1, 1]} : vector<16x32xbf16> to vector<16x8xbf16>
    %cst_44 = arith.constant dense<0.000000e+00> : vector<8x8xf32>
    %99 = tpu.matmul %97, %98, %cst_44 {dimension_numbers = #tpu.dot_dimension_numbers<[1], [0], [0], [1], [0, 0, 1, 1], [], []>} : vector<8x16xbf16>, vector<16x8xbf16>, vector<8x8xf32> -> vector<8x8xf32>
    %100 = arith.truncf %99 : vector<8x8xf32> to vector<8x8xbf16>
    %101 = vector.extract_strided_slice %51 {offsets = [1, 0, 0], sizes = [1, 8, 32], strides = [1, 1, 1]} : vector<4x8x32xbf16> to vector<1x8x32xbf16>
    %102 = vector.shape_cast %101 : vector<1x8x32xbf16> to vector<8x32xbf16>
    %cst_45 = arith.constant dense<0.000000e+00> : vector<8x32xf32>
    %103 = tpu.matmul %100, %102, %cst_45 {dimension_numbers = #tpu.dot_dimension_numbers<[1], [0], [0], [1], [0, 0, 1, 1], [], []>} : vector<8x8xbf16>, vector<8x32xbf16>, vector<8x32xf32> -> vector<8x32xf32>
    %104 = arith.addf %79, %103 : vector<8x32xf32>
    %105 = vector.extract_strided_slice %53 {offsets = [0, 16], sizes = [8, 8], strides = [1, 1]} : vector<8x32xbf16> to vector<8x8xbf16>
    %106 = vector.extract_strided_slice %54 {offsets = [0, 16], sizes = [16, 8], strides = [1, 1]} : vector<16x32xbf16> to vector<16x8xbf16>
    %cst_46 = arith.constant dense<0.000000e+00> : vector<8x16xf32>
    %107 = tpu.matmul %105, %106, %cst_46 {dimension_numbers = #tpu.dot_dimension_numbers<[1], [1], [0], [0], [0, 0, 1, 0], [], []>} : vector<8x8xbf16>, vector<16x8xbf16>, vector<8x16xf32> -> vector<8x16xf32>
    %cst_47 = arith.constant 0.353553385 : f32
    %108 = vector.broadcast %cst_47 : f32 to vector<8x16xf32>
    %109 = arith.mulf %107, %108 : vector<8x16xf32>
    %110 = vector.broadcast %10 : vector<1x16xf32> to vector<8x16xf32>
    %111 = arith.addf %109, %110 : vector<8x16xf32>
    %cst_48 = arith.constant dense<0xFF800000> : vector<8xf32>
    %112 = vector.multi_reduction <maximumf>, %111, %cst_48 [1] : vector<8x16xf32> to vector<8xf32>
    %113 = vector.shape_cast %112 : vector<8xf32> to vector<8x1xf32>
    %114 = vector.broadcast %113 : vector<8x1xf32> to vector<8x16xf32>
    %115 = arith.subf %111, %114 : vector<8x16xf32>
    %116 = math.exp %115 : vector<8x16xf32>
    %cst_49 = arith.constant dense<0.000000e+00> : vector<8xf32>
    %117 = vector.multi_reduction <add>, %116, %cst_49 [1] : vector<8x16xf32> to vector<8xf32>
    %118 = vector.shape_cast %117 : vector<8xf32> to vector<8x1xf32>
    %119 = tpu.reciprocal %118 {approx = true} : vector<8x1xf32> -> vector<8x1xf32>
    %120 = vector.broadcast %119 : vector<8x1xf32> to vector<8x16xf32>
    %121 = arith.mulf %116, %120 : vector<8x16xf32>
    %122 = arith.truncf %121 : vector<8x16xf32> to vector<8x16xbf16>
    %123 = vector.extract_strided_slice %55 {offsets = [0, 16], sizes = [16, 8], strides = [1, 1]} : vector<16x32xbf16> to vector<16x8xbf16>
    %cst_50 = arith.constant dense<0.000000e+00> : vector<8x8xf32>
    %124 = tpu.matmul %122, %123, %cst_50 {dimension_numbers = #tpu.dot_dimension_numbers<[1], [0], [0], [1], [0, 0, 1, 1], [], []>} : vector<8x16xbf16>, vector<16x8xbf16>, vector<8x8xf32> -> vector<8x8xf32>
    %125 = arith.truncf %124 : vector<8x8xf32> to vector<8x8xbf16>
    %126 = vector.extract_strided_slice %51 {offsets = [2, 0, 0], sizes = [1, 8, 32], strides = [1, 1, 1]} : vector<4x8x32xbf16> to vector<1x8x32xbf16>
    %127 = vector.shape_cast %126 : vector<1x8x32xbf16> to vector<8x32xbf16>
    %cst_51 = arith.constant dense<0.000000e+00> : vector<8x32xf32>
    %128 = tpu.matmul %125, %127, %cst_51 {dimension_numbers = #tpu.dot_dimension_numbers<[1], [0], [0], [1], [0, 0, 1, 1], [], []>} : vector<8x8xbf16>, vector<8x32xbf16>, vector<8x32xf32> -> vector<8x32xf32>
    %129 = arith.addf %104, %128 : vector<8x32xf32>
    %130 = vector.extract_strided_slice %53 {offsets = [0, 24], sizes = [8, 8], strides = [1, 1]} : vector<8x32xbf16> to vector<8x8xbf16>
    %131 = vector.extract_strided_slice %54 {offsets = [0, 24], sizes = [16, 8], strides = [1, 1]} : vector<16x32xbf16> to vector<16x8xbf16>
    %cst_52 = arith.constant dense<0.000000e+00> : vector<8x16xf32>
    %132 = tpu.matmul %130, %131, %cst_52 {dimension_numbers = #tpu.dot_dimension_numbers<[1], [1], [0], [0], [0, 0, 1, 0], [], []>} : vector<8x8xbf16>, vector<16x8xbf16>, vector<8x16xf32> -> vector<8x16xf32>
    %cst_53 = arith.constant 0.353553385 : f32
    %133 = vector.broadcast %cst_53 : f32 to vector<8x16xf32>
    %134 = arith.mulf %132, %133 : vector<8x16xf32>
    %135 = vector.broadcast %10 : vector<1x16xf32> to vector<8x16xf32>
    %136 = arith.addf %134, %135 : vector<8x16xf32>
    %cst_54 = arith.constant dense<0xFF800000> : vector<8xf32>
    %137 = vector.multi_reduction <maximumf>, %136, %cst_54 [1] : vector<8x16xf32> to vector<8xf32>
    %138 = vector.shape_cast %137 : vector<8xf32> to vector<8x1xf32>
    %139 = vector.broadcast %138 : vector<8x1xf32> to vector<8x16xf32>
    %140 = arith.subf %136, %139 : vector<8x16xf32>
    %141 = math.exp %140 : vector<8x16xf32>
    %cst_55 = arith.constant dense<0.000000e+00> : vector<8xf32>
    %142 = vector.multi_reduction <add>, %141, %cst_55 [1] : vector<8x16xf32> to vector<8xf32>
    %143 = vector.shape_cast %142 : vector<8xf32> to vector<8x1xf32>
    %144 = tpu.reciprocal %143 {approx = true} : vector<8x1xf32> -> vector<8x1xf32>
    %145 = vector.broadcast %144 : vector<8x1xf32> to vector<8x16xf32>
    %146 = arith.mulf %141, %145 : vector<8x16xf32>
    %147 = arith.truncf %146 : vector<8x16xf32> to vector<8x16xbf16>
    %148 = vector.extract_strided_slice %55 {offsets = [0, 24], sizes = [16, 8], strides = [1, 1]} : vector<16x32xbf16> to vector<16x8xbf16>
    %cst_56 = arith.constant dense<0.000000e+00> : vector<8x8xf32>
    %149 = tpu.matmul %147, %148, %cst_56 {dimension_numbers = #tpu.dot_dimension_numbers<[1], [0], [0], [1], [0, 0, 1, 1], [], []>} : vector<8x16xbf16>, vector<16x8xbf16>, vector<8x8xf32> -> vector<8x8xf32>
    %150 = arith.truncf %149 : vector<8x8xf32> to vector<8x8xbf16>
    %151 = vector.extract_strided_slice %51 {offsets = [3, 0, 0], sizes = [1, 8, 32], strides = [1, 1, 1]} : vector<4x8x32xbf16> to vector<1x8x32xbf16>
    %152 = vector.shape_cast %151 : vector<1x8x32xbf16> to vector<8x32xbf16>
    %cst_57 = arith.constant dense<0.000000e+00> : vector<8x32xf32>
    %153 = tpu.matmul %150, %152, %cst_57 {dimension_numbers = #tpu.dot_dimension_numbers<[1], [0], [0], [1], [0, 0, 1, 1], [], []>} : vector<8x8xbf16>, vector<8x32xbf16>, vector<8x32xf32> -> vector<8x32xf32>
    %154 = arith.addf %129, %153 : vector<8x32xf32>
    %155 = vector.broadcast %52 : vector<1x32xf32> to vector<8x32xf32>
    %156 = arith.addf %154, %155 : vector<8x32xf32>
    %157 = arith.addf %1, %156 : vector<8x32xf32>
    %c0_58 = arith.constant 0 : index
    %c0_59 = arith.constant 0 : index
    %158 = vector.load %arg12[%c0_58, %c0_59] : memref<1x32xf32, #tpu.memory_space<vmem>>, vector<1x32xf32>
    %c0_60 = arith.constant 0 : index
    %c0_61 = arith.constant 0 : index
    %159 = vector.load %arg13[%c0_60, %c0_61] : memref<1x32xf32, #tpu.memory_space<vmem>>, vector<1x32xf32>
    %cst_62 = arith.constant dense<0.000000e+00> : vector<8xf32>
    %160 = vector.multi_reduction <add>, %157, %cst_62 [1] : vector<8x32xf32> to vector<8xf32>
    %161 = vector.shape_cast %160 : vector<8xf32> to vector<8x1xf32>
    %cst_63 = arith.constant 3.200000e+01 : f32
    %162 = vector.broadcast %cst_63 : f32 to vector<8x1xf32>
    %163 = arith.divf %161, %162 : vector<8x1xf32>
    %164 = vector.broadcast %163 : vector<8x1xf32> to vector<8x32xf32>
    %165 = arith.subf %157, %164 : vector<8x32xf32>
    %166 = vector.broadcast %163 : vector<8x1xf32> to vector<8x32xf32>
    %167 = arith.subf %157, %166 : vector<8x32xf32>
    %168 = arith.mulf %165, %167 : vector<8x32xf32>
    %cst_64 = arith.constant dense<0.000000e+00> : vector<8xf32>
    %169 = vector.multi_reduction <add>, %168, %cst_64 [1] : vector<8x32xf32> to vector<8xf32>
    %170 = vector.shape_cast %169 : vector<8xf32> to vector<8x1xf32>
    %cst_65 = arith.constant 3.200000e+01 : f32
    %171 = vector.broadcast %cst_65 : f32 to vector<8x1xf32>
    %172 = arith.divf %170, %171 : vector<8x1xf32>
    %173 = vector.broadcast %163 : vector<8x1xf32> to vector<8x32xf32>
    %174 = arith.subf %157, %173 : vector<8x32xf32>
    %cst_66 = arith.constant 9.99999997E-7 : f32
    %175 = vector.broadcast %cst_66 : f32 to vector<8x1xf32>
    %176 = arith.addf %172, %175 : vector<8x1xf32>
    %177 = math.rsqrt %176 : vector<8x1xf32>
    %178 = vector.broadcast %177 : vector<8x1xf32> to vector<8x32xf32>
    %179 = arith.mulf %174, %178 : vector<8x32xf32>
    %180 = vector.broadcast %158 : vector<1x32xf32> to vector<8x32xf32>
    %181 = arith.mulf %179, %180 : vector<8x32xf32>
    %182 = vector.broadcast %159 : vector<1x32xf32> to vector<8x32xf32>
    %183 = arith.addf %181, %182 : vector<8x32xf32>
    %c0_67 = arith.constant 0 : index
    %c0_68 = arith.constant 0 : index
    %184 = vector.load %arg14[%c0_67, %c0_68] : memref<32x64xbf16, #tpu.memory_space<vmem>>, vector<32x64xbf16>
    %c0_69 = arith.constant 0 : index
    %c0_70 = arith.constant 0 : index
    %185 = vector.load %arg15[%c0_69, %c0_70] : memref<1x64xf32, #tpu.memory_space<vmem>>, vector<1x64xf32>
    %186 = arith.truncf %183 : vector<8x32xf32> to vector<8x32xbf16>
    %cst_71 = arith.constant dense<0.000000e+00> : vector<8x64xf32>
    %187 = tpu.matmul %186, %184, %cst_71 {dimension_numbers = #tpu.dot_dimension_numbers<[1], [0], [0], [1], [0, 0, 1, 1], [], []>} : vector<8x32xbf16>, vector<32x64xbf16>, vector<8x64xf32> -> vector<8x64xf32>
    %188 = vector.broadcast %185 : vector<1x64xf32> to vector<8x64xf32>
    %189 = arith.addf %187, %188 : vector<8x64xf32>
    %cst_72 = arith.constant 0.000000e+00 : f32
    %190 = vector.broadcast %cst_72 : f32 to vector<8x64xf32>
    %191 = arith.maximumf %189, %190 : vector<8x64xf32>
    %c0_73 = arith.constant 0 : index
    %c0_74 = arith.constant 0 : index
    %192 = vector.load %arg16[%c0_73, %c0_74] : memref<64x32xbf16, #tpu.memory_space<vmem>>, vector<64x32xbf16>
    %c0_75 = arith.constant 0 : index
    %c0_76 = arith.constant 0 : index
    %193 = vector.load %arg17[%c0_75, %c0_76] : memref<1x32xf32, #tpu.memory_space<vmem>>, vector<1x32xf32>
    %194 = arith.truncf %191 : vector<8x64xf32> to vector<8x64xbf16>
    %cst_77 = arith.constant dense<0.000000e+00> : vector<8x32xf32>
    %195 = tpu.matmul %194, %192, %cst_77 {dimension_numbers = #tpu.dot_dimension_numbers<[1], [0], [0], [1], [0, 0, 1, 1], [], []>} : vector<8x64xbf16>, vector<64x32xbf16>, vector<8x32xf32> -> vector<8x32xf32>
    %196 = vector.broadcast %193 : vector<1x32xf32> to vector<8x32xf32>
    %197 = arith.addf %195, %196 : vector<8x32xf32>
    %198 = arith.addf %157, %197 : vector<8x32xf32>
    %c0_78 = arith.constant 0 : index
    %c0_79 = arith.constant 0 : index
    %199 = vector.load %arg18[%c0_78, %c0_79] : memref<1x32xf32, #tpu.memory_space<vmem>>, vector<1x32xf32>
    %c0_80 = arith.constant 0 : index
    %c0_81 = arith.constant 0 : index
    %200 = vector.load %arg19[%c0_80, %c0_81] : memref<1x32xf32, #tpu.memory_space<vmem>>, vector<1x32xf32>
    %cst_82 = arith.constant dense<0.000000e+00> : vector<8xf32>
    %201 = vector.multi_reduction <add>, %198, %cst_82 [1] : vector<8x32xf32> to vector<8xf32>
    %202 = vector.shape_cast %201 : vector<8xf32> to vector<8x1xf32>
    %cst_83 = arith.constant 3.200000e+01 : f32
    %203 = vector.broadcast %cst_83 : f32 to vector<8x1xf32>
    %204 = arith.divf %202, %203 : vector<8x1xf32>
    %205 = vector.broadcast %204 : vector<8x1xf32> to vector<8x32xf32>
    %206 = arith.subf %198, %205 : vector<8x32xf32>
    %207 = vector.broadcast %204 : vector<8x1xf32> to vector<8x32xf32>
    %208 = arith.subf %198, %207 : vector<8x32xf32>
    %209 = arith.mulf %206, %208 : vector<8x32xf32>
    %cst_84 = arith.constant dense<0.000000e+00> : vector<8xf32>
    %210 = vector.multi_reduction <add>, %209, %cst_84 [1] : vector<8x32xf32> to vector<8xf32>
    %211 = vector.shape_cast %210 : vector<8xf32> to vector<8x1xf32>
    %cst_85 = arith.constant 3.200000e+01 : f32
    %212 = vector.broadcast %cst_85 : f32 to vector<8x1xf32>
    %213 = arith.divf %211, %212 : vector<8x1xf32>
    %214 = vector.broadcast %204 : vector<8x1xf32> to vector<8x32xf32>
    %215 = arith.subf %198, %214 : vector<8x32xf32>
    %cst_86 = arith.constant 9.99999997E-7 : f32
    %216 = vector.broadcast %cst_86 : f32 to vector<8x1xf32>
    %217 = arith.addf %213, %216 : vector<8x1xf32>
    %218 = math.rsqrt %217 : vector<8x1xf32>
    %219 = vector.broadcast %218 : vector<8x1xf32> to vector<8x32xf32>
    %220 = arith.mulf %215, %219 : vector<8x32xf32>
    %221 = vector.broadcast %199 : vector<1x32xf32> to vector<8x32xf32>
    %222 = arith.mulf %220, %221 : vector<8x32xf32>
    %223 = vector.broadcast %200 : vector<1x32xf32> to vector<8x32xf32>
    %224 = arith.addf %222, %223 : vector<8x32xf32>
    %c0_87 = arith.constant 0 : index
    %c0_88 = arith.constant 0 : index
    %c0_89 = arith.constant 0 : index
    %225 = vector.load %arg20[%c0_87, %c0_88, %c0_89] : memref<1x8x32xf32, #tpu.memory_space<vmem>>, vector<1x8x32xf32>
    %226 = vector.shape_cast %225 : vector<1x8x32xf32> to vector<8x32xf32>
    %227 = vector.shape_cast %224 : vector<8x32xf32> to vector<1x8x32xf32>
    tpu.vector_store %arg20[%c0_87, %c0_88, %c0_89], %227 {strides = array<i32>} : memref<1x8x32xf32, #tpu.memory_space<vmem>>, vector<1x8x32xf32>,
    return
  }
  func.func @transform_0(%arg0: i32) -> (i32, i32, i32) {
    %c0_i32 = arith.constant 0 : i32
    %c0_i32_0 = arith.constant 0 : i32
    %c0_i32_1 = arith.constant 0 : i32
    return %arg0, %c0_i32, %c0_i32_0 : i32, i32, i32
  }
  func.func @transform_1(%arg0: i32) -> (i32, i32, i32) {
    %c0_i32 = arith.constant 0 : i32
    %c0_i32_0 = arith.constant 0 : i32
    %c0_i32_1 = arith.constant 0 : i32
    return %arg0, %c0_i32, %c0_i32_0 : i32, i32, i32
  }
  func.func @transform_2(%arg0: i32) -> (i32, i32, i32) {
    %c0_i32 = arith.constant 0 : i32
    %c0_i32_0 = arith.constant 0 : i32
    %c0_i32_1 = arith.constant 0 : i32
    return %arg0, %c0_i32, %c0_i32_0 : i32, i32, i32
  }
  func.func @transform_3(%arg0: i32) -> (i32, i32) {
    %c0_i32 = arith.constant 0 : i32
    %c0_i32_0 = arith.constant 0 : i32
    %c0_i32_1 = arith.constant 0 : i32
    return %c0_i32, %c0_i32_0 : i32, i32
  }
  func.func @transform_4(%arg0: i32) -> (i32, i32) {
    %c0_i32 = arith.constant 0 : i32
    %c0_i32_0 = arith.constant 0 : i32
    %c0_i32_1 = arith.constant 0 : i32
    return %c0_i32, %c0_i32_0 : i32, i32
  }
  func.func @transform_5(%arg0: i32) -> (i32, i32) {
    %c0_i32 = arith.constant 0 : i32
    %c0_i32_0 = arith.constant 0 : i32
    %c0_i32_1 = arith.constant 0 : i32
    return %c0_i32, %c0_i32_0 : i32, i32
  }
  func.func @transform_6(%arg0: i32) -> (i32, i32) {
    %c0_i32 = arith.constant 0 : i32
    %c0_i32_0 = arith.constant 0 : i32
    %c0_i32_1 = arith.constant 0 : i32
    return %c0_i32, %c0_i32_0 : i32, i32
  }
  func.func @transform_7(%arg0: i32) -> (i32, i32) {
    %c0_i32 = arith.constant 0 : i32
    %c0_i32_0 = arith.constant 0 : i32
    %c0_i32_1 = arith.constant 0 : i32
    return %c0_i32, %c0_i32_0 : i32, i32
  }
  func.func @transform_8(%arg0: i32) -> (i32, i32) {
    %c0_i32 = arith.constant 0 : i32
    %c0_i32_0 = arith.constant 0 : i32
    %c0_i32_1 = arith.constant 0 : i32
    return %c0_i32, %c0_i32_0 : i32, i32
  }
  func.func @transform_9(%arg0: i32) -> (i32, i32, i32) {
    %c0_i32 = arith.constant 0 : i32
    %c0_i32_0 = arith.constant 0 : i32
    %c0_i32_1 = arith.constant 0 : i32
    %c0_i32_2 = arith.constant 0 : i32
    return %c0_i32, %c0_i32_0, %c0_i32_1 : i32, i32, i32
  }
  func.func @transform_10(%arg0: i32) -> (i32, i32) {
    %c0_i32 = arith.constant 0 : i32
    %c0_i32_0 = arith.constant 0 : i32
    %c0_i32_1 = arith.constant 0 : i32
    return %c0_i32, %c0_i32_0 : i32, i32
  }
  func.func @transform_11(%arg0: i32) -> (i32, i32) {
    %c0_i32 = arith.constant 0 : i32
    %c0_i32_0 = arith.constant 0 : i32
    %c0_i32_1 = arith.constant 0 : i32
    return %c0_i32, %c0_i32_0 : i32, i32
  }
  func.func @transform_12(%arg0: i32) -> (i32, i32) {
    %c0_i32 = arith.constant 0 : i32
    %c0_i32_0 = arith.constant 0 : i32
    %c0_i32_1 = arith.constant 0 : i32
    return %c0_i32, %c0_i32_0 : i32, i32
  }
  func.func @transform_13(%arg0: i32) -> (i32, i32) {
    %c0_i32 = arith.constant 0 : i32
    %c0_i32_0 = arith.constant 0 : i32
    %c0_i32_1 = arith.constant 0 : i32
    return %c0_i32, %c0_i32_0 : i32, i32
  }
  func.func @transform_14(%arg0: i32) -> (i32, i32) {
    %c0_i32 = arith.constant 0 : i32
    %c0_i32_0 = arith.constant 0 : i32
    %c0_i32_1 = arith.constant 0 : i32
    return %c0_i32, %c0_i32_0 : i32, i32
  }
  func.func @transform_15(%arg0: i32) -> (i32, i32) {
    %c0_i32 = arith.constant 0 : i32
    %c0_i32_0 = arith.constant 0 : i32
    %c0_i32_1 = arith.constant 0 : i32
    return %c0_i32, %c0_i32_0 : i32, i32
  }
  func.func @transform_16(%arg0: i32) -> (i32, i32) {
    %c0_i32 = arith.constant 0 : i32
    %c0_i32_0 = arith.constant 0 : i32
    %c0_i32_1 = arith.constant 0 : i32
    return %c0_i32, %c0_i32_0 : i32, i32
  }
  func.func @transform_17(%arg0: i32) -> (i32, i32) {
    %c0_i32 = arith.constant 0 : i32
    %c0_i32_0 = arith.constant 0 : i32
    %c0_i32_1 = arith.constant 0 : i32
    return %c0_i32, %c0_i32_0 : i32, i32
  }
  func.func @transform_18(%arg0: i32) -> (i32, i32) {
    %c0_i32 = arith.constant 0 : i32
    %c0_i32_0 = arith.constant 0 : i32
    %c0_i32_1 = arith.constant 0 : i32
    return %c0_i32, %c0_i32_0 : i32, i32
  }
  func.func @transform_19(%arg0: i32) -> (i32, i32, i32) {
    %c0_i32 = arith.constant 0 : i32
    %c0_i32_0 = arith.constant 0 : i32
    %c0_i32_1 = arith.constant 0 : i32
    return %arg0, %c0_i32, %c0_i32_0 : i32, i32, i32
  }
}

module attributes {stable_mosaic.version = 11 : i64} {
  func.func @_decoder_kernel(%arg0: i32, %arg1: memref<1x8x32xf32, #tpu.memory_space<vmem>>, %arg2: memref<1x1x8xf32, #tpu.memory_space<vmem>>, %arg3: memref<1x16x32xf32, #tpu.memory_space<vmem>>, %arg4: memref<1x1x16xf32, #tpu.memory_space<vmem>>, %arg5: memref<1x8x32xf32, #tpu.memory_space<vmem>>, %arg6: memref<1x1x8xf32, #tpu.memory_space<vmem>>, %arg7: memref<1x32xf32, #tpu.memory_space<vmem>>, %arg8: memref<1x32xf32, #tpu.memory_space<vmem>>, %arg9: memref<32x96xbf16, #tpu.memory_space<vmem>>, %arg10: memref<1x96xf32, #tpu.memory_space<vmem>>, %arg11: memref<4x8x32xbf16, #tpu.memory_space<vmem>>, %arg12: memref<1x32xf32, #tpu.memory_space<vmem>>, %arg13: memref<1x32xf32, #tpu.memory_space<vmem>>, %arg14: memref<1x32xf32, #tpu.memory_space<vmem>>, %arg15: memref<32x32xbf16, #tpu.memory_space<vmem>>, %arg16: memref<1x32xf32, #tpu.memory_space<vmem>>, %arg17: memref<32x64xbf16, #tpu.memory_space<vmem>>, %arg18: memref<1x64xf32, #tpu.memory_space<vmem>>, %arg19: memref<4x8x32xbf16, #tpu.memory_space<vmem>>, %arg20: memref<1x32xf32, #tpu.memory_space<vmem>>, %arg21: memref<1x32xf32, #tpu.memory_space<vmem>>, %arg22: memref<1x32xf32, #tpu.memory_space<vmem>>, %arg23: memref<32x32xbf16, #tpu.memory_space<vmem>>, %arg24: memref<1x32xf32, #tpu.memory_space<vmem>>, %arg25: memref<32x64xbf16, #tpu.memory_space<vmem>>, %arg26: memref<1x64xf32, #tpu.memory_space<vmem>>, %arg27: memref<4x8x32xbf16, #tpu.memory_space<vmem>>, %arg28: memref<1x32xf32, #tpu.memory_space<vmem>>, %arg29: memref<1x32xf32, #tpu.memory_space<vmem>>, %arg30: memref<1x32xf32, #tpu.memory_space<vmem>>, %arg31: memref<32x64xbf16, #tpu.memory_space<vmem>>, %arg32: memref<1x64xf32, #tpu.memory_space<vmem>>, %arg33: memref<64x32xbf16, #tpu.memory_space<vmem>>, %arg34: memref<1x32xf32, #tpu.memory_space<vmem>>, %arg35: memref<1x32xf32, #tpu.memory_space<vmem>>, %arg36: memref<1x32xf32, #tpu.memory_space<vmem>>, %arg37: memref<32x24xbf16, #tpu.memory_space<vmem>>, %arg38: memref<1x24xf32, #tpu.memory_space<vmem>>, %arg39: memref<1x8x24xf32, #tpu.memory_space<vmem>>) attributes {dimension_semantics = [#tpu.dimension_semantics<parallel>], iteration_bounds = array<i64: 2>, scalar_prefetch = 0 : i64, scratch_operands = 0 : i64, tpu.core_type = #tpu.core_type<tc>, window_params = [{transform_indices = @transform_0, window_bounds = array<i64: 1, 8, 32>}, {transform_indices = @transform_1, window_bounds = array<i64: 1, 1, 8>}, {transform_indices = @transform_2, window_bounds = array<i64: 1, 16, 32>}, {transform_indices = @transform_3, window_bounds = array<i64: 1, 1, 16>}, {transform_indices = @transform_4, window_bounds = array<i64: 1, 8, 32>}, {transform_indices = @transform_5, window_bounds = array<i64: 1, 1, 8>}, {pipeline_mode = #tpu.pipeline_mode<synchronous>, transform_indices = @transform_6, window_bounds = array<i64: 1, 32>}, {pipeline_mode = #tpu.pipeline_mode<synchronous>, transform_indices = @transform_7, window_bounds = array<i64: 1, 32>}, {pipeline_mode = #tpu.pipeline_mode<synchronous>, transform_indices = @transform_8, window_bounds = array<i64: 32, 96>}, {pipeline_mode = #tpu.pipeline_mode<synchronous>, transform_indices = @transform_9, window_bounds = array<i64: 1, 96>}, {pipeline_mode = #tpu.pipeline_mode<synchronous>, transform_indices = @transform_10, window_bounds = array<i64: 4, 8, 32>}, {pipeline_mode = #tpu.pipeline_mode<synchronous>, transform_indices = @transform_11, window_bounds = array<i64: 1, 32>}, {pipeline_mode = #tpu.pipeline_mode<synchronous>, transform_indices = @transform_12, window_bounds = array<i64: 1, 32>}, {pipeline_mode = #tpu.pipeline_mode<synchronous>, transform_indices = @transform_13, window_bounds = array<i64: 1, 32>}, {pipeline_mode = #tpu.pipeline_mode<synchronous>, transform_indices = @transform_14, window_bounds = array<i64: 32, 32>}, {pipeline_mode = #tpu.pipeline_mode<synchronous>, transform_indices = @transform_15, window_bounds = array<i64: 1, 32>}, {pipeline_mode = #tpu.pipeline_mode<synchronous>, transform_indices = @transform_16, window_bounds = array<i64: 32, 64>}, {pipeline_mode = #tpu.pipeline_mode<synchronous>, transform_indices = @transform_17, window_bounds = array<i64: 1, 64>}, {pipeline_mode = #tpu.pipeline_mode<synchronous>, transform_indices = @transform_18, window_bounds = array<i64: 4, 8, 32>}, {pipeline_mode = #tpu.pipeline_mode<synchronous>, transform_indices = @transform_19, window_bounds = array<i64: 1, 32>}, {pipeline_mode = #tpu.pipeline_mode<synchronous>, transform_indices = @transform_20, window_bounds = array<i64: 1, 32>}, {pipeline_mode = #tpu.pipeline_mode<synchronous>, transform_indices = @transform_21, window_bounds = array<i64: 1, 32>}, {pipeline_mode = #tpu.pipeline_mode<synchronous>, transform_indices = @transform_22, window_bounds = array<i64: 32, 32>}, {pipeline_mode = #tpu.pipeline_mode<synchronous>, transform_indices = @transform_23, window_bounds = array<i64: 1, 32>}, {pipeline_mode = #tpu.pipeline_mode<synchronous>, transform_indices = @transform_24, window_bounds = array<i64: 32, 64>}, {pipeline_mode = #tpu.pipeline_mode<synchronous>, transform_indices = @transform_25, window_bounds = array<i64: 1, 64>}, {pipeline_mode = #tpu.pipeline_mode<synchronous>, transform_indices = @transform_26, window_bounds = array<i64: 4, 8, 32>}, {pipeline_mode = #tpu.pipeline_mode<synchronous>, transform_indices = @transform_27, window_bounds = array<i64: 1, 32>}, {pipeline_mode = #tpu.pipeline_mode<synchronous>, transform_indices = @transform_28, window_bounds = array<i64: 1, 32>}, {pipeline_mode = #tpu.pipeline_mode<synchronous>, transform_indices = @transform_29, window_bounds = array<i64: 1, 32>}, {pipeline_mode = #tpu.pipeline_mode<synchronous>, transform_indices = @transform_30, window_bounds = array<i64: 32, 64>}, {pipeline_mode = #tpu.pipeline_mode<synchronous>, transform_indices = @transform_31, window_bounds = array<i64: 1, 64>}, {pipeline_mode = #tpu.pipeline_mode<synchronous>, transform_indices = @transform_32, window_bounds = array<i64: 64, 32>}, {pipeline_mode = #tpu.pipeline_mode<synchronous>, transform_indices = @transform_33, window_bounds = array<i64: 1, 32>}, {pipeline_mode = #tpu.pipeline_mode<synchronous>, transform_indices = @transform_34, window_bounds = array<i64: 1, 32>}, {pipeline_mode = #tpu.pipeline_mode<synchronous>, transform_indices = @transform_35, window_bounds = array<i64: 1, 32>}, {pipeline_mode = #tpu.pipeline_mode<synchronous>, transform_indices = @transform_36, window_bounds = array<i64: 32, 24>}, {pipeline_mode = #tpu.pipeline_mode<synchronous>, transform_indices = @transform_37, window_bounds = array<i64: 1, 24>}, {transform_indices = @transform_38, window_bounds = array<i64: 1, 8, 24>}]} {
    %c0 = arith.constant 0 : index
    %c0_0 = arith.constant 0 : index
    %c0_1 = arith.constant 0 : index
    %0 = vector.load %arg1[%c0, %c0_0, %c0_1] : memref<1x8x32xf32, #tpu.memory_space<vmem>>, vector<1x8x32xf32>
    %1 = vector.shape_cast %0 : vector<1x8x32xf32> to vector<8x32xf32>
    %c0_2 = arith.constant 0 : index
    %c0_3 = arith.constant 0 : index
    %c0_4 = arith.constant 0 : index
    %2 = vector.load %arg3[%c0_2, %c0_3, %c0_4] : memref<1x16x32xf32, #tpu.memory_space<vmem>>, vector<1x16x32xf32>
    %3 = vector.shape_cast %2 : vector<1x16x32xf32> to vector<16x32xf32>
    %c0_5 = arith.constant 0 : index
    %c0_6 = arith.constant 0 : index
    %c0_7 = arith.constant 0 : index
    %4 = vector.load %arg5[%c0_5, %c0_6, %c0_7] : memref<1x8x32xf32, #tpu.memory_space<vmem>>, vector<1x8x32xf32>
    %5 = vector.shape_cast %4 : vector<1x8x32xf32> to vector<8x32xf32>
    %6 = tpu.iota {dimensions = array<i32: 0>} : vector<8x8xi32>
    %7 = tpu.iota {dimensions = array<i32: 1>} : vector<8x8xi32>
    %8 = arith.cmpi sle, %7, %6 : vector<8x8xi32>
    %c0_8 = arith.constant 0 : index
    %c0_9 = arith.constant 0 : index
    %c0_10 = arith.constant 0 : index
    %9 = vector.load %arg2[%c0_8, %c0_9, %c0_10] : memref<1x1x8xf32, #tpu.memory_space<vmem>>, vector<1x1x8xf32>
    %10 = vector.shape_cast %9 : vector<1x1x8xf32> to vector<1x8xf32>
    %cst = arith.constant 0.000000e+00 : f32
    %11 = vector.broadcast %cst : f32 to vector<1x8xf32>
    %12 = arith.cmpf ogt, %10, %11 : vector<1x8xf32>
    %13 = vector.broadcast %12 : vector<1x8xi1> to vector<8x8xi1>
    %14 = arith.andi %8, %13 : vector<8x8xi1>
    %cst_11 = arith.constant 0.000000e+00 : f32
    %cst_12 = arith.constant -1.000000e+09 : f32
    %15 = vector.broadcast %cst_11 : f32 to vector<8x8xf32>
    %16 = vector.broadcast %cst_12 : f32 to vector<8x8xf32>
    %17 = arith.select %14, %15, %16 : vector<8x8xi1>, vector<8x8xf32>
    %c0_13 = arith.constant 0 : index
    %c0_14 = arith.constant 0 : index
    %c0_15 = arith.constant 0 : index
    %18 = vector.load %arg4[%c0_13, %c0_14, %c0_15] : memref<1x1x16xf32, #tpu.memory_space<vmem>>, vector<1x1x16xf32>
    %19 = vector.shape_cast %18 : vector<1x1x16xf32> to vector<1x16xf32>
    %cst_16 = arith.constant 0.000000e+00 : f32
    %20 = vector.broadcast %cst_16 : f32 to vector<1x16xf32>
    %21 = arith.cmpf ogt, %19, %20 : vector<1x16xf32>
    %cst_17 = arith.constant 0.000000e+00 : f32
    %cst_18 = arith.constant -1.000000e+09 : f32
    %22 = vector.broadcast %cst_17 : f32 to vector<1x16xf32>
    %23 = vector.broadcast %cst_18 : f32 to vector<1x16xf32>
    %24 = arith.select %21, %22, %23 : vector<1x16xi1>, vector<1x16xf32>
    %c0_19 = arith.constant 0 : index
    %c0_20 = arith.constant 0 : index
    %c0_21 = arith.constant 0 : index
    %25 = vector.load %arg6[%c0_19, %c0_20, %c0_21] : memref<1x1x8xf32, #tpu.memory_space<vmem>>, vector<1x1x8xf32>
    %26 = vector.shape_cast %25 : vector<1x1x8xf32> to vector<1x8xf32>
    %cst_22 = arith.constant 0.000000e+00 : f32
    %27 = vector.broadcast %cst_22 : f32 to vector<1x8xf32>
    %28 = arith.cmpf ogt, %26, %27 : vector<1x8xf32>
    %cst_23 = arith.constant 0.000000e+00 : f32
    %cst_24 = arith.constant -1.000000e+09 : f32
    %29 = vector.broadcast %cst_23 : f32 to vector<1x8xf32>
    %30 = vector.broadcast %cst_24 : f32 to vector<1x8xf32>
    %31 = arith.select %28, %29, %30 : vector<1x8xi1>, vector<1x8xf32>
    %c0_25 = arith.constant 0 : index
    %c0_26 = arith.constant 0 : index
    %32 = vector.load %arg7[%c0_25, %c0_26] : memref<1x32xf32, #tpu.memory_space<vmem>>, vector<1x32xf32>
    %c0_27 = arith.constant 0 : index
    %c0_28 = arith.constant 0 : index
    %33 = vector.load %arg8[%c0_27, %c0_28] : memref<1x32xf32, #tpu.memory_space<vmem>>, vector<1x32xf32>
    %cst_29 = arith.constant dense<0.000000e+00> : vector<8xf32>
    %34 = vector.multi_reduction <add>, %1, %cst_29 [1] : vector<8x32xf32> to vector<8xf32>
    %35 = vector.shape_cast %34 : vector<8xf32> to vector<8x1xf32>
    %cst_30 = arith.constant 3.200000e+01 : f32
    %36 = vector.broadcast %cst_30 : f32 to vector<8x1xf32>
    %37 = arith.divf %35, %36 : vector<8x1xf32>
    %38 = vector.broadcast %37 : vector<8x1xf32> to vector<8x32xf32>
    %39 = arith.subf %1, %38 : vector<8x32xf32>
    %40 = vector.broadcast %37 : vector<8x1xf32> to vector<8x32xf32>
    %41 = arith.subf %1, %40 : vector<8x32xf32>
    %42 = arith.mulf %39, %41 : vector<8x32xf32>
    %cst_31 = arith.constant dense<0.000000e+00> : vector<8xf32>
    %43 = vector.multi_reduction <add>, %42, %cst_31 [1] : vector<8x32xf32> to vector<8xf32>
    %44 = vector.shape_cast %43 : vector<8xf32> to vector<8x1xf32>
    %cst_32 = arith.constant 3.200000e+01 : f32
    %45 = vector.broadcast %cst_32 : f32 to vector<8x1xf32>
    %46 = arith.divf %44, %45 : vector<8x1xf32>
    %47 = vector.broadcast %37 : vector<8x1xf32> to vector<8x32xf32>
    %48 = arith.subf %1, %47 : vector<8x32xf32>
    %cst_33 = arith.constant 9.99999997E-7 : f32
    %49 = vector.broadcast %cst_33 : f32 to vector<8x1xf32>
    %50 = arith.addf %46, %49 : vector<8x1xf32>
    %51 = math.rsqrt %50 : vector<8x1xf32>
    %52 = vector.broadcast %51 : vector<8x1xf32> to vector<8x32xf32>
    %53 = arith.mulf %48, %52 : vector<8x32xf32>
    %54 = vector.broadcast %32 : vector<1x32xf32> to vector<8x32xf32>
    %55 = arith.mulf %53, %54 : vector<8x32xf32>
    %56 = vector.broadcast %33 : vector<1x32xf32> to vector<8x32xf32>
    %57 = arith.addf %55, %56 : vector<8x32xf32>
    %c0_34 = arith.constant 0 : index
    %c0_35 = arith.constant 0 : index
    %58 = vector.load %arg9[%c0_34, %c0_35] : memref<32x96xbf16, #tpu.memory_space<vmem>>, vector<32x96xbf16>
    %c0_36 = arith.constant 0 : index
    %c0_37 = arith.constant 0 : index
    %59 = vector.load %arg10[%c0_36, %c0_37] : memref<1x96xf32, #tpu.memory_space<vmem>>, vector<1x96xf32>
    %60 = arith.truncf %57 : vector<8x32xf32> to vector<8x32xbf16>
    %cst_38 = arith.constant dense<0.000000e+00> : vector<8x96xf32>
    %61 = tpu.matmul %60, %58, %cst_38 {dimension_numbers = #tpu.dot_dimension_numbers<[1], [0], [0], [1], [0, 0, 1, 1], [], []>} : vector<8x32xbf16>, vector<32x96xbf16>, vector<8x96xf32> -> vector<8x96xf32>
    %62 = vector.broadcast %59 : vector<1x96xf32> to vector<8x96xf32>
    %63 = arith.addf %61, %62 : vector<8x96xf32>
    %64 = vector.extract_strided_slice %63 {offsets = [0, 0], sizes = [8, 32], strides = [1, 1]} : vector<8x96xf32> to vector<8x32xf32>
    %65 = vector.extract_strided_slice %63 {offsets = [0, 32], sizes = [8, 32], strides = [1, 1]} : vector<8x96xf32> to vector<8x32xf32>
    %66 = vector.extract_strided_slice %63 {offsets = [0, 64], sizes = [8, 32], strides = [1, 1]} : vector<8x96xf32> to vector<8x32xf32>
    %c0_39 = arith.constant 0 : index
    %c0_40 = arith.constant 0 : index
    %c0_41 = arith.constant 0 : index
    %67 = vector.load %arg11[%c0_39, %c0_40, %c0_41] : memref<4x8x32xbf16, #tpu.memory_space<vmem>>, vector<4x8x32xbf16>
    %c0_42 = arith.constant 0 : index
    %c0_43 = arith.constant 0 : index
    %68 = vector.load %arg12[%c0_42, %c0_43] : memref<1x32xf32, #tpu.memory_space<vmem>>, vector<1x32xf32>
    %69 = arith.truncf %64 : vector<8x32xf32> to vector<8x32xbf16>
    %70 = arith.truncf %65 : vector<8x32xf32> to vector<8x32xbf16>
    %71 = arith.truncf %66 : vector<8x32xf32> to vector<8x32xbf16>
    %72 = vector.extract_strided_slice %69 {offsets = [0, 0], sizes = [8, 8], strides = [1, 1]} : vector<8x32xbf16> to vector<8x8xbf16>
    %73 = vector.extract_strided_slice %70 {offsets = [0, 0], sizes = [8, 8], strides = [1, 1]} : vector<8x32xbf16> to vector<8x8xbf16>
    %cst_44 = arith.constant dense<0.000000e+00> : vector<8x8xf32>
    %74 = tpu.matmul %72, %73, %cst_44 {dimension_numbers = #tpu.dot_dimension_numbers<[1], [1], [0], [0], [0, 0, 1, 0], [], []>} : vector<8x8xbf16>, vector<8x8xbf16>, vector<8x8xf32> -> vector<8x8xf32>
    %cst_45 = arith.constant 0.353553385 : f32
    %75 = vector.broadcast %cst_45 : f32 to vector<8x8xf32>
    %76 = arith.mulf %74, %75 : vector<8x8xf32>
    %77 = arith.addf %76, %17 : vector<8x8xf32>
    %cst_46 = arith.constant dense<0xFF800000> : vector<8xf32>
    %78 = vector.multi_reduction <maximumf>, %77, %cst_46 [1] : vector<8x8xf32> to vector<8xf32>
    %79 = vector.shape_cast %78 : vector<8xf32> to vector<8x1xf32>
    %80 = vector.broadcast %79 : vector<8x1xf32> to vector<8x8xf32>
    %81 = arith.subf %77, %80 : vector<8x8xf32>
    %82 = math.exp %81 : vector<8x8xf32>
    %cst_47 = arith.constant dense<0.000000e+00> : vector<8xf32>
    %83 = vector.multi_reduction <add>, %82, %cst_47 [1] : vector<8x8xf32> to vector<8xf32>
    %84 = vector.shape_cast %83 : vector<8xf32> to vector<8x1xf32>
    %85 = tpu.reciprocal %84 {approx = true} : vector<8x1xf32> -> vector<8x1xf32>
    %86 = vector.broadcast %85 : vector<8x1xf32> to vector<8x8xf32>
    %87 = arith.mulf %82, %86 : vector<8x8xf32>
    %88 = arith.truncf %87 : vector<8x8xf32> to vector<8x8xbf16>
    %89 = vector.extract_strided_slice %71 {offsets = [0, 0], sizes = [8, 8], strides = [1, 1]} : vector<8x32xbf16> to vector<8x8xbf16>
    %cst_48 = arith.constant dense<0.000000e+00> : vector<8x8xf32>
    %90 = tpu.matmul %88, %89, %cst_48 {dimension_numbers = #tpu.dot_dimension_numbers<[1], [0], [0], [1], [0, 0, 1, 1], [], []>} : vector<8x8xbf16>, vector<8x8xbf16>, vector<8x8xf32> -> vector<8x8xf32>
    %91 = arith.truncf %90 : vector<8x8xf32> to vector<8x8xbf16>
    %92 = vector.extract_strided_slice %67 {offsets = [0, 0, 0], sizes = [1, 8, 32], strides = [1, 1, 1]} : vector<4x8x32xbf16> to vector<1x8x32xbf16>
    %93 = vector.shape_cast %92 : vector<1x8x32xbf16> to vector<8x32xbf16>
    %cst_49 = arith.constant dense<0.000000e+00> : vector<8x32xf32>
    %94 = tpu.matmul %91, %93, %cst_49 {dimension_numbers = #tpu.dot_dimension_numbers<[1], [0], [0], [1], [0, 0, 1, 1], [], []>} : vector<8x8xbf16>, vector<8x32xbf16>, vector<8x32xf32> -> vector<8x32xf32>
    %95 = vector.extract_strided_slice %69 {offsets = [0, 8], sizes = [8, 8], strides = [1, 1]} : vector<8x32xbf16> to vector<8x8xbf16>
    %96 = vector.extract_strided_slice %70 {offsets = [0, 8], sizes = [8, 8], strides = [1, 1]} : vector<8x32xbf16> to vector<8x8xbf16>
    %cst_50 = arith.constant dense<0.000000e+00> : vector<8x8xf32>
    %97 = tpu.matmul %95, %96, %cst_50 {dimension_numbers = #tpu.dot_dimension_numbers<[1], [1], [0], [0], [0, 0, 1, 0], [], []>} : vector<8x8xbf16>, vector<8x8xbf16>, vector<8x8xf32> -> vector<8x8xf32>
    %cst_51 = arith.constant 0.353553385 : f32
    %98 = vector.broadcast %cst_51 : f32 to vector<8x8xf32>
    %99 = arith.mulf %97, %98 : vector<8x8xf32>
    %100 = arith.addf %99, %17 : vector<8x8xf32>
    %cst_52 = arith.constant dense<0xFF800000> : vector<8xf32>
    %101 = vector.multi_reduction <maximumf>, %100, %cst_52 [1] : vector<8x8xf32> to vector<8xf32>
    %102 = vector.shape_cast %101 : vector<8xf32> to vector<8x1xf32>
    %103 = vector.broadcast %102 : vector<8x1xf32> to vector<8x8xf32>
    %104 = arith.subf %100, %103 : vector<8x8xf32>
    %105 = math.exp %104 : vector<8x8xf32>
    %cst_53 = arith.constant dense<0.000000e+00> : vector<8xf32>
    %106 = vector.multi_reduction <add>, %105, %cst_53 [1] : vector<8x8xf32> to vector<8xf32>
    %107 = vector.shape_cast %106 : vector<8xf32> to vector<8x1xf32>
    %108 = tpu.reciprocal %107 {approx = true} : vector<8x1xf32> -> vector<8x1xf32>
    %109 = vector.broadcast %108 : vector<8x1xf32> to vector<8x8xf32>
    %110 = arith.mulf %105, %109 : vector<8x8xf32>
    %111 = arith.truncf %110 : vector<8x8xf32> to vector<8x8xbf16>
    %112 = vector.extract_strided_slice %71 {offsets = [0, 8], sizes = [8, 8], strides = [1, 1]} : vector<8x32xbf16> to vector<8x8xbf16>
    %cst_54 = arith.constant dense<0.000000e+00> : vector<8x8xf32>
    %113 = tpu.matmul %111, %112, %cst_54 {dimension_numbers = #tpu.dot_dimension_numbers<[1], [0], [0], [1], [0, 0, 1, 1], [], []>} : vector<8x8xbf16>, vector<8x8xbf16>, vector<8x8xf32> -> vector<8x8xf32>
    %114 = arith.truncf %113 : vector<8x8xf32> to vector<8x8xbf16>
    %115 = vector.extract_strided_slice %67 {offsets = [1, 0, 0], sizes = [1, 8, 32], strides = [1, 1, 1]} : vector<4x8x32xbf16> to vector<1x8x32xbf16>
    %116 = vector.shape_cast %115 : vector<1x8x32xbf16> to vector<8x32xbf16>
    %cst_55 = arith.constant dense<0.000000e+00> : vector<8x32xf32>
    %117 = tpu.matmul %114, %116, %cst_55 {dimension_numbers = #tpu.dot_dimension_numbers<[1], [0], [0], [1], [0, 0, 1, 1], [], []>} : vector<8x8xbf16>, vector<8x32xbf16>, vector<8x32xf32> -> vector<8x32xf32>
    %118 = arith.addf %94, %117 : vector<8x32xf32>
    %119 = vector.extract_strided_slice %69 {offsets = [0, 16], sizes = [8, 8], strides = [1, 1]} : vector<8x32xbf16> to vector<8x8xbf16>
    %120 = vector.extract_strided_slice %70 {offsets = [0, 16], sizes = [8, 8], strides = [1, 1]} : vector<8x32xbf16> to vector<8x8xbf16>
    %cst_56 = arith.constant dense<0.000000e+00> : vector<8x8xf32>
    %121 = tpu.matmul %119, %120, %cst_56 {dimension_numbers = #tpu.dot_dimension_numbers<[1], [1], [0], [0], [0, 0, 1, 0], [], []>} : vector<8x8xbf16>, vector<8x8xbf16>, vector<8x8xf32> -> vector<8x8xf32>
    %cst_57 = arith.constant 0.353553385 : f32
    %122 = vector.broadcast %cst_57 : f32 to vector<8x8xf32>
    %123 = arith.mulf %121, %122 : vector<8x8xf32>
    %124 = arith.addf %123, %17 : vector<8x8xf32>
    %cst_58 = arith.constant dense<0xFF800000> : vector<8xf32>
    %125 = vector.multi_reduction <maximumf>, %124, %cst_58 [1] : vector<8x8xf32> to vector<8xf32>
    %126 = vector.shape_cast %125 : vector<8xf32> to vector<8x1xf32>
    %127 = vector.broadcast %126 : vector<8x1xf32> to vector<8x8xf32>
    %128 = arith.subf %124, %127 : vector<8x8xf32>
    %129 = math.exp %128 : vector<8x8xf32>
    %cst_59 = arith.constant dense<0.000000e+00> : vector<8xf32>
    %130 = vector.multi_reduction <add>, %129, %cst_59 [1] : vector<8x8xf32> to vector<8xf32>
    %131 = vector.shape_cast %130 : vector<8xf32> to vector<8x1xf32>
    %132 = tpu.reciprocal %131 {approx = true} : vector<8x1xf32> -> vector<8x1xf32>
    %133 = vector.broadcast %132 : vector<8x1xf32> to vector<8x8xf32>
    %134 = arith.mulf %129, %133 : vector<8x8xf32>
    %135 = arith.truncf %134 : vector<8x8xf32> to vector<8x8xbf16>
    %136 = vector.extract_strided_slice %71 {offsets = [0, 16], sizes = [8, 8], strides = [1, 1]} : vector<8x32xbf16> to vector<8x8xbf16>
    %cst_60 = arith.constant dense<0.000000e+00> : vector<8x8xf32>
    %137 = tpu.matmul %135, %136, %cst_60 {dimension_numbers = #tpu.dot_dimension_numbers<[1], [0], [0], [1], [0, 0, 1, 1], [], []>} : vector<8x8xbf16>, vector<8x8xbf16>, vector<8x8xf32> -> vector<8x8xf32>
    %138 = arith.truncf %137 : vector<8x8xf32> to vector<8x8xbf16>
    %139 = vector.extract_strided_slice %67 {offsets = [2, 0, 0], sizes = [1, 8, 32], strides = [1, 1, 1]} : vector<4x8x32xbf16> to vector<1x8x32xbf16>
    %140 = vector.shape_cast %139 : vector<1x8x32xbf16> to vector<8x32xbf16>
    %cst_61 = arith.constant dense<0.000000e+00> : vector<8x32xf32>
    %141 = tpu.matmul %138, %140, %cst_61 {dimension_numbers = #tpu.dot_dimension_numbers<[1], [0], [0], [1], [0, 0, 1, 1], [], []>} : vector<8x8xbf16>, vector<8x32xbf16>, vector<8x32xf32> -> vector<8x32xf32>
    %142 = arith.addf %118, %141 : vector<8x32xf32>
    %143 = vector.extract_strided_slice %69 {offsets = [0, 24], sizes = [8, 8], strides = [1, 1]} : vector<8x32xbf16> to vector<8x8xbf16>
    %144 = vector.extract_strided_slice %70 {offsets = [0, 24], sizes = [8, 8], strides = [1, 1]} : vector<8x32xbf16> to vector<8x8xbf16>
    %cst_62 = arith.constant dense<0.000000e+00> : vector<8x8xf32>
    %145 = tpu.matmul %143, %144, %cst_62 {dimension_numbers = #tpu.dot_dimension_numbers<[1], [1], [0], [0], [0, 0, 1, 0], [], []>} : vector<8x8xbf16>, vector<8x8xbf16>, vector<8x8xf32> -> vector<8x8xf32>
    %cst_63 = arith.constant 0.353553385 : f32
    %146 = vector.broadcast %cst_63 : f32 to vector<8x8xf32>
    %147 = arith.mulf %145, %146 : vector<8x8xf32>
    %148 = arith.addf %147, %17 : vector<8x8xf32>
    %cst_64 = arith.constant dense<0xFF800000> : vector<8xf32>
    %149 = vector.multi_reduction <maximumf>, %148, %cst_64 [1] : vector<8x8xf32> to vector<8xf32>
    %150 = vector.shape_cast %149 : vector<8xf32> to vector<8x1xf32>
    %151 = vector.broadcast %150 : vector<8x1xf32> to vector<8x8xf32>
    %152 = arith.subf %148, %151 : vector<8x8xf32>
    %153 = math.exp %152 : vector<8x8xf32>
    %cst_65 = arith.constant dense<0.000000e+00> : vector<8xf32>
    %154 = vector.multi_reduction <add>, %153, %cst_65 [1] : vector<8x8xf32> to vector<8xf32>
    %155 = vector.shape_cast %154 : vector<8xf32> to vector<8x1xf32>
    %156 = tpu.reciprocal %155 {approx = true} : vector<8x1xf32> -> vector<8x1xf32>
    %157 = vector.broadcast %156 : vector<8x1xf32> to vector<8x8xf32>
    %158 = arith.mulf %153, %157 : vector<8x8xf32>
    %159 = arith.truncf %158 : vector<8x8xf32> to vector<8x8xbf16>
    %160 = vector.extract_strided_slice %71 {offsets = [0, 24], sizes = [8, 8], strides = [1, 1]} : vector<8x32xbf16> to vector<8x8xbf16>
    %cst_66 = arith.constant dense<0.000000e+00> : vector<8x8xf32>
    %161 = tpu.matmul %159, %160, %cst_66 {dimension_numbers = #tpu.dot_dimension_numbers<[1], [0], [0], [1], [0, 0, 1, 1], [], []>} : vector<8x8xbf16>, vector<8x8xbf16>, vector<8x8xf32> -> vector<8x8xf32>
    %162 = arith.truncf %161 : vector<8x8xf32> to vector<8x8xbf16>
    %163 = vector.extract_strided_slice %67 {offsets = [3, 0, 0], sizes = [1, 8, 32], strides = [1, 1, 1]} : vector<4x8x32xbf16> to vector<1x8x32xbf16>
    %164 = vector.shape_cast %163 : vector<1x8x32xbf16> to vector<8x32xbf16>
    %cst_67 = arith.constant dense<0.000000e+00> : vector<8x32xf32>
    %165 = tpu.matmul %162, %164, %cst_67 {dimension_numbers = #tpu.dot_dimension_numbers<[1], [0], [0], [1], [0, 0, 1, 1], [], []>} : vector<8x8xbf16>, vector<8x32xbf16>, vector<8x32xf32> -> vector<8x32xf32>
    %166 = arith.addf %142, %165 : vector<8x32xf32>
    %167 = vector.broadcast %68 : vector<1x32xf32> to vector<8x32xf32>
    %168 = arith.addf %166, %167 : vector<8x32xf32>
    %169 = arith.addf %1, %168 : vector<8x32xf32>
    %c0_68 = arith.constant 0 : index
    %c0_69 = arith.constant 0 : index
    %170 = vector.load %arg13[%c0_68, %c0_69] : memref<1x32xf32, #tpu.memory_space<vmem>>, vector<1x32xf32>
    %c0_70 = arith.constant 0 : index
    %c0_71 = arith.constant 0 : index
    %171 = vector.load %arg14[%c0_70, %c0_71] : memref<1x32xf32, #tpu.memory_space<vmem>>, vector<1x32xf32>
    %cst_72 = arith.constant dense<0.000000e+00> : vector<8xf32>
    %172 = vector.multi_reduction <add>, %169, %cst_72 [1] : vector<8x32xf32> to vector<8xf32>
    %173 = vector.shape_cast %172 : vector<8xf32> to vector<8x1xf32>
    %cst_73 = arith.constant 3.200000e+01 : f32
    %174 = vector.broadcast %cst_73 : f32 to vector<8x1xf32>
    %175 = arith.divf %173, %174 : vector<8x1xf32>
    %176 = vector.broadcast %175 : vector<8x1xf32> to vector<8x32xf32>
    %177 = arith.subf %169, %176 : vector<8x32xf32>
    %178 = vector.broadcast %175 : vector<8x1xf32> to vector<8x32xf32>
    %179 = arith.subf %169, %178 : vector<8x32xf32>
    %180 = arith.mulf %177, %179 : vector<8x32xf32>
    %cst_74 = arith.constant dense<0.000000e+00> : vector<8xf32>
    %181 = vector.multi_reduction <add>, %180, %cst_74 [1] : vector<8x32xf32> to vector<8xf32>
    %182 = vector.shape_cast %181 : vector<8xf32> to vector<8x1xf32>
    %cst_75 = arith.constant 3.200000e+01 : f32
    %183 = vector.broadcast %cst_75 : f32 to vector<8x1xf32>
    %184 = arith.divf %182, %183 : vector<8x1xf32>
    %185 = vector.broadcast %175 : vector<8x1xf32> to vector<8x32xf32>
    %186 = arith.subf %169, %185 : vector<8x32xf32>
    %cst_76 = arith.constant 9.99999997E-7 : f32
    %187 = vector.broadcast %cst_76 : f32 to vector<8x1xf32>
    %188 = arith.addf %184, %187 : vector<8x1xf32>
    %189 = math.rsqrt %188 : vector<8x1xf32>
    %190 = vector.broadcast %189 : vector<8x1xf32> to vector<8x32xf32>
    %191 = arith.mulf %186, %190 : vector<8x32xf32>
    %192 = vector.broadcast %170 : vector<1x32xf32> to vector<8x32xf32>
    %193 = arith.mulf %191, %192 : vector<8x32xf32>
    %194 = vector.broadcast %171 : vector<1x32xf32> to vector<8x32xf32>
    %195 = arith.addf %193, %194 : vector<8x32xf32>
    %c0_77 = arith.constant 0 : index
    %c0_78 = arith.constant 0 : index
    %196 = vector.load %arg15[%c0_77, %c0_78] : memref<32x32xbf16, #tpu.memory_space<vmem>>, vector<32x32xbf16>
    %c0_79 = arith.constant 0 : index
    %c0_80 = arith.constant 0 : index
    %197 = vector.load %arg16[%c0_79, %c0_80] : memref<1x32xf32, #tpu.memory_space<vmem>>, vector<1x32xf32>
    %198 = arith.truncf %195 : vector<8x32xf32> to vector<8x32xbf16>
    %cst_81 = arith.constant dense<0.000000e+00> : vector<8x32xf32>
    %199 = tpu.matmul %198, %196, %cst_81 {dimension_numbers = #tpu.dot_dimension_numbers<[1], [0], [0], [1], [0, 0, 1, 1], [], []>} : vector<8x32xbf16>, vector<32x32xbf16>, vector<8x32xf32> -> vector<8x32xf32>
    %200 = vector.broadcast %197 : vector<1x32xf32> to vector<8x32xf32>
    %201 = arith.addf %199, %200 : vector<8x32xf32>
    %c0_82 = arith.constant 0 : index
    %c0_83 = arith.constant 0 : index
    %202 = vector.load %arg17[%c0_82, %c0_83] : memref<32x64xbf16, #tpu.memory_space<vmem>>, vector<32x64xbf16>
    %c0_84 = arith.constant 0 : index
    %c0_85 = arith.constant 0 : index
    %203 = vector.load %arg18[%c0_84, %c0_85] : memref<1x64xf32, #tpu.memory_space<vmem>>, vector<1x64xf32>
    %204 = arith.truncf %3 : vector<16x32xf32> to vector<16x32xbf16>
    %cst_86 = arith.constant dense<0.000000e+00> : vector<16x64xf32>
    %205 = tpu.matmul %204, %202, %cst_86 {dimension_numbers = #tpu.dot_dimension_numbers<[1], [0], [0], [1], [0, 0, 1, 1], [], []>} : vector<16x32xbf16>, vector<32x64xbf16>, vector<16x64xf32> -> vector<16x64xf32>
    %206 = vector.broadcast %203 : vector<1x64xf32> to vector<16x64xf32>
    %207 = arith.addf %205, %206 : vector<16x64xf32>
    %208 = vector.extract_strided_slice %207 {offsets = [0, 0], sizes = [16, 32], strides = [1, 1]} : vector<16x64xf32> to vector<16x32xf32>
    %209 = vector.extract_strided_slice %207 {offsets = [0, 32], sizes = [16, 32], strides = [1, 1]} : vector<16x64xf32> to vector<16x32xf32>
    %c0_87 = arith.constant 0 : index
    %c0_88 = arith.constant 0 : index
    %c0_89 = arith.constant 0 : index
    %210 = vector.load %arg19[%c0_87, %c0_88, %c0_89] : memref<4x8x32xbf16, #tpu.memory_space<vmem>>, vector<4x8x32xbf16>
    %c0_90 = arith.constant 0 : index
    %c0_91 = arith.constant 0 : index
    %211 = vector.load %arg20[%c0_90, %c0_91] : memref<1x32xf32, #tpu.memory_space<vmem>>, vector<1x32xf32>
    %212 = arith.truncf %201 : vector<8x32xf32> to vector<8x32xbf16>
    %213 = arith.truncf %208 : vector<16x32xf32> to vector<16x32xbf16>
    %214 = arith.truncf %209 : vector<16x32xf32> to vector<16x32xbf16>
    %215 = vector.extract_strided_slice %212 {offsets = [0, 0], sizes = [8, 8], strides = [1, 1]} : vector<8x32xbf16> to vector<8x8xbf16>
    %216 = vector.extract_strided_slice %213 {offsets = [0, 0], sizes = [16, 8], strides = [1, 1]} : vector<16x32xbf16> to vector<16x8xbf16>
    %cst_92 = arith.constant dense<0.000000e+00> : vector<8x16xf32>
    %217 = tpu.matmul %215, %216, %cst_92 {dimension_numbers = #tpu.dot_dimension_numbers<[1], [1], [0], [0], [0, 0, 1, 0], [], []>} : vector<8x8xbf16>, vector<16x8xbf16>, vector<8x16xf32> -> vector<8x16xf32>
    %cst_93 = arith.constant 0.353553385 : f32
    %218 = vector.broadcast %cst_93 : f32 to vector<8x16xf32>
    %219 = arith.mulf %217, %218 : vector<8x16xf32>
    %220 = vector.broadcast %24 : vector<1x16xf32> to vector<8x16xf32>
    %221 = arith.addf %219, %220 : vector<8x16xf32>
    %cst_94 = arith.constant dense<0xFF800000> : vector<8xf32>
    %222 = vector.multi_reduction <maximumf>, %221, %cst_94 [1] : vector<8x16xf32> to vector<8xf32>
    %223 = vector.shape_cast %222 : vector<8xf32> to vector<8x1xf32>
    %224 = vector.broadcast %223 : vector<8x1xf32> to vector<8x16xf32>
    %225 = arith.subf %221, %224 : vector<8x16xf32>
    %226 = math.exp %225 : vector<8x16xf32>
    %cst_95 = arith.constant dense<0.000000e+00> : vector<8xf32>
    %227 = vector.multi_reduction <add>, %226, %cst_95 [1] : vector<8x16xf32> to vector<8xf32>
    %228 = vector.shape_cast %227 : vector<8xf32> to vector<8x1xf32>
    %229 = tpu.reciprocal %228 {approx = true} : vector<8x1xf32> -> vector<8x1xf32>
    %230 = vector.broadcast %229 : vector<8x1xf32> to vector<8x16xf32>
    %231 = arith.mulf %226, %230 : vector<8x16xf32>
    %232 = arith.truncf %231 : vector<8x16xf32> to vector<8x16xbf16>
    %233 = vector.extract_strided_slice %214 {offsets = [0, 0], sizes = [16, 8], strides = [1, 1]} : vector<16x32xbf16> to vector<16x8xbf16>
    %cst_96 = arith.constant dense<0.000000e+00> : vector<8x8xf32>
    %234 = tpu.matmul %232, %233, %cst_96 {dimension_numbers = #tpu.dot_dimension_numbers<[1], [0], [0], [1], [0, 0, 1, 1], [], []>} : vector<8x16xbf16>, vector<16x8xbf16>, vector<8x8xf32> -> vector<8x8xf32>
    %235 = arith.truncf %234 : vector<8x8xf32> to vector<8x8xbf16>
    %236 = vector.extract_strided_slice %210 {offsets = [0, 0, 0], sizes = [1, 8, 32], strides = [1, 1, 1]} : vector<4x8x32xbf16> to vector<1x8x32xbf16>
    %237 = vector.shape_cast %236 : vector<1x8x32xbf16> to vector<8x32xbf16>
    %cst_97 = arith.constant dense<0.000000e+00> : vector<8x32xf32>
    %238 = tpu.matmul %235, %237, %cst_97 {dimension_numbers = #tpu.dot_dimension_numbers<[1], [0], [0], [1], [0, 0, 1, 1], [], []>} : vector<8x8xbf16>, vector<8x32xbf16>, vector<8x32xf32> -> vector<8x32xf32>
    %239 = vector.extract_strided_slice %212 {offsets = [0, 8], sizes = [8, 8], strides = [1, 1]} : vector<8x32xbf16> to vector<8x8xbf16>
    %240 = vector.extract_strided_slice %213 {offsets = [0, 8], sizes = [16, 8], strides = [1, 1]} : vector<16x32xbf16> to vector<16x8xbf16>
    %cst_98 = arith.constant dense<0.000000e+00> : vector<8x16xf32>
    %241 = tpu.matmul %239, %240, %cst_98 {dimension_numbers = #tpu.dot_dimension_numbers<[1], [1], [0], [0], [0, 0, 1, 0], [], []>} : vector<8x8xbf16>, vector<16x8xbf16>, vector<8x16xf32> -> vector<8x16xf32>
    %cst_99 = arith.constant 0.353553385 : f32
    %242 = vector.broadcast %cst_99 : f32 to vector<8x16xf32>
    %243 = arith.mulf %241, %242 : vector<8x16xf32>
    %244 = vector.broadcast %24 : vector<1x16xf32> to vector<8x16xf32>
    %245 = arith.addf %243, %244 : vector<8x16xf32>
    %cst_100 = arith.constant dense<0xFF800000> : vector<8xf32>
    %246 = vector.multi_reduction <maximumf>, %245, %cst_100 [1] : vector<8x16xf32> to vector<8xf32>
    %247 = vector.shape_cast %246 : vector<8xf32> to vector<8x1xf32>
    %248 = vector.broadcast %247 : vector<8x1xf32> to vector<8x16xf32>
    %249 = arith.subf %245, %248 : vector<8x16xf32>
    %250 = math.exp %249 : vector<8x16xf32>
    %cst_101 = arith.constant dense<0.000000e+00> : vector<8xf32>
    %251 = vector.multi_reduction <add>, %250, %cst_101 [1] : vector<8x16xf32> to vector<8xf32>
    %252 = vector.shape_cast %251 : vector<8xf32> to vector<8x1xf32>
    %253 = tpu.reciprocal %252 {approx = true} : vector<8x1xf32> -> vector<8x1xf32>
    %254 = vector.broadcast %253 : vector<8x1xf32> to vector<8x16xf32>
    %255 = arith.mulf %250, %254 : vector<8x16xf32>
    %256 = arith.truncf %255 : vector<8x16xf32> to vector<8x16xbf16>
    %257 = vector.extract_strided_slice %214 {offsets = [0, 8], sizes = [16, 8], strides = [1, 1]} : vector<16x32xbf16> to vector<16x8xbf16>
    %cst_102 = arith.constant dense<0.000000e+00> : vector<8x8xf32>
    %258 = tpu.matmul %256, %257, %cst_102 {dimension_numbers = #tpu.dot_dimension_numbers<[1], [0], [0], [1], [0, 0, 1, 1], [], []>} : vector<8x16xbf16>, vector<16x8xbf16>, vector<8x8xf32> -> vector<8x8xf32>
    %259 = arith.truncf %258 : vector<8x8xf32> to vector<8x8xbf16>
    %260 = vector.extract_strided_slice %210 {offsets = [1, 0, 0], sizes = [1, 8, 32], strides = [1, 1, 1]} : vector<4x8x32xbf16> to vector<1x8x32xbf16>
    %261 = vector.shape_cast %260 : vector<1x8x32xbf16> to vector<8x32xbf16>
    %cst_103 = arith.constant dense<0.000000e+00> : vector<8x32xf32>
    %262 = tpu.matmul %259, %261, %cst_103 {dimension_numbers = #tpu.dot_dimension_numbers<[1], [0], [0], [1], [0, 0, 1, 1], [], []>} : vector<8x8xbf16>, vector<8x32xbf16>, vector<8x32xf32> -> vector<8x32xf32>
    %263 = arith.addf %238, %262 : vector<8x32xf32>
    %264 = vector.extract_strided_slice %212 {offsets = [0, 16], sizes = [8, 8], strides = [1, 1]} : vector<8x32xbf16> to vector<8x8xbf16>
    %265 = vector.extract_strided_slice %213 {offsets = [0, 16], sizes = [16, 8], strides = [1, 1]} : vector<16x32xbf16> to vector<16x8xbf16>
    %cst_104 = arith.constant dense<0.000000e+00> : vector<8x16xf32>
    %266 = tpu.matmul %264, %265, %cst_104 {dimension_numbers = #tpu.dot_dimension_numbers<[1], [1], [0], [0], [0, 0, 1, 0], [], []>} : vector<8x8xbf16>, vector<16x8xbf16>, vector<8x16xf32> -> vector<8x16xf32>
    %cst_105 = arith.constant 0.353553385 : f32
    %267 = vector.broadcast %cst_105 : f32 to vector<8x16xf32>
    %268 = arith.mulf %266, %267 : vector<8x16xf32>
    %269 = vector.broadcast %24 : vector<1x16xf32> to vector<8x16xf32>
    %270 = arith.addf %268, %269 : vector<8x16xf32>
    %cst_106 = arith.constant dense<0xFF800000> : vector<8xf32>
    %271 = vector.multi_reduction <maximumf>, %270, %cst_106 [1] : vector<8x16xf32> to vector<8xf32>
    %272 = vector.shape_cast %271 : vector<8xf32> to vector<8x1xf32>
    %273 = vector.broadcast %272 : vector<8x1xf32> to vector<8x16xf32>
    %274 = arith.subf %270, %273 : vector<8x16xf32>
    %275 = math.exp %274 : vector<8x16xf32>
    %cst_107 = arith.constant dense<0.000000e+00> : vector<8xf32>
    %276 = vector.multi_reduction <add>, %275, %cst_107 [1] : vector<8x16xf32> to vector<8xf32>
    %277 = vector.shape_cast %276 : vector<8xf32> to vector<8x1xf32>
    %278 = tpu.reciprocal %277 {approx = true} : vector<8x1xf32> -> vector<8x1xf32>
    %279 = vector.broadcast %278 : vector<8x1xf32> to vector<8x16xf32>
    %280 = arith.mulf %275, %279 : vector<8x16xf32>
    %281 = arith.truncf %280 : vector<8x16xf32> to vector<8x16xbf16>
    %282 = vector.extract_strided_slice %214 {offsets = [0, 16], sizes = [16, 8], strides = [1, 1]} : vector<16x32xbf16> to vector<16x8xbf16>
    %cst_108 = arith.constant dense<0.000000e+00> : vector<8x8xf32>
    %283 = tpu.matmul %281, %282, %cst_108 {dimension_numbers = #tpu.dot_dimension_numbers<[1], [0], [0], [1], [0, 0, 1, 1], [], []>} : vector<8x16xbf16>, vector<16x8xbf16>, vector<8x8xf32> -> vector<8x8xf32>
    %284 = arith.truncf %283 : vector<8x8xf32> to vector<8x8xbf16>
    %285 = vector.extract_strided_slice %210 {offsets = [2, 0, 0], sizes = [1, 8, 32], strides = [1, 1, 1]} : vector<4x8x32xbf16> to vector<1x8x32xbf16>
    %286 = vector.shape_cast %285 : vector<1x8x32xbf16> to vector<8x32xbf16>
    %cst_109 = arith.constant dense<0.000000e+00> : vector<8x32xf32>
    %287 = tpu.matmul %284, %286, %cst_109 {dimension_numbers = #tpu.dot_dimension_numbers<[1], [0], [0], [1], [0, 0, 1, 1], [], []>} : vector<8x8xbf16>, vector<8x32xbf16>, vector<8x32xf32> -> vector<8x32xf32>
    %288 = arith.addf %263, %287 : vector<8x32xf32>
    %289 = vector.extract_strided_slice %212 {offsets = [0, 24], sizes = [8, 8], strides = [1, 1]} : vector<8x32xbf16> to vector<8x8xbf16>
    %290 = vector.extract_strided_slice %213 {offsets = [0, 24], sizes = [16, 8], strides = [1, 1]} : vector<16x32xbf16> to vector<16x8xbf16>
    %cst_110 = arith.constant dense<0.000000e+00> : vector<8x16xf32>
    %291 = tpu.matmul %289, %290, %cst_110 {dimension_numbers = #tpu.dot_dimension_numbers<[1], [1], [0], [0], [0, 0, 1, 0], [], []>} : vector<8x8xbf16>, vector<16x8xbf16>, vector<8x16xf32> -> vector<8x16xf32>
    %cst_111 = arith.constant 0.353553385 : f32
    %292 = vector.broadcast %cst_111 : f32 to vector<8x16xf32>
    %293 = arith.mulf %291, %292 : vector<8x16xf32>
    %294 = vector.broadcast %24 : vector<1x16xf32> to vector<8x16xf32>
    %295 = arith.addf %293, %294 : vector<8x16xf32>
    %cst_112 = arith.constant dense<0xFF800000> : vector<8xf32>
    %296 = vector.multi_reduction <maximumf>, %295, %cst_112 [1] : vector<8x16xf32> to vector<8xf32>
    %297 = vector.shape_cast %296 : vector<8xf32> to vector<8x1xf32>
    %298 = vector.broadcast %297 : vector<8x1xf32> to vector<8x16xf32>
    %299 = arith.subf %295, %298 : vector<8x16xf32>
    %300 = math.exp %299 : vector<8x16xf32>
    %cst_113 = arith.constant dense<0.000000e+00> : vector<8xf32>
    %301 = vector.multi_reduction <add>, %300, %cst_113 [1] : vector<8x16xf32> to vector<8xf32>
    %302 = vector.shape_cast %301 : vector<8xf32> to vector<8x1xf32>
    %303 = tpu.reciprocal %302 {approx = true} : vector<8x1xf32> -> vector<8x1xf32>
    %304 = vector.broadcast %303 : vector<8x1xf32> to vector<8x16xf32>
    %305 = arith.mulf %300, %304 : vector<8x16xf32>
    %306 = arith.truncf %305 : vector<8x16xf32> to vector<8x16xbf16>
    %307 = vector.extract_strided_slice %214 {offsets = [0, 24], sizes = [16, 8], strides = [1, 1]} : vector<16x32xbf16> to vector<16x8xbf16>
    %cst_114 = arith.constant dense<0.000000e+00> : vector<8x8xf32>
    %308 = tpu.matmul %306, %307, %cst_114 {dimension_numbers = #tpu.dot_dimension_numbers<[1], [0], [0], [1], [0, 0, 1, 1], [], []>} : vector<8x16xbf16>, vector<16x8xbf16>, vector<8x8xf32> -> vector<8x8xf32>
    %309 = arith.truncf %308 : vector<8x8xf32> to vector<8x8xbf16>
    %310 = vector.extract_strided_slice %210 {offsets = [3, 0, 0], sizes = [1, 8, 32], strides = [1, 1, 1]} : vector<4x8x32xbf16> to vector<1x8x32xbf16>
    %311 = vector.shape_cast %310 : vector<1x8x32xbf16> to vector<8x32xbf16>
    %cst_115 = arith.constant dense<0.000000e+00> : vector<8x32xf32>
    %312 = tpu.matmul %309, %311, %cst_115 {dimension_numbers = #tpu.dot_dimension_numbers<[1], [0], [0], [1], [0, 0, 1, 1], [], []>} : vector<8x8xbf16>, vector<8x32xbf16>, vector<8x32xf32> -> vector<8x32xf32>
    %313 = arith.addf %288, %312 : vector<8x32xf32>
    %314 = vector.broadcast %211 : vector<1x32xf32> to vector<8x32xf32>
    %315 = arith.addf %313, %314 : vector<8x32xf32>
    %316 = arith.addf %169, %315 : vector<8x32xf32>
    %c0_116 = arith.constant 0 : index
    %c0_117 = arith.constant 0 : index
    %317 = vector.load %arg21[%c0_116, %c0_117] : memref<1x32xf32, #tpu.memory_space<vmem>>, vector<1x32xf32>
    %c0_118 = arith.constant 0 : index
    %c0_119 = arith.constant 0 : index
    %318 = vector.load %arg22[%c0_118, %c0_119] : memref<1x32xf32, #tpu.memory_space<vmem>>, vector<1x32xf32>
    %cst_120 = arith.constant dense<0.000000e+00> : vector<8xf32>
    %319 = vector.multi_reduction <add>, %316, %cst_120 [1] : vector<8x32xf32> to vector<8xf32>
    %320 = vector.shape_cast %319 : vector<8xf32> to vector<8x1xf32>
    %cst_121 = arith.constant 3.200000e+01 : f32
    %321 = vector.broadcast %cst_121 : f32 to vector<8x1xf32>
    %322 = arith.divf %320, %321 : vector<8x1xf32>
    %323 = vector.broadcast %322 : vector<8x1xf32> to vector<8x32xf32>
    %324 = arith.subf %316, %323 : vector<8x32xf32>
    %325 = vector.broadcast %322 : vector<8x1xf32> to vector<8x32xf32>
    %326 = arith.subf %316, %325 : vector<8x32xf32>
    %327 = arith.mulf %324, %326 : vector<8x32xf32>
    %cst_122 = arith.constant dense<0.000000e+00> : vector<8xf32>
    %328 = vector.multi_reduction <add>, %327, %cst_122 [1] : vector<8x32xf32> to vector<8xf32>
    %329 = vector.shape_cast %328 : vector<8xf32> to vector<8x1xf32>
    %cst_123 = arith.constant 3.200000e+01 : f32
    %330 = vector.broadcast %cst_123 : f32 to vector<8x1xf32>
    %331 = arith.divf %329, %330 : vector<8x1xf32>
    %332 = vector.broadcast %322 : vector<8x1xf32> to vector<8x32xf32>
    %333 = arith.subf %316, %332 : vector<8x32xf32>
    %cst_124 = arith.constant 9.99999997E-7 : f32
    %334 = vector.broadcast %cst_124 : f32 to vector<8x1xf32>
    %335 = arith.addf %331, %334 : vector<8x1xf32>
    %336 = math.rsqrt %335 : vector<8x1xf32>
    %337 = vector.broadcast %336 : vector<8x1xf32> to vector<8x32xf32>
    %338 = arith.mulf %333, %337 : vector<8x32xf32>
    %339 = vector.broadcast %317 : vector<1x32xf32> to vector<8x32xf32>
    %340 = arith.mulf %338, %339 : vector<8x32xf32>
    %341 = vector.broadcast %318 : vector<1x32xf32> to vector<8x32xf32>
    %342 = arith.addf %340, %341 : vector<8x32xf32>
    %c0_125 = arith.constant 0 : index
    %c0_126 = arith.constant 0 : index
    %343 = vector.load %arg23[%c0_125, %c0_126] : memref<32x32xbf16, #tpu.memory_space<vmem>>, vector<32x32xbf16>
    %c0_127 = arith.constant 0 : index
    %c0_128 = arith.constant 0 : index
    %344 = vector.load %arg24[%c0_127, %c0_128] : memref<1x32xf32, #tpu.memory_space<vmem>>, vector<1x32xf32>
    %345 = arith.truncf %342 : vector<8x32xf32> to vector<8x32xbf16>
    %cst_129 = arith.constant dense<0.000000e+00> : vector<8x32xf32>
    %346 = tpu.matmul %345, %343, %cst_129 {dimension_numbers = #tpu.dot_dimension_numbers<[1], [0], [0], [1], [0, 0, 1, 1], [], []>} : vector<8x32xbf16>, vector<32x32xbf16>, vector<8x32xf32> -> vector<8x32xf32>
    %347 = vector.broadcast %344 : vector<1x32xf32> to vector<8x32xf32>
    %348 = arith.addf %346, %347 : vector<8x32xf32>
    %c0_130 = arith.constant 0 : index
    %c0_131 = arith.constant 0 : index
    %349 = vector.load %arg25[%c0_130, %c0_131] : memref<32x64xbf16, #tpu.memory_space<vmem>>, vector<32x64xbf16>
    %c0_132 = arith.constant 0 : index
    %c0_133 = arith.constant 0 : index
    %350 = vector.load %arg26[%c0_132, %c0_133] : memref<1x64xf32, #tpu.memory_space<vmem>>, vector<1x64xf32>
    %351 = arith.truncf %5 : vector<8x32xf32> to vector<8x32xbf16>
    %cst_134 = arith.constant dense<0.000000e+00> : vector<8x64xf32>
    %352 = tpu.matmul %351, %349, %cst_134 {dimension_numbers = #tpu.dot_dimension_numbers<[1], [0], [0], [1], [0, 0, 1, 1], [], []>} : vector<8x32xbf16>, vector<32x64xbf16>, vector<8x64xf32> -> vector<8x64xf32>
    %353 = vector.broadcast %350 : vector<1x64xf32> to vector<8x64xf32>
    %354 = arith.addf %352, %353 : vector<8x64xf32>
    %355 = vector.extract_strided_slice %354 {offsets = [0, 0], sizes = [8, 32], strides = [1, 1]} : vector<8x64xf32> to vector<8x32xf32>
    %356 = vector.extract_strided_slice %354 {offsets = [0, 32], sizes = [8, 32], strides = [1, 1]} : vector<8x64xf32> to vector<8x32xf32>
    %c0_135 = arith.constant 0 : index
    %c0_136 = arith.constant 0 : index
    %c0_137 = arith.constant 0 : index
    %357 = vector.load %arg27[%c0_135, %c0_136, %c0_137] : memref<4x8x32xbf16, #tpu.memory_space<vmem>>, vector<4x8x32xbf16>
    %c0_138 = arith.constant 0 : index
    %c0_139 = arith.constant 0 : index
    %358 = vector.load %arg28[%c0_138, %c0_139] : memref<1x32xf32, #tpu.memory_space<vmem>>, vector<1x32xf32>
    %359 = arith.truncf %348 : vector<8x32xf32> to vector<8x32xbf16>
    %360 = arith.truncf %355 : vector<8x32xf32> to vector<8x32xbf16>
    %361 = arith.truncf %356 : vector<8x32xf32> to vector<8x32xbf16>
    %362 = vector.extract_strided_slice %359 {offsets = [0, 0], sizes = [8, 8], strides = [1, 1]} : vector<8x32xbf16> to vector<8x8xbf16>
    %363 = vector.extract_strided_slice %360 {offsets = [0, 0], sizes = [8, 8], strides = [1, 1]} : vector<8x32xbf16> to vector<8x8xbf16>
    %cst_140 = arith.constant dense<0.000000e+00> : vector<8x8xf32>
    %364 = tpu.matmul %362, %363, %cst_140 {dimension_numbers = #tpu.dot_dimension_numbers<[1], [1], [0], [0], [0, 0, 1, 0], [], []>} : vector<8x8xbf16>, vector<8x8xbf16>, vector<8x8xf32> -> vector<8x8xf32>
    %cst_141 = arith.constant 0.353553385 : f32
    %365 = vector.broadcast %cst_141 : f32 to vector<8x8xf32>
    %366 = arith.mulf %364, %365 : vector<8x8xf32>
    %367 = vector.broadcast %31 : vector<1x8xf32> to vector<8x8xf32>
    %368 = arith.addf %366, %367 : vector<8x8xf32>
    %cst_142 = arith.constant dense<0xFF800000> : vector<8xf32>
    %369 = vector.multi_reduction <maximumf>, %368, %cst_142 [1] : vector<8x8xf32> to vector<8xf32>
    %370 = vector.shape_cast %369 : vector<8xf32> to vector<8x1xf32>
    %371 = vector.broadcast %370 : vector<8x1xf32> to vector<8x8xf32>
    %372 = arith.subf %368, %371 : vector<8x8xf32>
    %373 = math.exp %372 : vector<8x8xf32>
    %cst_143 = arith.constant dense<0.000000e+00> : vector<8xf32>
    %374 = vector.multi_reduction <add>, %373, %cst_143 [1] : vector<8x8xf32> to vector<8xf32>
    %375 = vector.shape_cast %374 : vector<8xf32> to vector<8x1xf32>
    %376 = tpu.reciprocal %375 {approx = true} : vector<8x1xf32> -> vector<8x1xf32>
    %377 = vector.broadcast %376 : vector<8x1xf32> to vector<8x8xf32>
    %378 = arith.mulf %373, %377 : vector<8x8xf32>
    %379 = arith.truncf %378 : vector<8x8xf32> to vector<8x8xbf16>
    %380 = vector.extract_strided_slice %361 {offsets = [0, 0], sizes = [8, 8], strides = [1, 1]} : vector<8x32xbf16> to vector<8x8xbf16>
    %cst_144 = arith.constant dense<0.000000e+00> : vector<8x8xf32>
    %381 = tpu.matmul %379, %380, %cst_144 {dimension_numbers = #tpu.dot_dimension_numbers<[1], [0], [0], [1], [0, 0, 1, 1], [], []>} : vector<8x8xbf16>, vector<8x8xbf16>, vector<8x8xf32> -> vector<8x8xf32>
    %382 = arith.truncf %381 : vector<8x8xf32> to vector<8x8xbf16>
    %383 = vector.extract_strided_slice %357 {offsets = [0, 0, 0], sizes = [1, 8, 32], strides = [1, 1, 1]} : vector<4x8x32xbf16> to vector<1x8x32xbf16>
    %384 = vector.shape_cast %383 : vector<1x8x32xbf16> to vector<8x32xbf16>
    %cst_145 = arith.constant dense<0.000000e+00> : vector<8x32xf32>
    %385 = tpu.matmul %382, %384, %cst_145 {dimension_numbers = #tpu.dot_dimension_numbers<[1], [0], [0], [1], [0, 0, 1, 1], [], []>} : vector<8x8xbf16>, vector<8x32xbf16>, vector<8x32xf32> -> vector<8x32xf32>
    %386 = vector.extract_strided_slice %359 {offsets = [0, 8], sizes = [8, 8], strides = [1, 1]} : vector<8x32xbf16> to vector<8x8xbf16>
    %387 = vector.extract_strided_slice %360 {offsets = [0, 8], sizes = [8, 8], strides = [1, 1]} : vector<8x32xbf16> to vector<8x8xbf16>
    %cst_146 = arith.constant dense<0.000000e+00> : vector<8x8xf32>
    %388 = tpu.matmul %386, %387, %cst_146 {dimension_numbers = #tpu.dot_dimension_numbers<[1], [1], [0], [0], [0, 0, 1, 0], [], []>} : vector<8x8xbf16>, vector<8x8xbf16>, vector<8x8xf32> -> vector<8x8xf32>
    %cst_147 = arith.constant 0.353553385 : f32
    %389 = vector.broadcast %cst_147 : f32 to vector<8x8xf32>
    %390 = arith.mulf %388, %389 : vector<8x8xf32>
    %391 = vector.broadcast %31 : vector<1x8xf32> to vector<8x8xf32>
    %392 = arith.addf %390, %391 : vector<8x8xf32>
    %cst_148 = arith.constant dense<0xFF800000> : vector<8xf32>
    %393 = vector.multi_reduction <maximumf>, %392, %cst_148 [1] : vector<8x8xf32> to vector<8xf32>
    %394 = vector.shape_cast %393 : vector<8xf32> to vector<8x1xf32>
    %395 = vector.broadcast %394 : vector<8x1xf32> to vector<8x8xf32>
    %396 = arith.subf %392, %395 : vector<8x8xf32>
    %397 = math.exp %396 : vector<8x8xf32>
    %cst_149 = arith.constant dense<0.000000e+00> : vector<8xf32>
    %398 = vector.multi_reduction <add>, %397, %cst_149 [1] : vector<8x8xf32> to vector<8xf32>
    %399 = vector.shape_cast %398 : vector<8xf32> to vector<8x1xf32>
    %400 = tpu.reciprocal %399 {approx = true} : vector<8x1xf32> -> vector<8x1xf32>
    %401 = vector.broadcast %400 : vector<8x1xf32> to vector<8x8xf32>
    %402 = arith.mulf %397, %401 : vector<8x8xf32>
    %403 = arith.truncf %402 : vector<8x8xf32> to vector<8x8xbf16>
    %404 = vector.extract_strided_slice %361 {offsets = [0, 8], sizes = [8, 8], strides = [1, 1]} : vector<8x32xbf16> to vector<8x8xbf16>
    %cst_150 = arith.constant dense<0.000000e+00> : vector<8x8xf32>
    %405 = tpu.matmul %403, %404, %cst_150 {dimension_numbers = #tpu.dot_dimension_numbers<[1], [0], [0], [1], [0, 0, 1, 1], [], []>} : vector<8x8xbf16>, vector<8x8xbf16>, vector<8x8xf32> -> vector<8x8xf32>
    %406 = arith.truncf %405 : vector<8x8xf32> to vector<8x8xbf16>
    %407 = vector.extract_strided_slice %357 {offsets = [1, 0, 0], sizes = [1, 8, 32], strides = [1, 1, 1]} : vector<4x8x32xbf16> to vector<1x8x32xbf16>
    %408 = vector.shape_cast %407 : vector<1x8x32xbf16> to vector<8x32xbf16>
    %cst_151 = arith.constant dense<0.000000e+00> : vector<8x32xf32>
    %409 = tpu.matmul %406, %408, %cst_151 {dimension_numbers = #tpu.dot_dimension_numbers<[1], [0], [0], [1], [0, 0, 1, 1], [], []>} : vector<8x8xbf16>, vector<8x32xbf16>, vector<8x32xf32> -> vector<8x32xf32>
    %410 = arith.addf %385, %409 : vector<8x32xf32>
    %411 = vector.extract_strided_slice %359 {offsets = [0, 16], sizes = [8, 8], strides = [1, 1]} : vector<8x32xbf16> to vector<8x8xbf16>
    %412 = vector.extract_strided_slice %360 {offsets = [0, 16], sizes = [8, 8], strides = [1, 1]} : vector<8x32xbf16> to vector<8x8xbf16>
    %cst_152 = arith.constant dense<0.000000e+00> : vector<8x8xf32>
    %413 = tpu.matmul %411, %412, %cst_152 {dimension_numbers = #tpu.dot_dimension_numbers<[1], [1], [0], [0], [0, 0, 1, 0], [], []>} : vector<8x8xbf16>, vector<8x8xbf16>, vector<8x8xf32> -> vector<8x8xf32>
    %cst_153 = arith.constant 0.353553385 : f32
    %414 = vector.broadcast %cst_153 : f32 to vector<8x8xf32>
    %415 = arith.mulf %413, %414 : vector<8x8xf32>
    %416 = vector.broadcast %31 : vector<1x8xf32> to vector<8x8xf32>
    %417 = arith.addf %415, %416 : vector<8x8xf32>
    %cst_154 = arith.constant dense<0xFF800000> : vector<8xf32>
    %418 = vector.multi_reduction <maximumf>, %417, %cst_154 [1] : vector<8x8xf32> to vector<8xf32>
    %419 = vector.shape_cast %418 : vector<8xf32> to vector<8x1xf32>
    %420 = vector.broadcast %419 : vector<8x1xf32> to vector<8x8xf32>
    %421 = arith.subf %417, %420 : vector<8x8xf32>
    %422 = math.exp %421 : vector<8x8xf32>
    %cst_155 = arith.constant dense<0.000000e+00> : vector<8xf32>
    %423 = vector.multi_reduction <add>, %422, %cst_155 [1] : vector<8x8xf32> to vector<8xf32>
    %424 = vector.shape_cast %423 : vector<8xf32> to vector<8x1xf32>
    %425 = tpu.reciprocal %424 {approx = true} : vector<8x1xf32> -> vector<8x1xf32>
    %426 = vector.broadcast %425 : vector<8x1xf32> to vector<8x8xf32>
    %427 = arith.mulf %422, %426 : vector<8x8xf32>
    %428 = arith.truncf %427 : vector<8x8xf32> to vector<8x8xbf16>
    %429 = vector.extract_strided_slice %361 {offsets = [0, 16], sizes = [8, 8], strides = [1, 1]} : vector<8x32xbf16> to vector<8x8xbf16>
    %cst_156 = arith.constant dense<0.000000e+00> : vector<8x8xf32>
    %430 = tpu.matmul %428, %429, %cst_156 {dimension_numbers = #tpu.dot_dimension_numbers<[1], [0], [0], [1], [0, 0, 1, 1], [], []>} : vector<8x8xbf16>, vector<8x8xbf16>, vector<8x8xf32> -> vector<8x8xf32>
    %431 = arith.truncf %430 : vector<8x8xf32> to vector<8x8xbf16>
    %432 = vector.extract_strided_slice %357 {offsets = [2, 0, 0], sizes = [1, 8, 32], strides = [1, 1, 1]} : vector<4x8x32xbf16> to vector<1x8x32xbf16>
    %433 = vector.shape_cast %432 : vector<1x8x32xbf16> to vector<8x32xbf16>
    %cst_157 = arith.constant dense<0.000000e+00> : vector<8x32xf32>
    %434 = tpu.matmul %431, %433, %cst_157 {dimension_numbers = #tpu.dot_dimension_numbers<[1], [0], [0], [1], [0, 0, 1, 1], [], []>} : vector<8x8xbf16>, vector<8x32xbf16>, vector<8x32xf32> -> vector<8x32xf32>
    %435 = arith.addf %410, %434 : vector<8x32xf32>
    %436 = vector.extract_strided_slice %359 {offsets = [0, 24], sizes = [8, 8], strides = [1, 1]} : vector<8x32xbf16> to vector<8x8xbf16>
    %437 = vector.extract_strided_slice %360 {offsets = [0, 24], sizes = [8, 8], strides = [1, 1]} : vector<8x32xbf16> to vector<8x8xbf16>
    %cst_158 = arith.constant dense<0.000000e+00> : vector<8x8xf32>
    %438 = tpu.matmul %436, %437, %cst_158 {dimension_numbers = #tpu.dot_dimension_numbers<[1], [1], [0], [0], [0, 0, 1, 0], [], []>} : vector<8x8xbf16>, vector<8x8xbf16>, vector<8x8xf32> -> vector<8x8xf32>
    %cst_159 = arith.constant 0.353553385 : f32
    %439 = vector.broadcast %cst_159 : f32 to vector<8x8xf32>
    %440 = arith.mulf %438, %439 : vector<8x8xf32>
    %441 = vector.broadcast %31 : vector<1x8xf32> to vector<8x8xf32>
    %442 = arith.addf %440, %441 : vector<8x8xf32>
    %cst_160 = arith.constant dense<0xFF800000> : vector<8xf32>
    %443 = vector.multi_reduction <maximumf>, %442, %cst_160 [1] : vector<8x8xf32> to vector<8xf32>
    %444 = vector.shape_cast %443 : vector<8xf32> to vector<8x1xf32>
    %445 = vector.broadcast %444 : vector<8x1xf32> to vector<8x8xf32>
    %446 = arith.subf %442, %445 : vector<8x8xf32>
    %447 = math.exp %446 : vector<8x8xf32>
    %cst_161 = arith.constant dense<0.000000e+00> : vector<8xf32>
    %448 = vector.multi_reduction <add>, %447, %cst_161 [1] : vector<8x8xf32> to vector<8xf32>
    %449 = vector.shape_cast %448 : vector<8xf32> to vector<8x1xf32>
    %450 = tpu.reciprocal %449 {approx = true} : vector<8x1xf32> -> vector<8x1xf32>
    %451 = vector.broadcast %450 : vector<8x1xf32> to vector<8x8xf32>
    %452 = arith.mulf %447, %451 : vector<8x8xf32>
    %453 = arith.truncf %452 : vector<8x8xf32> to vector<8x8xbf16>
    %454 = vector.extract_strided_slice %361 {offsets = [0, 24], sizes = [8, 8], strides = [1, 1]} : vector<8x32xbf16> to vector<8x8xbf16>
    %cst_162 = arith.constant dense<0.000000e+00> : vector<8x8xf32>
    %455 = tpu.matmul %453, %454, %cst_162 {dimension_numbers = #tpu.dot_dimension_numbers<[1], [0], [0], [1], [0, 0, 1, 1], [], []>} : vector<8x8xbf16>, vector<8x8xbf16>, vector<8x8xf32> -> vector<8x8xf32>
    %456 = arith.truncf %455 : vector<8x8xf32> to vector<8x8xbf16>
    %457 = vector.extract_strided_slice %357 {offsets = [3, 0, 0], sizes = [1, 8, 32], strides = [1, 1, 1]} : vector<4x8x32xbf16> to vector<1x8x32xbf16>
    %458 = vector.shape_cast %457 : vector<1x8x32xbf16> to vector<8x32xbf16>
    %cst_163 = arith.constant dense<0.000000e+00> : vector<8x32xf32>
    %459 = tpu.matmul %456, %458, %cst_163 {dimension_numbers = #tpu.dot_dimension_numbers<[1], [0], [0], [1], [0, 0, 1, 1], [], []>} : vector<8x8xbf16>, vector<8x32xbf16>, vector<8x32xf32> -> vector<8x32xf32>
    %460 = arith.addf %435, %459 : vector<8x32xf32>
    %461 = vector.broadcast %358 : vector<1x32xf32> to vector<8x32xf32>
    %462 = arith.addf %460, %461 : vector<8x32xf32>
    %463 = arith.addf %316, %462 : vector<8x32xf32>
    %c0_164 = arith.constant 0 : index
    %c0_165 = arith.constant 0 : index
    %464 = vector.load %arg29[%c0_164, %c0_165] : memref<1x32xf32, #tpu.memory_space<vmem>>, vector<1x32xf32>
    %c0_166 = arith.constant 0 : index
    %c0_167 = arith.constant 0 : index
    %465 = vector.load %arg30[%c0_166, %c0_167] : memref<1x32xf32, #tpu.memory_space<vmem>>, vector<1x32xf32>
    %cst_168 = arith.constant dense<0.000000e+00> : vector<8xf32>
    %466 = vector.multi_reduction <add>, %463, %cst_168 [1] : vector<8x32xf32> to vector<8xf32>
    %467 = vector.shape_cast %466 : vector<8xf32> to vector<8x1xf32>
    %cst_169 = arith.constant 3.200000e+01 : f32
    %468 = vector.broadcast %cst_169 : f32 to vector<8x1xf32>
    %469 = arith.divf %467, %468 : vector<8x1xf32>
    %470 = vector.broadcast %469 : vector<8x1xf32> to vector<8x32xf32>
    %471 = arith.subf %463, %470 : vector<8x32xf32>
    %472 = vector.broadcast %469 : vector<8x1xf32> to vector<8x32xf32>
    %473 = arith.subf %463, %472 : vector<8x32xf32>
    %474 = arith.mulf %471, %473 : vector<8x32xf32>
    %cst_170 = arith.constant dense<0.000000e+00> : vector<8xf32>
    %475 = vector.multi_reduction <add>, %474, %cst_170 [1] : vector<8x32xf32> to vector<8xf32>
    %476 = vector.shape_cast %475 : vector<8xf32> to vector<8x1xf32>
    %cst_171 = arith.constant 3.200000e+01 : f32
    %477 = vector.broadcast %cst_171 : f32 to vector<8x1xf32>
    %478 = arith.divf %476, %477 : vector<8x1xf32>
    %479 = vector.broadcast %469 : vector<8x1xf32> to vector<8x32xf32>
    %480 = arith.subf %463, %479 : vector<8x32xf32>
    %cst_172 = arith.constant 9.99999997E-7 : f32
    %481 = vector.broadcast %cst_172 : f32 to vector<8x1xf32>
    %482 = arith.addf %478, %481 : vector<8x1xf32>
    %483 = math.rsqrt %482 : vector<8x1xf32>
    %484 = vector.broadcast %483 : vector<8x1xf32> to vector<8x32xf32>
    %485 = arith.mulf %480, %484 : vector<8x32xf32>
    %486 = vector.broadcast %464 : vector<1x32xf32> to vector<8x32xf32>
    %487 = arith.mulf %485, %486 : vector<8x32xf32>
    %488 = vector.broadcast %465 : vector<1x32xf32> to vector<8x32xf32>
    %489 = arith.addf %487, %488 : vector<8x32xf32>
    %c0_173 = arith.constant 0 : index
    %c0_174 = arith.constant 0 : index
    %490 = vector.load %arg31[%c0_173, %c0_174] : memref<32x64xbf16, #tpu.memory_space<vmem>>, vector<32x64xbf16>
    %c0_175 = arith.constant 0 : index
    %c0_176 = arith.constant 0 : index
    %491 = vector.load %arg32[%c0_175, %c0_176] : memref<1x64xf32, #tpu.memory_space<vmem>>, vector<1x64xf32>
    %492 = arith.truncf %489 : vector<8x32xf32> to vector<8x32xbf16>
    %cst_177 = arith.constant dense<0.000000e+00> : vector<8x64xf32>
    %493 = tpu.matmul %492, %490, %cst_177 {dimension_numbers = #tpu.dot_dimension_numbers<[1], [0], [0], [1], [0, 0, 1, 1], [], []>} : vector<8x32xbf16>, vector<32x64xbf16>, vector<8x64xf32> -> vector<8x64xf32>
    %494 = vector.broadcast %491 : vector<1x64xf32> to vector<8x64xf32>
    %495 = arith.addf %493, %494 : vector<8x64xf32>
    %cst_178 = arith.constant 0.000000e+00 : f32
    %496 = vector.broadcast %cst_178 : f32 to vector<8x64xf32>
    %497 = arith.maximumf %495, %496 : vector<8x64xf32>
    %c0_179 = arith.constant 0 : index
    %c0_180 = arith.constant 0 : index
    %498 = vector.load %arg33[%c0_179, %c0_180] : memref<64x32xbf16, #tpu.memory_space<vmem>>, vector<64x32xbf16>
    %c0_181 = arith.constant 0 : index
    %c0_182 = arith.constant 0 : index
    %499 = vector.load %arg34[%c0_181, %c0_182] : memref<1x32xf32, #tpu.memory_space<vmem>>, vector<1x32xf32>
    %500 = arith.truncf %497 : vector<8x64xf32> to vector<8x64xbf16>
    %cst_183 = arith.constant dense<0.000000e+00> : vector<8x32xf32>
    %501 = tpu.matmul %500, %498, %cst_183 {dimension_numbers = #tpu.dot_dimension_numbers<[1], [0], [0], [1], [0, 0, 1, 1], [], []>} : vector<8x64xbf16>, vector<64x32xbf16>, vector<8x32xf32> -> vector<8x32xf32>
    %502 = vector.broadcast %499 : vector<1x32xf32> to vector<8x32xf32>
    %503 = arith.addf %501, %502 : vector<8x32xf32>
    %504 = arith.addf %463, %503 : vector<8x32xf32>
    %c0_184 = arith.constant 0 : index
    %c0_185 = arith.constant 0 : index
    %505 = vector.load %arg35[%c0_184, %c0_185] : memref<1x32xf32, #tpu.memory_space<vmem>>, vector<1x32xf32>
    %c0_186 = arith.constant 0 : index
    %c0_187 = arith.constant 0 : index
    %506 = vector.load %arg36[%c0_186, %c0_187] : memref<1x32xf32, #tpu.memory_space<vmem>>, vector<1x32xf32>
    %cst_188 = arith.constant dense<0.000000e+00> : vector<8xf32>
    %507 = vector.multi_reduction <add>, %504, %cst_188 [1] : vector<8x32xf32> to vector<8xf32>
    %508 = vector.shape_cast %507 : vector<8xf32> to vector<8x1xf32>
    %cst_189 = arith.constant 3.200000e+01 : f32
    %509 = vector.broadcast %cst_189 : f32 to vector<8x1xf32>
    %510 = arith.divf %508, %509 : vector<8x1xf32>
    %511 = vector.broadcast %510 : vector<8x1xf32> to vector<8x32xf32>
    %512 = arith.subf %504, %511 : vector<8x32xf32>
    %513 = vector.broadcast %510 : vector<8x1xf32> to vector<8x32xf32>
    %514 = arith.subf %504, %513 : vector<8x32xf32>
    %515 = arith.mulf %512, %514 : vector<8x32xf32>
    %cst_190 = arith.constant dense<0.000000e+00> : vector<8xf32>
    %516 = vector.multi_reduction <add>, %515, %cst_190 [1] : vector<8x32xf32> to vector<8xf32>
    %517 = vector.shape_cast %516 : vector<8xf32> to vector<8x1xf32>
    %cst_191 = arith.constant 3.200000e+01 : f32
    %518 = vector.broadcast %cst_191 : f32 to vector<8x1xf32>
    %519 = arith.divf %517, %518 : vector<8x1xf32>
    %520 = vector.broadcast %510 : vector<8x1xf32> to vector<8x32xf32>
    %521 = arith.subf %504, %520 : vector<8x32xf32>
    %cst_192 = arith.constant 9.99999997E-7 : f32
    %522 = vector.broadcast %cst_192 : f32 to vector<8x1xf32>
    %523 = arith.addf %519, %522 : vector<8x1xf32>
    %524 = math.rsqrt %523 : vector<8x1xf32>
    %525 = vector.broadcast %524 : vector<8x1xf32> to vector<8x32xf32>
    %526 = arith.mulf %521, %525 : vector<8x32xf32>
    %527 = vector.broadcast %505 : vector<1x32xf32> to vector<8x32xf32>
    %528 = arith.mulf %526, %527 : vector<8x32xf32>
    %529 = vector.broadcast %506 : vector<1x32xf32> to vector<8x32xf32>
    %530 = arith.addf %528, %529 : vector<8x32xf32>
    %c0_193 = arith.constant 0 : index
    %c0_194 = arith.constant 0 : index
    %531 = vector.load %arg37[%c0_193, %c0_194] : memref<32x24xbf16, #tpu.memory_space<vmem>>, vector<32x24xbf16>
    %c0_195 = arith.constant 0 : index
    %c0_196 = arith.constant 0 : index
    %532 = vector.load %arg38[%c0_195, %c0_196] : memref<1x24xf32, #tpu.memory_space<vmem>>, vector<1x24xf32>
    %533 = arith.truncf %530 : vector<8x32xf32> to vector<8x32xbf16>
    %cst_197 = arith.constant dense<0.000000e+00> : vector<8x24xf32>
    %534 = tpu.matmul %533, %531, %cst_197 {dimension_numbers = #tpu.dot_dimension_numbers<[1], [0], [0], [1], [0, 0, 1, 1], [], []>} : vector<8x32xbf16>, vector<32x24xbf16>, vector<8x24xf32> -> vector<8x24xf32>
    %535 = vector.broadcast %532 : vector<1x24xf32> to vector<8x24xf32>
    %536 = arith.addf %534, %535 : vector<8x24xf32>
    %c0_198 = arith.constant 0 : index
    %c0_199 = arith.constant 0 : index
    %c0_200 = arith.constant 0 : index
    %537 = vector.load %arg39[%c0_198, %c0_199, %c0_200] : memref<1x8x24xf32, #tpu.memory_space<vmem>>, vector<1x8x24xf32>
    %538 = vector.shape_cast %537 : vector<1x8x24xf32> to vector<8x24xf32>
    %539 = vector.shape_cast %536 : vector<8x24xf32> to vector<1x8x24xf32>
    tpu.vector_store %arg39[%c0_198, %c0_199, %c0_200], %539 {strides = array<i32>} : memref<1x8x24xf32, #tpu.memory_space<vmem>>, vector<1x8x24xf32>,
    return
  }
  func.func @transform_0(%arg0: i32) -> (i32, i32, i32) {
    %c0_i32 = arith.constant 0 : i32
    %c0_i32_0 = arith.constant 0 : i32
    %c0_i32_1 = arith.constant 0 : i32
    return %arg0, %c0_i32, %c0_i32_0 : i32, i32, i32
  }
  func.func @transform_1(%arg0: i32) -> (i32, i32, i32) {
    %c0_i32 = arith.constant 0 : i32
    %c0_i32_0 = arith.constant 0 : i32
    %c0_i32_1 = arith.constant 0 : i32
    return %arg0, %c0_i32, %c0_i32_0 : i32, i32, i32
  }
  func.func @transform_2(%arg0: i32) -> (i32, i32, i32) {
    %c0_i32 = arith.constant 0 : i32
    %c0_i32_0 = arith.constant 0 : i32
    %c0_i32_1 = arith.constant 0 : i32
    return %arg0, %c0_i32, %c0_i32_0 : i32, i32, i32
  }
  func.func @transform_3(%arg0: i32) -> (i32, i32, i32) {
    %c0_i32 = arith.constant 0 : i32
    %c0_i32_0 = arith.constant 0 : i32
    %c0_i32_1 = arith.constant 0 : i32
    return %arg0, %c0_i32, %c0_i32_0 : i32, i32, i32
  }
  func.func @transform_4(%arg0: i32) -> (i32, i32, i32) {
    %c0_i32 = arith.constant 0 : i32
    %c0_i32_0 = arith.constant 0 : i32
    %c0_i32_1 = arith.constant 0 : i32
    return %arg0, %c0_i32, %c0_i32_0 : i32, i32, i32
  }
  func.func @transform_5(%arg0: i32) -> (i32, i32, i32) {
    %c0_i32 = arith.constant 0 : i32
    %c0_i32_0 = arith.constant 0 : i32
    %c0_i32_1 = arith.constant 0 : i32
    return %arg0, %c0_i32, %c0_i32_0 : i32, i32, i32
  }
  func.func @transform_6(%arg0: i32) -> (i32, i32) {
    %c0_i32 = arith.constant 0 : i32
    %c0_i32_0 = arith.constant 0 : i32
    %c0_i32_1 = arith.constant 0 : i32
    return %c0_i32, %c0_i32_0 : i32, i32
  }
  func.func @transform_7(%arg0: i32) -> (i32, i32) {
    %c0_i32 = arith.constant 0 : i32
    %c0_i32_0 = arith.constant 0 : i32
    %c0_i32_1 = arith.constant 0 : i32
    return %c0_i32, %c0_i32_0 : i32, i32
  }
  func.func @transform_8(%arg0: i32) -> (i32, i32) {
    %c0_i32 = arith.constant 0 : i32
    %c0_i32_0 = arith.constant 0 : i32
    %c0_i32_1 = arith.constant 0 : i32
    return %c0_i32, %c0_i32_0 : i32, i32
  }
  func.func @transform_9(%arg0: i32) -> (i32, i32) {
    %c0_i32 = arith.constant 0 : i32
    %c0_i32_0 = arith.constant 0 : i32
    %c0_i32_1 = arith.constant 0 : i32
    return %c0_i32, %c0_i32_0 : i32, i32
  }
  func.func @transform_10(%arg0: i32) -> (i32, i32, i32) {
    %c0_i32 = arith.constant 0 : i32
    %c0_i32_0 = arith.constant 0 : i32
    %c0_i32_1 = arith.constant 0 : i32
    %c0_i32_2 = arith.constant 0 : i32
    return %c0_i32, %c0_i32_0, %c0_i32_1 : i32, i32, i32
  }
  func.func @transform_11(%arg0: i32) -> (i32, i32) {
    %c0_i32 = arith.constant 0 : i32
    %c0_i32_0 = arith.constant 0 : i32
    %c0_i32_1 = arith.constant 0 : i32
    return %c0_i32, %c0_i32_0 : i32, i32
  }
  func.func @transform_12(%arg0: i32) -> (i32, i32) {
    %c0_i32 = arith.constant 0 : i32
    %c0_i32_0 = arith.constant 0 : i32
    %c0_i32_1 = arith.constant 0 : i32
    return %c0_i32, %c0_i32_0 : i32, i32
  }
  func.func @transform_13(%arg0: i32) -> (i32, i32) {
    %c0_i32 = arith.constant 0 : i32
    %c0_i32_0 = arith.constant 0 : i32
    %c0_i32_1 = arith.constant 0 : i32
    return %c0_i32, %c0_i32_0 : i32, i32
  }
  func.func @transform_14(%arg0: i32) -> (i32, i32) {
    %c0_i32 = arith.constant 0 : i32
    %c0_i32_0 = arith.constant 0 : i32
    %c0_i32_1 = arith.constant 0 : i32
    return %c0_i32, %c0_i32_0 : i32, i32
  }
  func.func @transform_15(%arg0: i32) -> (i32, i32) {
    %c0_i32 = arith.constant 0 : i32
    %c0_i32_0 = arith.constant 0 : i32
    %c0_i32_1 = arith.constant 0 : i32
    return %c0_i32, %c0_i32_0 : i32, i32
  }
  func.func @transform_16(%arg0: i32) -> (i32, i32) {
    %c0_i32 = arith.constant 0 : i32
    %c0_i32_0 = arith.constant 0 : i32
    %c0_i32_1 = arith.constant 0 : i32
    return %c0_i32, %c0_i32_0 : i32, i32
  }
  func.func @transform_17(%arg0: i32) -> (i32, i32) {
    %c0_i32 = arith.constant 0 : i32
    %c0_i32_0 = arith.constant 0 : i32
    %c0_i32_1 = arith.constant 0 : i32
    return %c0_i32, %c0_i32_0 : i32, i32
  }
  func.func @transform_18(%arg0: i32) -> (i32, i32, i32) {
    %c0_i32 = arith.constant 0 : i32
    %c0_i32_0 = arith.constant 0 : i32
    %c0_i32_1 = arith.constant 0 : i32
    %c0_i32_2 = arith.constant 0 : i32
    return %c0_i32, %c0_i32_0, %c0_i32_1 : i32, i32, i32
  }
  func.func @transform_19(%arg0: i32) -> (i32, i32) {
    %c0_i32 = arith.constant 0 : i32
    %c0_i32_0 = arith.constant 0 : i32
    %c0_i32_1 = arith.constant 0 : i32
    return %c0_i32, %c0_i32_0 : i32, i32
  }
  func.func @transform_20(%arg0: i32) -> (i32, i32) {
    %c0_i32 = arith.constant 0 : i32
    %c0_i32_0 = arith.constant 0 : i32
    %c0_i32_1 = arith.constant 0 : i32
    return %c0_i32, %c0_i32_0 : i32, i32
  }
  func.func @transform_21(%arg0: i32) -> (i32, i32) {
    %c0_i32 = arith.constant 0 : i32
    %c0_i32_0 = arith.constant 0 : i32
    %c0_i32_1 = arith.constant 0 : i32
    return %c0_i32, %c0_i32_0 : i32, i32
  }
  func.func @transform_22(%arg0: i32) -> (i32, i32) {
    %c0_i32 = arith.constant 0 : i32
    %c0_i32_0 = arith.constant 0 : i32
    %c0_i32_1 = arith.constant 0 : i32
    return %c0_i32, %c0_i32_0 : i32, i32
  }
  func.func @transform_23(%arg0: i32) -> (i32, i32) {
    %c0_i32 = arith.constant 0 : i32
    %c0_i32_0 = arith.constant 0 : i32
    %c0_i32_1 = arith.constant 0 : i32
    return %c0_i32, %c0_i32_0 : i32, i32
  }
  func.func @transform_24(%arg0: i32) -> (i32, i32) {
    %c0_i32 = arith.constant 0 : i32
    %c0_i32_0 = arith.constant 0 : i32
    %c0_i32_1 = arith.constant 0 : i32
    return %c0_i32, %c0_i32_0 : i32, i32
  }
  func.func @transform_25(%arg0: i32) -> (i32, i32) {
    %c0_i32 = arith.constant 0 : i32
    %c0_i32_0 = arith.constant 0 : i32
    %c0_i32_1 = arith.constant 0 : i32
    return %c0_i32, %c0_i32_0 : i32, i32
  }
  func.func @transform_26(%arg0: i32) -> (i32, i32, i32) {
    %c0_i32 = arith.constant 0 : i32
    %c0_i32_0 = arith.constant 0 : i32
    %c0_i32_1 = arith.constant 0 : i32
    %c0_i32_2 = arith.constant 0 : i32
    return %c0_i32, %c0_i32_0, %c0_i32_1 : i32, i32, i32
  }
  func.func @transform_27(%arg0: i32) -> (i32, i32) {
    %c0_i32 = arith.constant 0 : i32
    %c0_i32_0 = arith.constant 0 : i32
    %c0_i32_1 = arith.constant 0 : i32
    return %c0_i32, %c0_i32_0 : i32, i32
  }
  func.func @transform_28(%arg0: i32) -> (i32, i32) {
    %c0_i32 = arith.constant 0 : i32
    %c0_i32_0 = arith.constant 0 : i32
    %c0_i32_1 = arith.constant 0 : i32
    return %c0_i32, %c0_i32_0 : i32, i32
  }
  func.func @transform_29(%arg0: i32) -> (i32, i32) {
    %c0_i32 = arith.constant 0 : i32
    %c0_i32_0 = arith.constant 0 : i32
    %c0_i32_1 = arith.constant 0 : i32
    return %c0_i32, %c0_i32_0 : i32, i32
  }
  func.func @transform_30(%arg0: i32) -> (i32, i32) {
    %c0_i32 = arith.constant 0 : i32
    %c0_i32_0 = arith.constant 0 : i32
    %c0_i32_1 = arith.constant 0 : i32
    return %c0_i32, %c0_i32_0 : i32, i32
  }
  func.func @transform_31(%arg0: i32) -> (i32, i32) {
    %c0_i32 = arith.constant 0 : i32
    %c0_i32_0 = arith.constant 0 : i32
    %c0_i32_1 = arith.constant 0 : i32
    return %c0_i32, %c0_i32_0 : i32, i32
  }
  func.func @transform_32(%arg0: i32) -> (i32, i32) {
    %c0_i32 = arith.constant 0 : i32
    %c0_i32_0 = arith.constant 0 : i32
    %c0_i32_1 = arith.constant 0 : i32
    return %c0_i32, %c0_i32_0 : i32, i32
  }
  func.func @transform_33(%arg0: i32) -> (i32, i32) {
    %c0_i32 = arith.constant 0 : i32
    %c0_i32_0 = arith.constant 0 : i32
    %c0_i32_1 = arith.constant 0 : i32
    return %c0_i32, %c0_i32_0 : i32, i32
  }
  func.func @transform_34(%arg0: i32) -> (i32, i32) {
    %c0_i32 = arith.constant 0 : i32
    %c0_i32_0 = arith.constant 0 : i32
    %c0_i32_1 = arith.constant 0 : i32
    return %c0_i32, %c0_i32_0 : i32, i32
  }
  func.func @transform_35(%arg0: i32) -> (i32, i32) {
    %c0_i32 = arith.constant 0 : i32
    %c0_i32_0 = arith.constant 0 : i32
    %c0_i32_1 = arith.constant 0 : i32
    return %c0_i32, %c0_i32_0 : i32, i32
  }
  func.func @transform_36(%arg0: i32) -> (i32, i32) {
    %c0_i32 = arith.constant 0 : i32
    %c0_i32_0 = arith.constant 0 : i32
    %c0_i32_1 = arith.constant 0 : i32
    return %c0_i32, %c0_i32_0 : i32, i32
  }
  func.func @transform_37(%arg0: i32) -> (i32, i32) {
    %c0_i32 = arith.constant 0 : i32
    %c0_i32_0 = arith.constant 0 : i32
    %c0_i32_1 = arith.constant 0 : i32
    return %c0_i32, %c0_i32_0 : i32, i32
  }
  func.func @transform_38(%arg0: i32) -> (i32, i32, i32) {
    %c0_i32 = arith.constant 0 : i32
    %c0_i32_0 = arith.constant 0 : i32
    %c0_i32_1 = arith.constant 0 : i32
    return %arg0, %c0_i32, %c0_i32_0 : i32, i32, i32
  }
}

</mosaic_0001>

<bundles_post_ra>
// kernel: forward.3
= control target key start
LH: loop header
LB: loop body
LE: loop exit
PB: predicated region body
PF: predicated region fallthrough
CT: control target
= control target key end

     0   :  { %s2736_s0 = inlined_call_operand.hbm [shape: f32[2,16,48], index: 0, kind: input, shape index: {}]   ;;  %s2737_s1 = inlined_call_operand.vmem [shape: f32[2,1,16], index: 1, kind: input, shape index: {}]   ;;  %s2738_s2 = inlined_call_operand.vmem [shape: bf16[48,32], index: 2, kind: input, shape index: {}]   ;;  %s2739_s3 = inlined_call_operand.vmem [shape: f32[1,32], index: 3, kind: input, shape index: {}, may-alias: {3,5,9,11,15,17}]   ;;  %s2740_s4 = inlined_call_operand.vmem [shape: f32[1,32], index: 4, kind: input, shape index: {}, may-alias: {4,10,16}]   ;;  %s2741_s5 = inlined_call_operand.vmem [shape: f32[1,32], index: 5, kind: input, shape index: {}, may-alias: {3,5,9,11,15,17}]   ;;  %s2742_s6 = inlined_call_operand.hbm [shape: bf16[32,96], index: 6, kind: input, shape index: {}]   ;;  %s2743_s7 = inlined_call_operand.vmem [shape: f32[1,96], index: 7, kind: input, shape index: {}]   ;;  %s2744_s8 = inlined_call_operand.hbm [shape: bf16[4,8,32], index: 8, kind: input, shape index: {}]   ;;  %s2745_s9 = inlined_call_operand.vmem [shape: f32[1,32], index: 9, kind: input, shape index: {}, may-alias: {3,5,9,11,15,17}]   ;;  %s2746_s10 = inlined_call_operand.vmem [shape: f32[1,32], index: 10, kind: input, shape index: {}, may-alias: {4,10,16}]   ;;  %s2747_s11 = inlined_call_operand.vmem [shape: f32[1,32], index: 11, kind: input, shape index: {}, may-alias: {3,5,9,11,15,17}]   ;;  %s2748_s12 = inlined_call_operand.hbm [shape: bf16[32,64], index: 12, kind: input, shape index: {}]   ;;  %s2749_s13 = inlined_call_operand.vmem [shape: f32[1,64], index: 13, kind: input, shape index: {}]   ;;  %s2750_s14 = inlined_call_operand.hbm [shape: bf16[64,32], index: 14, kind: input, shape index: {}]   ;;  %s2751_s15 = inlined_call_operand.vmem [shape: f32[1,32], index: 15, kind: input, shape index: {}, may-alias: {3,5,9,11,15,17}]   ;;  %s2752_s16 = inlined_call_operand.vmem [shape: f32[1,32], index: 16, kind: input, shape index: {}, may-alias: {4,10,16}]   ;;  %s2753_s17 = inlined_call_operand.vmem [shape: f32[1,32], index: 17, kind: input, shape index: {}, may-alias: {3,5,9,11,15,17}]   ;;  %s2754_s18 = inlined_call_operand.hbm [shape: bf16[32,12], index: 18, kind: input, shape index: {}]   ;;  %s2755_s19 = inlined_call_operand.vmem [shape: f32[1,12], index: 19, kind: input, shape index: {}]   ;;  %s2756_s20 = inlined_call_operand.vmem [shape: f32[2,16,32], index: 20, kind: output, shape index: {0}]   ;;  %s2757_s21 = inlined_call_operand.vmem [shape: f32[2,16,12], index: 21, kind: output, shape index: {1}]  }
   0x1   :  { %2760 = sst [smem:[#allocation16_spill]] %s2736_s0 }
   0x2   :  { %2761 = sst [smem:[#allocation17_spill]] %s2737_s1 }
   0x3   :  { %2762 = sst [smem:[#allocation18_spill]] %s2738_s2 }
   0x4   :  { %2763 = sst [smem:[#allocation19_spill]] %s2739_s3 }
   0x5   :  { %2764 = sst [smem:[#allocation20_spill]] %s2740_s4 }
   0x6   :  { %2765 = sst [smem:[#allocation21_spill]] %s2741_s5 }
   0x7   :  { %2766 = sst [smem:[#allocation22_spill]] %s2742_s6 }
   0x8   :  { %2767 = sst [smem:[#allocation23_spill]] %s2744_s8 }
   0x9   :  { %2768 = sst [smem:[#allocation24_spill]] %s2748_s12 }
   0xa   :  { %2769 = sst [smem:[#allocation25_spill]] %s2750_s14 }
   0xb   :  { %2770 = sst [smem:[#allocation26_spill]] %s2753_s17 }
   0xc   :  { %2771 = sst [smem:[#allocation27_spill]] %s2755_s19 }
   0xd   :  { %2772 = sst [smem:[#allocation28_spill]] %s2756_s20 }
   0xe   :  { %2773 = sst [smem:[#allocation29_spill]] %s2757_s21 }
   0xf   :  { %27 = vsyncpa [#allocation3], 0 }
  0x10   :  { %29 = vsyncpa [#allocation3 + $0x1], 0 }
  0x11   :  { %30 = vsyncpa [#allocation5], 0 }
  0x12   :  { %31 = vsyncpa [#allocation8], 0 }
  0x13   :  { %32 = vsyncpa [#allocation11], 0  ;;  %s2414_s2 = smov 0   ;;  %s2416_s25 = smov 0  }
  0x14   :  { %s2418_s26 = smov 0   ;;  %s2420_s27 = smov 0  }
  0x15 LB: > { %s2774_s6 = sld [smem:[#allocation22_spill]]  ;;  %s2438_s0 = sadd.s32 4294967295, %s2280_s27   ;;  %s2280_s27 = sphi %s2420_s27, %s2795_s27   ;;  %s2276_s26 = sphi %s2418_s26, %s2794_s26   ;;  %s2272_s25 = sphi %s2416_s25, %s2793_s25   ;;  %s2268_s2 = sphi %s2414_s2, %s2792_s2  }
  0x16   : > { %p1773_p0 = scmp.ge.s32.totalorder %s2280_s27, 1  ;;  %p59_p1 = scmp.eq.s32.totalorder %s2438_s0, 0 }
  0x17   : > { %p525_p2 = scmp.lt.s32.totalorder %s2280_s27, 3  ;;  %s2282_s30 = smov [#allocation4]  }
  0x18   : > { %s550_s5 = sshll.u32 %s2282_s30, 4  ;;  %s2776_s12 = sld [smem:[#allocation24_spill]]  ;;  %s551_s5 = int_to_ptr.vmem [resolvable:$true] %s550_s5 }
  0x19   : > { %p2443_p3 = pnand %p1773_p0, %p525_p2  ;;  %s2778_s8 = sld [smem:[#allocation23_spill]] }
  0x1a   : > { %s2284_s19 = smov 64   ;;  %s2285_s20 = smov 4  }
  0x1b   : > { %s548_s29 = sshll.u32 %s2774_s6, 4  ;;  %p1903_p4 = pneg %p2443_p3  ;;  %s549_s29 = int_to_ptr.hbm [resolvable:$true] %s548_s29 }
  0x1c   : > { %s2283_s6 = smov [#allocation7]   ;;  %s2779_s14 = sld [smem:[#allocation25_spill]] }
  0x1d   : > { %p2454_p5 = pnand %p1903_p4, %p59_p1  ;;  %s590_s21 = sshll.u32 %s2283_s6, 4  ;;  %s591_s21 = int_to_ptr.vmem [resolvable:$true] %s590_s21 }
  0x1e   : > { %s588_s1 = sshll.u32 %s2776_s12, 4  ;;  %s2286_s17 = smov [#allocation6]   ;;  %s589_s1 = int_to_ptr.hbm [resolvable:$true] %s588_s1 }
  0x1f   : > { %s565_s30 = sshll.u32 %s2778_s8, 4  ;;  %s567_s3 = sshll.u32 %s2286_s17, 4  ;;  %s566_s30 = int_to_ptr.hbm [resolvable:$true] %s565_s30  ;;  %s568_s3 = int_to_ptr.vmem [resolvable:$true] %s567_s3 }
  0x20   : > { %1906 = dma.hbm_to_vmem [thread:$0]  (!%p2454_p5), %s549_s29, 256, %s551_s5, [#allocation5], %s2284_s19, %s2284_s19, %s2285_s20  }
  0x21   : > { %1912 = dma.hbm_to_vmem [thread:$0]  (!%p2454_p5), %s589_s1, 256, %s591_s21, [#allocation8], %s2284_s19, %s2284_s19, %s2285_s20  }
  0x22   : > { %s605_s12 = sshll.u32 %s2779_s14, 4  ;;  %s2287_s6 = smov [#allocation9]   ;;  %s606_s12 = int_to_ptr.hbm [resolvable:$true] %s605_s12 }
  0x23   : > { %1909 = dma.hbm_to_vmem [thread:$0]  (!%p2454_p5), %s566_s30, 256, %s568_s3, [#allocation5], %s2284_s19, %s2284_s19, %s2285_s20  }
  0x24   : > { %s607_s21 = sshll.u32 %s2287_s6, 4  ;;  %s628_s1 = sshll.u32 %s2754_s18, 4  ;;  %s608_s21 = int_to_ptr.vmem [resolvable:$true] %s607_s21  ;;  %s629_s1 = int_to_ptr.hbm [resolvable:$true] %s628_s1 }
  0x25   : > { %1915 = dma.hbm_to_vmem [thread:$0]  (!%p2454_p5), %s606_s12, 512, %s608_s21, [#allocation8], %s2284_s19, %s2284_s19, %s2285_s20  }
  0x26   : > { %s2288_s17 = smov [#allocation10]   ;;  %s2478_s30 = sadd.s32 1, %s2280_s27  }
  0x27   : > { %s630_s28 = sshll.u32 %s2288_s17, 4  ;;  %s42_s22 = ssub.s32 %s2280_s27, %s2478_s30  ;;  %s631_s28 = int_to_ptr.vmem [resolvable:$true] %s630_s28 }
  0x28   : > { %1918 = dma.hbm_to_vmem [thread:$0]  (!%p2454_p5), %s629_s1, 256, %s631_s28, [#allocation11], %s2284_s19, %s2284_s19, %s2285_s20  }
  0x29   : > { %s45_s23 = sadd.s32 1, %s2276_s26  ;;  %p43_p6 = scmp.eq.s32.totalorder %s42_s22, 0 }
  0x2a   : > { %p52_p7 = scmp.ne.s32.totalorder %s2276_s26, %s2272_s25  ;;  %p53_p8 = scmp.eq.s32.totalorder %s2280_s27, 0 }
  0x2b   : > { %p58_p9 = scmp.ne.s32.totalorder %s2272_s25, %s2268_s2  ;;  %p1928_p12 = scmp.lt.s32.totalorder %s2280_s27, 2 }
  0x2c   : > { %s2489_s3 = scalar_select %p43_p6, %s2276_s26, %s45_s23  }
  0x2d   : > { %p54_p10 = por %p53_p8, %p52_p7  ;;  %p2493_p11 = por %p59_p1, %p58_p9 }
  0x2e   : > { %s647_s24 = sand.u32 1, %s2276_s26   ;;  %s1865_s20 = sshll.u32 %s2280_s27, 4 }
  0x2f   : > { %s1780_s19 = sshll.u32 %s647_s24, 4  ;;  %s2781_s29 = sld [smem:[#allocation16_spill]] }
  0x30   : > { %s651_s1 = scalar_lea.vmem [#allocation2], %s1780_s19  ;;  %p2503_p13 = pnand %p1928_p12, %p54_p10 }
  0x31   : > { %s659_s17 = sshll.u32 %s651_s1, 4  ;;  %s648_s22 = scalar_lea.sflag [#allocation3], %s647_s24  ;;  %s660_s17 = int_to_ptr.vmem [resolvable:$true] %s659_s17 }
  0x32   : > { %p2208_p2 = pneg %p2503_p13 }
  0x35   : > { %s656_s5 = scalar_lea.hbm %s2781_s29, %s1865_s20  ;;  %s2211_s20 = scalar_lea.hbm %s2781_s29, 32 }
  0x36   : > { %s657_s28 = sshll.u32 %s656_s5, 4  ;;  %s658_s28 = int_to_ptr.hbm [resolvable:$true] %s657_s28 }
  0x37   : > { %s2204_s23 = sshra.s32 %s658_s28, 4  ;;  %s2205_s23 = int_to_ptr.hbm [resolvable:$true] %s2204_s23 }
  0x38   : > { %s2206_s8 = scalar_lea.hbm %s2205_s23, 16  ;;  %p2212_p6 = scmp.lt.s32.totalorder %s2205_s23, %s2781_s29 }
  0x39   : > { %p2207_p0 = scmp.ne.s32.totalorder %s2205_s23, %s2206_s8  ;;  %p2213_p7 = scmp.lt.s32.totalorder %s2211_s20, %s2206_s8 }
  0x3b   : > { %p2209_p4 = pnand %p2208_p2, %p2207_p0  ;;  %p2214_p8 = por %p2213_p7, %p2212_p6 }
  0x3d   : > { %p2210_p5 = pneg %p2209_p4 }
  0x3f   : > { %p2215_p9 = pnand %p2214_p8, %p2210_p5 }
  0x41   : > { %2218 = shalt.err (!%p2215_p9)
}
  0x42   : > { %s2289_s24 = smov 128   ;;  %s2290_s5 = smov 8  }
  0x43   : > { %1922 = dma.hbm_to_vmem [thread:$0]  (!%p2503_p13), %s658_s28, 256, %s660_s17, %s648_s22, %s2289_s24, %s2289_s24, %s2290_s5  }
  0x44   : > { %677 = sbr.rel (%p2443_p3) target bundleno = 3221 (0xc95), region = 100  ;;  %s679_s1 = sand.u32 (!%p2443_p3), 1, %s2272_s25  }
  0x45   : > { %s1784_s27 = sshll.u32 (!%p2443_p3), %s679_s1, 4  ;;  %s680_s19 = scalar_lea.sflag (!%p2443_p3), [#allocation3], %s679_s1 }
  0x46   : > { %s683_s14 = scalar_lea.vmem (!%p2443_p3), [#allocation2], %s1784_s27 }
  0x49   : > { %2251 = dma.done.wait (%p2493_p11), %s680_s19, 256  }
  0x4a   : > { %2253 = vsyncadd (%p2493_p11), %s680_s19, 4294967040 }
  0x4b   : > { %2255 = dma.done.wait (%p59_p1), [#allocation5], 512  }
  0x4c   : > { %2257 = vsyncadd (%p59_p1), [#allocation5], 4294966784 }
  0x4d   : > { %2259 = dma.done.wait (%p59_p1), [#allocation8], 768  }
  0x4e   : > { %2261 = vsyncadd (%p59_p1), [#allocation8], 4294966528 }
  0x4f   : > { %2263 = dma.done.wait (%p59_p1), [#allocation11], 256  }
  0x50   : > { %2265 = vsyncadd (%p59_p1), [#allocation11], 4294967040  ;;  %s2783_s12 = sld [smem:[#allocation18_spill]]  ;;  %v790_v3 = vld [vmem:[%s683_s14] sm:$0xff]  ;;  %v791_v4 = vld [vmem:[%s683_s14 + $0x8] sm:$0xff]  ;;  %vm824_vm0 = vcmask 392192  }
  0x51   : > { %v802_v5 = vpack.c.bf16 %v791_v4, %v790_v3  ;;  %s2784_s6 = sld [smem:[#allocation19_spill]]  ;;  %vm844_vm1 = vcmask 261120   ;;  %v2291_v13 = vmov 32.0   ;;  %v1872_v30 = vld [vmem:[#allocation4 + $0x8] sm:$0xff]  ;;  %v1871_v32 = vld [vmem:[#allocation4] sm:$0xff]  ;;  %s2292_s4 = smov 96  }
  0x52   : > { %2000 = vrcp.f32 %v2291_v13  ;;  %936 = vmatpush.bf16.msra.mxu1 %v1872_v30  ;;  %s2785_s24 = sld [smem:[#allocation20_spill]]  ;;  %v1991_v62 = vld [vmem:[%s2743_s7] ss:$0 sm:$0xff]  ;;  %vm958_vm9 = vcmask 64512   ;;  %p776_p1 = scmp.lt.s32.totalorder %s2438_s0, 1  ;;  %vm986_vm11 = vcmask 130048  }
  0x53   : > { %s2786_s27 = sld [smem:[#allocation21_spill]]  ;;  %s2294_s23 = smov 80   ;;  %vm1106_vm12 = vcmask 1043456  }
  0x54   : > { %s2797_s0 = smov (!%p776_p1, %s2438_s0), 1  ;;  %s2787_s2 = sld [smem:[#allocation17_spill]] }
  0x55   : > { %s2295_s20 = smov 64   ;;  %s2297_s14 = smov 120  }
  0x56   : > { %v1870_v0 = vld [vmem:[%s2783_s12 + $0x10] sm:$0xff]  ;;  %v1869_v1 = vld [vmem:[%s2783_s12 + $0x8] sm:$0xff]  ;;  %v1868_v2 = vld [vmem:[%s2783_s12] sm:$0xff]  ;;  %937 = vmatpush.bf16.msra.mxu1 %v1871_v32  ;;  %s2298_s21 = smov 112   ;;  %s2300_s5 = smov 104  }
  0x57   : > { %833 = vmatpush.bf16.msra.mxu0 %v1870_v0  ;;  %v1988_v6 = vld [vmem:[%s2784_s6] ss:$0 sm:$0xff]  ;;  %s2296_s6 = smov 88   ;;  %s2301_s1 = smov 56  }
  0x58   : > { %v2001_v14 = vpop.eup %2000  ;;  %v1989_v51 = vld [vmem:[%s2785_s24] ss:$0 sm:$0xff]  ;;  %s2299_s24 = smov 72   ;;  %s2303_s19 = smov 40  }
  0x59   : > { %v852_v15 = vmul.f32 32.0, %v2001_v14  ;;  %vm856_vm2 = vweird.f32 %v2001_v14  ;;  %v1990_v56 = vld [vmem:[%s2786_s27] ss:$0 sm:$0xff]  ;;  %s2302_s27 = smov 48   ;;  %s2789_s17 = sld [smem:[#allocation28_spill]] }
  0x5a   : > { %s778_s22 = scalar_lea.vmem %s2787_s2, %s2797_s0 }
  0x5b   : > { %834 = vmatpush.bf16.msra.mxu0 %v1869_v1  ;;  %v853_v16 = vsub.f32 1.0, %v852_v15 }
  0x5d   : > { %v854_v17 = vmul.f32 %v2001_v14, %v853_v16 }
  0x5f   : > { %835 = vmatpush.bf16.msra.mxu0 %v1868_v2  ;;  %v855_v18 = vadd.f32 %v2001_v14, %v854_v17 }
  0x61   : > { %v2556_v19 = vsel %vm856_vm2, %v2001_v14, %v855_v18 }
  0x62   : > { %1806 = vmatmul.msk.bf16.vlgmr.msra.gmra.mxu0 %vm824_vm0, %v802_v5 }
  0xdf   : > { %v837_v7 = vpop.f32.mrf.mxu0 }
  0xe0   : > { %v2548_v8 = vadd.f32 %v1988_v6, %v837_v7 }
  0xe2   : > { %v845_v9 = vsel %vm844_vm1, %v2548_v8, 0.0 }
  0xe3   : > { %846 = vadd.xlane.f32.xlu0 %v845_v9 }
  0xe7   : > { %v839_v10 = vpop.f32.mrf.mxu0 }
  0xe8   : > { %v2552_v11 = vadd.f32 %v1988_v6, %v839_v10  ;;  %v792_v10 = vld [vmem:[%s778_s22] sm:$0x1] }
  0xe9   : > { %vm793_vm10 = vcmp.gt.f32.partialorder %v792_v10, 0.0 }
  0xea   : > { %v848_v12 = vsel %vm844_vm1, %v2552_v11, 0.0 }
  0xeb   : > { %849 = vadd.xlane.f32.xlu0 %v848_v12  ;;  %v2293_v12 = vmov -1e+09  }
  0xec   : > { %v794_v13 = vsel %vm793_vm10, 0.0, %v2293_v12 }
  0xed   : > { %v2590_v14 = vperm.slane %v794_v13, 0 }
 0x156   : > { %v847_v20 = vpop.xlane.xlu0 %846 }
 0x157   : > { %v858_v21 = vmul.f32 %v2556_v19, %v847_v20 }
 0x159   : > { %v860_v22 = vsub.f32 %v2548_v8, %v858_v21 }
 0x15b   : > { %v862_v23 = vmul.f32 %v860_v22, %v860_v22 }
 0x15d   : > { %v864_v24 = vsel %vm844_vm1, %v862_v23, 0.0 }
 0x15e   : > { %865 = vadd.xlane.f32.xlu1 %v864_v24  ;;  %v850_v25 = vpop.xlane.xlu0 %849 }
 0x15f   : > { %v859_v26 = vmul.f32 %v2556_v19, %v850_v25 }
 0x161   : > { %v861_v27 = vsub.f32 %v2552_v11, %v859_v26 }
 0x163   : > { %v863_v28 = vmul.f32 %v861_v27, %v861_v27 }
 0x165   : > { %v867_v29 = vsel %vm844_vm1, %v863_v28, 0.0 }
 0x166   : > { %868 = vadd.xlane.f32.xlu1 %v867_v29 }
 0x1d1   : > { %v866_v31 = vpop.xlane.xlu1 %865 }
 0x1d2   : > { %v870_v33 = vmul.f32 %v866_v31, %v2556_v19 }
 0x1d4   : > { %v872_v34 = vadd.f32 1e-06, %v870_v33 }
 0x1d6   : > { %2002 = vrsqrt.f32 %v872_v34  ;;  %vm880_vm4 = vweird.f32 %v872_v34 }
 0x1d9   : > { %v869_v35 = vpop.xlane.xlu1 %868 }
 0x1da   : > { %v871_v36 = vmul.f32 %v869_v35, %v2556_v19 }
 0x1dc   : > { %v2003_v37 = vpop.eup %2002  ;;  %v873_v38 = vadd.f32 1e-06, %v871_v36 }
 0x1dd   : > { %v875_v39 = vmul.f32 %v2003_v37, %v872_v34  ;;  %vm881_vm3 = vweird.f32 %v2003_v37  ;;  %v944_v34 = vld [vmem:[#allocation6] sm:$0xf] }
 0x1de   : > { %2004 = vrsqrt.f32 %v873_v38  ;;  %vm882_vm5 = vmor %vm880_vm4, %vm881_vm3  ;;  %vm890_vm7 = vweird.f32 %v873_v38  ;;  %v1128_v35 = vsel %vm1106_vm12, %v944_v34, 0  ;;  %vm1472_vm4 = vcmask 523264  }
 0x1df   : > { %v876_v40 = vmul.f32 %v2003_v37, %v875_v39  ;;  %1137 = vmatpush.bf16.msrb.mxu0 %v1128_v35 }
 0x1e1   : > { %v877_v41 = vmul.f32 0.5, %v876_v40 }
 0x1e3   : > { %v878_v42 = vsub.f32 1.5, %v877_v41 }
 0x1e4   : > { %v2005_v43 = vpop.eup %2004 }
 0x1e5   : > { %v879_v44 = vmul.f32 %v2003_v37, %v878_v42  ;;  %v885_v45 = vmul.f32 %v2005_v43, %v873_v38  ;;  %vm891_vm6 = vweird.f32 %v2005_v43 }
 0x1e6   : > { %vm892_vm8 = vmor %vm890_vm7, %vm891_vm6 }
 0x1e7   : > { %v886_v46 = vmul.f32 %v2005_v43, %v885_v45  ;;  %v883_v47 = vsel %vm882_vm5, %v2003_v37, %v879_v44 }
 0x1e8   : > { %v894_v50 = vmul.f32 %v883_v47, %v860_v22 }
 0x1e9   : > { %v887_v48 = vmul.f32 0.5, %v886_v46 }
 0x1ea   : > { %v899_v55 = vmul.f32 %v1989_v51, %v894_v50 }
 0x1eb   : > { %v888_v49 = vsub.f32 1.5, %v887_v48 }
 0x1ec   : > { %v904_v58 = vadd.f32 %v1990_v56, %v899_v55 }
 0x1ed   : > { %v889_v52 = vmul.f32 %v2005_v43, %v888_v49 }
 0x1ef   : > { %v893_v53 = vsel %vm892_vm8, %v2005_v43, %v889_v52 }
 0x1f0   : > { %v895_v54 = vmul.f32 %v893_v53, %v861_v27 }
 0x1f2   : > { %v900_v57 = vmul.f32 %v1989_v51, %v895_v54 }
 0x1f4   : > { %v905_v59 = vadd.f32 %v1990_v56, %v900_v57 }
 0x1f6   : > { %v911_v60 = vpack.c.bf16 %v905_v59, %v904_v58 }
 0x1f8   : > { %1815 = vmatmul.msk.bf16.vlgmr.msra.gmra.mxu1 %vm844_vm1, %v911_v60 }
 0x275   : > { %v939_v61 = vpop.f32.mrf.mxu1 }
 0x276   : > { %v940_v63 = vadd.f32 %v1991_v62, %v939_v61 }
 0x278   : > { %v949_v1 = vpack.c.bf16 %v940_v63, %v940_v63 }
 0x27a   : > { %v953_v4 = vunpack.c.l.b16 %v949_v1 }
 0x27d   : > { %v941_v0 = vpop.f32.mrf.mxu1 }
 0x27e   : > { %v942_v2 = vadd.f32 %v1991_v62, %v941_v0 }
 0x280   : > { %v950_v3 = vpack.c.bf16 %v942_v2, %v942_v2 }
 0x282   : > { %v954_v5 = vunpack.c.l.b16 %v950_v3 }
 0x284   : > { %v2576_v6 = vpack.c.b16 %v954_v5, %v953_v4 }
 0x286   : > { %956 = vrot.lane.b32.xlu2 %v2576_v6, %s2292_s4 }
 0x2e0   : > { %v957_v7 = vpop.permute.xlu2 %956 }
 0x2e1   : > { %v963_v9 = vsel %vm958_vm9, %v957_v7, 0 }
 0x2e2   : > { %972 = vmatpush.bf16.xpose.msra.mxu2 %v963_v9 }
 0x2e9   : > { %1816 = vmatmul.msk.bf16.vlgmr.msra.gmra.mxu2 %vm958_vm9, %v2576_v6 }
 0x36c   : > { %v974_v15 = vpop.f32.mrf.mxu2 }
 0x36d   : > { %v979_v16 = vmul.f32 0.35355338, %v974_v15 }
 0x36f   : > { %v984_v17 = vadd.f32 %v2590_v14, %v979_v16 }
 0x371   : > { %v987_v18 = vsel %vm986_vm11, %v984_v17, -inf }
 0x372   : > { %988 = vmax.xlane.f32.xlu2 %v987_v18 }
 0x374   : > { %v976_v20 = vpop.f32.mrf.mxu2 }
 0x375   : > { %v980_v21 = vmul.f32 0.35355338, %v976_v20 }
 0x377   : > { %v985_v22 = vadd.f32 %v2590_v14, %v980_v21 }
 0x379   : > { %v990_v23 = vsel %vm986_vm11, %v985_v22, -inf }
 0x37a   : > { %991 = vmax.xlane.f32.xlu0 %v990_v23 }
 0x38a   : > { %1146 = vrot.lane.b32.xlu2 %v2576_v6, %s2294_s23  ;;  %s2790_s23 = sld [smem:[#allocation27_spill]] }
 0x3e5   : > { %v989_v24 = vpop.xlane.xlu2 %988 }
 0x3e6   : > { %v993_v25 = vsub.f32 %v984_v17, %v989_v24 }
 0x3e8   : > { %v995_v26 = vmul.f32 1.442695, %v993_v25 }
 0x3ea   : > { %2006 = vpow2.f32 %v995_v26 }
 0x3ed   : > { %v992_v27 = vpop.xlane.xlu0 %991  ;;  %v1147_v43 = vpop.permute.xlu2 %1146 }
 0x3ee   : > { %v994_v28 = vsub.f32 %v985_v22, %v992_v27  ;;  %v1152_v47 = vsel %vm958_vm9, %v1147_v43, 0 }
 0x3f0   : > { %v2007_v29 = vpop.eup %2006  ;;  %v997_v30 = vmul.f32 1.442695, %v994_v28 }
 0x3f1   : > { %v999_v31 = vsel %vm986_vm11, %v2007_v29, 0.0 }
 0x3f2   : > { %2008 = vpow2.f32 %v997_v30  ;;  %1000 = vadd.xlane.f32.xlu1 %v999_v31 }
 0x3f8   : > { %v2009_v32 = vpop.eup %2008 }
 0x3f9   : > { %v1002_v33 = vsel %vm986_vm11, %v2009_v32, 0.0 }
 0x3fa   : > { %1003 = vadd.xlane.f32.xlu0 %v1002_v33 }
 0x40b   : > { %1010 = vrot.lane.b32.xlu1 %v2576_v6, %s2295_s20 }
 0x40e   : > { %1033 = vrot.lane.b32.xlu0 %v2576_v6, %s2296_s6 }
 0x413   : > { %1031 = vrot.lane.b32.xlu1 %v2576_v6, %s2297_s14  ;;  %s2791_s14 = sld [smem:[#allocation29_spill]] }
 0x416   : > { %1144 = vrot.lane.b32.xlu0 %v2576_v6, %s2298_s21 }
 0x41b   : > { %1240 = vrot.lane.b32.xlu1 %v2576_v6, %s2299_s24 }
 0x41e   : > { %1238 = vrot.lane.b32.xlu0 %v2576_v6, %s2300_s5 }
 0x465   : > { %v1001_v37 = vpop.xlane.xlu1 %1000 }
 0x46d   : > { %v1004_v36 = vpop.xlane.xlu0 %1003 }
 0x46e   : > { %2010 = vrcp.f32 %v1004_v36 }
 0x46f   : > { %2012 = vrcp.f32 %v1001_v37 }
 0x474   : > { %v2011_v38 = vpop.eup %2010 }
 0x475   : > { %v2013_v39 = vpop.eup %2012  ;;  %v1008_v40 = vmul.f32 %v2011_v38, %v2009_v32 }
 0x476   : > { %v1007_v42 = vmul.f32 %v2013_v39, %v2007_v29 }
 0x478   : > { %v1009_v44 = vpack.c.bf16 %v1008_v40, %v1007_v42 }
 0x47d   : > { %v1011_v41 = vpop.permute.xlu1 %1010 }
 0x47e   : > { %1023 = vmatpush.bf16.msra.mxu3 %v1011_v41 }
 0x480   : > { %v1034_v45 = vpop.permute.xlu0 %1033 }
 0x481   : > { %1817 = vmatmul.msk.bf16.vlgmr.msra.gmra.mxu3 %vm986_vm11, %v1009_v44  ;;  %v1039_v46 = vsel %vm958_vm9, %v1034_v45, 0 }
 0x482   : > { %1048 = vmatpush.bf16.xpose.msrb.mxu3 %v1039_v46 }
 0x485   : > { %v1032_v48 = vpop.permute.xlu1 %1031 }
 0x488   : > { %v1145_v51 = vpop.permute.xlu0 %1144 }
 0x48a   : > { %1161 = vmatpush.bf16.xpose.msra.mxu3 %v1152_v47 }
 0x48d   : > { %v1241_v49 = vpop.permute.xlu1 %1240 }
 0x48e   : > { %v1246_v50 = vsel %vm958_vm9, %v1241_v49, 0 }
 0x48f   : > { %1255 = vmatpush.bf16.xpose.msra.mxu0 %v1246_v50 }
 0x490   : > { %v1239_v61 = vpop.permute.xlu0 %1238 }
 0x491   : > { %1818 = vmatmul.msk.bf16.vlgmr.msrb.gmra.mxu3 %vm958_vm9, %v1032_v48 }
 0x4a1   : > { %1822 = vmatmul.msk.bf16.vlgmr.msra.gmra.mxu3 %vm958_vm9, %v1145_v51 }
 0x504   : > { %v1025_v52 = vpop.f32.mrf.mxu3 }
 0x50c   : > { %v1027_v53 = vpop.f32.mrf.mxu3 }
 0x50d   : > { %v1030_v54 = vpack.c.bf16 %v1027_v53, %v1025_v52 }
 0x50f   : > { %1821 = vmatmul.msk.bf16.vlgmr.msrb.gmra.mxu0 %vm958_vm9, %v1030_v54 }
 0x514   : > { %v1050_v55 = vpop.f32.mrf.mxu3 }
 0x515   : > { %v1055_v56 = vmul.f32 0.35355338, %v1050_v55 }
 0x517   : > { %v1057_v57 = vadd.f32 %v1055_v56, %v2590_v14 }
 0x519   : > { %v1059_v58 = vsel %vm986_vm11, %v1057_v57, -inf }
 0x51a   : > { %1060 = vmax.xlane.f32.xlu1 %v1059_v58 }
 0x51c   : > { %v1052_v59 = vpop.f32.mrf.mxu3 }
 0x51d   : > { %v1056_v60 = vmul.f32 0.35355338, %v1052_v59 }
 0x51f   : > { %1825 = vmatmul.msk.bf16.vlgmr.msra.gmra.mxu0 %vm958_vm9, %v1239_v61  ;;  %v1058_v62 = vadd.f32 %v1056_v60, %v2590_v14  ;;  %v945_v60 = vld [vmem:[#allocation6 + $0x4] sm:$0xf] }
 0x520   : > { %v1108_v61 = vsel %vm1106_vm12, %v945_v60, 0 }
 0x521   : > { %v1062_v63 = vsel %vm986_vm11, %v1058_v62, -inf  ;;  %1117 = vmatpush.bf16.msrb.mxu2 %v1108_v61  ;;  %v1873_v61 = vld [vmem:[#allocation7] sm:$0xff] }
 0x522   : > { %1063 = vmax.xlane.f32.xlu0 %v1062_v63 }
 0x524   : > { %v1163_v0 = vpop.f32.mrf.mxu3 }
 0x525   : > { %v1168_v1 = vmul.f32 0.35355338, %v1163_v0 }
 0x527   : > { %v1170_v2 = vadd.f32 %v1168_v1, %v2590_v14 }
 0x529   : > { %v1172_v3 = vsel %vm986_vm11, %v1170_v2, -inf }
 0x52a   : > { %1173 = vmax.xlane.f32.xlu2 %v1172_v3 }
 0x52c   : > { %v1165_v4 = vpop.f32.mrf.mxu3 }
 0x52d   : > { %v1169_v5 = vmul.f32 0.35355338, %v1165_v4 }
 0x52f   : > { %v1171_v7 = vadd.f32 %v1169_v5, %v2590_v14 }
 0x531   : > { %v1175_v9 = vsel %vm986_vm11, %v1171_v7, -inf }
 0x532   : > { %1176 = vmax.xlane.f32.xlu1 %v1175_v9 }
 0x58c   : > { %v2622_v10 = vpop.f32.mrf.mxu0 }
 0x58d   : > { %v1061_v12 = vpop.xlane.xlu1 %1060 }
 0x58e   : > { %v1065_v13 = vsub.f32 %v1057_v57, %v1061_v12 }
 0x590   : > { %v1067_v15 = vmul.f32 1.442695, %v1065_v13 }
 0x592   : > { %2014 = vpow2.f32 %v1067_v15 }
 0x594   : > { %v2624_v16 = vpop.f32.mrf.mxu0 }
 0x595   : > { %v1064_v17 = vpop.xlane.xlu0 %1063 }
 0x596   : > { %v1066_v20 = vsub.f32 %v1058_v62, %v1064_v17 }
 0x598   : > { %v2015_v18 = vpop.eup %2014  ;;  %v1069_v23 = vmul.f32 1.442695, %v1066_v20 }
 0x599   : > { %v1071_v21 = vsel %vm986_vm11, %v2015_v18, 0.0 }
 0x59a   : > { %1072 = vadd.xlane.f32.xlu1 %v1071_v21  ;;  %2016 = vpow2.f32 %v1069_v23  ;;  %v946_v23 = vld [vmem:[#allocation6 + $0x8] sm:$0xf] }
 0x59c   : > { %v1257_v22 = vpop.f32.mrf.mxu0 }
 0x59d   : > { %v1262_v24 = vmul.f32 0.35355338, %v1257_v22  ;;  %v1174_v25 = vpop.xlane.xlu2 %1173 }
 0x59e   : > { %v1178_v26 = vsub.f32 %v1170_v2, %v1174_v25  ;;  %v947_v25 = vld [vmem:[#allocation6 + $0xc] sm:$0xf] }
 0x59f   : > { %v1264_v27 = vadd.f32 %v1262_v24, %v2590_v14  ;;  %v1220_v24 = vsel %vm1106_vm12, %v946_v23, 0  ;;  %v1994_v23 = vld [vmem:[%s2747_s11] ss:$0 sm:$0xff] }
 0x5a0   : > { %v1180_v28 = vmul.f32 1.442695, %v1178_v26  ;;  %v2017_v34 = vpop.eup %2016  ;;  %1229 = vmatpush.bf16.msra.mxu2 %v1220_v24  ;;  %v1314_v26 = vsel %vm1106_vm12, %v947_v25, 0 }
 0x5a1   : > { %v1266_v29 = vsel %vm986_vm11, %v1264_v27, -inf  ;;  %v1074_v40 = vsel %vm986_vm11, %v2017_v34, 0.0 }
 0x5a2   : > { %2018 = vpow2.f32 %v1180_v28  ;;  %1267 = vmax.xlane.f32.xlu0 %v1266_v29 }
 0x5a4   : > { %v1259_v30 = vpop.f32.mrf.mxu0 }
 0x5a5   : > { %v1263_v31 = vmul.f32 0.35355338, %v1259_v30  ;;  %v1177_v32 = vpop.xlane.xlu1 %1176 }
 0x5a6   : > { %v1179_v33 = vsub.f32 %v1171_v7, %v1177_v32 }
 0x5a7   : > { %v1265_v35 = vadd.f32 %v1263_v31, %v2590_v14 }
 0x5a8   : > { %v2019_v36 = vpop.eup %2018  ;;  %v1182_v37 = vmul.f32 1.442695, %v1179_v33 }
 0x5a9   : > { %v1184_v38 = vsel %vm986_vm11, %v2019_v36, 0.0  ;;  %v1269_v39 = vsel %vm986_vm11, %v1265_v35, -inf }
 0x5aa   : > { %2020 = vpow2.f32 %v1182_v37  ;;  %1185 = vadd.xlane.f32.xlu1 %v1184_v38  ;;  %1270 = vmax.xlane.f32.xlu2 %v1269_v39  ;;  %v1992_v38 = vld [vmem:[%s2745_s9] ss:$0 sm:$0xff] }
 0x5ab   : > { %1075 = vadd.xlane.f32.xlu0 %v1074_v40 }
 0x5b0   : > { %v2021_v41 = vpop.eup %2020 }
 0x5b1   : > { %v1187_v42 = vsel %vm986_vm11, %v2021_v41, 0.0 }
 0x5b3   : > { %1188 = vadd.xlane.f32.xlu0 %v1187_v42 }
 0x5c2   : > { %1082 = vrot.lane.b32.xlu2 %v2576_v6, %s2301_s1 }
 0x60d   : > { %v1073_v45 = vpop.xlane.xlu1 %1072 }
 0x615   : > { %v1268_v14 = vpop.xlane.xlu0 %1267 }
 0x616   : > { %v1272_v43 = vsub.f32 %v1264_v27, %v1268_v14 }
 0x618   : > { %v1274_v44 = vmul.f32 1.442695, %v1272_v43 }
 0x61a   : > { %2022 = vpow2.f32 %v1274_v44 }
 0x61b   : > { %2024 = vrcp.f32 %v1073_v45 }
 0x61d   : > { %v1271_v46 = vpop.xlane.xlu2 %1270  ;;  %v1186_v63 = vpop.xlane.xlu1 %1185 }
 0x61e   : > { %v1273_v47 = vsub.f32 %v1265_v35, %v1271_v46  ;;  %v1076_v48 = vpop.xlane.xlu0 %1075 }
 0x61f   : > { %2026 = vrcp.f32 %v1076_v48 }
 0x620   : > { %v2023_v49 = vpop.eup %2022  ;;  %v1276_v50 = vmul.f32 1.442695, %v1273_v47 }
 0x621   : > { %v1278_v51 = vsel %vm986_vm11, %v2023_v49, 0.0  ;;  %v2025_v52 = vpop.eup %2024 }
 0x622   : > { %2028 = vpow2.f32 %v1276_v50  ;;  %1279 = vadd.xlane.f32.xlu1 %v1278_v51  ;;  %v1079_v55 = vmul.f32 %v2025_v52, %v2015_v18 }
 0x625   : > { %v2027_v53 = vpop.eup %2026  ;;  %v1083_v54 = vpop.permute.xlu2 %1082 }
 0x626   : > { %v1080_v56 = vmul.f32 %v2027_v53, %v2017_v34  ;;  %1095 = vmatpush.bf16.msrb.mxu1 %v1083_v54  ;;  %v1189_v62 = vpop.xlane.xlu0 %1188 }
 0x627   : > { %2030 = vrcp.f32 %v1189_v62 }
 0x628   : > { %v2029_v57 = vpop.eup %2028  ;;  %v1081_v58 = vpack.c.bf16 %v1080_v56, %v1079_v55  ;;  %2032 = vrcp.f32 %v1186_v63 }
 0x629   : > { %v1281_v59 = vsel %vm986_vm11, %v2029_v57, 0.0 }
 0x62a   : > { %1819 = vmatmul.msk.bf16.vlgmr.msrb.gmra.mxu1 %vm986_vm11, %v1081_v58  ;;  %1282 = vadd.xlane.f32.xlu0 %v1281_v59 }
 0x62d   : > { %v2031_v3 = vpop.eup %2030 }
 0x62e   : > { %v2033_v4 = vpop.eup %2032  ;;  %v1193_v7 = vmul.f32 %v2031_v3, %v2021_v41 }
 0x62f   : > { %v1192_v12 = vmul.f32 %v2033_v4, %v2019_v36 }
 0x631   : > { %v1194_v15 = vpack.c.bf16 %v1193_v7, %v1192_v12 }
 0x63b   : > { %1195 = vrot.lane.b32.xlu1 %v2576_v6, %s2302_s27  ;;  %s2788_s27 = sld [smem:[#allocation26_spill]] }
 0x63e   : > { %1289 = vrot.lane.b32.xlu0 %v2576_v6, %s2303_s19  ;;  %s1866_s19 = sshll.u32 %s2797_s0, 4 }
 0x63f   : > { %s783_s28 = scalar_lea.vmem %s2789_s17, %s1866_s19  ;;  %s788_s21 = scalar_lea.vmem %s2791_s14, %s1866_s19 }
 0x695   : > { %v1280_v1 = vpop.xlane.xlu1 %1279 }
 0x69d   : > { %v1283_v0 = vpop.xlane.xlu0 %1282 }
 0x69e   : > { %2034 = vrcp.f32 %v1283_v0 }
 0x69f   : > { %2036 = vrcp.f32 %v1280_v1 }
 0x6a4   : > { %v2035_v5 = vpop.eup %2034 }
 0x6a5   : > { %v2037_v9 = vpop.eup %2036  ;;  %v1287_v13 = vmul.f32 %v2035_v5, %v2029_v57  ;;  %v1874_v57 = vld [vmem:[#allocation7 + $0x8] sm:$0xff] }
 0x6a6   : > { %v1286_v18 = vmul.f32 %v2037_v9, %v2023_v49 }
 0x6a7   : > { %v1097_v2 = vpop.f32.mrf.mxu1 }
 0x6a8   : > { %v1288_v22 = vpack.c.bf16 %v1287_v13, %v1286_v18  ;;  %v1993_v18 = vld [vmem:[%s2746_s10] ss:$0 sm:$0xff] }
 0x6ad   : > { %v1196_v6 = vpop.permute.xlu1 %1195 }
 0x6ae   : > { %1208 = vmatpush.bf16.msra.mxu1 %v1196_v6 }
 0x6af   : > { %v1099_v17 = vpop.f32.mrf.mxu1 }
 0x6b0   : > { %v1102_v20 = vpack.c.bf16 %v1099_v17, %v1097_v2  ;;  %v1290_v21 = vpop.permute.xlu0 %1289 }
 0x6b1   : > { %1823 = vmatmul.msk.bf16.vlgmr.msra.gmra.mxu1 %vm986_vm11, %v1194_v15  ;;  %1302 = vmatpush.bf16.msrb.mxu3 %v1290_v21 }
 0x6b2   : > { %1820 = vmatmul.msk.bf16.vlgmr.msrb.gmra.mxu2 %vm958_vm9, %v1102_v20  ;;  %1323 = vmatpush.bf16.msrb.mxu1 %v1314_v26 }
 0x6b3   : > { %1425 = vmatpush.bf16.msrb.mxu2 %v1874_v57 }
 0x6b4   : > { %1826 = vmatmul.msk.bf16.vlgmr.msrb.gmra.mxu3 %vm986_vm11, %v1288_v22  ;;  %vm1588_vm11 = vcmask 97280  }
 0x6b7   : > { %1426 = vmatpush.bf16.msrb.mxu2 %v1873_v61 }
 0x72e   : > { %v1210_v27 = vpop.f32.mrf.mxu1 }
 0x735   : > { %v1119_v33 = vpop.f32.mrf.mxu2 }
 0x736   : > { %v1212_v28 = vpop.f32.mrf.mxu1  ;;  %v1140_v35 = vadd.f32 %v2622_v10, %v1119_v33  ;;  %v1875_v33 = vld [vmem:[#allocation9] sm:$0xff] }
 0x737   : > { %v1215_v29 = vpack.c.bf16 %v1212_v28, %v1210_v27  ;;  %v1304_v30 = vpop.f32.mrf.mxu3 }
 0x739   : > { %1824 = vmatmul.msk.bf16.vlgmr.msra.gmra.mxu2 %vm958_vm9, %v1215_v29 }
 0x73d   : > { %v1121_v34 = vpop.f32.mrf.mxu2 }
 0x73e   : > { %v1142_v42 = vadd.f32 %v2624_v16, %v1121_v34 }
 0x73f   : > { %v1306_v31 = vpop.f32.mrf.mxu3 }
 0x740   : > { %v1309_v32 = vpack.c.bf16 %v1306_v31, %v1304_v30  ;;  %v1878_v30 = vld [vmem:[#allocation9 + $0x18] sm:$0xff]  ;;  %v1877_v31 = vld [vmem:[#allocation9 + $0x10] sm:$0xff] }
 0x741   : > { %1480 = vmatpush.bf16.msrb.mxu0 %v1878_v30 }
 0x742   : > { %1827 = vmatmul.msk.bf16.vlgmr.msrb.gmra.mxu1 %vm958_vm9, %v1309_v32  ;;  %v1876_v32 = vld [vmem:[#allocation9 + $0x8] sm:$0xff] }
 0x745   : > { %1481 = vmatpush.bf16.msrb.mxu0 %v1877_v31 }
 0x749   : > { %1482 = vmatpush.bf16.msrb.mxu0 %v1876_v32 }
 0x74d   : > { %1483 = vmatpush.bf16.msrb.mxu0 %v1875_v33 }
 0x7bc   : > { %v1231_v36 = vpop.f32.mrf.mxu2 }
 0x7bd   : > { %v1236_v37 = vadd.f32 %v1231_v36, %v1140_v35  ;;  %v1995_v35 = vld [vmem:[%s2749_s13] ss:$0 sm:$0xff] }
 0x7bf   : > { %v1325_v39 = vpop.f32.mrf.mxu1 }
 0x7c0   : > { %v1330_v40 = vadd.f32 %v1325_v39, %v1236_v37 }
 0x7c2   : > { %v1335_v41 = vadd.f32 %v1992_v38, %v1330_v40 }
 0x7c4   : > { %v2654_v14 = vadd.f32 %v1335_v41, %v2548_v8  ;;  %v1233_v43 = vpop.f32.mrf.mxu2 }
 0x7c5   : > { %v1237_v44 = vadd.f32 %v1233_v43, %v1142_v42  ;;  %v1996_v42 = vld [vmem:[%s2751_s15] ss:$0 sm:$0xff] }
 0x7c6   : > { %v1341_v45 = vsel %vm844_vm1, %v2654_v14, 0.0 }
 0x7c7   : > { %1342 = vadd.xlane.f32.xlu2 %v1341_v45  ;;  %v1327_v10 = vpop.f32.mrf.mxu1 }
 0x7c8   : > { %v1331_v46 = vadd.f32 %v1327_v10, %v1237_v44 }
 0x7ca   : > { %v1336_v47 = vadd.f32 %v1992_v38, %v1331_v46 }
 0x7cc   : > { %v2659_v48 = vadd.f32 %v1336_v47, %v2552_v11 }
 0x7ce   : > { %v1344_v49 = vsel %vm844_vm1, %v2659_v48, 0.0 }
 0x7cf   : > { %1345 = vadd.xlane.f32.xlu0 %v1344_v49 }
 0x83a   : > { %v1343_v16 = vpop.xlane.xlu2 %1342 }
 0x83b   : > { %v1347_v8 = vmul.f32 %v1343_v16, %v2556_v19 }
 0x83d   : > { %v1349_v50 = vsub.f32 %v2654_v14, %v1347_v8 }
 0x83f   : > { %v1351_v51 = vmul.f32 %v1349_v50, %v1349_v50 }
 0x841   : > { %v1353_v52 = vsel %vm844_vm1, %v1351_v51, 0.0 }
 0x842   : > { %1354 = vadd.xlane.f32.xlu1 %v1353_v52  ;;  %v1346_v53 = vpop.xlane.xlu0 %1345 }
 0x843   : > { %v1348_v54 = vmul.f32 %v1346_v53, %v2556_v19 }
 0x845   : > { %v1350_v55 = vsub.f32 %v2659_v48, %v1348_v54 }
 0x847   : > { %v1352_v11 = vmul.f32 %v1350_v55, %v1350_v55 }
 0x849   : > { %v1356_v56 = vsel %vm844_vm1, %v1352_v11, 0.0 }
 0x84a   : > { %1357 = vadd.xlane.f32.xlu2 %v1356_v56 }
 0x8b5   : > { %v1355_v58 = vpop.xlane.xlu1 %1354 }
 0x8b6   : > { %v1359_v59 = vmul.f32 %v1355_v58, %v2556_v19 }
 0x8b8   : > { %v1361_v60 = vadd.f32 1e-06, %v1359_v59 }
 0x8ba   : > { %2038 = vrsqrt.f32 %v1361_v60  ;;  %vm1369_vm14 = vweird.f32 %v1361_v60 }
 0x8bd   : > { %v1358_v62 = vpop.xlane.xlu2 %1357 }
 0x8be   : > { %v1360_v63 = vmul.f32 %v1358_v62, %v2556_v19 }
 0x8c0   : > { %v2039_v0 = vpop.eup %2038  ;;  %v1362_v1 = vadd.f32 1e-06, %v1360_v63 }
 0x8c1   : > { %v1364_v2 = vmul.f32 %v2039_v0, %v1361_v60  ;;  %vm1370_vm13 = vweird.f32 %v2039_v0  ;;  %v1879_v60 = vld [vmem:[#allocation10] sm:$0xff] }
 0x8c2   : > { %2040 = vrsqrt.f32 %v1362_v1  ;;  %vm1371_vm15 = vmor %vm1369_vm14, %vm1370_vm13  ;;  %vm1379_vm2 = vweird.f32 %v1362_v1 }
 0x8c3   : > { %v1365_v3 = vmul.f32 %v2039_v0, %v1364_v2 }
 0x8c5   : > { %v1366_v4 = vmul.f32 0.5, %v1365_v3 }
 0x8c7   : > { %v1367_v5 = vsub.f32 1.5, %v1366_v4 }
 0x8c8   : > { %v2041_v7 = vpop.eup %2040 }
 0x8c9   : > { %v1368_v9 = vmul.f32 %v2039_v0, %v1367_v5  ;;  %v1374_v12 = vmul.f32 %v2041_v7, %v1362_v1  ;;  %vm1380_vm0 = vweird.f32 %v2041_v7 }
 0x8ca   : > { %vm1381_vm3 = vmor %vm1379_vm2, %vm1380_vm0 }
 0x8cb   : > { %v1375_v6 = vmul.f32 %v2041_v7, %v1374_v12  ;;  %v1372_v13 = vsel %vm1371_vm15, %v2039_v0, %v1368_v9  ;;  %v1997_v12 = vld [vmem:[%s2752_s16] ss:$0 sm:$0xff] }
 0x8cc   : > { %v1383_v20 = vmul.f32 %v1372_v13, %v1349_v50  ;;  %v1998_v13 = vld [vmem:[%s2788_s27] ss:$0 sm:$0xff] }
 0x8cd   : > { %v1376_v15 = vmul.f32 0.5, %v1375_v6 }
 0x8ce   : > { %v1388_v24 = vmul.f32 %v1993_v18, %v1383_v20 }
 0x8cf   : > { %v1377_v17 = vsub.f32 1.5, %v1376_v15 }
 0x8d0   : > { %v1393_v27 = vadd.f32 %v1994_v23, %v1388_v24 }
 0x8d1   : > { %v1378_v21 = vmul.f32 %v2041_v7, %v1377_v17 }
 0x8d3   : > { %v1382_v22 = vsel %vm1381_vm3, %v2041_v7, %v1378_v21 }
 0x8d4   : > { %v1384_v25 = vmul.f32 %v1382_v22, %v1350_v55 }
 0x8d6   : > { %v1389_v26 = vmul.f32 %v1993_v18, %v1384_v25 }
 0x8d8   : > { %v1394_v28 = vadd.f32 %v1994_v23, %v1389_v26 }
 0x8da   : > { %v1400_v29 = vpack.c.bf16 %v1394_v28, %v1393_v27  ;;  %v1999_v28 = vld [vmem:[%s2790_s23] ss:$0 sm:$0xff] }
 0x8dc   : > { %1836 = vmatmul.msk.bf16.vlgmr.msrb.gmra.mxu2 %vm844_vm1, %v1400_v29 }
 0x95f   : > { %v1428_v34 = vpop.f32.mrf.mxu2 }
 0x960   : > { %v1429_v36 = vadd.f32 %v1995_v35, %v1428_v34 }
 0x962   : > { %v1433_v39 = vmax.f32 %v1429_v36, 0.0 }
 0x967   : > { %v1430_v37 = vpop.f32.mrf.mxu2 }
 0x968   : > { %v1431_v38 = vadd.f32 %v1995_v35, %v1430_v37 }
 0x96a   : > { %v1434_v40 = vmax.f32 %v1431_v38, 0.0 }
 0x96c   : > { %v1444_v41 = vpack.c.bf16 %v1434_v40, %v1433_v39 }
 0x96e   : > { %1853 = vmatmul.msk.bf16.vlgmr.msrb.gmra.mxu0 %vm1472_vm4, %v1444_v41 }
 0x9eb   : > { %v1485_v43 = vpop.f32.mrf.mxu0 }
 0x9ec   : > { %v1486_v44 = vadd.f32 %v1996_v42, %v1485_v43 }
 0x9ee   : > { %v1490_v45 = vadd.f32 %v1486_v44, %v2654_v14 }
 0x9f0   : > { %v1494_v10 = vsel %vm844_vm1, %v1490_v45, 0.0 }
 0x9f1   : > { %1495 = vadd.xlane.f32.xlu2 %v1494_v10 }
 0x9f3   : > { %v1487_v46 = vpop.f32.mrf.mxu0 }
 0x9f4   : > { %v1488_v47 = vadd.f32 %v1996_v42, %v1487_v46 }
 0x9f6   : > { %v1491_v49 = vadd.f32 %v1488_v47, %v2659_v48  ;;  %v1880_v48 = vld [vmem:[#allocation10 + $0x8] sm:$0xff] }
 0x9f7   : > { %1580 = vmatpush.bf16.msra.mxu3 %v1880_v48 }
 0x9f8   : > { %v1497_v16 = vsel %vm844_vm1, %v1491_v49, 0.0 }
 0x9f9   : > { %1498 = vadd.xlane.f32.xlu2 %v1497_v16 }
 0x9fb   : > { %1581 = vmatpush.bf16.msra.mxu3 %v1879_v60 }
 0xa64   : > { %v1496_v8 = vpop.xlane.xlu2 %1495 }
 0xa65   : > { %v1500_v50 = vmul.f32 %v1496_v8, %v2556_v19 }
 0xa67   : > { %v1502_v51 = vsub.f32 %v1490_v45, %v1500_v50 }
 0xa69   : > { %v1504_v52 = vmul.f32 %v1502_v51, %v1502_v51 }
 0xa6b   : > { %v1506_v53 = vsel %vm844_vm1, %v1504_v52, 0.0 }
 0xa6c   : > { %1507 = vadd.xlane.f32.xlu0 %v1506_v53  ;;  %v1499_v54 = vpop.xlane.xlu2 %1498 }
 0xa6d   : > { %v1501_v14 = vmul.f32 %v1499_v54, %v2556_v19 }
 0xa6f   : > { %v1503_v55 = vsub.f32 %v1491_v49, %v1501_v14 }
 0xa71   : > { %v1505_v11 = vmul.f32 %v1503_v55, %v1503_v55 }
 0xa73   : > { %v1509_v56 = vsel %vm844_vm1, %v1505_v11, 0.0 }
 0xa74   : > { %1510 = vadd.xlane.f32.xlu1 %v1509_v56 }
 0xadf   : > { %v1508_v57 = vpop.xlane.xlu0 %1507 }
 0xae0   : > { %v1512_v58 = vmul.f32 %v1508_v57, %v2556_v19 }
 0xae2   : > { %v1514_v59 = vadd.f32 1e-06, %v1512_v58 }
 0xae4   : > { %2042 = vrsqrt.f32 %v1514_v59  ;;  %vm1522_vm6 = vweird.f32 %v1514_v59 }
 0xae7   : > { %v1511_v61 = vpop.xlane.xlu1 %1510 }
 0xae8   : > { %v1513_v62 = vmul.f32 %v1511_v61, %v2556_v19 }
 0xaea   : > { %v2043_v63 = vpop.eup %2042  ;;  %v1515_v0 = vadd.f32 1e-06, %v1513_v62 }
 0xaeb   : > { %v1517_v1 = vmul.f32 %v2043_v63, %v1514_v59  ;;  %vm1523_vm5 = vweird.f32 %v2043_v63 }
 0xaec   : > { %2044 = vrsqrt.f32 %v1515_v0  ;;  %vm1524_vm7 = vmor %vm1522_vm6, %vm1523_vm5  ;;  %vm1532_vm9 = vweird.f32 %v1515_v0 }
 0xaed   : > { %v1518_v2 = vmul.f32 %v2043_v63, %v1517_v1 }
 0xaef   : > { %v1519_v3 = vmul.f32 0.5, %v1518_v2 }
 0xaf1   : > { %v1520_v4 = vsub.f32 1.5, %v1519_v3 }
 0xaf2   : > { %v2045_v5 = vpop.eup %2044 }
 0xaf3   : > { %v1521_v7 = vmul.f32 %v2043_v63, %v1520_v4  ;;  %v1527_v9 = vmul.f32 %v2045_v5, %v1515_v0  ;;  %vm1533_vm8 = vweird.f32 %v2045_v5 }
 0xaf4   : > { %vm1534_vm10 = vmor %vm1532_vm9, %vm1533_vm8 }
 0xaf5   : > { %v1525_v19 = vsel %vm1524_vm7, %v2043_v63, %v1521_v7  ;;  %v1528_v6 = vmul.f32 %v2045_v5, %v1527_v9 }
 0xaf6   : > { %v1536_v15 = vmul.f32 %v1525_v19, %v1502_v51 }
 0xaf7   : > { %v1529_v17 = vmul.f32 0.5, %v1528_v6 }
 0xaf8   : > { %v1541_v18 = vmul.f32 %v1997_v12, %v1536_v15 }
 0xaf9   : > { %v1530_v20 = vsub.f32 1.5, %v1529_v17 }
 0xafa   : > { %v1546_v21 = vadd.f32 %v1998_v13, %v1541_v18 }
 0xafb   : > { %v1531_v22 = vmul.f32 %v2045_v5, %v1530_v20 }
 0xafc   : > { %1548 = vst.msk [vmem:[%s783_s28] sm:$0xff] %vm844_vm1, %v1546_v21 }
 0xafd   : > { %v1535_v23 = vsel %vm1534_vm10, %v2045_v5, %v1531_v22 }
 0xafe   : > { %v1537_v24 = vmul.f32 %v1535_v23, %v1503_v55 }
 0xb00   : > { %v1542_v25 = vmul.f32 %v1997_v12, %v1537_v24 }
 0xb02   : > { %v1547_v26 = vadd.f32 %v1998_v13, %v1542_v25 }
 0xb04   : > { %v1555_v27 = vpack.c.bf16 %v1547_v26, %v1546_v21  ;;  %1549 = vst.msk [vmem:[%s783_s28 + $0x8] sm:$0xff] %vm844_vm1, %v1547_v26 }
 0xb06   : > { %1862 = vmatmul.msk.bf16.vlgmr.msra.gmra.mxu3 %vm844_vm1, %v1555_v27 }
 0xb89   : > { %v1583_v29 = vpop.f32.mrf.mxu3 }
 0xb8a   : > { %v1584_v30 = vadd.f32 %v1999_v28, %v1583_v29 }
 0xb8c   : > { %v1589_v31 = vsel %vm1588_vm11, %v1584_v30, -inf }
 0xb8d   : > { %1590 = vmax.xlane.f32.xlu2 %v1589_v31 }
 0xb91   : > { %v1585_v32 = vpop.f32.mrf.mxu3 }
 0xb92   : > { %v1586_v33 = vadd.f32 %v1999_v28, %v1585_v32 }
 0xb94   : > { %v1592_v34 = vsel %vm1588_vm11, %v1586_v33, -inf }
 0xb95   : > { %1593 = vmax.xlane.f32.xlu0 %v1592_v34 }
 0xc00   : > { %v1591_v35 = vpop.xlane.xlu2 %1590 }
 0xc01   : > { %v1595_v36 = vsub.f32 %v1584_v30, %v1591_v35 }
 0xc03   : > { %v1597_v37 = vmul.f32 1.442695, %v1595_v36 }
 0xc05   : > { %2046 = vpow2.f32 %v1597_v37 }
 0xc08   : > { %v1594_v38 = vpop.xlane.xlu0 %1593 }
 0xc09   : > { %v1596_v39 = vsub.f32 %v1586_v33, %v1594_v38 }
 0xc0b   : > { %v2047_v40 = vpop.eup %2046  ;;  %v1599_v41 = vmul.f32 1.442695, %v1596_v39 }
 0xc0c   : > { %v1601_v42 = vsel %vm1588_vm11, %v2047_v40, 0.0 }
 0xc0d   : > { %2048 = vpow2.f32 %v1599_v41  ;;  %1602 = vadd.xlane.f32.xlu1 %v1601_v42 }
 0xc13   : > { %v2049_v43 = vpop.eup %2048 }
 0xc14   : > { %v1604_v44 = vsel %vm1588_vm11, %v2049_v43, 0.0 }
 0xc15   : > { %1605 = vadd.xlane.f32.xlu2 %v1604_v44 }
 0xc80   : > { %v1603_v45 = vpop.xlane.xlu1 %1602 }
 0xc81   : > { %2050 = vlog2.f32 %v1603_v45 }
 0xc87   : > { %v2051_v10 = vpop.eup %2050 }
 0xc88   : > { %v1608_v46 = vmul.f32 0.6931472, %v2051_v10  ;;  %v1606_v47 = vpop.xlane.xlu2 %1605 }
 0xc89   : > { %2052 = vlog2.f32 %v1606_v47 }
 0xc8a   : > { %v1611_v49 = vsub.f32 %v1595_v36, %v1608_v46 }
 0xc8c   : > { %1613 = vst.msk [vmem:[%s788_s21] sm:$0xff] %vm1588_vm11, %v1611_v49 }
 0xc8f   : > { %v2053_v16 = vpop.eup %2052 }
 0xc90   : > { %v1610_v8 = vmul.f32 0.6931472, %v2053_v16 }
 0xc92   : > { %v1612_v50 = vsub.f32 %v1596_v39, %v1610_v8 }
 0xc94   : > { %1614 = vst.msk [vmem:[%s788_s21 + $0x8] sm:$0xff] %vm1588_vm11, %v1612_v50 }
 0xc95 PF: > { %p35_p3 = scmp.ge.s32.totalorder %s2478_s30, 4   ;;  %s2792_s2 = smov %s2272_s25 }
 0xc96   : > { %s2793_s25 = smov %s2276_s26  ;;  %s2794_s26 = smov %s2489_s3 }
 0xc97   : > { %s2795_s27 = smov %s2478_s30  ;;  %37 = sbr.rel (!%p35_p3) target bundleno = 21 (0x15), region = 175 }
 0xc9c   :  { %1652 = vsyncpa [#allocation3], 1 }
 0xc9d   :  { %1654 = vsyncpa [#allocation3 + $0x1], 1 }
 0xc9e   :  { %1655 = vsyncpa [#allocation5], 1 }
 0xc9f   :  { %1656 = vsyncpa [#allocation8], 1 }
 0xca0   :  { %1657 = vsyncpa [#allocation11], 1 }

// kernel: forward.4
= control target key start
LH: loop header
LB: loop body
LE: loop exit
PB: predicated region body
PF: predicated region fallthrough
CT: control target
= control target key end

     0   :  { %s2118_s0 = inlined_call_operand.vmem [shape: f32[2,8,32], index: 0, kind: input, shape index: {}]   ;;  %s2119_s1 = inlined_call_operand.vmem [shape: f32[2,16,32], index: 1, kind: input, shape index: {}]   ;;  %s2120_s2 = inlined_call_operand.vmem [shape: f32[2,1,16], index: 2, kind: input, shape index: {}]   ;;  %s2121_s3 = inlined_call_operand.vmem [shape: f32[1,32], index: 3, kind: input, shape index: {}, may-alias: {3,11,17}]   ;;  %s2122_s4 = inlined_call_operand.vmem [shape: f32[1,32], index: 4, kind: input, shape index: {}, may-alias: {4,6,10,12,16,18}]   ;;  %s2123_s5 = inlined_call_operand.hbm [shape: bf16[32,32], index: 5, kind: input, shape index: {}]   ;;  %s2124_s6 = inlined_call_operand.vmem [shape: f32[1,32], index: 6, kind: input, shape index: {}, may-alias: {4,6,10,12,16,18}]   ;;  %s2125_s7 = inlined_call_operand.hbm [shape: bf16[32,64], index: 7, kind: input, shape index: {}]   ;;  %s2126_s8 = inlined_call_operand.vmem [shape: f32[1,64], index: 8, kind: input, shape index: {}, may-alias: {8,14}]   ;;  %s2127_s9 = inlined_call_operand.hbm [shape: bf16[4,8,32], index: 9, kind: input, shape index: {}]   ;;  %s2128_s10 = inlined_call_operand.vmem [shape: f32[1,32], index: 10, kind: input, shape index: {}, may-alias: {4,6,10,12,16,18}]   ;;  %s2129_s11 = inlined_call_operand.vmem [shape: f32[1,32], index: 11, kind: input, shape index: {}, may-alias: {3,11,17}]   ;;  %s2130_s12 = inlined_call_operand.vmem [shape: f32[1,32], index: 12, kind: input, shape index: {}, may-alias: {4,6,10,12,16,18}]   ;;  %s2131_s13 = inlined_call_operand.hbm [shape: bf16[32,64], index: 13, kind: input, shape index: {}]   ;;  %s2132_s14 = inlined_call_operand.vmem [shape: f32[1,64], index: 14, kind: input, shape index: {}, may-alias: {8,14}]   ;;  %s2133_s15 = inlined_call_operand.hbm [shape: bf16[64,32], index: 15, kind: input, shape index: {}]   ;;  %s2134_s16 = inlined_call_operand.vmem [shape: f32[1,32], index: 16, kind: input, shape index: {}, may-alias: {4,6,10,12,16,18}]   ;;  %s2135_s17 = inlined_call_operand.vmem [shape: f32[1,32], index: 17, kind: input, shape index: {}, may-alias: {3,11,17}]   ;;  %s2136_s18 = inlined_call_operand.vmem [shape: f32[1,32], index: 18, kind: input, shape index: {}, may-alias: {4,6,10,12,16,18}]   ;;  %s2137_s19 = inlined_call_operand.vmem [shape: f32[2,8,32], index: 19, kind: output, shape index: {}]  }
   0x1   :  { %2139 = sst [smem:[#allocation14_spill]] %s2118_s0 }
   0x2   :  { %2140 = sst [smem:[#allocation15_spill]] %s2119_s1 }
   0x3   :  { %2141 = sst [smem:[#allocation16_spill]] %s2120_s2 }
   0x4   :  { %2142 = sst [smem:[#allocation17_spill]] %s2121_s3 }
   0x5   :  { %2143 = sst [smem:[#allocation18_spill]] %s2123_s5 }
   0x6   :  { %2144 = sst [smem:[#allocation19_spill]] %s2125_s7 }
   0x7   :  { %2145 = sst [smem:[#allocation20_spill]] %s2131_s13 }
   0x8   :  { %2146 = sst [smem:[#allocation21_spill]] %s2137_s19 }
   0x9   :  { %24 = vsyncpa [#allocation3], 0 }
   0xa   :  { %25 = vsyncpa [#allocation5], 0 }
   0xb   :  { %26 = vsyncpa [#allocation8], 0  ;;  %s1927_s0 = smov 0  }
   0xc LB: > { %2147 = sst [smem:[#allocation13_spill]] %s1809_s0  ;;  %s1933_s30 = sadd.s32 4294967295, %s1809_s0   ;;  %s1809_s0 = sphi %s1927_s0, %s32_s0  }
   0xd   : > { %p1450_p0 = scmp.ge.s32.totalorder %s1809_s0, 1  ;;  %p477_p1 = scmp.lt.s32.totalorder %s1809_s0, 3 }
   0xe   : > { %p1572_p2 = scmp.eq.s32.totalorder %s1933_s30, 0  ;;  %s2148_s7 = sld [smem:[#allocation19_spill]] }
   0xf   : > { %p1941_p3 = pnand %p1450_p0, %p477_p1  ;;  %s2150_s13 = sld [smem:[#allocation20_spill]] }
  0x10   : > { %s1811_s25 = smov [#allocation4]   ;;  %s1812_s27 = smov [#allocation7]  }
  0x11   : > { %p1556_p4 = pneg %p1941_p3  ;;  %s513_s3 = sshll.u32 %s1811_s25, 4  ;;  %s514_s3 = int_to_ptr.vmem [resolvable:$true] %s513_s3 }
  0x12   : > { %s553_s28 = sshll.u32 %s1812_s27, 4  ;;  %s2152_s5 = sld [smem:[#allocation18_spill]]  ;;  %s554_s28 = int_to_ptr.vmem [resolvable:$true] %s553_s28 }
  0x13   : > { %p1952_p5 = pnand %p1572_p2, %p1556_p4  ;;  %s1813_s2 = smov 64  }
  0x14   : > { %s511_s1 = sshll.u32 %s2148_s7, 4  ;;  %s1814_s23 = smov 4   ;;  %s512_s1 = int_to_ptr.hbm [resolvable:$true] %s511_s1 }
  0x15   : > { %s551_s24 = sshll.u32 %s2150_s13, 4  ;;  %s1815_s25 = smov [#allocation2]   ;;  %s552_s24 = int_to_ptr.hbm [resolvable:$true] %s551_s24 }
  0x16   : > { %1562 = dma.hbm_to_vmem [thread:$0]  (!%p1952_p5), %s512_s1, 256, %s514_s3, [#allocation5], %s1813_s2, %s1813_s2, %s1814_s23  }
  0x17   : > { %1568 = dma.hbm_to_vmem [thread:$0]  (!%p1952_p5), %s552_s24, 256, %s554_s28, [#allocation8], %s1813_s2, %s1813_s2, %s1814_s23  }
  0x18   : > { %s494_s21 = sshll.u32 %s2152_s5, 4  ;;  %s496_s7 = sshll.u32 %s1815_s25, 4  ;;  %s495_s21 = int_to_ptr.hbm [resolvable:$true] %s494_s21  ;;  %s497_s7 = int_to_ptr.vmem [resolvable:$true] %s496_s7 }
  0x19   : > { %s528_s27 = sshll.u32 %s2127_s9, 4  ;;  %s568_s5 = sshll.u32 %s2133_s15, 4  ;;  %s529_s27 = int_to_ptr.hbm [resolvable:$true] %s528_s27  ;;  %s569_s5 = int_to_ptr.hbm [resolvable:$true] %s568_s5 }
  0x1a   : > { %1559 = dma.hbm_to_vmem [thread:$0]  (!%p1952_p5), %s495_s21, 256, %s497_s7, [#allocation3], %s1813_s2, %s1813_s2, %s1814_s23  }
  0x1b   : > { %s1816_s19 = smov [#allocation6]   ;;  %s1817_s24 = smov [#allocation9]  }
  0x1c   : > { %s530_s1 = sshll.u32 %s1816_s19, 4  ;;  %s570_s3 = sshll.u32 %s1817_s24, 4  ;;  %s531_s1 = int_to_ptr.vmem [resolvable:$true] %s530_s1  ;;  %s571_s3 = int_to_ptr.vmem [resolvable:$true] %s570_s3 }
  0x1d   : > { %1565 = dma.hbm_to_vmem [thread:$0]  (!%p1952_p5), %s529_s27, 256, %s531_s1, [#allocation5], %s1813_s2, %s1813_s2, %s1814_s23  }
  0x1e   : > { %1571 = dma.hbm_to_vmem [thread:$0]  (!%p1952_p5), %s569_s5, 512, %s571_s3, [#allocation8], %s1813_s2, %s1813_s2, %s1814_s23  }
  0x1f   : > { %616 = sbr.rel (%p1941_p3) target bundleno = 2472 (0x9a8), region = 96 }
  0x24   : > { %1796 = dma.done.wait (%p1572_p2), [#allocation3], 256  }
  0x25   : > { %1798 = vsyncadd (%p1572_p2), [#allocation3], 4294967040 }
  0x26   : > { %1800 = dma.done.wait (%p1572_p2), [#allocation5], 512  }
  0x27   : > { %1802 = vsyncadd (%p1572_p2), [#allocation5], 4294966784 }
  0x28   : > { %1804 = dma.done.wait (%p1572_p2), [#allocation8], 768  }
  0x29   : > { %1806 = vsyncadd (%p1572_p2), [#allocation8], 4294966528  ;;  %p699_p6 = scmp.lt.s32.totalorder %s1933_s30, 1  ;;  %s2153_s19 = sld [smem:[#allocation14_spill]]  ;;  %vm724_vm0 = vcmask 261120   ;;  %v1818_v2 = vmov 32.0  }
  0x2a   : > { %1617 = vrcp.f32 %v1818_v2  ;;  %s2154_s21 = sld [smem:[#allocation15_spill]]  ;;  %v1529_v3 = vld [vmem:[#allocation4 + $0x8] sm:$0xff]  ;;  %v1528_v4 = vld [vmem:[#allocation4] sm:$0xff]  ;;  %v1527_v19 = vld [vmem:[#allocation2 + $0x8] sm:$0xff]  ;;  %vm850_vm2 = vcmask 64512   ;;  %s1819_s27 = smov 96  }
  0x2b   : > { %s2160_s30 = smov (!%p699_p6, %s1933_s30), 1  ;;  %829 = vmatpush.bf16.msra.mxu1 %v1529_v3  ;;  %792 = vmatpush.bf16.msra.mxu0 %v1527_v19  ;;  %v1526_v20 = vld [vmem:[#allocation2] sm:$0xff]  ;;  %s2155_s1 = sld [smem:[#allocation17_spill]]  ;;  %v1823_v59 = vmov -1e+09   ;;  %vm875_vm7 = vcmask 130048  }
  0x2c   : > { %s1463_s5 = sshll.u32 %s2160_s30, 3  ;;  %s1525_s22 = sshll.u32 %s2160_s30, 4  ;;  %v1608_v21 = vld [vmem:[%s2126_s8] ss:$0 sm:$0xff]  ;;  %vm971_vm8 = vcmask 1043456   ;;  %vm1273_vm12 = vcmask 523264  }
  0x2d   : > { %v1607_v44 = vld [vmem:[%s2122_s4] ss:$0 sm:$0xff]  ;;  %s1820_s7 = smov 120   ;;  %s1821_s13 = smov 112  }
  0x2e   : > { %v1609_v51 = vld [vmem:[%s2124_s6] ss:$0 sm:$0xff]  ;;  %s1824_s23 = smov 88   ;;  %s1825_s25 = smov 80  }
  0x2f   : > { %s702_s0 = scalar_lea.vmem %s2153_s19, %s1463_s5  ;;  %830 = vmatpush.bf16.msra.mxu1 %v1528_v4  ;;  %793 = vmatpush.bf16.msra.mxu0 %v1526_v20 }
  0x30   : > { %v1999_v0 = vld [vmem:[%s702_s0] sm:$0xff]  ;;  %s707_s2 = scalar_lea.vmem %s2154_s21, %s1525_s22  ;;  %v1618_v7 = vpop.eup %1617  ;;  %s1822_s22 = smov 104  }
  0x31   : > { %v725_v1 = vsel %vm724_vm0, %v1999_v0, 0.0  ;;  %v717_v5 = vld [vmem:[%s707_s2] sm:$0xff]  ;;  %v718_v6 = vld [vmem:[%s707_s2 + $0x8] sm:$0xff]  ;;  %v729_v9 = vmul.f32 32.0, %v1618_v7  ;;  %vm733_vm1 = vweird.f32 %v1618_v7  ;;  %s2156_s21 = sld [smem:[#allocation16_spill]] }
  0x32   : > { %726 = vadd.xlane.f32.xlu0 %v725_v1  ;;  %v804_v8 = vpack.c.bf16 %v718_v6, %v717_v5  ;;  %v1606_v41 = vld [vmem:[%s2155_s1] ss:$0 sm:$0xff] }
  0x33   : > { %v730_v10 = vsub.f32 1.0, %v729_v9  ;;  %v837_v9 = vld [vmem:[#allocation6] sm:$0xf] }
  0x34   : > { %1484 = vmatmul.msk.bf16.vlgmr.msra.gmra.mxu1 %vm724_vm0, %v804_v8 }
  0x35   : > { %v731_v11 = vmul.f32 %v1618_v7, %v730_v10  ;;  %v992_v10 = vsel %vm971_vm8, %v837_v9, 0 }
  0x37   : > { %v732_v12 = vadd.f32 %v1618_v7, %v731_v11  ;;  %s710_s2 = scalar_lea.vmem %s2156_s21, %s2160_s30 }
  0x38   : > { %v719_v58 = vld [vmem:[%s710_s2] sm:$0x1] }
  0x39   : > { %v2008_v13 = vsel %vm733_vm1, %v1618_v7, %v732_v12  ;;  %vm720_vm6 = vcmp.gt.f32.partialorder %v719_v58, 0.0 }
  0x3a   : > { %v721_v60 = vsel %vm720_vm6, 0.0, %v1823_v59 }
  0x3b   : > { %v2040_v61 = vperm.slane %v721_v60, 0 }
  0xa5   : > { %v727_v14 = vpop.xlane.xlu0 %726 }
  0xa6   : > { %v735_v15 = vmul.f32 %v2008_v13, %v727_v14 }
  0xa8   : > { %v736_v16 = vsub.f32 %v1999_v0, %v735_v15 }
  0xaa   : > { %v737_v17 = vmul.f32 %v736_v16, %v736_v16 }
  0xac   : > { %v738_v18 = vsel %vm724_vm0, %v737_v17, 0.0 }
  0xad   : > { %739 = vadd.xlane.f32.xlu0 %v738_v18 }
  0xb1   : > { %v832_v22 = vpop.f32.mrf.mxu1 }
  0xb2   : > { %v833_v25 = vadd.f32 %v1608_v21, %v832_v22 }
  0xb4   : > { %v843_v27 = vpack.c.bf16 %v833_v25, %v833_v25 }
  0xb6   : > { %v847_v30 = vunpack.c.l.b16 %v843_v27 }
  0xb9   : > { %v834_v28 = vpop.f32.mrf.mxu1 }
  0xba   : > { %v835_v29 = vadd.f32 %v1608_v21, %v834_v28 }
  0xbc   : > { %v844_v31 = vpack.c.bf16 %v835_v29, %v835_v29 }
  0xbe   : > { %v848_v34 = vunpack.c.l.b16 %v844_v31 }
  0xc0   : > { %v2017_v36 = vpack.c.b16 %v848_v34, %v847_v30 }
  0xc2   : > { %888 = vrot.lane.b32.xlu2 %v2017_v36, %s1819_s27  ;;  %v855_v38 = vsel %vm850_vm2, %v2017_v36, 0  ;;  %s1826_s27 = smov 72  }
  0xc3   : > { %864 = vmatpush.bf16.xpose.msra.mxu2 %v855_v38 }
  0xca   : > { %913 = vrot.lane.b32.xlu2 %v2017_v36, %s1820_s7 }
  0xcb   : > { %1001 = vmatpush.bf16.msrb.mxu2 %v992_v10 }
  0xd2   : > { %1009 = vrot.lane.b32.xlu2 %v2017_v36, %s1821_s13 }
 0x11c   : > { %v889_v48 = vpop.permute.xlu2 %888 }
 0x11d   : > { %901 = vmatpush.bf16.msra.mxu3 %v889_v48 }
 0x120   : > { %v740_v23 = vpop.xlane.xlu0 %739 }
 0x121   : > { %v741_v24 = vmul.f32 %v740_v23, %v2008_v13 }
 0x123   : > { %v742_v26 = vadd.f32 1e-06, %v741_v24 }
 0x124   : > { %v914_v49 = vpop.permute.xlu2 %913 }
 0x125   : > { %1619 = vrsqrt.f32 %v742_v26  ;;  %vm749_vm4 = vweird.f32 %v742_v26  ;;  %v919_v50 = vsel %vm850_vm2, %v914_v49, 0 }
 0x126   : > { %928 = vmatpush.bf16.xpose.msrb.mxu3 %v919_v50 }
 0x12b   : > { %v1620_v32 = vpop.eup %1619 }
 0x12c   : > { %v744_v33 = vmul.f32 %v1620_v32, %v742_v26  ;;  %vm750_vm3 = vweird.f32 %v1620_v32  ;;  %v1010_v15 = vpop.permute.xlu2 %1009 }
 0x12d   : > { %vm751_vm5 = vmor %vm749_vm4, %vm750_vm3  ;;  %v1015_v17 = vsel %vm850_vm2, %v1010_v15, 0 }
 0x12e   : > { %v745_v35 = vmul.f32 %v1620_v32, %v744_v33 }
 0x130   : > { %v746_v37 = vmul.f32 0.5, %v745_v35 }
 0x132   : > { %v747_v39 = vsub.f32 1.5, %v746_v37 }
 0x134   : > { %v748_v40 = vmul.f32 %v1620_v32, %v747_v39 }
 0x136   : > { %v752_v42 = vsel %vm751_vm5, %v1620_v32, %v748_v40 }
 0x137   : > { %v753_v43 = vmul.f32 %v752_v42, %v736_v16 }
 0x139   : > { %v757_v45 = vmul.f32 %v1606_v41, %v753_v43 }
 0x13b   : > { %v761_v46 = vadd.f32 %v1607_v44, %v757_v45 }
 0x13d   : > { %v767_v47 = vpack.c.bf16 %v761_v46, %v761_v46 }
 0x13f   : > { %1475 = vmatmul.msk.bf16.vlgmr.msra.gmra.mxu0 %vm724_vm0, %v767_v47 }
 0x1bc   : > { %v795_v52 = vpop.f32.mrf.mxu0 }
 0x1bd   : > { %v796_v53 = vadd.f32 %v1609_v51, %v795_v52 }
 0x1bf   : > { %v842_v54 = vpack.c.bf16 %v796_v53, %v796_v53 }
 0x1c1   : > { %v909_v55 = vunpack.c.l.b16 %v842_v54  ;;  %1485 = vmatmul.msk.bf16.vlgmr.msra.gmra.mxu2 %vm850_vm2, %v842_v54 }
 0x1c3   : > { %v910_v56 = vpack.c.b16 %v909_v55, %v909_v55 }
 0x1c4   : > { %v797_v57 = vpop.f32.mrf.mxu0 }
 0x1c5   : > { %1084 = vrot.lane.b32.xlu2 %v910_v56, %s1822_s22  ;;  %911 = vrot.lane.b32.xlu0 %v910_v56, %s1820_s7 }
 0x1cd   : > { %1007 = vrot.lane.b32.xlu2 %v910_v56, %s1821_s13 }
 0x21f   : > { %v1085_v21 = vpop.permute.xlu2 %1084 }
 0x227   : > { %v1008_v22 = vpop.permute.xlu2 %1007 }
 0x237   : > { %v912_v20 = vpop.permute.xlu0 %911 }
 0x244   : > { %v866_v62 = vpop.f32.mrf.mxu2 }
 0x245   : > { %v870_v63 = vmul.f32 0.35355338, %v866_v62 }
 0x247   : > { %v874_v1 = vadd.f32 %v2040_v61, %v870_v63 }
 0x249   : > { %v876_v2 = vsel %vm875_vm7, %v874_v1, -inf }
 0x24a   : > { %877 = vmax.xlane.f32.xlu1 %v876_v2 }
 0x24c   : > { %v868_v3 = vpop.f32.mrf.mxu2 }
 0x2bd   : > { %v878_v4 = vpop.xlane.xlu1 %877 }
 0x2be   : > { %v879_v5 = vsub.f32 %v874_v1, %v878_v4 }
 0x2c0   : > { %v880_v6 = vmul.f32 1.442695, %v879_v5 }
 0x2c2   : > { %1621 = vpow2.f32 %v880_v6  ;;  %v838_v6 = vld [vmem:[#allocation6 + $0x4] sm:$0xf] }
 0x2c8   : > { %v1622_v7 = vpop.eup %1621 }
 0x2c9   : > { %v882_v8 = vsel %vm875_vm7, %v1622_v7, 0.0 }
 0x2ca   : > { %883 = vadd.xlane.f32.xlu1 %v882_v8  ;;  %v839_v8 = vld [vmem:[#allocation6 + $0x8] sm:$0xf] }
 0x2cb   : > { %v1068_v9 = vsel %vm971_vm8, %v839_v8, 0 }
 0x2e3   : > { %1086 = vrot.lane.b32.xlu1 %v2017_v36, %s1822_s22 }
 0x33d   : > { %v884_v11 = vpop.xlane.xlu1 %883 }
 0x33e   : > { %1623 = vrcp.f32 %v884_v11 }
 0x344   : > { %v1624_v12 = vpop.eup %1623 }
 0x345   : > { %v886_v14 = vmul.f32 %v1624_v12, %v1622_v7  ;;  %v973_v7 = vsel %vm971_vm8, %v838_v6, 0 }
 0x346   : > { %982 = vmatpush.bf16.msrb.mxu1 %v973_v7 }
 0x347   : > { %v887_v16 = vpack.c.bf16 %v886_v14, %v886_v14 }
 0x349   : > { %1486 = vmatmul.msk.bf16.vlgmr.msra.gmra.mxu3 %vm875_vm7, %v887_v16 }
 0x34a   : > { %1024 = vmatpush.bf16.xpose.msra.mxu3 %v1015_v17  ;;  %1077 = vmatpush.bf16.msra.mxu1 %v1068_v9  ;;  %v1614_v9 = vld [vmem:[%s2134_s16] ss:$0 sm:$0xff] }
 0x355   : > { %v1087_v18 = vpop.permute.xlu1 %1086 }
 0x356   : > { %v1092_v19 = vsel %vm850_vm2, %v1087_v18, 0 }
 0x357   : > { %1101 = vmatpush.bf16.xpose.msra.mxu2 %v1092_v19 }
 0x359   : > { %1487 = vmatmul.msk.bf16.vlgmr.msrb.gmra.mxu3 %vm850_vm2, %v912_v20 }
 0x369   : > { %1491 = vmatmul.msk.bf16.vlgmr.msra.gmra.mxu3 %vm850_vm2, %v1008_v22 }
 0x3cc   : > { %v903_v23 = vpop.f32.mrf.mxu3 }
 0x3cd   : > { %v907_v24 = vpack.c.bf16 %v903_v23, %v903_v23 }
 0x3cf   : > { %1490 = vmatmul.msk.bf16.vlgmr.msrb.gmra.mxu2 %vm850_vm2, %v907_v24 }
 0x3d4   : > { %v905_v25 = vpop.f32.mrf.mxu3 }
 0x3dc   : > { %v930_v26 = vpop.f32.mrf.mxu3 }
 0x3dd   : > { %v934_v27 = vmul.f32 0.35355338, %v930_v26 }
 0x3df   : > { %1494 = vmatmul.msk.bf16.vlgmr.msra.gmra.mxu2 %vm850_vm2, %v1085_v21  ;;  %v935_v28 = vadd.f32 %v934_v27, %v2040_v61  ;;  %v840_v21 = vld [vmem:[#allocation6 + $0xc] sm:$0xf] }
 0x3e0   : > { %v1145_v22 = vsel %vm971_vm8, %v840_v21, 0 }
 0x3e1   : > { %v936_v29 = vsel %vm875_vm7, %v935_v28, -inf }
 0x3e2   : > { %937 = vmax.xlane.f32.xlu0 %v936_v29 }
 0x3e4   : > { %v932_v30 = vpop.f32.mrf.mxu3 }
 0x3ec   : > { %v1026_v31 = vpop.f32.mrf.mxu3 }
 0x3ed   : > { %v1030_v32 = vmul.f32 0.35355338, %v1026_v31 }
 0x3ef   : > { %v1031_v33 = vadd.f32 %v1030_v32, %v2040_v61  ;;  %v1610_v32 = vld [vmem:[%s2128_s10] ss:$0 sm:$0xff] }
 0x3f1   : > { %v1032_v34 = vsel %vm875_vm7, %v1031_v33, -inf }
 0x3f2   : > { %1033 = vmax.xlane.f32.xlu1 %v1032_v34 }
 0x3f4   : > { %v1028_v35 = vpop.f32.mrf.mxu3 }
 0x452   : > { %v2058_v37 = vpop.f32.mrf.mxu2 }
 0x455   : > { %v938_v38 = vpop.xlane.xlu0 %937 }
 0x456   : > { %v939_v39 = vsub.f32 %v935_v28, %v938_v38 }
 0x458   : > { %v940_v40 = vmul.f32 1.442695, %v939_v39 }
 0x45a   : > { %1625 = vpow2.f32 %v940_v40  ;;  %v1005_v41 = vpop.f32.mrf.mxu2 }
 0x460   : > { %v1626_v42 = vpop.eup %1625 }
 0x461   : > { %v942_v43 = vsel %vm875_vm7, %v1626_v42, 0.0 }
 0x462   : > { %943 = vadd.xlane.f32.xlu0 %v942_v43  ;;  %v1103_v44 = vpop.f32.mrf.mxu2 }
 0x463   : > { %v1107_v45 = vmul.f32 0.35355338, %v1103_v44 }
 0x465   : > { %v1034_v46 = vpop.xlane.xlu1 %1033  ;;  %v1108_v47 = vadd.f32 %v1107_v45, %v2040_v61  ;;  %v1531_v45 = vld [vmem:[#allocation7 + $0x8] sm:$0xff] }
 0x466   : > { %v1035_v48 = vsub.f32 %v1031_v33, %v1034_v46  ;;  %v1530_v46 = vld [vmem:[#allocation7] sm:$0xff] }
 0x467   : > { %v1109_v49 = vsel %vm875_vm7, %v1108_v47, -inf }
 0x468   : > { %v1036_v50 = vmul.f32 1.442695, %v1035_v48  ;;  %1110 = vmax.xlane.f32.xlu2 %v1109_v49  ;;  %v1534_v49 = vld [vmem:[#allocation9 + $0x10] sm:$0xff] }
 0x46a   : > { %1627 = vpow2.f32 %v1036_v50  ;;  %v1105_v51 = vpop.f32.mrf.mxu2 }
 0x470   : > { %v1628_v52 = vpop.eup %1627 }
 0x471   : > { %v1038_v53 = vsel %vm875_vm7, %v1628_v52, 0.0 }
 0x472   : > { %1039 = vadd.xlane.f32.xlu0 %v1038_v53 }
 0x480   : > { %948 = vrot.lane.b32.xlu2 %v2017_v36, %s1824_s23 }
 0x486   : > { %1044 = vrot.lane.b32.xlu0 %v2017_v36, %s1825_s25 }
 0x4d5   : > { %v944_v54 = vpop.xlane.xlu0 %943 }
 0x4d6   : > { %1629 = vrcp.f32 %v944_v54 }
 0x4db   : > { %v1111_v55 = vpop.xlane.xlu2 %1110 }
 0x4dc   : > { %v1112_v56 = vsub.f32 %v1108_v47, %v1111_v55  ;;  %v1630_v57 = vpop.eup %1629  ;;  %v1535_v47 = vld [vmem:[#allocation9 + $0x18] sm:$0xff] }
 0x4dd   : > { %v946_v59 = vmul.f32 %v1630_v57, %v1626_v42  ;;  %1281 = vmatpush.bf16.msrb.mxu2 %v1535_v47  ;;  %v1611_v57 = vld [vmem:[%s2129_s11] ss:$0 sm:$0xff] }
 0x4de   : > { %v1113_v58 = vmul.f32 1.442695, %v1112_v56 }
 0x4df   : > { %v947_v61 = vpack.c.bf16 %v946_v59, %v946_v59 }
 0x4e0   : > { %1631 = vpow2.f32 %v1113_v58 }
 0x4e1   : > { %1282 = vmatpush.bf16.msrb.mxu2 %v1534_v49 }
 0x4e3   : > { %v949_v60 = vpop.permute.xlu2 %948 }
 0x4e4   : > { %961 = vmatpush.bf16.msrb.mxu0 %v949_v60  ;;  %v1612_v60 = vld [vmem:[%s2130_s12] ss:$0 sm:$0xff] }
 0x4e5   : > { %v1040_v1 = vpop.xlane.xlu0 %1039 }
 0x4e6   : > { %v1632_v62 = vpop.eup %1631  ;;  %1633 = vrcp.f32 %v1040_v1  ;;  %v1533_v1 = vld [vmem:[#allocation9 + $0x8] sm:$0xff] }
 0x4e7   : > { %1488 = vmatmul.msk.bf16.vlgmr.msrb.gmra.mxu0 %vm875_vm7, %v947_v61  ;;  %v1115_v63 = vsel %vm875_vm7, %v1632_v62, 0.0  ;;  %1283 = vmatpush.bf16.msrb.mxu2 %v1533_v1 }
 0x4e8   : > { %1116 = vadd.xlane.f32.xlu1 %v1115_v63 }
 0x4ec   : > { %v1634_v2 = vpop.eup %1633 }
 0x4ed   : > { %v1042_v3 = vmul.f32 %v1634_v2, %v1628_v52  ;;  %v1532_v2 = vld [vmem:[#allocation9] sm:$0xff] }
 0x4ee   : > { %1284 = vmatpush.bf16.msrb.mxu2 %v1532_v2 }
 0x4ef   : > { %v1043_v5 = vpack.c.bf16 %v1042_v3, %v1042_v3  ;;  %v1613_v3 = vld [vmem:[%s2132_s14] ss:$0 sm:$0xff] }
 0x4f8   : > { %v1045_v4 = vpop.permute.xlu0 %1044 }
 0x4f9   : > { %1057 = vmatpush.bf16.msra.mxu0 %v1045_v4 }
 0x4fc   : > { %1492 = vmatmul.msk.bf16.vlgmr.msra.gmra.mxu0 %vm875_vm7, %v1043_v5 }
 0x4fd   : > { %1154 = vmatpush.bf16.msrb.mxu0 %v1145_v22 }
 0x501   : > { %1121 = vrot.lane.b32.xlu1 %v2017_v36, %s1826_s27  ;;  %s2157_s27 = sld [smem:[#allocation21_spill]] }
 0x507   : > { %s714_s29 = scalar_lea.vmem %s2157_s27, %s1463_s5 }
 0x55b   : > { %v1117_v11 = vpop.xlane.xlu1 %1116 }
 0x55c   : > { %1635 = vrcp.f32 %v1117_v11 }
 0x562   : > { %v1636_v15 = vpop.eup %1635 }
 0x563   : > { %v1119_v16 = vmul.f32 %v1636_v15, %v1632_v62 }
 0x564   : > { %v963_v10 = vpop.f32.mrf.mxu0 }
 0x565   : > { %v967_v12 = vpack.c.bf16 %v963_v10, %v963_v10  ;;  %v1120_v36 = vpack.c.bf16 %v1119_v16, %v1119_v16 }
 0x567   : > { %1489 = vmatmul.msk.bf16.vlgmr.msrb.gmra.mxu1 %vm850_vm2, %v967_v12 }
 0x568   : > { %1228 = vmatpush.bf16.msrb.mxu1 %v1531_v45 }
 0x56c   : > { %v965_v14 = vpop.f32.mrf.mxu0  ;;  %1229 = vmatpush.bf16.msrb.mxu1 %v1530_v46 }
 0x573   : > { %v1122_v17 = vpop.permute.xlu1 %1121 }
 0x574   : > { %1134 = vmatpush.bf16.msrb.mxu3 %v1122_v17 }
 0x577   : > { %1495 = vmatmul.msk.bf16.vlgmr.msrb.gmra.mxu3 %vm875_vm7, %v1120_v36 }
 0x579   : > { %v1059_v18 = vpop.f32.mrf.mxu0 }
 0x57a   : > { %v1063_v19 = vpack.c.bf16 %v1059_v18, %v1059_v18 }
 0x57c   : > { %1493 = vmatmul.msk.bf16.vlgmr.msra.gmra.mxu1 %vm850_vm2, %v1063_v19 }
 0x581   : > { %v1061_v20 = vpop.f32.mrf.mxu0 }
 0x5e4   : > { %v984_v23 = vpop.f32.mrf.mxu1 }
 0x5e5   : > { %v1004_v25 = vadd.f32 %v2058_v37, %v984_v23 }
 0x5ec   : > { %v986_v24 = vpop.f32.mrf.mxu1 }
 0x5f9   : > { %v1079_v26 = vpop.f32.mrf.mxu1 }
 0x5fa   : > { %v1083_v27 = vadd.f32 %v1079_v26, %v1004_v25  ;;  %v1136_v28 = vpop.f32.mrf.mxu3 }
 0x5fb   : > { %v1140_v29 = vpack.c.bf16 %v1136_v28, %v1136_v28 }
 0x5fd   : > { %1496 = vmatmul.msk.bf16.vlgmr.msrb.gmra.mxu0 %vm850_vm2, %v1140_v29  ;;  %v1615_v29 = vld [vmem:[%s2135_s17] ss:$0 sm:$0xff] }
 0x601   : > { %v1081_v30 = vpop.f32.mrf.mxu1 }
 0x602   : > { %v1138_v31 = vpop.f32.mrf.mxu3 }
 0x67a   : > { %v1156_v33 = vpop.f32.mrf.mxu0 }
 0x67b   : > { %v1160_v34 = vadd.f32 %v1156_v33, %v1083_v27 }
 0x67d   : > { %v1164_v35 = vadd.f32 %v1610_v32, %v1160_v34 }
 0x67f   : > { %v1165_v38 = vadd.f32 %v1164_v35, %v1999_v0 }
 0x681   : > { %v1168_v39 = vsel %vm724_vm0, %v1165_v38, 0.0 }
 0x682   : > { %1169 = vadd.xlane.f32.xlu2 %v1168_v39  ;;  %v1158_v37 = vpop.f32.mrf.mxu0 }
 0x6f5   : > { %v1170_v40 = vpop.xlane.xlu2 %1169 }
 0x6f6   : > { %v1171_v41 = vmul.f32 %v1170_v40, %v2008_v13 }
 0x6f8   : > { %v1172_v42 = vsub.f32 %v1165_v38, %v1171_v41 }
 0x6fa   : > { %v1173_v43 = vmul.f32 %v1172_v42, %v1172_v42 }
 0x6fc   : > { %v1174_v44 = vsel %vm724_vm0, %v1173_v43, 0.0 }
 0x6fd   : > { %1175 = vadd.xlane.f32.xlu0 %v1174_v44 }
 0x770   : > { %v1176_v48 = vpop.xlane.xlu0 %1175 }
 0x771   : > { %v1177_v0 = vmul.f32 %v1176_v48, %v2008_v13 }
 0x773   : > { %v1178_v50 = vadd.f32 1e-06, %v1177_v0 }
 0x775   : > { %1637 = vrsqrt.f32 %v1178_v50  ;;  %vm1185_vm10 = vweird.f32 %v1178_v50 }
 0x77b   : > { %v1638_v51 = vpop.eup %1637 }
 0x77c   : > { %v1180_v52 = vmul.f32 %v1638_v51, %v1178_v50  ;;  %vm1186_vm9 = vweird.f32 %v1638_v51 }
 0x77d   : > { %vm1187_vm11 = vmor %vm1185_vm10, %vm1186_vm9 }
 0x77e   : > { %v1181_v53 = vmul.f32 %v1638_v51, %v1180_v52 }
 0x780   : > { %v1182_v54 = vmul.f32 0.5, %v1181_v53 }
 0x782   : > { %v1183_v55 = vsub.f32 1.5, %v1182_v54 }
 0x784   : > { %v1184_v56 = vmul.f32 %v1638_v51, %v1183_v55 }
 0x786   : > { %v1188_v58 = vsel %vm1187_vm11, %v1638_v51, %v1184_v56 }
 0x787   : > { %v1189_v59 = vmul.f32 %v1188_v58, %v1172_v42 }
 0x789   : > { %v1193_v61 = vmul.f32 %v1611_v57, %v1189_v59 }
 0x78b   : > { %v1197_v62 = vadd.f32 %v1612_v60, %v1193_v61 }
 0x78d   : > { %v1203_v63 = vpack.c.bf16 %v1197_v62, %v1197_v62 }
 0x78f   : > { %1505 = vmatmul.msk.bf16.vlgmr.msrb.gmra.mxu1 %vm724_vm0, %v1203_v63 }
 0x80c   : > { %v1231_v4 = vpop.f32.mrf.mxu1 }
 0x80d   : > { %v1232_v5 = vadd.f32 %v1613_v3, %v1231_v4 }
 0x80f   : > { %v1235_v6 = vmax.f32 %v1232_v5, 0.0 }
 0x811   : > { %v1245_v7 = vpack.c.bf16 %v1235_v6, %v1235_v6 }
 0x813   : > { %1522 = vmatmul.msk.bf16.vlgmr.msrb.gmra.mxu2 %vm1273_vm12, %v1245_v7 }
 0x814   : > { %v1233_v8 = vpop.f32.mrf.mxu1 }
 0x896   : > { %v1286_v10 = vpop.f32.mrf.mxu2 }
 0x897   : > { %v1287_v11 = vadd.f32 %v1614_v9, %v1286_v10 }
 0x899   : > { %v1290_v12 = vadd.f32 %v1287_v11, %v1165_v38 }
 0x89b   : > { %v1293_v14 = vsel %vm724_vm0, %v1290_v12, 0.0 }
 0x89c   : > { %1294 = vadd.xlane.f32.xlu1 %v1293_v14 }
 0x89e   : > { %v1288_v15 = vpop.f32.mrf.mxu2 }
 0x90f   : > { %v1295_v16 = vpop.xlane.xlu1 %1294 }
 0x910   : > { %v1296_v17 = vmul.f32 %v1295_v16, %v2008_v13 }
 0x912   : > { %v1297_v36 = vsub.f32 %v1290_v12, %v1296_v17 }
 0x914   : > { %v1298_v18 = vmul.f32 %v1297_v36, %v1297_v36 }
 0x916   : > { %v1299_v19 = vsel %vm724_vm0, %v1298_v18, 0.0 }
 0x917   : > { %1300 = vadd.xlane.f32.xlu2 %v1299_v19 }
 0x98a   : > { %v1301_v20 = vpop.xlane.xlu2 %1300 }
 0x98b   : > { %v1302_v21 = vmul.f32 %v1301_v20, %v2008_v13  ;;  %v1616_v13 = vld [vmem:[%s2136_s18] ss:$0 sm:$0xff] }
 0x98d   : > { %v1303_v22 = vadd.f32 1e-06, %v1302_v21 }
 0x98f   : > { %1639 = vrsqrt.f32 %v1303_v22  ;;  %vm1310_vm14 = vweird.f32 %v1303_v22 }
 0x995   : > { %v1640_v23 = vpop.eup %1639 }
 0x996   : > { %v1305_v24 = vmul.f32 %v1640_v23, %v1303_v22  ;;  %vm1311_vm13 = vweird.f32 %v1640_v23 }
 0x997   : > { %vm1312_vm15 = vmor %vm1310_vm14, %vm1311_vm13 }
 0x998   : > { %v1306_v25 = vmul.f32 %v1640_v23, %v1305_v24 }
 0x99a   : > { %v1307_v26 = vmul.f32 0.5, %v1306_v25 }
 0x99c   : > { %v1308_v27 = vsub.f32 1.5, %v1307_v26 }
 0x99e   : > { %v1309_v28 = vmul.f32 %v1640_v23, %v1308_v27 }
 0x9a0   : > { %v1313_v30 = vsel %vm1312_vm15, %v1640_v23, %v1309_v28 }
 0x9a1   : > { %v1314_v31 = vmul.f32 %v1313_v30, %v1297_v36 }
 0x9a3   : > { %v1318_v32 = vmul.f32 %v1615_v29, %v1314_v31 }
 0x9a5   : > { %v1322_v33 = vadd.f32 %v1616_v13, %v1318_v32 }
 0x9a7   : > { %1323 = vst.msk [vmem:[%s714_s29] sm:$0xff] %vm724_vm0, %v1322_v33 }
 0x9a8 PF: > { %s2158_s20 = sld [smem:[#allocation13_spill]] }
 0x9ae   : > { %s32_s0 = sadd.s32 1, %s2158_s20  }
 0x9af   : > { %p29_p7 = scmp.ge.s32.totalorder %s32_s0, 4  }
 0x9b1   :  { %31 = sbr.rel (!%p29_p7) target bundleno = 12 (0xc), region = 153 }
 0x9b6   :  { %1343 = vsyncpa [#allocation3], 1 }
 0x9b7   :  { %1345 = vsyncpa [#allocation3 + $0x1], 1 }
 0x9b8   :  { %1346 = vsyncpa [#allocation5], 1 }
 0x9b9   :  { %1347 = vsyncpa [#allocation8], 1 }

// kernel: forward.5
= control target key start
LH: loop header
LB: loop body
LE: loop exit
PB: predicated region body
PF: predicated region fallthrough
CT: control target
= control target key end

     0   :  { %s3423_s6 = smov 1   ;;  %s3424_s10 = smov 2   ;;  %s4089_s0 = inlined_call_operand.smem [shape: u32[39], index: -1, kind: input, shape index: {}] }
   0x1   :  { %s3487_s5 = sld [smem:[%s4089_s0]]   ;;  %s3425_s14 = smov 3  }
   0x2   :  { %s3492_s9 = sld [smem:[%s4089_s0 + %s3423_s6]]   ;;  %s3426_s18 = smov 4  }
   0x3   :  { %s3497_s13 = sld [smem:[%s4089_s0 + %s3424_s10]]   ;;  %s3427_s22 = smov 5  }
   0x4   :  { %s3502_s17 = sld [smem:[%s4089_s0 + %s3425_s14]]   ;;  %s3428_s26 = smov 6  }
   0x5   :  { %s3507_s21 = sld [smem:[%s4089_s0 + %s3426_s18]]   ;;  %s3429_s30 = smov 7  }
   0x6   :  { %s3512_s25 = sld [smem:[%s4089_s0 + %s3427_s22]]   ;;  %s3430_s4 = smov 8  }
   0x7   :  { %4110 = sst [smem:[#allocation11_spill]] %s3487_s5  ;;  %s3431_s10 = smov 9  }
   0x8   :  { %s3517_s29 = sld [smem:[%s4089_s0 + %s3428_s26]]   ;;  %s3432_s15 = smov 10  }
   0x9   :  { %s3522_s3 = sld [smem:[%s4089_s0 + %s3429_s30]]   ;;  %s3433_s20 = smov 11  }
   0xa   :  { %4111 = sst [smem:[#allocation12_spill]] %s3502_s17  ;;  %s3434_s26 = smov 12  }
   0xb   :  { %4112 = sst [smem:[#allocation13_spill]] %s3507_s21  ;;  %s3435_s1 = smov 13  }
   0xc   :  { %4113 = sst [smem:[#allocation14_spill]] %s3512_s25  ;;  %s3436_s7 = smov 14  }
   0xd   :  { %s3527_s8 = sld [smem:[%s4089_s0 + %s3430_s4]]   ;;  %s3438_s22 = smov 16  }
   0xe   :  { %s3532_s14 = sld [smem:[%s4089_s0 + %s3431_s10]]   ;;  %s3439_s28 = smov 17  }
   0xf   :  { %4114 = sst [smem:[#allocation15_spill]] %s3522_s3 }
  0x10   :  { %s3537_s19 = sld [smem:[%s4089_s0 + %s3432_s15]]   ;;  %s3437_s15 = smov 15  }
  0x11   :  { %s3542_s24 = sld [smem:[%s4089_s0 + %s3433_s20]]  }
  0x12   :  { %s3547_s30 = sld [smem:[%s4089_s0 + %s3434_s26]]  }
  0x13   :  { %s3552_s6 = sld [smem:[%s4089_s0 + %s3435_s1]]  }
  0x14   :  { %s3557_s12 = sld [smem:[%s4089_s0 + %s3436_s7]]   ;;  %s3440_s7 = smov 18  }
  0x15   :  { %s3562_s20 = sld [smem:[%s4089_s0 + %s3437_s15]]   ;;  %s3441_s15 = smov 19  }
  0x16   :  { %s3567_s27 = sld [smem:[%s4089_s0 + %s3438_s22]]   ;;  %s3442_s22 = smov 20  }
  0x17   :  { %s3572_s4 = sld [smem:[%s4089_s0 + %s3439_s28]]   ;;  %s3443_s28 = smov 21  }
  0x18   :  { %s3577_s25 = sld [smem:[%s4089_s0 + %s3440_s7]]   ;;  %s3444_s7 = smov 22  }
  0x19   :  { %4115 = sst [smem:[#allocation16_spill]] %s3552_s6 }
  0x1a   :  { %s3582_s21 = sld [smem:[%s4089_s0 + %s3441_s15]]   ;;  %s3445_s15 = smov 23  }
  0x1b   :  { %4116 = sst [smem:[#allocation17_spill]] %s3562_s20 }
  0x1c   :  { %s3587_s17 = sld [smem:[%s4089_s0 + %s3442_s22]]   ;;  %s3446_s22 = smov 24  }
  0x1d   :  { %4117 = sst [smem:[#allocation18_spill]] %s3572_s4 }
  0x1e   :  { %4118 = sst [smem:[#allocation19_spill]] %s3577_s25 }
  0x1f   :  { %s3592_s20 = sld [smem:[%s4089_s0 + %s3443_s28]]   ;;  %s3447_s28 = smov 25  }
  0x20   :  { %4119 = sst [smem:[#allocation20_spill]] %s3582_s21 }
  0x21   :  { %s3597_s25 = sld [smem:[%s4089_s0 + %s3444_s7]]   ;;  %s3448_s7 = smov 26  }
  0x22   :  { %4120 = sst [smem:[#allocation21_spill]] %s3587_s17 }
  0x23   :  { %s3602_s21 = sld [smem:[%s4089_s0 + %s3445_s15]]   ;;  %s3449_s15 = smov 27  }
  0x24   :  { %s3607_s17 = sld [smem:[%s4089_s0 + %s3446_s22]]   ;;  %s3450_s22 = smov 28  }
  0x25   :  { %4121 = sst [smem:[#allocation22_spill]] %s3592_s20 }
  0x26   :  { %s3612_s20 = sld [smem:[%s4089_s0 + %s3447_s28]]   ;;  %s3451_s28 = smov 29  }
  0x27   :  { %4122 = sst [smem:[#allocation23_spill]] %s3597_s25 }
  0x28   :  { %s3617_s25 = sld [smem:[%s4089_s0 + %s3448_s7]]   ;;  %s3452_s7 = smov 30  }
  0x29   :  { %4123 = sst [smem:[#allocation24_spill]] %s3602_s21 }
  0x2a   :  { %4124 = sst [smem:[#allocation25_spill]] %s3607_s17 }
  0x2b   :  { %s3622_s21 = sld [smem:[%s4089_s0 + %s3449_s15]]   ;;  %s3453_s15 = smov 31  }
  0x2c   :  { %4125 = sst [smem:[#allocation26_spill]] %s3612_s20 }
  0x2d   :  { %s3627_s17 = sld [smem:[%s4089_s0 + %s3450_s22]]   ;;  %s3454_s22 = smov 32  }
  0x2e   :  { %4126 = sst [smem:[#allocation27_spill]] %s3617_s25 }
  0x2f   :  { %s3632_s20 = sld [smem:[%s4089_s0 + %s3451_s28]]   ;;  %s3455_s28 = smov 33  }
  0x30   :  { %s3637_s25 = sld [smem:[%s4089_s0 + %s3452_s7]]   ;;  %s3456_s7 = smov 34  }
  0x31   :  { %4127 = sst [smem:[#allocation28_spill]] %s3622_s21 }
  0x32   :  { %s3642_s21 = sld [smem:[%s4089_s0 + %s3453_s15]]   ;;  %s3457_s15 = smov 35  }
  0x33   :  { %4128 = sst [smem:[#allocation29_spill]] %s3627_s17 }
  0x34   :  { %s3647_s17 = sld [smem:[%s4089_s0 + %s3454_s22]]   ;;  %s3458_s22 = smov 36  }
  0x35   :  { %4129 = sst [smem:[#allocation30_spill]] %s3632_s20 }
  0x36   :  { %s3652_s20 = sld [smem:[%s4089_s0 + %s3455_s28]]   ;;  %s3459_s28 = smov 37  }
  0x37   :  { %s3657_s4 = sld [smem:[%s4089_s0 + %s3456_s7]]   ;;  %s3460_s7 = smov 38  }
  0x38   :  { %4130 = sst [smem:[#allocation31_spill]] %s3642_s21 }
  0x39   :  { %s3662_s21 = sld [smem:[%s4089_s0 + %s3457_s15]]  }
  0x3a   :  { %4131 = sst [smem:[#allocation32_spill]] %s3647_s17 }
  0x3b   :  { %s3667_s17 = sld [smem:[%s4089_s0 + %s3458_s22]]  }
  0x3c   :  { %4132 = sst [smem:[#allocation33_spill]] %s3652_s20 }
  0x3d   :  { %4133 = sst [smem:[#allocation34_spill]] %s3657_s4 }
  0x3e   :  { %s3672_s20 = sld [smem:[%s4089_s0 + %s3459_s28]]  }
  0x3f   :  { %s3677_s4 = sld [smem:[%s4089_s0 + %s3460_s7]]  }
  0x44   :  { %4134 = sst [smem:[#allocation35_spill]] %s3672_s20 }
  0x45   :  { %4135 = sst [smem:[#allocation36_spill]] %s3677_s4 }
  0x46   :  { %82 = vsyncpa [#allocation3], 0 }
  0x47   :  { %83 = vsyncpa [#allocation6], 0 }
  0x48   :  { %84 = vsyncpa [#allocation4], 0 }
  0x49   :  { %86 = vsyncpa [#allocation4 + $0x1], 0  ;;  %s3679_s15 = smov 0   ;;  %s3681_s16 = smov 0  }
  0x4a   :  { %s3683_s18 = smov 0   ;;  %s3685_s22 = smov 0  }
  0x4b LB: > { %4136 = sst [smem:[#allocation37_spill]] %s3409_s15  ;;  %s3700_s0 = sadd.s32 4294967295, %s3421_s22   ;;  %s3421_s22 = sphi %s3685_s22, %s4185_s22   ;;  %s3417_s18 = sphi %s3683_s18, %s4188_s18   ;;  %s3413_s16 = sphi %s3681_s16, %s4187_s16   ;;  %s3409_s15 = sphi %s3679_s15, %s4186_s15  }
  0x4c   : > { %4137 = sst [smem:[#allocation38_spill]] %s3413_s16  ;;  %s2944_s23 = sadd.s32 4294967294, %s3421_s22  }
  0x4d   : > { %4138 = sst [smem:[#allocation39_spill]] %s3417_s18  ;;  %s3704_s26 = sadd.s32 1, %s3421_s22  }
  0x4e   : > { %4139 = sst [smem:[#allocation40_spill]] %s3421_s22  ;;  %s927_s28 = sadd.s32 1, %s3417_s18 }
  0x4f   : > { %4140 = sst [smem:[#allocation41_spill]] %s3704_s26  ;;  %s924_s1 = ssub.s32 %s3421_s22, %s3704_s26 }
  0x50   : > { %p937_p0 = scmp.ne.s32.totalorder %s3417_s18, %s3413_s16  ;;  %p925_p1 = scmp.eq.s32.totalorder %s924_s1, 0 }
  0x51   : > { %p938_p2 = scmp.eq.s32.totalorder %s3700_s0, 1  ;;  %p943_p3 = scmp.ne.s32.totalorder %s3413_s16, %s3409_s15 }
  0x52   : > { %p944_p4 = scmp.eq.s32.totalorder %s2944_s23, 1  ;;  %p2945_p7 = scmp.ge.s32.totalorder %s3421_s22, 1 }
  0x53   : > { %s3715_s2 = scalar_select %p925_p1, %s3417_s18, %s927_s28  }
  0x54   : > { %p3717_p5 = por %p938_p2, %p937_p0  ;;  %p3721_p6 = por %p944_p4, %p943_p3 }
  0x55   : > { %4141 = sst [smem:[#allocation42_spill]] %s3715_s2  ;;  %p951_p8 = scmp.lt.s32.totalorder %s3421_s22, 3 }
  0x56   : > { %s4142_s7 = scalar_select %p3717_p5, 1, 0 }
  0x57   : > { %s4144_s10 = scalar_select %p3721_p6, 1, 0 }
  0x58   : > { %4143 = sst [smem:[#allocation43_spill]] %s4142_s7  ;;  %p3117_p9 = scmp.eq.s32.totalorder %s3700_s0, 0 }
  0x59   : > { %4145 = sst [smem:[#allocation44_spill]] %s4144_s10  ;;  %p3728_p10 = pnand %p2945_p7, %p951_p8 }
  0x5a   : > { %s1034_s1 = sshll.u32 %s3637_s25, 4  ;;  %s3461_s23 = smov [#allocation2]   ;;  %s1035_s1 = int_to_ptr.hbm [resolvable:$true] %s1034_s1 }
  0x5b   : > { %p3106_p11 = pneg %p3728_p10  ;;  %s1036_s28 = sshll.u32 %s3461_s23, 4  ;;  %s1037_s28 = int_to_ptr.vmem [resolvable:$true] %s1036_s28 }
  0x5c   : > { %s1063_s18 = sshll.u32 %s3667_s17, 4  ;;  %s3291_s26 = sshra.s32 %s1035_s1, 4  ;;  %s3742_s18 = int_to_ptr.hbm [resolvable:$true] %s1063_s18  ;;  %s3292_s26 = int_to_ptr.hbm [resolvable:$true] %s3291_s26 }
  0x5d   : > { %p3737_p12 = pnand %p3117_p9, %p3106_p11  ;;  %s3293_s10 = scalar_lea.hbm %s3292_s26, 16 }
  0x5e   : > { %p3294_p13 = scmp.ne.s32.totalorder %s3292_s26, %s3293_s10  ;;  %s3298_s23 = scalar_lea.hbm %s3637_s25, 16 }
  0x5f   : > { %p3295_p0 = pneg %p3737_p12  ;;  %p3299_p3 = scmp.lt.s32.totalorder %s3292_s26, %s3637_s25 }
  0x60   : > { %p3300_p4 = scmp.lt.s32.totalorder %s3298_s23, %s3293_s10 }
  0x61   : > { %p3296_p1 = pnand %p3295_p0, %p3294_p13 }
  0x62   : > { %p3301_p7 = por %p3300_p4, %p3299_p3 }
  0x63   : > { %p3297_p2 = pneg %p3296_p1 }
  0x65   : > { %p3302_p8 = pnand %p3301_p7, %p3297_p2 }
  0x67   : > { %3305 = shalt.err (!%p3302_p8)
}
  0x68   : > { %s3462_s15 = smov 64   ;;  %s3463_s22 = smov 4  }
  0x69   : > { %3109 = dma.hbm_to_vmem [thread:$0]  (!%p3737_p12), %s1035_s1, 256, %s1037_s28, [#allocation3], %s3462_s15, %s3462_s15, %s3463_s22  }
  0x6a   : > { %s3464_s7 = smov [#allocation5]   ;;  %s3321_s4 = sshra.s32 %s3742_s18, 4  ;;  %s3322_s4 = int_to_ptr.hbm [resolvable:$true] %s3321_s4 }
  0x6b   : > { %s1065_s20 = sshll.u32 %s3464_s7, 4  ;;  %s3323_s16 = scalar_lea.hbm %s3322_s4, 16  ;;  %s1066_s20 = int_to_ptr.vmem [resolvable:$true] %s1065_s20 }
  0x6c   : > { %p3324_p11 = scmp.ne.s32.totalorder %s3322_s4, %s3323_s16  ;;  %s3328_s26 = scalar_lea.hbm %s3667_s17, 16 }
  0x6d   : > { %p3329_p2 = scmp.lt.s32.totalorder %s3322_s4, %s3667_s17  ;;  %p3330_p3 = scmp.lt.s32.totalorder %s3328_s26, %s3323_s16 }
  0x6e   : > { %p3326_p13 = pnand %p3324_p11, %p3295_p0 }
  0x6f   : > { %p3331_p4 = por %p3330_p3, %p3329_p2 }
  0x70   : > { %p3327_p1 = pneg %p3326_p13 }
  0x72   : > { %p3332_p7 = pnand %p3331_p4, %p3327_p1 }
  0x74   : > { %3335 = shalt.err (!%p3332_p7)
}
  0x75   : > { %3112 = dma.hbm_to_vmem [thread:$0]  (!%p3737_p12), %s3742_s18, 256, %s1066_s20, [#allocation6], %s3462_s15, %s3462_s15, %s3463_s22  }
  0x76   : > { %1124 = sbr.rel (%p3728_p10) target bundleno = 6031 (0x178f), region = 172 }
  0x7b   : > { %3396 = dma.done.wait (%p3117_p9), [#allocation3], 256  }
  0x7c   : > { %3398 = vsyncadd (%p3117_p9), [#allocation3], 4294967040 }
  0x7d   : > { %3400 = dma.done.wait (%p3117_p9), [#allocation6], 256  }
  0x7e   : > { %3402 = vsyncadd (%p3117_p9), [#allocation6], 4294967040  ;;  %s4148_s5 = sld [smem:[#allocation11_spill]]  ;;  %p1241_p0 = scmp.lt.s32.totalorder %s3700_s0, 1  ;;  %vm1288_vm0 = vcmask 261120   ;;  %v3465_v2 = vmov 32.0   ;;  %v1268_v46 = vlaneseq }
  0x7f   : > { %3231 = vrcp.f32 %v3465_v2  ;;  %v3079_v14 = vld [vmem:[%s3527_s8 + $0x8] sm:$0xff]  ;;  %v3078_v15 = vld [vmem:[%s3527_s8] sm:$0xff]  ;;  %s4149_s3 = sld [smem:[#allocation15_spill]]  ;;  %s4107_s16 = smov 88   ;;  %vm1374_vm5 = vcmask 64512   ;;  %v3470_v47 = vmov 0  }
  0x80   : > { %s3774_s20 = scalar_select %p1241_p0, %s3700_s0, 1  ;;  %1356 = vmatpush.bf16.msra.mxu0 %v3079_v14  ;;  %v3210_v25 = vld [vmem:[%s3517_s29] ss:$0 sm:$0xff]  ;;  %v1269_v49 = vshrl.u32 %v1268_v46, 7  ;;  %v1271_v50 = vand.u32 127, %v1268_v46  ;;  %vm1413_vm10 = vcmask 1043456  }
  0x81   : > { %v3212_v32 = vld [vmem:[%s3532_s14] ss:$0 sm:$0xff]  ;;  %s3467_s18 = smov 96   ;;  %s4106_s22 = smov 80   ;;  %v3471_v53 = vmov -1e+09  }
  0x82   : > { %s2953_s4 = sshll.u32 %s3774_s20, 3  ;;  %s3469_s2 = smov 112   ;;  %vm1272_vm7 = vcmp.le.s32.totalorder %v1271_v50, %v1269_v49  ;;  %vm1835_vm15 = vcmask 130048  }
  0x83   : > { %s1247_s7 = scalar_lea.vmem %s3492_s9, %s3774_s20  ;;  %s3472_s10 = smov 64  }
  0x84   : > { %s1244_s15 = scalar_lea.vmem %s4148_s5, %s2953_s4  ;;  %1357 = vmatpush.bf16.msra.mxu0 %v3078_v15  ;;  %v1273_v45 = vld [vmem:[%s1247_s7] sm:$0x1]  ;;  %s3473_s11 = smov 120  }
  0x85   : > { %v3780_v0 = vld [vmem:[%s1244_s15] sm:$0xff]  ;;  %v3232_v3 = vpop.eup %3231  ;;  %vm1274_vm6 = vcmp.gt.f32.partialorder %v1273_v45, 0.0  ;;  %s4105_s1 = smov 72   ;;  %s3475_s28 = smov 104  }
  0x86   : > { %v1289_v1 = vsel %vm1288_vm0, %v3780_v0, 0.0  ;;  %v1293_v4 = vmul.f32 32.0, %v3232_v3  ;;  %vm1297_vm1 = vweird.f32 %v3232_v3  ;;  %v3211_v28 = vld [vmem:[%s4149_s3] ss:$0 sm:$0xff]  ;;  %v1275_v48 = vsel %vm1274_vm6, 1, %v3470_v47  ;;  %s3476_s23 = smov 40  }
  0x87   : > { %1290 = vadd.xlane.f32.xlu0 %v1289_v1  ;;  %v1276_v51 = vperm.slane %v1275_v48, 0  ;;  %v1363_v1 = vld [vmem:[%s3537_s19] sm:$0xf]  ;;  %s3477_s26 = smov 56   ;;  %s3478_s15 = smov 48  }
  0x88   : > { %v1294_v5 = vsub.f32 1.0, %v1293_v4  ;;  %v1513_v2 = vsel %vm1413_vm10, %v1363_v1, 0  ;;  %s3077_s7 = sshll.u32 %s3774_s20, 4  ;;  %s4150_s6 = sld [smem:[#allocation16_spill]] }
  0x89   : > { %vm1277_vm8 = vcmp.eq.s32.totalorder %v1276_v51, 1 }
  0x8a   : > { %v1295_v6 = vmul.f32 %v3232_v3, %v1294_v5  ;;  %vm1278_vm9 = vmand %vm1272_vm7, %vm1277_vm8  ;;  %vm2669_vm8 = vcmask 523264  }
  0x8b   : > { %v3813_v54 = vsel %vm1278_vm9, 0.0, %v3471_v53 }
  0x8c   : > { %v1296_v7 = vadd.f32 %v3232_v3, %v1295_v6 }
  0x8e   : > { %v3784_v8 = vsel %vm1297_vm1, %v3232_v3, %v1296_v7 }
  0xfa   : > { %v1291_v9 = vpop.xlane.xlu0 %1290 }
  0xfb   : > { %v1299_v10 = vmul.f32 %v3784_v8, %v1291_v9 }
  0xfd   : > { %v1300_v11 = vsub.f32 %v3780_v0, %v1299_v10 }
  0xff   : > { %v1301_v12 = vmul.f32 %v1300_v11, %v1300_v11 }
 0x101   : > { %v1302_v13 = vsel %vm1288_vm0, %v1301_v12, 0.0 }
 0x102   : > { %1303 = vadd.xlane.f32.xlu0 %v1302_v13 }
 0x175   : > { %v1304_v16 = vpop.xlane.xlu0 %1303 }
 0x176   : > { %v1305_v17 = vmul.f32 %v1304_v16, %v3784_v8 }
 0x178   : > { %v1306_v18 = vadd.f32 1e-06, %v1305_v17 }
 0x17a   : > { %3233 = vrsqrt.f32 %v1306_v18  ;;  %vm1313_vm3 = vweird.f32 %v1306_v18 }
 0x180   : > { %v3234_v19 = vpop.eup %3233 }
 0x181   : > { %v1308_v20 = vmul.f32 %v3234_v19, %v1306_v18  ;;  %vm1314_vm2 = vweird.f32 %v3234_v19 }
 0x182   : > { %vm1315_vm4 = vmor %vm1313_vm3, %vm1314_vm2 }
 0x183   : > { %v1309_v21 = vmul.f32 %v3234_v19, %v1308_v20 }
 0x185   : > { %v1310_v22 = vmul.f32 0.5, %v1309_v21 }
 0x187   : > { %v1311_v23 = vsub.f32 1.5, %v1310_v22 }
 0x189   : > { %v1312_v24 = vmul.f32 %v3234_v19, %v1311_v23 }
 0x18b   : > { %v1316_v26 = vsel %vm1315_vm4, %v3234_v19, %v1312_v24 }
 0x18c   : > { %v1317_v27 = vmul.f32 %v1316_v26, %v1300_v11 }
 0x18e   : > { %v1321_v29 = vmul.f32 %v3210_v25, %v1317_v27 }
 0x190   : > { %v1325_v30 = vadd.f32 %v3211_v28, %v1321_v29 }
 0x192   : > { %v1331_v31 = vpack.c.bf16 %v1325_v30, %v1325_v30 }
 0x194   : > { %2965 = vmatmul.msk.bf16.vlgmr.msra.gmra.mxu0 %vm1288_vm0, %v1331_v31 }
 0x211   : > { %v1359_v33 = vpop.f32.mrf.mxu0 }
 0x212   : > { %v1360_v34 = vadd.f32 %v3212_v32, %v1359_v33 }
 0x214   : > { %v1368_v35 = vpack.c.bf16 %v1360_v34, %v1360_v34 }
 0x216   : > { %v1370_v36 = vunpack.c.l.b16 %v1368_v35 }
 0x218   : > { %v3796_v37 = vpack.c.b16 %v1370_v36, %v1370_v36 }
 0x219   : > { %v1361_v38 = vpop.f32.mrf.mxu0 }
 0x21a   : > { %1433 = vrot.lane.b32.xlu0 %v3796_v37, %s4107_s16  ;;  %1372 = vrot.lane.b32.xlu1 %v3796_v37, %s3467_s18 }
 0x222   : > { %1530 = vrot.lane.b32.xlu0 %v3796_v37, %s4106_s22 }
 0x22a   : > { %1528 = vrot.lane.b32.xlu0 %v3796_v37, %s3469_s2 }
 0x28c   : > { %v1434_v39 = vpop.permute.xlu0 %1433  ;;  %v1373_v40 = vpop.permute.xlu1 %1372 }
 0x28d   : > { %v1379_v41 = vsel %vm1374_vm5, %v1373_v40, 0  ;;  %v1439_v42 = vsel %vm1374_vm5, %v1434_v39, 0 }
 0x28e   : > { %1388 = vmatpush.bf16.xpose.msra.mxu1 %v1379_v41  ;;  %1448 = vmatpush.bf16.xpose.msra.mxu3 %v1439_v42 }
 0x294   : > { %v1531_v43 = vpop.permute.xlu0 %1530 }
 0x295   : > { %2966 = vmatmul.msk.bf16.vlgmr.msra.gmra.mxu1 %vm1374_vm5, %v1368_v35  ;;  %v1536_v44 = vsel %vm1374_vm5, %v1531_v43, 0 }
 0x296   : > { %1545 = vmatpush.bf16.xpose.msrb.mxu3 %v1536_v44  ;;  %1522 = vmatpush.bf16.msrb.mxu1 %v1513_v2  ;;  %v1364_v2 = vld [vmem:[%s3537_s19 + $0x4] sm:$0xf] }
 0x29c   : > { %v1529_v13 = vpop.permute.xlu0 %1528 }
 0x312   : > { %v1390_v52 = vpop.f32.mrf.mxu1 }
 0x313   : > { %v1394_v55 = vmul.f32 0.35355338, %v1390_v52 }
 0x315   : > { %v1395_v56 = vadd.f32 %v1394_v55, %v3813_v54 }
 0x317   : > { %v1396_v57 = vsel %vm1374_vm5, %v1395_v56, -inf }
 0x318   : > { %1397 = vmax.xlane.f32.xlu1 %v1396_v57 }
 0x31a   : > { %v1392_v58 = vpop.f32.mrf.mxu1 }
 0x38b   : > { %v1398_v59 = vpop.xlane.xlu1 %1397 }
 0x38c   : > { %v1399_v60 = vsub.f32 %v1395_v56, %v1398_v59 }
 0x38e   : > { %v1400_v61 = vmul.f32 1.442695, %v1399_v60 }
 0x390   : > { %3235 = vpow2.f32 %v1400_v61 }
 0x396   : > { %v3236_v62 = vpop.eup %3235 }
 0x397   : > { %v1402_v63 = vsel %vm1374_vm5, %v3236_v62, 0.0 }
 0x398   : > { %1403 = vadd.xlane.f32.xlu2 %v1402_v63 }
 0x3b0   : > { %1408 = vrot.lane.b32.xlu2 %v3796_v37, %s3472_s10  ;;  %s1252_s10 = scalar_lea.vmem %s3497_s13, %s3077_s7 }
 0x3b8   : > { %1431 = vrot.lane.b32.xlu2 %v3796_v37, %s3473_s11 }
 0x3c0   : > { %1609 = vrot.lane.b32.xlu2 %v3796_v37, %s4105_s1 }
 0x3c8   : > { %1607 = vrot.lane.b32.xlu2 %v3796_v37, %s3475_s28 }
 0x40b   : > { %v1404_v3 = vpop.xlane.xlu2 %1403 }
 0x40c   : > { %3237 = vrcp.f32 %v1404_v3  ;;  %v1494_v3 = vsel %vm1413_vm10, %v1364_v2, 0 }
 0x40d   : > { %1503 = vmatpush.bf16.msrb.mxu0 %v1494_v3 }
 0x412   : > { %v3238_v4 = vpop.eup %3237 }
 0x413   : > { %v1409_v5 = vpop.permute.xlu2 %1408  ;;  %v1406_v6 = vmul.f32 %v3238_v4, %v3236_v62 }
 0x414   : > { %v1415_v7 = vsel %vm1413_vm10, %v1409_v5, 0  ;;  %v1365_v5 = vld [vmem:[%s3537_s19 + $0x8] sm:$0xf] }
 0x415   : > { %1424 = vmatpush.bf16.msra.mxu2 %v1415_v7  ;;  %v1407_v9 = vpack.c.bf16 %v1406_v6, %v1406_v6  ;;  %v1591_v6 = vsel %vm1413_vm10, %v1365_v5, 0 }
 0x416   : > { %1600 = vmatpush.bf16.msra.mxu0 %v1591_v6 }
 0x418   : > { %2967 = vmatmul.msk.bf16.vlgmr.msra.gmra.mxu2 %vm1374_vm5, %v1407_v9 }
 0x41b   : > { %v1432_v10 = vpop.permute.xlu2 %1431 }
 0x41c   : > { %2968 = vmatmul.msk.bf16.vlgmr.msra.gmra.mxu3 %vm1374_vm5, %v1432_v10 }
 0x423   : > { %v1610_v11 = vpop.permute.xlu2 %1609 }
 0x424   : > { %v1615_v12 = vsel %vm1374_vm5, %v1610_v11, 0 }
 0x425   : > { %1624 = vmatpush.bf16.xpose.msra.mxu1 %v1615_v12 }
 0x42b   : > { %v1608_v22 = vpop.permute.xlu2 %1607 }
 0x42c   : > { %2972 = vmatmul.msk.bf16.vlgmr.msrb.gmra.mxu3 %vm1374_vm5, %v1529_v13 }
 0x49b   : > { %v1426_v14 = vpop.f32.mrf.mxu2 }
 0x49c   : > { %v1430_v15 = vpack.c.bf16 %v1426_v14, %v1426_v14 }
 0x49e   : > { %2971 = vmatmul.msk.bf16.vlgmr.msrb.gmra.mxu1 %vm1374_vm5, %v1430_v15 }
 0x49f   : > { %v1450_v16 = vpop.f32.mrf.mxu3 }
 0x4a0   : > { %v1454_v17 = vmul.f32 0.35355338, %v1450_v16 }
 0x4a2   : > { %v1455_v18 = vadd.f32 %v1454_v17, %v3813_v54  ;;  %v1366_v17 = vld [vmem:[%s3537_s19 + $0xc] sm:$0xf] }
 0x4a3   : > { %v1428_v19 = vpop.f32.mrf.mxu2 }
 0x4a4   : > { %v1456_v20 = vsel %vm1374_vm5, %v1455_v18, -inf }
 0x4a5   : > { %1457 = vmax.xlane.f32.xlu1 %v1456_v20 }
 0x4a7   : > { %v1452_v21 = vpop.f32.mrf.mxu3 }
 0x4ae   : > { %2975 = vmatmul.msk.bf16.vlgmr.msra.gmra.mxu1 %vm1374_vm5, %v1608_v22 }
 0x4af   : > { %v1547_v23 = vpop.f32.mrf.mxu3 }
 0x4b0   : > { %v1551_v24 = vmul.f32 0.35355338, %v1547_v23 }
 0x4b2   : > { %v1552_v25 = vadd.f32 %v1551_v24, %v3813_v54 }
 0x4b4   : > { %v1553_v26 = vsel %vm1374_vm5, %v1552_v25, -inf }
 0x4b5   : > { %1554 = vmax.xlane.f32.xlu2 %v1553_v26 }
 0x4b7   : > { %v1549_v27 = vpop.f32.mrf.mxu3 }
 0x4cd   : > { %1644 = vrot.lane.b32.xlu2 %v3796_v37, %s3476_s23  ;;  %s4151_s23 = sld [smem:[#allocation18_spill]] }
 0x518   : > { %v1458_v28 = vpop.xlane.xlu1 %1457 }
 0x519   : > { %v1459_v29 = vsub.f32 %v1455_v18, %v1458_v28  ;;  %v1670_v18 = vsel %vm1413_vm10, %v1366_v17, 0  ;;  %v3213_v28 = vld [vmem:[%s3542_s24] ss:$0 sm:$0xff] }
 0x51b   : > { %v1460_v30 = vmul.f32 1.442695, %v1459_v29  ;;  %v3839_v31 = vpop.f32.mrf.mxu1 }
 0x51d   : > { %3239 = vpow2.f32 %v1460_v30 }
 0x523   : > { %v3240_v32 = vpop.eup %3239  ;;  %v1526_v33 = vpop.f32.mrf.mxu1 }
 0x524   : > { %v1462_v34 = vsel %vm1374_vm5, %v3240_v32, 0.0 }
 0x525   : > { %1463 = vadd.xlane.f32.xlu1 %v1462_v34 }
 0x528   : > { %v1555_v35 = vpop.xlane.xlu2 %1554 }
 0x529   : > { %v1556_v36 = vsub.f32 %v1552_v25, %v1555_v35 }
 0x52b   : > { %v1557_v38 = vmul.f32 1.442695, %v1556_v36  ;;  %v1626_v39 = vpop.f32.mrf.mxu1  ;;  %v3083_v36 = vld [vmem:[%s3567_s27 + $0x8] sm:$0xff] }
 0x52c   : > { %v1630_v40 = vmul.f32 0.35355338, %v1626_v39  ;;  %1790 = vmatpush.bf16.msrb.mxu1 %v3083_v36 }
 0x52d   : > { %3241 = vpow2.f32 %v1557_v38 }
 0x52e   : > { %v1631_v41 = vadd.f32 %v1630_v40, %v3813_v54 }
 0x530   : > { %v1645_v42 = vpop.permute.xlu2 %1644  ;;  %v1632_v43 = vsel %vm1374_vm5, %v1631_v41, -inf }
 0x531   : > { %v1650_v44 = vsel %vm1413_vm10, %v1645_v42, 0  ;;  %1633 = vmax.xlane.f32.xlu0 %v1632_v43  ;;  %v1265_v42 = vld [vmem:[%s1252_s10] sm:$0xff]  ;;  %v1266_v43 = vld [vmem:[%s1252_s10 + $0x8] sm:$0xff]  ;;  %s4154_s10 = sld [smem:[#allocation19_spill]] }
 0x532   : > { %1659 = vmatpush.bf16.msra.mxu3 %v1650_v44  ;;  %v1765_v44 = vpack.c.bf16 %v1266_v43, %v1265_v42 }
 0x533   : > { %v1628_v45 = vpop.f32.mrf.mxu1  ;;  %v3242_v46 = vpop.eup %3241 }
 0x534   : > { %v1559_v47 = vsel %vm1374_vm5, %v3242_v46, 0.0  ;;  %v3081_v45 = vld [vmem:[%s3557_s12 + $0x8] sm:$0xff] }
 0x537   : > { %v1798_v43 = vld [vmem:[%s4154_s10] sm:$0xf] }
 0x539   : > { %1560 = vadd.xlane.f32.xlu0 %v1559_v47 }
 0x53e   : > { %1468 = vrot.lane.b32.xlu1 %v3796_v37, %s3477_s26  ;;  %s4152_s26 = sld [smem:[#allocation17_spill]] }
 0x54d   : > { %1565 = vrot.lane.b32.xlu0 %v3796_v37, %s3478_s15  ;;  %s4153_s15 = sld [smem:[#allocation12_spill]] }
 0x553   : > { %s1255_s7 = scalar_lea.vmem %s4153_s15, %s3774_s20  ;;  %s4157_s15 = sld [smem:[#allocation25_spill]] }
 0x598   : > { %v1464_v48 = vpop.xlane.xlu1 %1463 }
 0x599   : > { %3243 = vrcp.f32 %v1464_v48 }
 0x59f   : > { %v3244_v52 = vpop.eup %3243 }
 0x5a0   : > { %v1466_v55 = vmul.f32 %v3244_v52, %v3240_v32 }
 0x5a2   : > { %v1467_v37 = vpack.c.bf16 %v1466_v55, %v1466_v55 }
 0x5a4   : > { %v1634_v49 = vpop.xlane.xlu0 %1633 }
 0x5a5   : > { %v1635_v50 = vsub.f32 %v1631_v41, %v1634_v49 }
 0x5a7   : > { %v1636_v51 = vmul.f32 1.442695, %v1635_v50 }
 0x5a9   : > { %3245 = vpow2.f32 %v1636_v51 }
 0x5ac   : > { %v1561_v59 = vpop.xlane.xlu0 %1560 }
 0x5ad   : > { %3247 = vrcp.f32 %v1561_v59 }
 0x5af   : > { %v3246_v54 = vpop.eup %3245 }
 0x5b0   : > { %v1469_v56 = vpop.permute.xlu1 %1468  ;;  %v1638_v57 = vsel %vm1374_vm5, %v3246_v54, 0.0 }
 0x5b1   : > { %1639 = vadd.xlane.f32.xlu1 %v1638_v57  ;;  %v1474_v58 = vsel %vm1413_vm10, %v1469_v56, 0  ;;  %v3214_v57 = vld [vmem:[%s3547_s30] ss:$0 sm:$0xff] }
 0x5b2   : > { %1483 = vmatpush.bf16.msrb.mxu2 %v1474_v58 }
 0x5b3   : > { %v3248_v60 = vpop.eup %3247 }
 0x5b4   : > { %v1563_v61 = vmul.f32 %v3248_v60, %v3242_v46  ;;  %v3080_v46 = vld [vmem:[%s3557_s12] sm:$0xff] }
 0x5b5   : > { %2969 = vmatmul.msk.bf16.vlgmr.msrb.gmra.mxu2 %vm1374_vm5, %v1467_v37  ;;  %v3215_v37 = vld [vmem:[%s4150_s6] ss:$0 sm:$0xff] }
 0x5b6   : > { %v1564_v1 = vpack.c.bf16 %v1563_v61, %v1563_v61 }
 0x5bf   : > { %v1566_v62 = vpop.permute.xlu0 %1565 }
 0x5c0   : > { %v1571_v63 = vsel %vm1413_vm10, %v1566_v62, 0 }
 0x5c1   : > { %1580 = vmatpush.bf16.msra.mxu2 %v1571_v63  ;;  %v3216_v63 = vld [vmem:[%s4151_s23] ss:$0 sm:$0xff]  ;;  %s4155_s23 = sld [smem:[#allocation20_spill]] }
 0x5c5   : > { %2973 = vmatmul.msk.bf16.vlgmr.msra.gmra.mxu2 %vm1374_vm5, %v1564_v1 }
 0x5c6   : > { %1679 = vmatpush.bf16.msrb.mxu2 %v1670_v18 }
 0x624   : > { %v1640_v4 = vpop.xlane.xlu1 %1639 }
 0x625   : > { %3249 = vrcp.f32 %v1640_v4 }
 0x62b   : > { %v3250_v7 = vpop.eup %3249 }
 0x62c   : > { %v1642_v9 = vmul.f32 %v3250_v7, %v3246_v54 }
 0x62e   : > { %v1643_v10 = vpack.c.bf16 %v1642_v9, %v1642_v9 }
 0x630   : > { %2976 = vmatmul.msk.bf16.vlgmr.msra.gmra.mxu3 %vm1374_vm5, %v1643_v10 }
 0x638   : > { %v1485_v11 = vpop.f32.mrf.mxu2 }
 0x639   : > { %v1489_v12 = vpack.c.bf16 %v1485_v11, %v1485_v11 }
 0x63b   : > { %2970 = vmatmul.msk.bf16.vlgmr.msrb.gmra.mxu0 %vm1374_vm5, %v1489_v12  ;;  %v3217_v12 = vld [vmem:[%s4152_s26] ss:$0 sm:$0xff]  ;;  %s4156_s26 = sld [smem:[#allocation13_spill]] }
 0x63c   : > { %1753 = vmatpush.bf16.msrb.mxu0 %v3081_v45  ;;  %v1951_v45 = vsel %vm1413_vm10, %v1798_v43, 0 }
 0x640   : > { %v1487_v13 = vpop.f32.mrf.mxu2  ;;  %1754 = vmatpush.bf16.msrb.mxu0 %v3080_v46 }
 0x648   : > { %v1582_v14 = vpop.f32.mrf.mxu2 }
 0x649   : > { %v1586_v15 = vpack.c.bf16 %v1582_v14, %v1582_v14 }
 0x64b   : > { %2974 = vmatmul.msk.bf16.vlgmr.msra.gmra.mxu0 %vm1374_vm5, %v1586_v15 }
 0x650   : > { %v1584_v16 = vpop.f32.mrf.mxu2 }
 0x6b3   : > { %v1661_v19 = vpop.f32.mrf.mxu3 }
 0x6b4   : > { %v1665_v20 = vpack.c.bf16 %v1661_v19, %v1661_v19 }
 0x6b6   : > { %2977 = vmatmul.msk.bf16.vlgmr.msrb.gmra.mxu2 %vm1374_vm5, %v1665_v20 }
 0x6b8   : > { %v1505_v21 = vpop.f32.mrf.mxu0 }
 0x6b9   : > { %v1525_v24 = vadd.f32 %v3839_v31, %v1505_v21  ;;  %v3082_v31 = vld [vmem:[%s3567_s27] sm:$0xff] }
 0x6ba   : > { %1791 = vmatpush.bf16.msrb.mxu1 %v3082_v31 }
 0x6bb   : > { %v1663_v22 = vpop.f32.mrf.mxu3 }
 0x6bc   : > { %v1280_v22 = vld [vmem:[%s1255_s7] sm:$0x1]  ;;  %s4158_s7 = smov %s4157_s15 }
 0x6bd   : > { %2995 = vmatmul.msk.bf16.vlgmr.msrb.gmra.mxu1 %vm1288_vm0, %v1765_v44  ;;  %vm1281_vm14 = vcmp.gt.f32.partialorder %v1280_v22, 0.0 }
 0x6c0   : > { %v1507_v23 = vpop.f32.mrf.mxu0 }
 0x6c1   : > { %v1282_v23 = vsel %vm1281_vm14, 0.0, %v3471_v53 }
 0x6c8   : > { %v1602_v25 = vpop.f32.mrf.mxu0 }
 0x6c9   : > { %v1606_v26 = vadd.f32 %v1602_v25, %v1525_v24  ;;  %v3901_v24 = vperm.slane %v1282_v23, 0  ;;  %v1799_v23 = vld [vmem:[%s4154_s10 + $0x4] sm:$0xf] }
 0x6d0   : > { %v1604_v27 = vpop.f32.mrf.mxu0 }
 0x739   : > { %v1681_v29 = vpop.f32.mrf.mxu2 }
 0x73a   : > { %v1685_v30 = vadd.f32 %v1681_v29, %v1606_v26  ;;  %v1793_v1 = vpop.f32.mrf.mxu1 }
 0x73b   : > { %v1794_v2 = vadd.f32 %v3216_v63, %v1793_v1 }
 0x73c   : > { %v1689_v32 = vadd.f32 %v3213_v28, %v1685_v30 }
 0x73d   : > { %v1804_v3 = vpack.c.bf16 %v1794_v2, %v1794_v2 }
 0x73e   : > { %v3866_v33 = vadd.f32 %v1689_v32, %v3780_v0 }
 0x73f   : > { %v1808_v6 = vunpack.c.l.b16 %v1804_v3 }
 0x740   : > { %v1693_v34 = vsel %vm1288_vm0, %v3866_v33, 0.0 }
 0x741   : > { %v1683_v35 = vpop.f32.mrf.mxu2  ;;  %1694 = vadd.xlane.f32.xlu2 %v1693_v34 }
 0x742   : > { %v1795_v4 = vpop.f32.mrf.mxu1 }
 0x743   : > { %v1796_v5 = vadd.f32 %v3216_v63, %v1795_v4 }
 0x745   : > { %v1805_v7 = vpack.c.bf16 %v1796_v5, %v1796_v5 }
 0x747   : > { %v1809_v9 = vunpack.c.l.b16 %v1805_v7 }
 0x749   : > { %v3885_v10 = vpack.c.b16 %v1809_v9, %v1808_v6 }
 0x74b   : > { %v1815_v11 = vsel %vm1374_vm5, %v3885_v10, 0 }
 0x74c   : > { %1824 = vmatpush.bf16.xpose.msrb.mxu3 %v1815_v11 }
 0x759   : > { %1873 = vrot.lane.b32.xlu2 %v3885_v10, %s3473_s11 }
 0x7b4   : > { %v1695_v38 = vpop.xlane.xlu2 %1694 }
 0x7b5   : > { %v1696_v39 = vmul.f32 %v1695_v38, %v3784_v8 }
 0x7b7   : > { %v1697_v40 = vsub.f32 %v3866_v33, %v1696_v39 }
 0x7b9   : > { %v1698_v41 = vmul.f32 %v1697_v40, %v1697_v40 }
 0x7bb   : > { %v1699_v0 = vsel %vm1288_vm0, %v1698_v41, 0.0 }
 0x7bc   : > { %1700 = vadd.xlane.f32.xlu0 %v1699_v0  ;;  %v1874_v19 = vpop.permute.xlu2 %1873 }
 0x7bd   : > { %v1879_v20 = vsel %vm1374_vm5, %v1874_v19, 0 }
 0x7be   : > { %1888 = vmatpush.bf16.xpose.msra.mxu0 %v1879_v20 }
 0x82f   : > { %v1701_v47 = vpop.xlane.xlu0 %1700 }
 0x830   : > { %v1702_v48 = vmul.f32 %v1701_v47, %v3784_v8 }
 0x832   : > { %v1703_v49 = vadd.f32 1e-06, %v1702_v48 }
 0x834   : > { %3251 = vrsqrt.f32 %v1703_v49  ;;  %vm1710_vm12 = vweird.f32 %v1703_v49 }
 0x83a   : > { %v3252_v50 = vpop.eup %3251 }
 0x83b   : > { %v1705_v51 = vmul.f32 %v3252_v50, %v1703_v49  ;;  %vm1711_vm11 = vweird.f32 %v3252_v50 }
 0x83c   : > { %vm1712_vm13 = vmor %vm1710_vm12, %vm1711_vm11  ;;  %vm2756_vm12 = vcmask 195584  }
 0x83d   : > { %v1706_v52 = vmul.f32 %v3252_v50, %v1705_v51 }
 0x83f   : > { %v1707_v54 = vmul.f32 0.5, %v1706_v52 }
 0x841   : > { %v1708_v55 = vsub.f32 1.5, %v1707_v54 }
 0x843   : > { %v1709_v56 = vmul.f32 %v3252_v50, %v1708_v55 }
 0x845   : > { %v1713_v58 = vsel %vm1712_vm13, %v3252_v50, %v1709_v56 }
 0x846   : > { %v1714_v59 = vmul.f32 %v1713_v58, %v1697_v40 }
 0x848   : > { %v1718_v60 = vmul.f32 %v3214_v57, %v1714_v59 }
 0x84a   : > { %v1722_v61 = vadd.f32 %v3215_v37, %v1718_v60 }
 0x84c   : > { %v1728_v62 = vpack.c.bf16 %v1722_v61, %v1722_v61 }
 0x84e   : > { %2986 = vmatmul.msk.bf16.vlgmr.msrb.gmra.mxu0 %vm1288_vm0, %v1728_v62 }
 0x8cb   : > { %v1756_v13 = vpop.f32.mrf.mxu0 }
 0x8cc   : > { %v1757_v14 = vadd.f32 %v3217_v12, %v1756_v13 }
 0x8ce   : > { %v1803_v15 = vpack.c.bf16 %v1757_v14, %v1757_v14 }
 0x8d0   : > { %v1869_v16 = vunpack.c.l.b16 %v1803_v15  ;;  %2996 = vmatmul.msk.bf16.vlgmr.msrb.gmra.mxu3 %vm1374_vm5, %v1803_v15 }
 0x8d2   : > { %v1870_v17 = vpack.c.b16 %v1869_v16, %v1869_v16 }
 0x8d3   : > { %v1758_v18 = vpop.f32.mrf.mxu0 }
 0x8d4   : > { %2043 = vrot.lane.b32.xlu2 %v1870_v17, %s3475_s28  ;;  %1871 = vrot.lane.b32.xlu0 %v1870_v17, %s3473_s11 }
 0x8dc   : > { %1966 = vrot.lane.b32.xlu0 %v1870_v17, %s3469_s2 }
 0x92e   : > { %v2044_v3 = vpop.permute.xlu2 %2043 }
 0x946   : > { %v1872_v21 = vpop.permute.xlu0 %1871 }
 0x947   : > { %2998 = vmatmul.msk.bf16.vlgmr.msra.gmra.mxu0 %vm1374_vm5, %v1872_v21 }
 0x94e   : > { %v1967_v50 = vpop.permute.xlu0 %1966 }
 0x953   : > { %v1826_v25 = vpop.f32.mrf.mxu3 }
 0x954   : > { %v1830_v26 = vmul.f32 0.35355338, %v1826_v25  ;;  %v1932_v25 = vsel %vm1413_vm10, %v1799_v23, 0 }
 0x955   : > { %1941 = vmatpush.bf16.msra.mxu3 %v1932_v25 }
 0x956   : > { %v1834_v27 = vadd.f32 %v3901_v24, %v1830_v26 }
 0x958   : > { %v1836_v28 = vsel %vm1835_vm15, %v1834_v27, -inf }
 0x959   : > { %1837 = vmax.xlane.f32.xlu1 %v1836_v28 }
 0x95b   : > { %v1828_v29 = vpop.f32.mrf.mxu3 }
 0x9c4   : > { %v1890_v30 = vpop.f32.mrf.mxu0 }
 0x9c5   : > { %v1894_v39 = vmul.f32 0.35355338, %v1890_v30 }
 0x9c7   : > { %v1895_v40 = vadd.f32 %v1894_v39, %v3901_v24 }
 0x9c9   : > { %v1896_v41 = vsel %vm1835_vm15, %v1895_v40, -inf }
 0x9cc   : > { %v1838_v32 = vpop.xlane.xlu1 %1837  ;;  %v1892_v34 = vpop.f32.mrf.mxu0 }
 0x9cd   : > { %v1839_v35 = vsub.f32 %v1834_v27, %v1838_v32 }
 0x9cf   : > { %v1840_v36 = vmul.f32 1.442695, %v1839_v35 }
 0x9d1   : > { %3253 = vpow2.f32 %v1840_v36 }
 0x9d7   : > { %v3254_v31 = vpop.eup %3253 }
 0x9d8   : > { %v1842_v38 = vsel %vm1835_vm15, %v3254_v31, 0.0 }
 0x9d9   : > { %1843 = vadd.xlane.f32.xlu1 %v1842_v38 }
 0x9f2   : > { %1848 = vrot.lane.b32.xlu1 %v3885_v10, %s3467_s18 }
 0x9fa   : > { %1968 = vrot.lane.b32.xlu1 %v3885_v10, %s3469_s2 }
 0xa02   : > { %2045 = vrot.lane.b32.xlu1 %v3885_v10, %s3475_s28 }
 0xa2c   : > { %1897 = vmax.xlane.f32.xlu1 %v1896_v41 }
 0xa4c   : > { %v1844_v0 = vpop.xlane.xlu1 %1843 }
 0xa4d   : > { %3255 = vrcp.f32 %v1844_v0 }
 0xa53   : > { %v3256_v42 = vpop.eup %3255 }
 0xa54   : > { %v1846_v44 = vmul.f32 %v3256_v42, %v3254_v31 }
 0xa56   : > { %v1847_v47 = vpack.c.bf16 %v1846_v44, %v1846_v44 }
 0xa64   : > { %v1849_v46 = vpop.permute.xlu1 %1848 }
 0xa65   : > { %1861 = vmatpush.bf16.msra.mxu2 %v1849_v46 }
 0xa68   : > { %2997 = vmatmul.msk.bf16.vlgmr.msra.gmra.mxu2 %vm1835_vm15, %v1847_v47 }
 0xa69   : > { %1960 = vmatpush.bf16.msrb.mxu2 %v1951_v45 }
 0xa6c   : > { %v1969_v48 = vpop.permute.xlu1 %1968 }
 0xa6d   : > { %v1974_v49 = vsel %vm1374_vm5, %v1969_v48, 0 }
 0xa6e   : > { %1983 = vmatpush.bf16.xpose.msrb.mxu0 %v1974_v49 }
 0xa74   : > { %v2046_v51 = vpop.permute.xlu1 %2045 }
 0xa75   : > { %v2051_v52 = vsel %vm1374_vm5, %v2046_v51, 0  ;;  %3002 = vmatmul.msk.bf16.vlgmr.msrb.gmra.mxu0 %vm1374_vm5, %v1967_v50  ;;  %v1801_v50 = vld [vmem:[%s4154_s10 + $0xc] sm:$0xf] }
 0xa76   : > { %2060 = vmatpush.bf16.xpose.msra.mxu2 %v2051_v52  ;;  %v2104_v51 = vsel %vm1413_vm10, %v1801_v50, 0 }
 0xa9f   : > { %v1898_v54 = vpop.xlane.xlu1 %1897 }
 0xaa0   : > { %v1899_v55 = vsub.f32 %v1895_v40, %v1898_v54  ;;  %v1800_v40 = vld [vmem:[%s4154_s10 + $0x8] sm:$0xf] }
 0xaa1   : > { %v2027_v41 = vsel %vm1413_vm10, %v1800_v40, 0 }
 0xaa2   : > { %v1900_v56 = vmul.f32 1.442695, %v1899_v55  ;;  %2036 = vmatpush.bf16.msrb.mxu3 %v2027_v41 }
 0xaa4   : > { %3257 = vpow2.f32 %v1900_v56 }
 0xaaa   : > { %v3258_v57 = vpop.eup %3257 }
 0xaab   : > { %v1902_v58 = vsel %vm1835_vm15, %v3258_v57, 0.0 }
 0xaac   : > { %1903 = vadd.xlane.f32.xlu1 %v1902_v58 }
 0xaeb   : > { %v1863_v59 = vpop.f32.mrf.mxu2 }
 0xaec   : > { %v1867_v37 = vpack.c.bf16 %v1863_v59, %v1863_v59 }
 0xaee   : > { %3001 = vmatmul.msk.bf16.vlgmr.msrb.gmra.mxu2 %vm1374_vm5, %v1867_v37  ;;  %v3218_v37 = vld [vmem:[%s4155_s23] ss:$0 sm:$0xff]  ;;  %s1259_s23 = scalar_lea.vmem %s4156_s26, %s2953_s4  ;;  %s4162_s4 = sld [smem:[#allocation26_spill]] }
 0xaef   : > { %s4163_s26 = sld [smem:[#allocation24_spill]] }
 0xaf2   : > { %v1985_v60 = vpop.f32.mrf.mxu0 }
 0xaf3   : > { %v1989_v61 = vmul.f32 0.35355338, %v1985_v60  ;;  %v1865_v62 = vpop.f32.mrf.mxu2 }
 0xaf5   : > { %v1990_v63 = vadd.f32 %v1989_v61, %v3901_v24  ;;  %v3222_v41 = vld [vmem:[%s4163_s26] ss:$0 sm:$0xff]  ;;  %s4173_s26 = sld [smem:[#allocation30_spill]] }
 0xaf7   : > { %v1991_v1 = vsel %vm1835_vm15, %v1990_v63, -inf }
 0xaf8   : > { %1992 = vmax.xlane.f32.xlu0 %v1991_v1 }
 0xafa   : > { %v1987_v2 = vpop.f32.mrf.mxu0 }
 0xafe   : > { %3005 = vmatmul.msk.bf16.vlgmr.msra.gmra.mxu2 %vm1374_vm5, %v2044_v3 }
 0xb0c   : > { %1908 = vrot.lane.b32.xlu0 %v3885_v10, %s4107_s16  ;;  %s4161_s16 = sld [smem:[#allocation22_spill]] }
 0xb1f   : > { %v1904_v4 = vpop.xlane.xlu1 %1903 }
 0xb20   : > { %3259 = vrcp.f32 %v1904_v4 }
 0xb26   : > { %v3260_v7 = vpop.eup %3259 }
 0xb27   : > { %v1906_v11 = vmul.f32 %v3260_v7, %v3258_v57 }
 0xb29   : > { %v1907_v14 = vpack.c.bf16 %v1906_v11, %v1906_v11  ;;  %v3086_v11 = vld [vmem:[%s4158_s7] sm:$0xff] }
 0xb6b   : > { %v1993_v6 = vpop.xlane.xlu0 %1992 }
 0xb6c   : > { %v1994_v12 = vsub.f32 %v1990_v63, %v1993_v6 }
 0xb6e   : > { %v1995_v15 = vmul.f32 1.442695, %v1994_v12 }
 0xb70   : > { %3261 = vpow2.f32 %v1995_v15 }
 0xb71   : > { %v3927_v5 = vpop.f32.mrf.mxu2 }
 0xb76   : > { %v3262_v21 = vpop.eup %3261 }
 0xb77   : > { %v1997_v22 = vsel %vm1835_vm15, %v3262_v21, 0.0 }
 0xb79   : > { %v1964_v9 = vpop.f32.mrf.mxu2 }
 0xb7a   : > { %v1267_v9 = vld [vmem:[%s1259_s23] sm:$0xff] }
 0xb7b   : > { %v2199_v12 = vpack.c.bf16 %v1267_v9, %v1267_v9 }
 0xb7e   : > { %v1909_v13 = vpop.permute.xlu0 %1908 }
 0xb7f   : > { %1921 = vmatpush.bf16.msra.mxu1 %v1909_v13 }
 0xb81   : > { %v2062_v16 = vpop.f32.mrf.mxu2 }
 0xb82   : > { %v2066_v17 = vmul.f32 0.35355338, %v2062_v16  ;;  %2999 = vmatmul.msk.bf16.vlgmr.msra.gmra.mxu1 %vm1835_vm15, %v1907_v14 }
 0xb84   : > { %v2067_v18 = vadd.f32 %v2066_v17, %v3901_v24 }
 0xb86   : > { %v2068_v19 = vsel %vm1835_vm15, %v2067_v18, -inf }
 0xb87   : > { %2069 = vmax.xlane.f32.xlu2 %v2068_v19 }
 0xb89   : > { %v2064_v20 = vpop.f32.mrf.mxu2 }
 0xb8f   : > { %1998 = vadd.xlane.f32.xlu2 %v1997_v22 }
 0xba7   : > { %2003 = vrot.lane.b32.xlu2 %v3885_v10, %s4106_s22  ;;  %s4160_s22 = sld [smem:[#allocation21_spill]] }
 0xbad   : > { %v3219_v25 = vld [vmem:[%s4160_s22] ss:$0 sm:$0xff]  ;;  %s4164_s22 = sld [smem:[#allocation14_spill]] }
 0xbfa   : > { %v2070_v26 = vpop.xlane.xlu2 %2069 }
 0xbfb   : > { %v2071_v27 = vsub.f32 %v2067_v18, %v2070_v26 }
 0xbfd   : > { %v2072_v28 = vmul.f32 1.442695, %v2071_v27 }
 0xbff   : > { %3263 = vpow2.f32 %v2072_v28  ;;  %v1923_v24 = vpop.f32.mrf.mxu1  ;;  %v3220_v28 = vld [vmem:[%s4161_s16] ss:$0 sm:$0xff]  ;;  %s1262_s16 = scalar_lea.vmem %s4164_s22, %s3774_s20  ;;  %s4167_s20 = smov 88  }
 0xc00   : > { %v1927_v29 = vpack.c.bf16 %v1923_v24, %v1923_v24  ;;  %s4174_s22 = sld [smem:[#allocation31_spill]] }
 0xc02   : > { %3000 = vmatmul.msk.bf16.vlgmr.msra.gmra.mxu3 %vm1374_vm5, %v1927_v29  ;;  %v1999_v30 = vpop.xlane.xlu2 %1998 }
 0xc03   : > { %3265 = vrcp.f32 %v1999_v30 }
 0xc05   : > { %v3264_v32 = vpop.eup %3263 }
 0xc06   : > { %v2074_v34 = vsel %vm1835_vm15, %v3264_v32, 0.0 }
 0xc07   : > { %v1925_v35 = vpop.f32.mrf.mxu1  ;;  %2075 = vadd.xlane.f32.xlu1 %v2074_v34 }
 0xc09   : > { %v3266_v36 = vpop.eup %3265 }
 0xc0a   : > { %v2001_v31 = vmul.f32 %v3266_v36, %v3262_v21  ;;  %v2004_v38 = vpop.permute.xlu2 %2003 }
 0xc0b   : > { %2016 = vmatpush.bf16.msrb.mxu1 %v2004_v38 }
 0xc0c   : > { %v2002_v39 = vpack.c.bf16 %v2001_v31, %v2001_v31 }
 0xc0e   : > { %3003 = vmatmul.msk.bf16.vlgmr.msrb.gmra.mxu1 %vm1835_vm15, %v2002_v39 }
 0xc0f   : > { %2113 = vmatpush.bf16.msra.mxu1 %v2104_v51 }
 0xc20   : > { %2080 = vrot.lane.b32.xlu1 %v3885_v10, %s4105_s1  ;;  %s4159_s1 = sld [smem:[#allocation23_spill]] }
 0xc26   : > { %v3085_v13 = vld [vmem:[%s4159_s1 + $0x8] sm:$0xff]  ;;  %v3084_v14 = vld [vmem:[%s4159_s1] sm:$0xff] }
 0xc27   : > { %2187 = vmatpush.bf16.msra.mxu3 %v3085_v13 }
 0xc2b   : > { %2188 = vmatpush.bf16.msra.mxu3 %v3084_v14 }
 0xc7a   : > { %v2076_v0 = vpop.xlane.xlu1 %2075 }
 0xc7b   : > { %3267 = vrcp.f32 %v2076_v0 }
 0xc81   : > { %v3268_v45 = vpop.eup %3267 }
 0xc82   : > { %v2078_v47 = vmul.f32 %v3268_v45, %v3264_v32  ;;  %v3221_v32 = vld [vmem:[%s4162_s4] ss:$0 sm:$0xff]  ;;  %s4172_s4 = sld [smem:[#allocation29_spill]] }
 0xc84   : > { %v2079_v10 = vpack.c.bf16 %v2078_v47, %v2078_v47 }
 0xc85   : > { %v1943_v42 = vpop.f32.mrf.mxu3 }
 0xc86   : > { %v1963_v52 = vadd.f32 %v3927_v5, %v1943_v42 }
 0xc8b   : > { %v2018_v43 = vpop.f32.mrf.mxu1 }
 0xc8c   : > { %v2022_v44 = vpack.c.bf16 %v2018_v43, %v2018_v43 }
 0xc8d   : > { %v1945_v46 = vpop.f32.mrf.mxu3 }
 0xc8e   : > { %3004 = vmatmul.msk.bf16.vlgmr.msrb.gmra.mxu3 %vm1374_vm5, %v2022_v44 }
 0xc92   : > { %v2081_v48 = vpop.permute.xlu1 %2080 }
 0xc93   : > { %v2020_v49 = vpop.f32.mrf.mxu1  ;;  %2093 = vmatpush.bf16.msra.mxu0 %v2081_v48 }
 0xc94   : > { %v1283_v49 = vld [vmem:[%s1262_s16] sm:$0x1]  ;;  %s4175_s16 = sld [smem:[#allocation33_spill]] }
 0xc95   : > { %vm1284_vm4 = vcmp.gt.f32.partialorder %v1283_v49, 0.0 }
 0xc96   : > { %3006 = vmatmul.msk.bf16.vlgmr.msra.gmra.mxu0 %vm1835_vm15, %v2079_v10  ;;  %v1285_v10 = vsel %vm1284_vm4, 0.0, %v3471_v53 }
 0xc97   : > { %v3984_v50 = vperm.slane %v1285_v10, 0 }
 0xd11   : > { %v2038_v54 = vpop.f32.mrf.mxu3 }
 0xd12   : > { %v2042_v55 = vadd.f32 %v2038_v54, %v1963_v52 }
 0xd13   : > { %v2095_v56 = vpop.f32.mrf.mxu0 }
 0xd14   : > { %v2099_v57 = vpack.c.bf16 %v2095_v56, %v2095_v56 }
 0xd16   : > { %3007 = vmatmul.msk.bf16.vlgmr.msra.gmra.mxu1 %vm1374_vm5, %v2099_v57 }
 0xd19   : > { %v2040_v58 = vpop.f32.mrf.mxu3 }
 0xd1b   : > { %v2097_v59 = vpop.f32.mrf.mxu0 }
 0xd93   : > { %v2115_v60 = vpop.f32.mrf.mxu1 }
 0xd94   : > { %v2119_v61 = vadd.f32 %v2115_v60, %v2042_v55 }
 0xd96   : > { %v2123_v62 = vadd.f32 %v3218_v37, %v2119_v61 }
 0xd98   : > { %v3952_v63 = vadd.f32 %v2123_v62, %v3866_v33  ;;  %v3087_v33 = vld [vmem:[%s4157_s15 + $0x8] sm:$0xff]  ;;  %s4165_s15 = sld [smem:[#allocation27_spill]] }
 0xd99   : > { %2224 = vmatpush.bf16.msrb.mxu2 %v3087_v33 }
 0xd9a   : > { %v2127_v1 = vsel %vm1288_vm0, %v3952_v63, 0.0 }
 0xd9b   : > { %2128 = vadd.xlane.f32.xlu0 %v2127_v1  ;;  %v2117_v2 = vpop.f32.mrf.mxu1 }
 0xd9d   : > { %2225 = vmatpush.bf16.msrb.mxu2 %v3086_v11 }
 0xd9e   : > { %s4166_s23 = smov %s4165_s15  ;;  %v2231_v1 = vld [vmem:[%s4165_s15] sm:$0xf]  ;;  %s4176_s15 = sld [smem:[#allocation34_spill]] }
 0xda0   : > { %3025 = vmatmul.msk.bf16.vlgmr.msrb.gmra.mxu2 %vm1288_vm0, %v2199_v12 }
 0xe0e   : > { %v2129_v3 = vpop.xlane.xlu0 %2128 }
 0xe0f   : > { %v2130_v4 = vmul.f32 %v2129_v3, %v3784_v8 }
 0xe11   : > { %v2131_v5 = vsub.f32 %v3952_v63, %v2130_v4  ;;  %v2384_v4 = vsel %vm1413_vm10, %v2231_v1, 0 }
 0xe13   : > { %v2132_v6 = vmul.f32 %v2131_v5, %v2131_v5 }
 0xe15   : > { %v2133_v7 = vsel %vm1288_vm0, %v2132_v6, 0.0 }
 0xe16   : > { %2134 = vadd.xlane.f32.xlu2 %v2133_v7 }
 0xe23   : > { %v2227_v34 = vpop.f32.mrf.mxu2 }
 0xe24   : > { %v2228_v35 = vadd.f32 %v3221_v32, %v2227_v34 }
 0xe26   : > { %v2237_v36 = vpack.c.bf16 %v2228_v35, %v2228_v35 }
 0xe28   : > { %v2242_v31 = vsel %vm1374_vm5, %v2237_v36, 0  ;;  %v2275_v38 = vunpack.c.l.b16 %v2237_v36 }
 0xe29   : > { %2251 = vmatpush.bf16.xpose.msrb.mxu0 %v2242_v31 }
 0xe2a   : > { %v3973_v39 = vpack.c.b16 %v2275_v38, %v2275_v38 }
 0xe2b   : > { %v2229_v40 = vpop.f32.mrf.mxu2 }
 0xe2e   : > { %2304 = vrot.lane.b32.xlu2 %v3973_v39, %s3473_s11 }
 0xe89   : > { %v2135_v15 = vpop.xlane.xlu2 %2134 }
 0xe8a   : > { %v2136_v16 = vmul.f32 %v2135_v15, %v3784_v8 }
 0xe8c   : > { %v2137_v17 = vadd.f32 1e-06, %v2136_v16 }
 0xe8e   : > { %3269 = vrsqrt.f32 %v2137_v17  ;;  %vm2144_vm2 = vweird.f32 %v2137_v17 }
 0xe91   : > { %v2305_v47 = vpop.permute.xlu2 %2304 }
 0xe92   : > { %v2310_v48 = vsel %vm1374_vm5, %v2305_v47, 0 }
 0xe93   : > { %2319 = vmatpush.bf16.xpose.msrb.mxu3 %v2310_v48 }
 0xe94   : > { %v3270_v18 = vpop.eup %3269 }
 0xe95   : > { %v2139_v19 = vmul.f32 %v3270_v18, %v2137_v17  ;;  %vm2145_vm1 = vweird.f32 %v3270_v18 }
 0xe96   : > { %vm2146_vm3 = vmor %vm2144_vm2, %vm2145_vm1 }
 0xe97   : > { %v2140_v20 = vmul.f32 %v3270_v18, %v2139_v19 }
 0xe99   : > { %v2141_v21 = vmul.f32 0.5, %v2140_v20 }
 0xe9b   : > { %v2142_v22 = vsub.f32 1.5, %v2141_v21 }
 0xe9d   : > { %v2143_v23 = vmul.f32 %v3270_v18, %v2142_v22 }
 0xe9f   : > { %v2147_v26 = vsel %vm2146_vm3, %v3270_v18, %v2143_v23 }
 0xea0   : > { %v2148_v27 = vmul.f32 %v2147_v26, %v2131_v5 }
 0xea2   : > { %v2152_v24 = vmul.f32 %v3219_v25, %v2148_v27 }
 0xea4   : > { %v2156_v29 = vadd.f32 %v3220_v28, %v2152_v24 }
 0xea6   : > { %v2162_v30 = vpack.c.bf16 %v2156_v29, %v2156_v29 }
 0xea8   : > { %3016 = vmatmul.msk.bf16.vlgmr.msra.gmra.mxu3 %vm1288_vm0, %v2162_v30 }
 0xf2b   : > { %v2190_v0 = vpop.f32.mrf.mxu3 }
 0xf2c   : > { %v2191_v42 = vadd.f32 %v3222_v41, %v2190_v0 }
 0xf2e   : > { %v2236_v43 = vpack.c.bf16 %v2191_v42, %v2191_v42 }
 0xf30   : > { %v2300_v44 = vunpack.c.l.b16 %v2236_v43  ;;  %3026 = vmatmul.msk.bf16.vlgmr.msrb.gmra.mxu0 %vm1374_vm5, %v2236_v43 }
 0xf32   : > { %v2301_v45 = vpack.c.b16 %v2300_v44, %v2300_v44 }
 0xf33   : > { %v2192_v46 = vpop.f32.mrf.mxu3 }
 0xf34   : > { %2399 = vrot.lane.b32.xlu2 %v2301_v45, %s3469_s2 }
 0xf8e   : > { %v2400_v14 = vpop.permute.xlu2 %2399 }
 0xfad   : > { %v2253_v51 = vpop.f32.mrf.mxu0 }
 0xfae   : > { %v2257_v52 = vmul.f32 0.35355338, %v2253_v51 }
 0xfb0   : > { %v2261_v54 = vadd.f32 %v3984_v50, %v2257_v52 }
 0xfb2   : > { %v2262_v55 = vsel %vm1374_vm5, %v2261_v54, -inf }
 0xfb3   : > { %2263 = vmax.xlane.f32.xlu1 %v2262_v55 }
 0xfb5   : > { %v2255_v56 = vpop.f32.mrf.mxu0 }
 0xfcc   : > { %2302 = vrot.lane.b32.xlu1 %v2301_v45, %s3473_s11  ;;  %s4170_s11 = sld [smem:[#allocation28_spill]] }
0x1026   : > { %v2264_v57 = vpop.xlane.xlu1 %2263 }
0x1027   : > { %v2265_v58 = vsub.f32 %v2261_v54, %v2264_v57 }
0x1029   : > { %v2266_v59 = vmul.f32 1.442695, %v2265_v58 }
0x102b   : > { %3271 = vpow2.f32 %v2266_v59 }
0x1031   : > { %v3272_v37 = vpop.eup %3271 }
0x1032   : > { %v2268_v53 = vsel %vm1374_vm5, %v3272_v37, 0.0 }
0x1033   : > { %2269 = vadd.xlane.f32.xlu0 %v2268_v53 }
0x103e   : > { %v2303_v60 = vpop.permute.xlu1 %2302 }
0x103f   : > { %3028 = vmatmul.msk.bf16.vlgmr.msrb.gmra.mxu3 %vm1374_vm5, %v2303_v60 }
0x1047   : > { %2277 = vrot.lane.b32.xlu0 %v3973_v39, %s3467_s18  ;;  %s4168_s18 = smov 80  }
0x104f   : > { %2401 = vrot.lane.b32.xlu0 %v3973_v39, %s3469_s2  ;;  %s4169_s2 = smov 72  }
0x1057   : > { %2480 = vrot.lane.b32.xlu0 %v3973_v39, %s3475_s28 }
0x105f   : > { %2478 = vrot.lane.b32.xlu0 %v2301_v45, %s3475_s28  ;;  %s4171_s28 = sld [smem:[#allocation32_spill]] }
0x10a6   : > { %v2270_v61 = vpop.xlane.xlu0 %2269 }
0x10a7   : > { %3273 = vrcp.f32 %v2270_v61  ;;  %v2232_v61 = vld [vmem:[%s4166_s23 + $0x4] sm:$0xf] }
0x10ad   : > { %v3274_v62 = vpop.eup %3273 }
0x10ae   : > { %v2272_v2 = vmul.f32 %v3274_v62, %v3272_v37  ;;  %v2365_v62 = vsel %vm1413_vm10, %v2232_v61, 0 }
0x10af   : > { %2374 = vmatpush.bf16.msra.mxu0 %v2365_v62 }
0x10b0   : > { %v2273_v6 = vpack.c.bf16 %v2272_v2, %v2272_v2  ;;  %v2233_v2 = vld [vmem:[%s4166_s23 + $0x8] sm:$0xf] }
0x10b9   : > { %v2278_v3 = vpop.permute.xlu0 %2277 }
0x10ba   : > { %v2283_v5 = vsel %vm1413_vm10, %v2278_v3, 0  ;;  %v2462_v3 = vsel %vm1413_vm10, %v2233_v2, 0 }
0x10bb   : > { %2292 = vmatpush.bf16.msrb.mxu1 %v2283_v5  ;;  %2471 = vmatpush.bf16.msrb.mxu0 %v2462_v3  ;;  %v3227_v3 = vld [vmem:[%s4175_s16] ss:$0 sm:$0xff] }
0x10be   : > { %3027 = vmatmul.msk.bf16.vlgmr.msrb.gmra.mxu1 %vm1374_vm5, %v2273_v6 }
0x10bf   : > { %2393 = vmatpush.bf16.msra.mxu1 %v2384_v4 }
0x10c1   : > { %v2402_v7 = vpop.permute.xlu0 %2401 }
0x10c2   : > { %v2407_v33 = vsel %vm1374_vm5, %v2402_v7, 0  ;;  %v2321_v9 = vpop.f32.mrf.mxu3 }
0x10c3   : > { %v2325_v11 = vmul.f32 0.35355338, %v2321_v9  ;;  %2416 = vmatpush.bf16.xpose.msra.mxu3 %v2407_v33 }
0x10c5   : > { %v2326_v12 = vadd.f32 %v2325_v11, %v3984_v50 }
0x10c7   : > { %v2327_v13 = vsel %vm1374_vm5, %v2326_v12, -inf }
0x10c8   : > { %2328 = vmax.xlane.f32.xlu1 %v2327_v13 }
0x10c9   : > { %v2481_v15 = vpop.permute.xlu0 %2480 }
0x10ca   : > { %v2486_v16 = vsel %vm1374_vm5, %v2481_v15, 0  ;;  %v2323_v17 = vpop.f32.mrf.mxu3  ;;  %3032 = vmatmul.msk.bf16.vlgmr.msra.gmra.mxu3 %vm1374_vm5, %v2400_v14  ;;  %v2234_v15 = vld [vmem:[%s4166_s23 + $0xc] sm:$0xf] }
0x10cb   : > { %2495 = vmatpush.bf16.xpose.msrb.mxu1 %v2486_v16  ;;  %v2541_v16 = vsel %vm1413_vm10, %v2234_v15, 0  ;;  %v3094_v15 = vld [vmem:[#allocation5] sm:$0xff] }
0x10d1   : > { %v2479_v22 = vpop.permute.xlu0 %2478 }
0x10e1   : > { %2339 = vrot.lane.b32.xlu1 %v3973_v39, %s4167_s20  ;;  %s4177_s20 = sld [smem:[#allocation38_spill]] }
0x113b   : > { %v2294_v18 = vpop.f32.mrf.mxu1  ;;  %v2329_v21 = vpop.xlane.xlu1 %2328 }
0x113c   : > { %v2298_v19 = vpack.c.bf16 %v2294_v18, %v2294_v18  ;;  %v2330_v35 = vsub.f32 %v2326_v12, %v2329_v21 }
0x113e   : > { %3031 = vmatmul.msk.bf16.vlgmr.msra.gmra.mxu1 %vm1374_vm5, %v2298_v19  ;;  %v2331_v38 = vmul.f32 1.442695, %v2330_v35 }
0x1143   : > { %v2296_v20 = vpop.f32.mrf.mxu1 }
0x114d   : > { %v2418_v23 = vpop.f32.mrf.mxu3 }
0x114e   : > { %v2422_v25 = vmul.f32 0.35355338, %v2418_v23  ;;  %3035 = vmatmul.msk.bf16.vlgmr.msrb.gmra.mxu1 %vm1374_vm5, %v2479_v22 }
0x1150   : > { %v2423_v26 = vadd.f32 %v2422_v25, %v3984_v50 }
0x1152   : > { %v2424_v27 = vsel %vm1374_vm5, %v2423_v26, -inf }
0x1153   : > { %v2340_v28 = vpop.permute.xlu1 %2339  ;;  %2425 = vmax.xlane.f32.xlu0 %v2424_v27  ;;  %v3223_v27 = vld [vmem:[%s4170_s11] ss:$0 sm:$0xff]  ;;  %s4180_s11 = sld [smem:[#allocation35_spill]] }
0x1154   : > { %v2345_v24 = vsel %vm1413_vm10, %v2340_v28, 0 }
0x1155   : > { %2354 = vmatpush.bf16.msra.mxu2 %v2345_v24  ;;  %v2420_v29 = vpop.f32.mrf.mxu3 }
0x11bb   : > { %v4014_v30 = vpop.f32.mrf.mxu1 }
0x11c3   : > { %v2397_v32 = vpop.f32.mrf.mxu1 }
0x11c6   : > { %v2426_v34 = vpop.xlane.xlu0 %2425 }
0x11c7   : > { %v2427_v36 = vsub.f32 %v2423_v26, %v2426_v34 }
0x11c9   : > { %v2428_v31 = vmul.f32 1.442695, %v2427_v36 }
0x11cb   : > { %3275 = vpow2.f32 %v2428_v31  ;;  %v2497_v40 = vpop.f32.mrf.mxu1 }
0x11cc   : > { %v2501_v41 = vmul.f32 0.35355338, %v2497_v40  ;;  %3277 = vpow2.f32 %v2331_v38 }
0x11ce   : > { %v2502_v0 = vadd.f32 %v2501_v41, %v3984_v50  ;;  %v3089_v41 = vld [vmem:[#allocation2 + $0x8] sm:$0xff] }
0x11d0   : > { %v2503_v42 = vsel %vm1374_vm5, %v2502_v0, -inf }
0x11d1   : > { %v3276_v43 = vpop.eup %3275  ;;  %2504 = vmax.xlane.f32.xlu2 %v2503_v42  ;;  %v3093_v42 = vld [vmem:[%s4171_s28 + $0x18] sm:$0xff] }
0x11d2   : > { %v2430_v44 = vsel %vm1374_vm5, %v3276_v43, 0.0  ;;  %v3278_v46 = vpop.eup %3277  ;;  %2677 = vmatpush.bf16.msra.mxu1 %v3093_v42 }
0x11d3   : > { %v2499_v45 = vpop.f32.mrf.mxu1  ;;  %2431 = vadd.xlane.f32.xlu0 %v2430_v44  ;;  %v2333_v47 = vsel %vm1374_vm5, %v3278_v46, 0.0  ;;  %v3092_v44 = vld [vmem:[%s4171_s28 + $0x10] sm:$0xff] }
0x11d6   : > { %2678 = vmatpush.bf16.msra.mxu1 %v3092_v44 }
0x11d9   : > { %2334 = vadd.xlane.f32.xlu2 %v2333_v47 }
0x11e7   : > { %2436 = vrot.lane.b32.xlu0 %v3973_v39, %s4168_s18  ;;  %s4178_s18 = sld [smem:[#allocation36_spill]] }
0x1244   : > { %v2505_v48 = vpop.xlane.xlu2 %2504 }
0x1245   : > { %v2506_v49 = vsub.f32 %v2502_v0, %v2505_v48  ;;  %v3088_v0 = vld [vmem:[#allocation2] sm:$0xff] }
0x1246   : > { %v2432_v54 = vpop.xlane.xlu0 %2431 }
0x1247   : > { %v2507_v10 = vmul.f32 1.442695, %v2506_v49 }
0x1249   : > { %3279 = vpow2.f32 %v2507_v10 }
0x124c   : > { %v2335_v50 = vpop.xlane.xlu2 %2334 }
0x124d   : > { %3281 = vrcp.f32 %v2335_v50 }
0x124e   : > { %3283 = vrcp.f32 %v2432_v54 }
0x124f   : > { %v3280_v51 = vpop.eup %3279 }
0x1250   : > { %v2509_v52 = vsel %vm1374_vm5, %v3280_v51, 0.0 }
0x1251   : > { %2510 = vadd.xlane.f32.xlu2 %v2509_v52 }
0x1253   : > { %v3282_v55 = vpop.eup %3281 }
0x1254   : > { %v2337_v56 = vmul.f32 %v3282_v55, %v3278_v46  ;;  %v3284_v37 = vpop.eup %3283  ;;  %v3225_v55 = vld [vmem:[%s4173_s26] ss:$0 sm:$0xff]  ;;  %s3074_s26 = sshll.u32 %s3700_s0, 3 }
0x1255   : > { %v2434_v53 = vmul.f32 %v3284_v37, %v3276_v43  ;;  %v3090_v37 = vld [vmem:[%s4171_s28] sm:$0xff]  ;;  %s2769_s16 = scalar_lea.hbm %s4178_s18, %s3074_s26 }
0x1256   : > { %v2338_v57 = vpack.c.bf16 %v2337_v56, %v2337_v56 }
0x1257   : > { %v2435_v60 = vpack.c.bf16 %v2434_v53, %v2434_v53  ;;  %v3226_v53 = vld [vmem:[%s4174_s22] ss:$0 sm:$0xff] }
0x1258   : > { %3029 = vmatmul.msk.bf16.vlgmr.msra.gmra.mxu2 %vm1374_vm5, %v2338_v57 }
0x1259   : > { %v2437_v58 = vpop.permute.xlu0 %2436 }
0x125a   : > { %v2442_v59 = vsel %vm1413_vm10, %v2437_v58, 0 }
0x125b   : > { %2451 = vmatpush.bf16.msrb.mxu2 %v2442_v59  ;;  %v3091_v59 = vld [vmem:[%s4171_s28 + $0x8] sm:$0xff] }
0x125c   : > { %2679 = vmatpush.bf16.msra.mxu1 %v3091_v59 }
0x125f   : > { %2550 = vmatpush.bf16.msra.mxu2 %v2541_v16 }
0x1260   : > { %2680 = vmatpush.bf16.msra.mxu1 %v3090_v37 }
0x1268   : > { %3033 = vmatmul.msk.bf16.vlgmr.msrb.gmra.mxu2 %vm1374_vm5, %v2435_v60 }
0x1269   : > { %2515 = vrot.lane.b32.xlu2 %v3973_v39, %s4169_s2  ;;  %s4179_s2 = smov %s4178_s18 }
0x126a   : > { %s3371_s0 = scalar_lea.hbm %s4179_s2, 16 }
0x12c4   : > { %v2511_v1 = vpop.xlane.xlu2 %2510 }
0x12c5   : > { %3285 = vrcp.f32 %v2511_v1 }
0x12cb   : > { %v3286_v4 = vpop.eup %3285 }
0x12cc   : > { %v2513_v5 = vmul.f32 %v3286_v4, %v3280_v51  ;;  %v2516_v6 = vpop.permute.xlu2 %2515  ;;  %v3224_v51 = vld [vmem:[%s4172_s4] ss:$0 sm:$0xff]  ;;  %s1238_s4 = sand.u32 1, %s4177_s20  }
0x12cd   : > { %v2521_v7 = vsel %vm1413_vm10, %v2516_v6, 0  ;;  %s2952_s22 = sshll.u32 %s1238_s4, 3  ;;  %s2759_s6 = scalar_lea.sflag [#allocation4], %s1238_s4 }
0x12ce   : > { %v2514_v33 = vpack.c.bf16 %v2513_v5, %v2513_v5  ;;  %2530 = vmatpush.bf16.msrb.mxu3 %v2521_v7  ;;  %s1240_s3 = scalar_lea.vmem [#allocation7], %s2952_s22 }
0x12cf   : > { %s2771_s5 = sshll.u32 %s1240_s3, 4  ;;  %s2772_s5 = int_to_ptr.vmem [resolvable:$true] %s2771_s5 }
0x12d1   : > { %3036 = vmatmul.msk.bf16.vlgmr.msrb.gmra.mxu3 %vm1374_vm5, %v2514_v33 }
0x12db   : > { %v2356_v39 = vpop.f32.mrf.mxu2 }
0x12dc   : > { %v2360_v9 = vpack.c.bf16 %v2356_v39, %v2356_v39 }
0x12de   : > { %3030 = vmatmul.msk.bf16.vlgmr.msra.gmra.mxu0 %vm1374_vm5, %v2360_v9 }
0x12df   : > { %2624 = vmatpush.bf16.msra.mxu0 %v3089_v41 }
0x12e3   : > { %v2358_v11 = vpop.f32.mrf.mxu2  ;;  %2625 = vmatpush.bf16.msra.mxu0 %v3088_v0 }
0x12eb   : > { %v2453_v12 = vpop.f32.mrf.mxu2 }
0x12ec   : > { %v2457_v13 = vpack.c.bf16 %v2453_v12, %v2453_v12 }
0x12ee   : > { %3034 = vmatmul.msk.bf16.vlgmr.msrb.gmra.mxu0 %vm1374_vm5, %v2457_v13 }
0x12f3   : > { %v2455_v14 = vpop.f32.mrf.mxu2 }
0x12f4   : > { %v3095_v14 = vld [vmem:[#allocation5 + $0x8] sm:$0xff] }
0x12f5   : > { %2749 = vmatpush.bf16.msra.mxu3 %v3095_v14 }
0x12f9   : > { %2750 = vmatpush.bf16.msra.mxu3 %v3094_v15 }
0x1354   : > { %v2532_v17 = vpop.f32.mrf.mxu3 }
0x1355   : > { %v2536_v18 = vpack.c.bf16 %v2532_v17, %v2532_v17 }
0x1357   : > { %3037 = vmatmul.msk.bf16.vlgmr.msra.gmra.mxu2 %vm1374_vm5, %v2536_v18 }
0x135b   : > { %v2376_v19 = vpop.f32.mrf.mxu0 }
0x135c   : > { %v2534_v20 = vpop.f32.mrf.mxu3  ;;  %v2396_v22 = vadd.f32 %v4014_v30, %v2376_v19 }
0x1363   : > { %v2378_v21 = vpop.f32.mrf.mxu0 }
0x136b   : > { %v2473_v23 = vpop.f32.mrf.mxu0 }
0x136c   : > { %v2477_v25 = vadd.f32 %v2473_v23, %v2396_v22 }
0x1373   : > { %v2475_v26 = vpop.f32.mrf.mxu0 }
0x1374   : > { %v3228_v26 = vld [vmem:[%s4176_s15] ss:$0 sm:$0xff]  ;;  %s2773_s15 = sshll.u32 %s2769_s16, 4  ;;  %s2774_s15 = int_to_ptr.hbm [resolvable:$true] %s2773_s15 }
0x1375   : > { %s3365_s7 = sshra.s32 %s2774_s15, 4  ;;  %s3366_s7 = int_to_ptr.hbm [resolvable:$true] %s3365_s7 }
0x1376   : > { %s3367_s20 = scalar_lea.hbm %s3366_s7, 8  ;;  %p3372_p8 = scmp.lt.s32.totalorder %s3366_s7, %s4179_s2 }
0x1377   : > { %p3368_p9 = scmp.ne.s32.totalorder %s3366_s7, %s3367_s20  ;;  %p3373_p11 = scmp.lt.s32.totalorder %s3371_s0, %s3367_s20 }
0x1379   : > { %p3369_p10 = pnand %p3368_p9, %p3717_p5  ;;  %p3374_p13 = por %p3373_p11, %p3372_p8 }
0x137b   : > { %p3370_p12 = pneg %p3369_p10 }
0x137d   : > { %p3375_p1 = pnand %p3374_p13, %p3370_p12 }
0x13da   : > { %v2552_v28 = vpop.f32.mrf.mxu2 }
0x13db   : > { %v2556_v24 = vadd.f32 %v2552_v28, %v2477_v25 }
0x13dd   : > { %v2560_v29 = vadd.f32 %v3223_v27, %v2556_v24  ;;  %v3229_v24 = vld [vmem:[%s3662_s21] ss:$0 sm:$0xff] }
0x13df   : > { %v2561_v32 = vadd.f32 %v2560_v29, %v3952_v63 }
0x13e1   : > { %v2564_v34 = vsel %vm1288_vm0, %v2561_v32, 0.0 }
0x13e2   : > { %v2554_v35 = vpop.f32.mrf.mxu2  ;;  %2565 = vadd.xlane.f32.xlu1 %v2564_v34  ;;  %v3230_v34 = vld [vmem:[%s4180_s11] ss:$0 sm:$0xff] }
0x1455   : > { %v2566_v36 = vpop.xlane.xlu1 %2565 }
0x1456   : > { %v2567_v31 = vmul.f32 %v2566_v36, %v3784_v8 }
0x1458   : > { %v2568_v38 = vsub.f32 %v2561_v32, %v2567_v31 }
0x145a   : > { %v2569_v30 = vmul.f32 %v2568_v38, %v2568_v38 }
0x145c   : > { %v2570_v40 = vsel %vm1288_vm0, %v2569_v30, 0.0 }
0x145d   : > { %2571 = vadd.xlane.f32.xlu0 %v2570_v40 }
0x14d0   : > { %v2572_v63 = vpop.xlane.xlu0 %2571 }
0x14d1   : > { %v2573_v43 = vmul.f32 %v2572_v63, %v3784_v8 }
0x14d3   : > { %v2574_v45 = vadd.f32 1e-06, %v2573_v43 }
0x14d5   : > { %3287 = vrsqrt.f32 %v2574_v45  ;;  %vm2581_vm6 = vweird.f32 %v2574_v45 }
0x14db   : > { %v3288_v46 = vpop.eup %3287 }
0x14dc   : > { %v2576_v47 = vmul.f32 %v3288_v46, %v2574_v45  ;;  %vm2582_vm5 = vweird.f32 %v3288_v46 }
0x14dd   : > { %vm2583_vm7 = vmor %vm2581_vm6, %vm2582_vm5 }
0x14de   : > { %v2577_v48 = vmul.f32 %v3288_v46, %v2576_v47 }
0x14e0   : > { %v2578_v49 = vmul.f32 0.5, %v2577_v48 }
0x14e2   : > { %v2579_v10 = vsub.f32 1.5, %v2578_v49 }
0x14e4   : > { %v2580_v50 = vmul.f32 %v3288_v46, %v2579_v10 }
0x14e6   : > { %v2584_v52 = vsel %vm2583_vm7, %v3288_v46, %v2580_v50 }
0x14e7   : > { %v2585_v54 = vmul.f32 %v2584_v52, %v2568_v38 }
0x14e9   : > { %v2589_v56 = vmul.f32 %v3224_v51, %v2585_v54 }
0x14eb   : > { %v2593_v57 = vadd.f32 %v3225_v55, %v2589_v56 }
0x14ed   : > { %v2599_v58 = vpack.c.bf16 %v2593_v57, %v2593_v57 }
0x14ef   : > { %3046 = vmatmul.msk.bf16.vlgmr.msra.gmra.mxu0 %vm1288_vm0, %v2599_v58 }
0x156c   : > { %v2627_v60 = vpop.f32.mrf.mxu0 }
0x156d   : > { %v2628_v61 = vadd.f32 %v3226_v53, %v2627_v60 }
0x156f   : > { %v2631_v62 = vmax.f32 %v2628_v61, 0.0 }
0x1571   : > { %v2641_v1 = vpack.c.bf16 %v2631_v62, %v2631_v62 }
0x1573   : > { %3063 = vmatmul.msk.bf16.vlgmr.msra.gmra.mxu1 %vm2669_vm8, %v2641_v1 }
0x1574   : > { %v2629_v2 = vpop.f32.mrf.mxu0 }
0x15f0   : > { %v2682_v4 = vpop.f32.mrf.mxu1 }
0x15f1   : > { %v2683_v5 = vadd.f32 %v3227_v3, %v2682_v4 }
0x15f3   : > { %v2686_v6 = vadd.f32 %v2683_v5, %v2561_v32 }
0x15f5   : > { %v2689_v7 = vsel %vm1288_vm0, %v2686_v6, 0.0 }
0x15f6   : > { %2690 = vadd.xlane.f32.xlu2 %v2689_v7 }
0x15f8   : > { %v2684_v33 = vpop.f32.mrf.mxu1 }
0x1669   : > { %v2691_v39 = vpop.xlane.xlu2 %2690 }
0x166a   : > { %v2692_v9 = vmul.f32 %v2691_v39, %v3784_v8 }
0x166c   : > { %v2693_v11 = vsub.f32 %v2686_v6, %v2692_v9 }
0x166e   : > { %v2694_v12 = vmul.f32 %v2693_v11, %v2693_v11 }
0x1670   : > { %v2695_v13 = vsel %vm1288_vm0, %v2694_v12, 0.0 }
0x1671   : > { %2696 = vadd.xlane.f32.xlu1 %v2695_v13 }
0x16e4   : > { %v2697_v16 = vpop.xlane.xlu1 %2696 }
0x16e5   : > { %v2698_v17 = vmul.f32 %v2697_v16, %v3784_v8 }
0x16e7   : > { %v2699_v18 = vadd.f32 1e-06, %v2698_v17 }
0x16e9   : > { %3289 = vrsqrt.f32 %v2699_v18  ;;  %vm2706_vm10 = vweird.f32 %v2699_v18 }
0x16ef   : > { %v3290_v19 = vpop.eup %3289 }
0x16f0   : > { %v2701_v20 = vmul.f32 %v3290_v19, %v2699_v18  ;;  %vm2707_vm9 = vweird.f32 %v3290_v19 }
0x16f1   : > { %vm2708_vm11 = vmor %vm2706_vm10, %vm2707_vm9 }
0x16f2   : > { %v2702_v21 = vmul.f32 %v3290_v19, %v2701_v20 }
0x16f4   : > { %v2703_v22 = vmul.f32 0.5, %v2702_v21 }
0x16f6   : > { %v2704_v23 = vsub.f32 1.5, %v2703_v22 }
0x16f8   : > { %v2705_v25 = vmul.f32 %v3290_v19, %v2704_v23 }
0x16fa   : > { %v2709_v27 = vsel %vm2708_vm11, %v3290_v19, %v2705_v25 }
0x16fb   : > { %v2710_v28 = vmul.f32 %v2709_v27, %v2693_v11 }
0x16fd   : > { %v2714_v8 = vmul.f32 %v3228_v26, %v2710_v28 }
0x16ff   : > { %v2718_v29 = vadd.f32 %v3229_v24, %v2714_v8 }
0x1701   : > { %v2724_v32 = vpack.c.bf16 %v2718_v29, %v2718_v29 }
0x1703   : > { %3072 = vmatmul.msk.bf16.vlgmr.msra.gmra.mxu3 %vm1288_vm0, %v2724_v32 }
0x1786   : > { %v2752_v35 = vpop.f32.mrf.mxu3 }
0x1787   : > { %v2753_v36 = vadd.f32 %v3230_v34, %v2752_v35 }
0x1789   : > { %2757 = vst.msk [vmem:[%s1240_s3] sm:$0xff] %vm2756_vm12, %v2753_v36 }
0x178a   : > { %3378 = shalt.err (!%p3375_p1)
}
0x178b   : > { %3104 = dma.vmem_to_hbm [thread:$0]  (%p3717_p5), %s2772_s5, 128, %s2774_s15, %s2759_s6  }
0x178e   : > { %v2754_v31 = vpop.f32.mrf.mxu3 }
0x178f PF: > { %s4182_s3 = sld [smem:[#allocation40_spill]] }
0x1790   : > { %s4183_s18 = sld [smem:[#allocation37_spill]] }
0x1795   : > { %p3121_p2 = scmp.ge.s32.totalorder %s4182_s3, 2 }
0x1796   : > { %s2785_s4 = sand.u32 1, %s4183_s18  }
0x1797   : > { %p3114_p3 = pnand %p3121_p2, %p3721_p6  ;;  %s2786_s26 = scalar_lea.sflag [#allocation4], %s2785_s4 }
0x1799   : > { %p3115_p4 = pneg %p3114_p3 }
0x179b   : > { %3404 = dma.done.wait (%p3115_p4), %s2786_s26, 128  }
0x179c   : > { %3406 = vsyncadd (%p3115_p4), %s2786_s26, 4294967168  ;;  %s4185_s22 = sld [smem:[#allocation41_spill]] }
0x179d   : > { %s4186_s15 = sld [smem:[#allocation38_spill]] }
0x179e   : > { %s4187_s16 = sld [smem:[#allocation39_spill]] }
0x179f   : > { %s4188_s18 = sld [smem:[#allocation42_spill]] }
0x17a2   : > { %p89_p7 = scmp.ge.s32.totalorder %s4185_s22, 4  }
0x17a4   :  { %91 = sbr.rel (!%p89_p7) target bundleno = 75 (0x4b), region = 269 }
0x17a9   :  { %2792 = vsyncpa [#allocation3], 1 }
0x17aa   :  { %2794 = vsyncpa [#allocation3 + $0x1], 1 }
0x17ab   :  { %2795 = vsyncpa [#allocation6], 1 }
0x17ac   :  { %2796 = vsyncpa [#allocation4], 1 }
0x17ad   :  { %2798 = vsyncpa [#allocation4 + $0x1], 1 }

</bundles_post_ra>
